<compile_context>
chip_gen: v6e
topology: v6e:2x2x1
jax: 0.10.0
libtpu: 0.0.40
codegen_flags: <defaults>
</compile_context>

<pallas_src>
import jax
import jax.numpy as jnp
from jax.experimental import pallas as pl
from jax.experimental.pallas import tpu as pltpu

D_MODEL = 32
N_HEAD = 4
DIM_FF = 64
HEAD_DIM = D_MODEL // N_HEAD
LN_EPS = 1e-5

# rows of the packed bias/LayerNorm slab (shape (8, 3*D_MODEL))
_ROW_BQKV, _ROW_BO, _ROW_B1, _ROW_B2 = 0, 1, 2, 3
_ROW_LN1W, _ROW_LN1B, _ROW_LN2W, _ROW_LN2B = 4, 5, 6, 7


def _layernorm(x, w, b):
    mean = jnp.mean(x, axis=-1, keepdims=True)
    var = jnp.mean((x - mean) ** 2, axis=-1, keepdims=True)
    inv = jax.lax.rsqrt(var + LN_EPS)
    return (x - mean) * inv * w + b


def _make_kernel(gb, seq, lane_dense):
    """Kernel for one grid step covering `gb` batch elements."""

    def kernel(src_ref, wqkv_ref, wo_ref, w1_ref, w2_ref, slab_ref,
               out_ref, attn_ref):
        x = src_ref[...]                                    # (gb*S, D)

        slab = slab_ref[...]                                # (8, 3D)
        bqkv = slab[_ROW_BQKV:_ROW_BQKV + 1, :]             # (1, 3D)
        bo = slab[_ROW_BO:_ROW_BO + 1, :D_MODEL]
        b1 = slab[_ROW_B1:_ROW_B1 + 1, :DIM_FF]
        b2 = slab[_ROW_B2:_ROW_B2 + 1, :D_MODEL]
        ln1w = slab[_ROW_LN1W:_ROW_LN1W + 1, :D_MODEL]
        ln1b = slab[_ROW_LN1B:_ROW_LN1B + 1, :D_MODEL]
        ln2w = slab[_ROW_LN2W:_ROW_LN2W + 1, :D_MODEL]
        ln2b = slab[_ROW_LN2B:_ROW_LN2B + 1, :D_MODEL]

        # Fused QKV projection; the 1/sqrt(head_dim) scale is pre-folded into
        # the Q columns of wqkv/bqkv, so no per-step score scaling is needed.
        qkv = jnp.dot(x, wqkv_ref[...],
                      preferred_element_type=jnp.float32) + bqkv
        qkv3 = qkv.reshape(gb, seq, 3 * D_MODEL)

        # Merge (head, batch) into a single leading batch axis (leading-dim
        # concat is cheap tile movement) so attention runs as two batched
        # einsums and one softmax instead of 4 of each.
        q_heads, k_heads, v_heads = [], [], []
        for h in range(N_HEAD):
            lo = h * HEAD_DIM
            q_heads.append(qkv3[:, :, lo:lo + HEAD_DIM])
            k_heads.append(qkv3[:, :, D_MODEL + lo:D_MODEL + lo + HEAD_DIM])
            v_heads.append(
                qkv3[:, :, 2 * D_MODEL + lo:2 * D_MODEL + lo + HEAD_DIM])
        q = jnp.concatenate(q_heads, axis=0)                # (H*gb, S, hd)
        k = jnp.concatenate(k_heads, axis=0)
        v = jnp.concatenate(v_heads, axis=0)

        s = jnp.einsum('bqd,bkd->bqk', q, k,
                       preferred_element_type=jnp.float32)  # (H*gb, S, S)
        s = s - jnp.max(s, axis=-1, keepdims=True)
        p = jnp.exp(s)
        # Exact divide: p is returned as the attention weights (need_weights),
        # so rows must sum to 1 (no approx reciprocal here).
        p = p / jnp.sum(p, axis=-1, keepdims=True)

        ho = jnp.einsum('bqk,bkd->bqd', p, v,
                        preferred_element_type=jnp.float32)  # (H*gb, S, hd)

        # need_weights=True with average_attn_weights=True -> mean over heads.
        attn_mean = p[0:gb]
        for h in range(1, N_HEAD):
            attn_mean = attn_mean + p[h * gb:(h + 1) * gb]
        attn_mean = attn_mean * (1.0 / N_HEAD)               # (gb, S, S)

        # Reassemble heads along the feature axis and project out.
        attn_cat = jnp.concatenate(
            [ho[h * gb:(h + 1) * gb].reshape(gb * seq, HEAD_DIM)
             for h in range(N_HEAD)], axis=-1)               # (gb*S, D)
        attn_out = jnp.dot(attn_cat, wo_ref[...],
                           preferred_element_type=jnp.float32) + bo

        # residual + norm1 (dropout1 == identity)
        src2 = _layernorm(x + attn_out, ln1w, ln1b)

        # feed-forward (dropout == identity)
        h1 = jnp.maximum(
            jnp.dot(src2, w1_ref[...],
                    preferred_element_type=jnp.float32) + b1, 0.0)
        ff = jnp.dot(h1, w2_ref[...],
                     preferred_element_type=jnp.float32) + b2

        # residual + norm2 (dropout2 == identity)
        src3 = _layernorm(src2 + ff, ln2w, ln2b)

        if lane_dense:
            # Lane-dense stores: 256-wide / 128-wide unmasked vst instead of
            # 32- / 8-lane masked partial stores.
            out_ref[...] = src3.reshape(gb, seq * D_MODEL)
            attn_ref[...] = attn_mean.reshape((gb * seq * seq) // 128, 128)
        else:
            out_ref[...] = src3
            attn_ref[...] = attn_mean

    return kernel


def _tensorcores_per_device():
    """Best-effort TensorCore count of one jax device (1 on v5e/v6e)."""
    try:
        dev = jax.devices()[0]
    except Exception:
        return 1
    nc = getattr(dev, "num_cores", None)
    try:
        if nc is not None and int(nc) > 0:
            return int(nc)
    except Exception:
        pass
    kind = str(getattr(dev, "device_kind", "")).lower()
    if any(t in kind for t in ("lite", "v5e", "v6e", "v6", "v2", "v3")):
        return 1           # single TensorCore per jax device
    if any(t in kind for t in ("v7", "v5p", "v4")):
        return 2           # dual TensorCore (megacore / v7x)
    return 1


def transformer_layer(src, params):
    B, S, D = src.shape
    assert D == D_MODEL
    wqkv, wo, w1, w2, slab = params

    # Chip-aware grid: 1 step on single-TC chips (no benefit from a 2nd step,
    # ~0.35us fixed overhead each), exactly 2 parallel steps on dual-TC chips
    # so both cores get one batch block.
    cores = _tensorcores_per_device()
    num_blocks = 2 if (cores >= 2 and B >= 2) else 1

    GB = -(-B // num_blocks)
    # (8,128) rule: the flattened (GB*S, D) input block needs GB*S % 8 == 0
    # (unless it is the full array) — round GB up if necessary.
    while (GB * S) % 8 != 0:
        GB += 1
    assert (GB * S) % 8 == 0
    B_pad = GB * num_blocks

    if B_pad != B:
        # Padded rows are finite garbage through LayerNorm and sliced off.
        src = jnp.pad(src, ((0, B_pad - B), (0, 0), (0, 0)))
    src_flat = src.reshape(B_pad * S, D)

    # VMEM guard: resident (double-buffered) blocks total well under 1 MiB at
    # these sizes; re-derive GB from the 32 MiB scoped / 64 MiB physical v7x
    # limit if B, S or D_MODEL are ever scaled up.

    # Constant-index_map weight specs: Pallas keeps them resident across grid
    # steps (no re-DMA between consecutive steps).
    weight_specs = [
        pl.BlockSpec(wqkv.shape, lambda b: (0, 0)),
        pl.BlockSpec(wo.shape, lambda b: (0, 0)),
        pl.BlockSpec(w1.shape, lambda b: (0, 0)),
        pl.BlockSpec(w2.shape, lambda b: (0, 0)),
        pl.BlockSpec(slab.shape, lambda b: (0, 0)),
    ]
    in_specs = [pl.BlockSpec((GB * S, D), lambda b: (b, 0))] + weight_specs

    attn_rows = (GB * S * S) // 128
    dense_ok = (
        (GB * S * S) % 128 == 0
        and (num_blocks == 1 or GB % 8 == 0)
        and (num_blocks == 1 or attn_rows % 8 == 0)
    )

    def run(lane_dense):
        if lane_dense:
            out_specs = (
                pl.BlockSpec((GB, S * D), lambda b: (b, 0)),
                pl.BlockSpec((attn_rows, 128), lambda b: (b, 0)),
            )
            out_shape = (
                jax.ShapeDtypeStruct((B_pad, S * D), jnp.float32),
                jax.ShapeDtypeStruct((num_blocks * attn_rows, 128),
                                     jnp.float32),
            )
        else:
            out_specs = (
                pl.BlockSpec((GB * S, D), lambda b: (b, 0)),
                pl.BlockSpec((GB, S, S), lambda b: (b, 0, 0)),
            )
            out_shape = (
                jax.ShapeDtypeStruct((B_pad * S, D), jnp.float32),
                jax.ShapeDtypeStruct((B_pad, S, S), jnp.float32),
            )
        return pl.pallas_call(
            _make_kernel(GB, S, lane_dense),
            grid=(num_blocks,),
            in_specs=in_specs,
            out_specs=out_specs,
            out_shape=out_shape,
            compiler_params=pltpu.CompilerParams(
                dimension_semantics=("parallel",)),
        )(src_flat, wqkv, wo, w1, w2, slab)

    attempts = [True, False] if dense_ok else [False]
    last_err = None
    for lane_dense in attempts:
        try:
            out_raw, attn_raw = run(lane_dense)
            jax.block_until_ready((out_raw, attn_raw))
        except Exception as err:  # lane-dense relayout unsupported -> fallback
            last_err = err
            continue
        out = out_raw.reshape(B_pad, S, D)[:B]
        attn = attn_raw.reshape(B_pad, S, S)[:B]
        return out, attn
    raise last_err


def pack_bias_slab(bq, bk, bv, bo, b1, b2, ln1w, ln1b, ln2w, ln2b):
    """Pack all 1-D bias / LayerNorm params into one (8, 3*D_MODEL) slab."""
    width = 3 * D_MODEL

    def row(v):
        v = jnp.asarray(v, jnp.float32).reshape(-1)
        return jnp.pad(v, (0, width - v.shape[0]))

    rows = [
        jnp.concatenate([bq.reshape(-1), bk.reshape(-1), bv.reshape(-1)]),
        row(bo), row(b1), row(b2),
        row(ln1w), row(ln1b), row(ln2w), row(ln2b),
    ]
    return jnp.stack(rows, axis=0).astype(jnp.float32)


def init_params(key):
    ks = jax.random.split(key, 8)
    scale = 0.05

    def mat(k, shape):
        return (scale * jax.random.normal(k, shape)).astype(jnp.float32)

    wq = mat(ks[0], (D_MODEL, D_MODEL))
    wk = mat(ks[1], (D_MODEL, D_MODEL))
    wv = mat(ks[2], (D_MODEL, D_MODEL))
    wo = mat(ks[3], (D_MODEL, D_MODEL))
    w1 = mat(ks[4], (D_MODEL, DIM_FF))
    w2 = mat(ks[5], (DIM_FF, D_MODEL))
    bq = mat(ks[6], (D_MODEL,))
    bk = jnp.zeros((D_MODEL,), jnp.float32)
    bv = mat(ks[7], (D_MODEL,))
    bo = jnp.zeros((D_MODEL,), jnp.float32)
    b1 = jnp.zeros((DIM_FF,), jnp.float32)
    b2 = jnp.zeros((D_MODEL,), jnp.float32)
    # LayerNorm init matches PyTorch defaults: weight=1, bias=0
    ln1w = jnp.ones((D_MODEL,), jnp.float32)
    ln1b = jnp.zeros((D_MODEL,), jnp.float32)
    ln2w = jnp.ones((D_MODEL,), jnp.float32)
    ln2b = jnp.zeros((D_MODEL,), jnp.float32)

    # Fold the 1/sqrt(head_dim) attention scale into the Q projection once at
    # parameter-pack time (free) instead of per-step score multiplies.
    att_scale = HEAD_DIM ** -0.5
    wq = wq * att_scale
    bq = bq * att_scale

    wqkv = jnp.concatenate([wq, wk, wv], axis=1)   # (D, 3D): x @ wqkv
    slab = pack_bias_slab(bq, bk, bv, bo, b1, b2, ln1w, ln1b, ln2w, ln2b)
    return [wqkv, wo, w1, w2, slab]


def reference_forward(src, params):
    """Pure-JAX reference with the same packed parameters (scale pre-folded)."""
    wqkv, wo, w1, w2, slab = params
    B, S, D = src.shape
    with jax.default_matmul_precision("float32"):
        qkv = src @ wqkv + slab[_ROW_BQKV]                    # (B, S, 3D)
        q, k, v = qkv[..., :D], qkv[..., D:2 * D], qkv[..., 2 * D:]

        def split(t):
            return t.reshape(B, S, N_HEAD, HEAD_DIM).transpose(0, 2, 1, 3)

        qh, kh, vh = split(q), split(k), split(v)
        s = jnp.einsum('bhqd,bhkd->bhqk', qh, kh)
        p = jax.nn.softmax(s, axis=-1)
        attn_w = jnp.mean(p, axis=1)
        ho = jnp.einsum('bhqk,bhkd->bhqd', p, vh)
        ho = ho.transpose(0, 2, 1, 3).reshape(B, S, D)
        attn_out = ho @ wo + slab[_ROW_BO, :D]
        src2 = _layernorm(src + attn_out,
                          slab[_ROW_LN1W, :D], slab[_ROW_LN1B, :D])
        ffh = jnp.maximum(src2 @ w1 + slab[_ROW_B1, :DIM_FF], 0.0)
        ff = ffh @ w2 + slab[_ROW_B2, :D]
        src3 = _layernorm(src2 + ff,
                          slab[_ROW_LN2W, :D], slab[_ROW_LN2B, :D])
    return src3, attn_w


if __name__ == "__main__":
    # TODO(synk): dropout is implemented as identity (eval-mode semantics);
    # train-mode stochastic masking is not reproduced.
    B, S = 32, 8
    key = jax.random.PRNGKey(0)
    k_src, k_par = jax.random.split(key)
    src = jax.random.normal(k_src, (B, S, D_MODEL), dtype=jnp.float32)
    params = init_params(k_par)

    out, attn_w = transformer_layer(src, params)
    out, attn_w = jax.block_until_ready((out, attn_w))

    assert out.shape == (B, S, D_MODEL)
    assert attn_w.shape == (B, S, S)
    assert bool(jnp.all(jnp.isfinite(out)))
    assert bool(jnp.all(jnp.isfinite(attn_w)))

    # Correctness check against a pure-JAX reference of the same forward pass.
    ref_out, ref_attn = reference_forward(src, params)
    assert float(jnp.max(jnp.abs(out - ref_out))) < 2e-2
    assert float(jnp.max(jnp.abs(attn_w - ref_attn))) < 2e-2
    # Exact softmax divide -> attention rows sum to 1.
    assert float(jnp.max(jnp.abs(jnp.sum(attn_w, axis=-1) - 1.0))) < 1e-3

    print("KERNEL_OK")
</pallas_src>

<mosaic_0001>
module attributes {stable_mosaic.version = 11 : i64} {
  func.func @kernel(%arg0: i32, %arg1: memref<256x32xf32, #tpu.memory_space<vmem>>, %arg2: memref<32x96xf32, #tpu.memory_space<vmem>>, %arg3: memref<32x32xf32, #tpu.memory_space<vmem>>, %arg4: memref<32x64xf32, #tpu.memory_space<vmem>>, %arg5: memref<64x32xf32, #tpu.memory_space<vmem>>, %arg6: memref<8x96xf32, #tpu.memory_space<vmem>>, %arg7: memref<32x256xf32, #tpu.memory_space<vmem>>, %arg8: memref<16x128xf32, #tpu.memory_space<vmem>>) attributes {dimension_semantics = [#tpu.dimension_semantics<parallel>], iteration_bounds = array<i64: 1>, scalar_prefetch = 0 : i64, scratch_operands = 0 : i64, tpu.core_type = #tpu.core_type<tc>, window_params = [{transform_indices = @transform_0, window_bounds = array<i64: 256, 32>}, {pipeline_mode = #tpu.pipeline_mode<synchronous>, transform_indices = @transform_1, window_bounds = array<i64: 32, 96>}, {pipeline_mode = #tpu.pipeline_mode<synchronous>, transform_indices = @transform_2, window_bounds = array<i64: 32, 32>}, {pipeline_mode = #tpu.pipeline_mode<synchronous>, transform_indices = @transform_3, window_bounds = array<i64: 32, 64>}, {pipeline_mode = #tpu.pipeline_mode<synchronous>, transform_indices = @transform_4, window_bounds = array<i64: 64, 32>}, {pipeline_mode = #tpu.pipeline_mode<synchronous>, transform_indices = @transform_5, window_bounds = array<i64: 8, 96>}, {transform_indices = @transform_6, window_bounds = array<i64: 32, 256>}, {transform_indices = @transform_7, window_bounds = array<i64: 16, 128>}]} {
    %c0 = arith.constant 0 : index
    %c0_0 = arith.constant 0 : index
    %0 = vector.load %arg1[%c0, %c0_0] : memref<256x32xf32, #tpu.memory_space<vmem>>, vector<256x32xf32>
    %c0_1 = arith.constant 0 : index
    %c0_2 = arith.constant 0 : index
    %1 = vector.load %arg6[%c0_1, %c0_2] : memref<8x96xf32, #tpu.memory_space<vmem>>, vector<8x96xf32>
    %2 = vector.extract_strided_slice %1 {offsets = [0, 0], sizes = [1, 96], strides = [1, 1]} : vector<8x96xf32> to vector<1x96xf32>
    %3 = vector.extract_strided_slice %1 {offsets = [1, 0], sizes = [1, 32], strides = [1, 1]} : vector<8x96xf32> to vector<1x32xf32>
    %4 = vector.extract_strided_slice %1 {offsets = [2, 0], sizes = [1, 64], strides = [1, 1]} : vector<8x96xf32> to vector<1x64xf32>
    %5 = vector.extract_strided_slice %1 {offsets = [3, 0], sizes = [1, 32], strides = [1, 1]} : vector<8x96xf32> to vector<1x32xf32>
    %6 = vector.extract_strided_slice %1 {offsets = [4, 0], sizes = [1, 32], strides = [1, 1]} : vector<8x96xf32> to vector<1x32xf32>
    %7 = vector.extract_strided_slice %1 {offsets = [5, 0], sizes = [1, 32], strides = [1, 1]} : vector<8x96xf32> to vector<1x32xf32>
    %8 = vector.extract_strided_slice %1 {offsets = [6, 0], sizes = [1, 32], strides = [1, 1]} : vector<8x96xf32> to vector<1x32xf32>
    %9 = vector.extract_strided_slice %1 {offsets = [7, 0], sizes = [1, 32], strides = [1, 1]} : vector<8x96xf32> to vector<1x32xf32>
    %c0_3 = arith.constant 0 : index
    %c0_4 = arith.constant 0 : index
    %10 = vector.load %arg2[%c0_3, %c0_4] : memref<32x96xf32, #tpu.memory_space<vmem>>, vector<32x96xf32>
    %cst = arith.constant dense<0.000000e+00> : vector<256x96xf32>
    %11 = tpu.matmul %0, %10, %cst {dimension_numbers = #tpu.dot_dimension_numbers<[1], [0], [0], [1], [0, 0, 1, 1], [], []>} : vector<256x32xf32>, vector<32x96xf32>, vector<256x96xf32> -> vector<256x96xf32>
    %12 = vector.broadcast %2 : vector<1x96xf32> to vector<256x96xf32>
    %13 = arith.addf %11, %12 : vector<256x96xf32>
    %14 = vector.shape_cast %13 : vector<256x96xf32> to vector<32x8x96xf32>
    %15 = vector.extract_strided_slice %14 {offsets = [0, 0, 0], sizes = [32, 8, 8], strides = [1, 1, 1]} : vector<32x8x96xf32> to vector<32x8x8xf32>
    %16 = vector.extract_strided_slice %14 {offsets = [0, 0, 32], sizes = [32, 8, 8], strides = [1, 1, 1]} : vector<32x8x96xf32> to vector<32x8x8xf32>
    %17 = vector.extract_strided_slice %14 {offsets = [0, 0, 64], sizes = [32, 8, 8], strides = [1, 1, 1]} : vector<32x8x96xf32> to vector<32x8x8xf32>
    %18 = vector.extract_strided_slice %14 {offsets = [0, 0, 8], sizes = [32, 8, 8], strides = [1, 1, 1]} : vector<32x8x96xf32> to vector<32x8x8xf32>
    %19 = vector.extract_strided_slice %14 {offsets = [0, 0, 40], sizes = [32, 8, 8], strides = [1, 1, 1]} : vector<32x8x96xf32> to vector<32x8x8xf32>
    %20 = vector.extract_strided_slice %14 {offsets = [0, 0, 72], sizes = [32, 8, 8], strides = [1, 1, 1]} : vector<32x8x96xf32> to vector<32x8x8xf32>
    %21 = vector.extract_strided_slice %14 {offsets = [0, 0, 16], sizes = [32, 8, 8], strides = [1, 1, 1]} : vector<32x8x96xf32> to vector<32x8x8xf32>
    %22 = vector.extract_strided_slice %14 {offsets = [0, 0, 48], sizes = [32, 8, 8], strides = [1, 1, 1]} : vector<32x8x96xf32> to vector<32x8x8xf32>
    %23 = vector.extract_strided_slice %14 {offsets = [0, 0, 80], sizes = [32, 8, 8], strides = [1, 1, 1]} : vector<32x8x96xf32> to vector<32x8x8xf32>
    %24 = vector.extract_strided_slice %14 {offsets = [0, 0, 24], sizes = [32, 8, 8], strides = [1, 1, 1]} : vector<32x8x96xf32> to vector<32x8x8xf32>
    %25 = vector.extract_strided_slice %14 {offsets = [0, 0, 56], sizes = [32, 8, 8], strides = [1, 1, 1]} : vector<32x8x96xf32> to vector<32x8x8xf32>
    %26 = vector.extract_strided_slice %14 {offsets = [0, 0, 88], sizes = [32, 8, 8], strides = [1, 1, 1]} : vector<32x8x96xf32> to vector<32x8x8xf32>
    %27 = tpu.concatenate %15, %18, %21, %24 in 0 : vector<32x8x8xf32>, vector<32x8x8xf32>, vector<32x8x8xf32>, vector<32x8x8xf32> -> vector<128x8x8xf32>
    %28 = tpu.concatenate %16, %19, %22, %25 in 0 : vector<32x8x8xf32>, vector<32x8x8xf32>, vector<32x8x8xf32>, vector<32x8x8xf32> -> vector<128x8x8xf32>
    %29 = tpu.concatenate %17, %20, %23, %26 in 0 : vector<32x8x8xf32>, vector<32x8x8xf32>, vector<32x8x8xf32>, vector<32x8x8xf32> -> vector<128x8x8xf32>
    "tpu.trace_start"() <{level = 10 : i32, message = "bqd,bkd->bqk"}> : () -> ()
    %cst_5 = arith.constant dense<0.000000e+00> : vector<128x8x8xf32>
    %30 = tpu.matmul %27, %28, %cst_5 {dimension_numbers = #tpu.dot_dimension_numbers<[2], [2], [1], [1], [0, 0, 0, 1, 1, 1], [0], [0]>} : vector<128x8x8xf32>, vector<128x8x8xf32>, vector<128x8x8xf32> -> vector<128x8x8xf32>
    "tpu.trace_stop"() : () -> ()
    %cst_6 = arith.constant dense<0xFF800000> : vector<128x8xf32>
    %31 = vector.multi_reduction <maximumf>, %30, %cst_6 [2] : vector<128x8x8xf32> to vector<128x8xf32>
    %32 = vector.shape_cast %31 : vector<128x8xf32> to vector<128x8x1xf32>
    %33 = vector.broadcast %32 : vector<128x8x1xf32> to vector<128x8x8xf32>
    %34 = arith.subf %30, %33 : vector<128x8x8xf32>
    %35 = math.exp %34 : vector<128x8x8xf32>
    %cst_7 = arith.constant dense<0.000000e+00> : vector<128x8xf32>
    %36 = vector.multi_reduction <add>, %35, %cst_7 [2] : vector<128x8x8xf32> to vector<128x8xf32>
    %37 = vector.shape_cast %36 : vector<128x8xf32> to vector<128x8x1xf32>
    %38 = vector.broadcast %37 : vector<128x8x1xf32> to vector<128x8x8xf32>
    %39 = arith.divf %35, %38 : vector<128x8x8xf32>
    "tpu.trace_start"() <{level = 10 : i32, message = "bqk,bkd->bqd"}> : () -> ()
    %cst_8 = arith.constant dense<0.000000e+00> : vector<128x8x8xf32>
    %40 = tpu.matmul %39, %29, %cst_8 {dimension_numbers = #tpu.dot_dimension_numbers<[2], [1], [1], [2], [0, 0, 0, 1, 1, 2], [0], [0]>} : vector<128x8x8xf32>, vector<128x8x8xf32>, vector<128x8x8xf32> -> vector<128x8x8xf32>
    "tpu.trace_stop"() : () -> ()
    %41 = vector.extract_strided_slice %39 {offsets = [0, 0, 0], sizes = [32, 8, 8], strides = [1, 1, 1]} : vector<128x8x8xf32> to vector<32x8x8xf32>
    %42 = vector.extract_strided_slice %39 {offsets = [32, 0, 0], sizes = [32, 8, 8], strides = [1, 1, 1]} : vector<128x8x8xf32> to vector<32x8x8xf32>
    %43 = arith.addf %41, %42 : vector<32x8x8xf32>
    %44 = vector.extract_strided_slice %39 {offsets = [64, 0, 0], sizes = [32, 8, 8], strides = [1, 1, 1]} : vector<128x8x8xf32> to vector<32x8x8xf32>
    %45 = arith.addf %43, %44 : vector<32x8x8xf32>
    %46 = vector.extract_strided_slice %39 {offsets = [96, 0, 0], sizes = [32, 8, 8], strides = [1, 1, 1]} : vector<128x8x8xf32> to vector<32x8x8xf32>
    %47 = arith.addf %45, %46 : vector<32x8x8xf32>
    %cst_9 = arith.constant 2.500000e-01 : f32
    %48 = vector.broadcast %cst_9 : f32 to vector<32x8x8xf32>
    %49 = arith.mulf %47, %48 : vector<32x8x8xf32>
    %50 = vector.extract_strided_slice %40 {offsets = [0, 0, 0], sizes = [32, 8, 8], strides = [1, 1, 1]} : vector<128x8x8xf32> to vector<32x8x8xf32>
    %51 = vector.shape_cast %50 : vector<32x8x8xf32> to vector<256x8xf32>
    %52 = vector.extract_strided_slice %40 {offsets = [32, 0, 0], sizes = [32, 8, 8], strides = [1, 1, 1]} : vector<128x8x8xf32> to vector<32x8x8xf32>
    %53 = vector.shape_cast %52 : vector<32x8x8xf32> to vector<256x8xf32>
    %54 = vector.extract_strided_slice %40 {offsets = [64, 0, 0], sizes = [32, 8, 8], strides = [1, 1, 1]} : vector<128x8x8xf32> to vector<32x8x8xf32>
    %55 = vector.shape_cast %54 : vector<32x8x8xf32> to vector<256x8xf32>
    %56 = vector.extract_strided_slice %40 {offsets = [96, 0, 0], sizes = [32, 8, 8], strides = [1, 1, 1]} : vector<128x8x8xf32> to vector<32x8x8xf32>
    %57 = vector.shape_cast %56 : vector<32x8x8xf32> to vector<256x8xf32>
    %58 = tpu.concatenate %51, %53, %55, %57 in 1 : vector<256x8xf32>, vector<256x8xf32>, vector<256x8xf32>, vector<256x8xf32> -> vector<256x32xf32>
    %c0_10 = arith.constant 0 : index
    %c0_11 = arith.constant 0 : index
    %59 = vector.load %arg3[%c0_10, %c0_11] : memref<32x32xf32, #tpu.memory_space<vmem>>, vector<32x32xf32>
    %cst_12 = arith.constant dense<0.000000e+00> : vector<256x32xf32>
    %60 = tpu.matmul %58, %59, %cst_12 {dimension_numbers = #tpu.dot_dimension_numbers<[1], [0], [0], [1], [0, 0, 1, 1], [], []>} : vector<256x32xf32>, vector<32x32xf32>, vector<256x32xf32> -> vector<256x32xf32>
    %61 = vector.broadcast %3 : vector<1x32xf32> to vector<256x32xf32>
    %62 = arith.addf %60, %61 : vector<256x32xf32>
    %63 = arith.addf %0, %62 : vector<256x32xf32>
    %cst_13 = arith.constant dense<0.000000e+00> : vector<256xf32>
    %64 = vector.multi_reduction <add>, %63, %cst_13 [1] : vector<256x32xf32> to vector<256xf32>
    %65 = vector.shape_cast %64 : vector<256xf32> to vector<256x1xf32>
    %cst_14 = arith.constant 3.200000e+01 : f32
    %66 = vector.broadcast %cst_14 : f32 to vector<256x1xf32>
    %67 = arith.divf %65, %66 : vector<256x1xf32>
    %68 = vector.broadcast %67 : vector<256x1xf32> to vector<256x32xf32>
    %69 = arith.subf %63, %68 : vector<256x32xf32>
    %70 = arith.mulf %69, %69 : vector<256x32xf32>
    %cst_15 = arith.constant dense<0.000000e+00> : vector<256xf32>
    %71 = vector.multi_reduction <add>, %70, %cst_15 [1] : vector<256x32xf32> to vector<256xf32>
    %72 = vector.shape_cast %71 : vector<256xf32> to vector<256x1xf32>
    %cst_16 = arith.constant 3.200000e+01 : f32
    %73 = vector.broadcast %cst_16 : f32 to vector<256x1xf32>
    %74 = arith.divf %72, %73 : vector<256x1xf32>
    %cst_17 = arith.constant 9.99999974E-6 : f32
    %75 = vector.broadcast %cst_17 : f32 to vector<256x1xf32>
    %76 = arith.addf %74, %75 : vector<256x1xf32>
    %77 = math.rsqrt %76 : vector<256x1xf32>
    %78 = vector.broadcast %67 : vector<256x1xf32> to vector<256x32xf32>
    %79 = arith.subf %63, %78 : vector<256x32xf32>
    %80 = vector.broadcast %77 : vector<256x1xf32> to vector<256x32xf32>
    %81 = arith.mulf %79, %80 : vector<256x32xf32>
    %82 = vector.broadcast %6 : vector<1x32xf32> to vector<256x32xf32>
    %83 = arith.mulf %81, %82 : vector<256x32xf32>
    %84 = vector.broadcast %7 : vector<1x32xf32> to vector<256x32xf32>
    %85 = arith.addf %83, %84 : vector<256x32xf32>
    %c0_18 = arith.constant 0 : index
    %c0_19 = arith.constant 0 : index
    %86 = vector.load %arg4[%c0_18, %c0_19] : memref<32x64xf32, #tpu.memory_space<vmem>>, vector<32x64xf32>
    %cst_20 = arith.constant dense<0.000000e+00> : vector<256x64xf32>
    %87 = tpu.matmul %85, %86, %cst_20 {dimension_numbers = #tpu.dot_dimension_numbers<[1], [0], [0], [1], [0, 0, 1, 1], [], []>} : vector<256x32xf32>, vector<32x64xf32>, vector<256x64xf32> -> vector<256x64xf32>
    %88 = vector.broadcast %4 : vector<1x64xf32> to vector<256x64xf32>
    %89 = arith.addf %87, %88 : vector<256x64xf32>
    %cst_21 = arith.constant 0.000000e+00 : f32
    %90 = vector.broadcast %cst_21 : f32 to vector<256x64xf32>
    %91 = arith.maximumf %89, %90 : vector<256x64xf32>
    %c0_22 = arith.constant 0 : index
    %c0_23 = arith.constant 0 : index
    %92 = vector.load %arg5[%c0_22, %c0_23] : memref<64x32xf32, #tpu.memory_space<vmem>>, vector<64x32xf32>
    %cst_24 = arith.constant dense<0.000000e+00> : vector<256x32xf32>
    %93 = tpu.matmul %91, %92, %cst_24 {dimension_numbers = #tpu.dot_dimension_numbers<[1], [0], [0], [1], [0, 0, 1, 1], [], []>} : vector<256x64xf32>, vector<64x32xf32>, vector<256x32xf32> -> vector<256x32xf32>
    %94 = vector.broadcast %5 : vector<1x32xf32> to vector<256x32xf32>
    %95 = arith.addf %93, %94 : vector<256x32xf32>
    %96 = arith.addf %85, %95 : vector<256x32xf32>
    %cst_25 = arith.constant dense<0.000000e+00> : vector<256xf32>
    %97 = vector.multi_reduction <add>, %96, %cst_25 [1] : vector<256x32xf32> to vector<256xf32>
    %98 = vector.shape_cast %97 : vector<256xf32> to vector<256x1xf32>
    %cst_26 = arith.constant 3.200000e+01 : f32
    %99 = vector.broadcast %cst_26 : f32 to vector<256x1xf32>
    %100 = arith.divf %98, %99 : vector<256x1xf32>
    %101 = vector.broadcast %100 : vector<256x1xf32> to vector<256x32xf32>
    %102 = arith.subf %96, %101 : vector<256x32xf32>
    %103 = arith.mulf %102, %102 : vector<256x32xf32>
    %cst_27 = arith.constant dense<0.000000e+00> : vector<256xf32>
    %104 = vector.multi_reduction <add>, %103, %cst_27 [1] : vector<256x32xf32> to vector<256xf32>
    %105 = vector.shape_cast %104 : vector<256xf32> to vector<256x1xf32>
    %cst_28 = arith.constant 3.200000e+01 : f32
    %106 = vector.broadcast %cst_28 : f32 to vector<256x1xf32>
    %107 = arith.divf %105, %106 : vector<256x1xf32>
    %cst_29 = arith.constant 9.99999974E-6 : f32
    %108 = vector.broadcast %cst_29 : f32 to vector<256x1xf32>
    %109 = arith.addf %107, %108 : vector<256x1xf32>
    %110 = math.rsqrt %109 : vector<256x1xf32>
    %111 = vector.broadcast %100 : vector<256x1xf32> to vector<256x32xf32>
    %112 = arith.subf %96, %111 : vector<256x32xf32>
    %113 = vector.broadcast %110 : vector<256x1xf32> to vector<256x32xf32>
    %114 = arith.mulf %112, %113 : vector<256x32xf32>
    %115 = vector.broadcast %8 : vector<1x32xf32> to vector<256x32xf32>
    %116 = arith.mulf %114, %115 : vector<256x32xf32>
    %117 = vector.broadcast %9 : vector<1x32xf32> to vector<256x32xf32>
    %118 = arith.addf %116, %117 : vector<256x32xf32>
    %119 = vector.shape_cast %118 : vector<256x32xf32> to vector<32x256xf32>
    %c0_30 = arith.constant 0 : index
    %c0_31 = arith.constant 0 : index
    %120 = vector.load %arg7[%c0_30, %c0_31] : memref<32x256xf32, #tpu.memory_space<vmem>>, vector<32x256xf32>
    tpu.vector_store %arg7[%c0_30, %c0_31], %119 {strides = array<i32>} : memref<32x256xf32, #tpu.memory_space<vmem>>, vector<32x256xf32>,
    %121 = vector.shape_cast %49 : vector<32x8x8xf32> to vector<16x128xf32>
    %c0_32 = arith.constant 0 : index
    %c0_33 = arith.constant 0 : index
    %122 = vector.load %arg8[%c0_32, %c0_33] : memref<16x128xf32, #tpu.memory_space<vmem>>, vector<16x128xf32>
    tpu.vector_store %arg8[%c0_32, %c0_33], %121 {strides = array<i32>} : memref<16x128xf32, #tpu.memory_space<vmem>>, vector<16x128xf32>,
    return
  }
  func.func @transform_0(%arg0: i32) -> (i32, i32) {
    %c0_i32 = arith.constant 0 : i32
    %c0_i32_0 = arith.constant 0 : i32
    return %arg0, %c0_i32 : i32, i32
  }
  func.func @transform_1(%arg0: i32) -> (i32, i32) {
    %c0_i32 = arith.constant 0 : i32
    %c0_i32_0 = arith.constant 0 : i32
    %c0_i32_1 = arith.constant 0 : i32
    return %c0_i32, %c0_i32_0 : i32, i32
  }
  func.func @transform_2(%arg0: i32) -> (i32, i32) {
    %c0_i32 = arith.constant 0 : i32
    %c0_i32_0 = arith.constant 0 : i32
    %c0_i32_1 = arith.constant 0 : i32
    return %c0_i32, %c0_i32_0 : i32, i32
  }
  func.func @transform_3(%arg0: i32) -> (i32, i32) {
    %c0_i32 = arith.constant 0 : i32
    %c0_i32_0 = arith.constant 0 : i32
    %c0_i32_1 = arith.constant 0 : i32
    return %c0_i32, %c0_i32_0 : i32, i32
  }
  func.func @transform_4(%arg0: i32) -> (i32, i32) {
    %c0_i32 = arith.constant 0 : i32
    %c0_i32_0 = arith.constant 0 : i32
    %c0_i32_1 = arith.constant 0 : i32
    return %c0_i32, %c0_i32_0 : i32, i32
  }
  func.func @transform_5(%arg0: i32) -> (i32, i32) {
    %c0_i32 = arith.constant 0 : i32
    %c0_i32_0 = arith.constant 0 : i32
    %c0_i32_1 = arith.constant 0 : i32
    return %c0_i32, %c0_i32_0 : i32, i32
  }
  func.func @transform_6(%arg0: i32) -> (i32, i32) {
    %c0_i32 = arith.constant 0 : i32
    %c0_i32_0 = arith.constant 0 : i32
    return %arg0, %c0_i32 : i32, i32
  }
  func.func @transform_7(%arg0: i32) -> (i32, i32) {
    %c0_i32 = arith.constant 0 : i32
    %c0_i32_0 = arith.constant 0 : i32
    return %arg0, %c0_i32 : i32, i32
  }
}

module attributes {stable_mosaic.version = 11 : i64} {
  func.func @kernel(%arg0: i32, %arg1: memref<256x32xf32, #tpu.memory_space<vmem>>, %arg2: memref<32x96xf32, #tpu.memory_space<vmem>>, %arg3: memref<32x32xf32, #tpu.memory_space<vmem>>, %arg4: memref<32x64xf32, #tpu.memory_space<vmem>>, %arg5: memref<64x32xf32, #tpu.memory_space<vmem>>, %arg6: memref<8x96xf32, #tpu.memory_space<vmem>>, %arg7: memref<256x32xf32, #tpu.memory_space<vmem>>, %arg8: memref<32x8x8xf32, #tpu.memory_space<vmem>>) attributes {dimension_semantics = [#tpu.dimension_semantics<parallel>], iteration_bounds = array<i64: 1>, scalar_prefetch = 0 : i64, scratch_operands = 0 : i64, tpu.core_type = #tpu.core_type<tc>, window_params = [{transform_indices = @transform_0, window_bounds = array<i64: 256, 32>}, {pipeline_mode = #tpu.pipeline_mode<synchronous>, transform_indices = @transform_1, window_bounds = array<i64: 32, 96>}, {pipeline_mode = #tpu.pipeline_mode<synchronous>, transform_indices = @transform_2, window_bounds = array<i64: 32, 32>}, {pipeline_mode = #tpu.pipeline_mode<synchronous>, transform_indices = @transform_3, window_bounds = array<i64: 32, 64>}, {pipeline_mode = #tpu.pipeline_mode<synchronous>, transform_indices = @transform_4, window_bounds = array<i64: 64, 32>}, {pipeline_mode = #tpu.pipeline_mode<synchronous>, transform_indices = @transform_5, window_bounds = array<i64: 8, 96>}, {transform_indices = @transform_6, window_bounds = array<i64: 256, 32>}, {transform_indices = @transform_7, window_bounds = array<i64: 32, 8, 8>}]} {
    %c0 = arith.constant 0 : index
    %c0_0 = arith.constant 0 : index
    %0 = vector.load %arg1[%c0, %c0_0] : memref<256x32xf32, #tpu.memory_space<vmem>>, vector<256x32xf32>
    %c0_1 = arith.constant 0 : index
    %c0_2 = arith.constant 0 : index
    %1 = vector.load %arg6[%c0_1, %c0_2] : memref<8x96xf32, #tpu.memory_space<vmem>>, vector<8x96xf32>
    %2 = vector.extract_strided_slice %1 {offsets = [0, 0], sizes = [1, 96], strides = [1, 1]} : vector<8x96xf32> to vector<1x96xf32>
    %3 = vector.extract_strided_slice %1 {offsets = [1, 0], sizes = [1, 32], strides = [1, 1]} : vector<8x96xf32> to vector<1x32xf32>
    %4 = vector.extract_strided_slice %1 {offsets = [2, 0], sizes = [1, 64], strides = [1, 1]} : vector<8x96xf32> to vector<1x64xf32>
    %5 = vector.extract_strided_slice %1 {offsets = [3, 0], sizes = [1, 32], strides = [1, 1]} : vector<8x96xf32> to vector<1x32xf32>
    %6 = vector.extract_strided_slice %1 {offsets = [4, 0], sizes = [1, 32], strides = [1, 1]} : vector<8x96xf32> to vector<1x32xf32>
    %7 = vector.extract_strided_slice %1 {offsets = [5, 0], sizes = [1, 32], strides = [1, 1]} : vector<8x96xf32> to vector<1x32xf32>
    %8 = vector.extract_strided_slice %1 {offsets = [6, 0], sizes = [1, 32], strides = [1, 1]} : vector<8x96xf32> to vector<1x32xf32>
    %9 = vector.extract_strided_slice %1 {offsets = [7, 0], sizes = [1, 32], strides = [1, 1]} : vector<8x96xf32> to vector<1x32xf32>
    %c0_3 = arith.constant 0 : index
    %c0_4 = arith.constant 0 : index
    %10 = vector.load %arg2[%c0_3, %c0_4] : memref<32x96xf32, #tpu.memory_space<vmem>>, vector<32x96xf32>
    %cst = arith.constant dense<0.000000e+00> : vector<256x96xf32>
    %11 = tpu.matmul %0, %10, %cst {dimension_numbers = #tpu.dot_dimension_numbers<[1], [0], [0], [1], [0, 0, 1, 1], [], []>} : vector<256x32xf32>, vector<32x96xf32>, vector<256x96xf32> -> vector<256x96xf32>
    %12 = vector.broadcast %2 : vector<1x96xf32> to vector<256x96xf32>
    %13 = arith.addf %11, %12 : vector<256x96xf32>
    %14 = vector.shape_cast %13 : vector<256x96xf32> to vector<32x8x96xf32>
    %15 = vector.extract_strided_slice %14 {offsets = [0, 0, 0], sizes = [32, 8, 8], strides = [1, 1, 1]} : vector<32x8x96xf32> to vector<32x8x8xf32>
    %16 = vector.extract_strided_slice %14 {offsets = [0, 0, 32], sizes = [32, 8, 8], strides = [1, 1, 1]} : vector<32x8x96xf32> to vector<32x8x8xf32>
    %17 = vector.extract_strided_slice %14 {offsets = [0, 0, 64], sizes = [32, 8, 8], strides = [1, 1, 1]} : vector<32x8x96xf32> to vector<32x8x8xf32>
    %18 = vector.extract_strided_slice %14 {offsets = [0, 0, 8], sizes = [32, 8, 8], strides = [1, 1, 1]} : vector<32x8x96xf32> to vector<32x8x8xf32>
    %19 = vector.extract_strided_slice %14 {offsets = [0, 0, 40], sizes = [32, 8, 8], strides = [1, 1, 1]} : vector<32x8x96xf32> to vector<32x8x8xf32>
    %20 = vector.extract_strided_slice %14 {offsets = [0, 0, 72], sizes = [32, 8, 8], strides = [1, 1, 1]} : vector<32x8x96xf32> to vector<32x8x8xf32>
    %21 = vector.extract_strided_slice %14 {offsets = [0, 0, 16], sizes = [32, 8, 8], strides = [1, 1, 1]} : vector<32x8x96xf32> to vector<32x8x8xf32>
    %22 = vector.extract_strided_slice %14 {offsets = [0, 0, 48], sizes = [32, 8, 8], strides = [1, 1, 1]} : vector<32x8x96xf32> to vector<32x8x8xf32>
    %23 = vector.extract_strided_slice %14 {offsets = [0, 0, 80], sizes = [32, 8, 8], strides = [1, 1, 1]} : vector<32x8x96xf32> to vector<32x8x8xf32>
    %24 = vector.extract_strided_slice %14 {offsets = [0, 0, 24], sizes = [32, 8, 8], strides = [1, 1, 1]} : vector<32x8x96xf32> to vector<32x8x8xf32>
    %25 = vector.extract_strided_slice %14 {offsets = [0, 0, 56], sizes = [32, 8, 8], strides = [1, 1, 1]} : vector<32x8x96xf32> to vector<32x8x8xf32>
    %26 = vector.extract_strided_slice %14 {offsets = [0, 0, 88], sizes = [32, 8, 8], strides = [1, 1, 1]} : vector<32x8x96xf32> to vector<32x8x8xf32>
    %27 = tpu.concatenate %15, %18, %21, %24 in 0 : vector<32x8x8xf32>, vector<32x8x8xf32>, vector<32x8x8xf32>, vector<32x8x8xf32> -> vector<128x8x8xf32>
    %28 = tpu.concatenate %16, %19, %22, %25 in 0 : vector<32x8x8xf32>, vector<32x8x8xf32>, vector<32x8x8xf32>, vector<32x8x8xf32> -> vector<128x8x8xf32>
    %29 = tpu.concatenate %17, %20, %23, %26 in 0 : vector<32x8x8xf32>, vector<32x8x8xf32>, vector<32x8x8xf32>, vector<32x8x8xf32> -> vector<128x8x8xf32>
    "tpu.trace_start"() <{level = 10 : i32, message = "bqd,bkd->bqk"}> : () -> ()
    %cst_5 = arith.constant dense<0.000000e+00> : vector<128x8x8xf32>
    %30 = tpu.matmul %27, %28, %cst_5 {dimension_numbers = #tpu.dot_dimension_numbers<[2], [2], [1], [1], [0, 0, 0, 1, 1, 1], [0], [0]>} : vector<128x8x8xf32>, vector<128x8x8xf32>, vector<128x8x8xf32> -> vector<128x8x8xf32>
    "tpu.trace_stop"() : () -> ()
    %cst_6 = arith.constant dense<0xFF800000> : vector<128x8xf32>
    %31 = vector.multi_reduction <maximumf>, %30, %cst_6 [2] : vector<128x8x8xf32> to vector<128x8xf32>
    %32 = vector.shape_cast %31 : vector<128x8xf32> to vector<128x8x1xf32>
    %33 = vector.broadcast %32 : vector<128x8x1xf32> to vector<128x8x8xf32>
    %34 = arith.subf %30, %33 : vector<128x8x8xf32>
    %35 = math.exp %34 : vector<128x8x8xf32>
    %cst_7 = arith.constant dense<0.000000e+00> : vector<128x8xf32>
    %36 = vector.multi_reduction <add>, %35, %cst_7 [2] : vector<128x8x8xf32> to vector<128x8xf32>
    %37 = vector.shape_cast %36 : vector<128x8xf32> to vector<128x8x1xf32>
    %38 = vector.broadcast %37 : vector<128x8x1xf32> to vector<128x8x8xf32>
    %39 = arith.divf %35, %38 : vector<128x8x8xf32>
    "tpu.trace_start"() <{level = 10 : i32, message = "bqk,bkd->bqd"}> : () -> ()
    %cst_8 = arith.constant dense<0.000000e+00> : vector<128x8x8xf32>
    %40 = tpu.matmul %39, %29, %cst_8 {dimension_numbers = #tpu.dot_dimension_numbers<[2], [1], [1], [2], [0, 0, 0, 1, 1, 2], [0], [0]>} : vector<128x8x8xf32>, vector<128x8x8xf32>, vector<128x8x8xf32> -> vector<128x8x8xf32>
    "tpu.trace_stop"() : () -> ()
    %41 = vector.extract_strided_slice %39 {offsets = [0, 0, 0], sizes = [32, 8, 8], strides = [1, 1, 1]} : vector<128x8x8xf32> to vector<32x8x8xf32>
    %42 = vector.extract_strided_slice %39 {offsets = [32, 0, 0], sizes = [32, 8, 8], strides = [1, 1, 1]} : vector<128x8x8xf32> to vector<32x8x8xf32>
    %43 = arith.addf %41, %42 : vector<32x8x8xf32>
    %44 = vector.extract_strided_slice %39 {offsets = [64, 0, 0], sizes = [32, 8, 8], strides = [1, 1, 1]} : vector<128x8x8xf32> to vector<32x8x8xf32>
    %45 = arith.addf %43, %44 : vector<32x8x8xf32>
    %46 = vector.extract_strided_slice %39 {offsets = [96, 0, 0], sizes = [32, 8, 8], strides = [1, 1, 1]} : vector<128x8x8xf32> to vector<32x8x8xf32>
    %47 = arith.addf %45, %46 : vector<32x8x8xf32>
    %cst_9 = arith.constant 2.500000e-01 : f32
    %48 = vector.broadcast %cst_9 : f32 to vector<32x8x8xf32>
    %49 = arith.mulf %47, %48 : vector<32x8x8xf32>
    %50 = vector.extract_strided_slice %40 {offsets = [0, 0, 0], sizes = [32, 8, 8], strides = [1, 1, 1]} : vector<128x8x8xf32> to vector<32x8x8xf32>
    %51 = vector.shape_cast %50 : vector<32x8x8xf32> to vector<256x8xf32>
    %52 = vector.extract_strided_slice %40 {offsets = [32, 0, 0], sizes = [32, 8, 8], strides = [1, 1, 1]} : vector<128x8x8xf32> to vector<32x8x8xf32>
    %53 = vector.shape_cast %52 : vector<32x8x8xf32> to vector<256x8xf32>
    %54 = vector.extract_strided_slice %40 {offsets = [64, 0, 0], sizes = [32, 8, 8], strides = [1, 1, 1]} : vector<128x8x8xf32> to vector<32x8x8xf32>
    %55 = vector.shape_cast %54 : vector<32x8x8xf32> to vector<256x8xf32>
    %56 = vector.extract_strided_slice %40 {offsets = [96, 0, 0], sizes = [32, 8, 8], strides = [1, 1, 1]} : vector<128x8x8xf32> to vector<32x8x8xf32>
    %57 = vector.shape_cast %56 : vector<32x8x8xf32> to vector<256x8xf32>
    %58 = tpu.concatenate %51, %53, %55, %57 in 1 : vector<256x8xf32>, vector<256x8xf32>, vector<256x8xf32>, vector<256x8xf32> -> vector<256x32xf32>
    %c0_10 = arith.constant 0 : index
    %c0_11 = arith.constant 0 : index
    %59 = vector.load %arg3[%c0_10, %c0_11] : memref<32x32xf32, #tpu.memory_space<vmem>>, vector<32x32xf32>
    %cst_12 = arith.constant dense<0.000000e+00> : vector<256x32xf32>
    %60 = tpu.matmul %58, %59, %cst_12 {dimension_numbers = #tpu.dot_dimension_numbers<[1], [0], [0], [1], [0, 0, 1, 1], [], []>} : vector<256x32xf32>, vector<32x32xf32>, vector<256x32xf32> -> vector<256x32xf32>
    %61 = vector.broadcast %3 : vector<1x32xf32> to vector<256x32xf32>
    %62 = arith.addf %60, %61 : vector<256x32xf32>
    %63 = arith.addf %0, %62 : vector<256x32xf32>
    %cst_13 = arith.constant dense<0.000000e+00> : vector<256xf32>
    %64 = vector.multi_reduction <add>, %63, %cst_13 [1] : vector<256x32xf32> to vector<256xf32>
    %65 = vector.shape_cast %64 : vector<256xf32> to vector<256x1xf32>
    %cst_14 = arith.constant 3.200000e+01 : f32
    %66 = vector.broadcast %cst_14 : f32 to vector<256x1xf32>
    %67 = arith.divf %65, %66 : vector<256x1xf32>
    %68 = vector.broadcast %67 : vector<256x1xf32> to vector<256x32xf32>
    %69 = arith.subf %63, %68 : vector<256x32xf32>
    %70 = arith.mulf %69, %69 : vector<256x32xf32>
    %cst_15 = arith.constant dense<0.000000e+00> : vector<256xf32>
    %71 = vector.multi_reduction <add>, %70, %cst_15 [1] : vector<256x32xf32> to vector<256xf32>
    %72 = vector.shape_cast %71 : vector<256xf32> to vector<256x1xf32>
    %cst_16 = arith.constant 3.200000e+01 : f32
    %73 = vector.broadcast %cst_16 : f32 to vector<256x1xf32>
    %74 = arith.divf %72, %73 : vector<256x1xf32>
    %cst_17 = arith.constant 9.99999974E-6 : f32
    %75 = vector.broadcast %cst_17 : f32 to vector<256x1xf32>
    %76 = arith.addf %74, %75 : vector<256x1xf32>
    %77 = math.rsqrt %76 : vector<256x1xf32>
    %78 = vector.broadcast %67 : vector<256x1xf32> to vector<256x32xf32>
    %79 = arith.subf %63, %78 : vector<256x32xf32>
    %80 = vector.broadcast %77 : vector<256x1xf32> to vector<256x32xf32>
    %81 = arith.mulf %79, %80 : vector<256x32xf32>
    %82 = vector.broadcast %6 : vector<1x32xf32> to vector<256x32xf32>
    %83 = arith.mulf %81, %82 : vector<256x32xf32>
    %84 = vector.broadcast %7 : vector<1x32xf32> to vector<256x32xf32>
    %85 = arith.addf %83, %84 : vector<256x32xf32>
    %c0_18 = arith.constant 0 : index
    %c0_19 = arith.constant 0 : index
    %86 = vector.load %arg4[%c0_18, %c0_19] : memref<32x64xf32, #tpu.memory_space<vmem>>, vector<32x64xf32>
    %cst_20 = arith.constant dense<0.000000e+00> : vector<256x64xf32>
    %87 = tpu.matmul %85, %86, %cst_20 {dimension_numbers = #tpu.dot_dimension_numbers<[1], [0], [0], [1], [0, 0, 1, 1], [], []>} : vector<256x32xf32>, vector<32x64xf32>, vector<256x64xf32> -> vector<256x64xf32>
    %88 = vector.broadcast %4 : vector<1x64xf32> to vector<256x64xf32>
    %89 = arith.addf %87, %88 : vector<256x64xf32>
    %cst_21 = arith.constant 0.000000e+00 : f32
    %90 = vector.broadcast %cst_21 : f32 to vector<256x64xf32>
    %91 = arith.maximumf %89, %90 : vector<256x64xf32>
    %c0_22 = arith.constant 0 : index
    %c0_23 = arith.constant 0 : index
    %92 = vector.load %arg5[%c0_22, %c0_23] : memref<64x32xf32, #tpu.memory_space<vmem>>, vector<64x32xf32>
    %cst_24 = arith.constant dense<0.000000e+00> : vector<256x32xf32>
    %93 = tpu.matmul %91, %92, %cst_24 {dimension_numbers = #tpu.dot_dimension_numbers<[1], [0], [0], [1], [0, 0, 1, 1], [], []>} : vector<256x64xf32>, vector<64x32xf32>, vector<256x32xf32> -> vector<256x32xf32>
    %94 = vector.broadcast %5 : vector<1x32xf32> to vector<256x32xf32>
    %95 = arith.addf %93, %94 : vector<256x32xf32>
    %96 = arith.addf %85, %95 : vector<256x32xf32>
    %cst_25 = arith.constant dense<0.000000e+00> : vector<256xf32>
    %97 = vector.multi_reduction <add>, %96, %cst_25 [1] : vector<256x32xf32> to vector<256xf32>
    %98 = vector.shape_cast %97 : vector<256xf32> to vector<256x1xf32>
    %cst_26 = arith.constant 3.200000e+01 : f32
    %99 = vector.broadcast %cst_26 : f32 to vector<256x1xf32>
    %100 = arith.divf %98, %99 : vector<256x1xf32>
    %101 = vector.broadcast %100 : vector<256x1xf32> to vector<256x32xf32>
    %102 = arith.subf %96, %101 : vector<256x32xf32>
    %103 = arith.mulf %102, %102 : vector<256x32xf32>
    %cst_27 = arith.constant dense<0.000000e+00> : vector<256xf32>
    %104 = vector.multi_reduction <add>, %103, %cst_27 [1] : vector<256x32xf32> to vector<256xf32>
    %105 = vector.shape_cast %104 : vector<256xf32> to vector<256x1xf32>
    %cst_28 = arith.constant 3.200000e+01 : f32
    %106 = vector.broadcast %cst_28 : f32 to vector<256x1xf32>
    %107 = arith.divf %105, %106 : vector<256x1xf32>
    %cst_29 = arith.constant 9.99999974E-6 : f32
    %108 = vector.broadcast %cst_29 : f32 to vector<256x1xf32>
    %109 = arith.addf %107, %108 : vector<256x1xf32>
    %110 = math.rsqrt %109 : vector<256x1xf32>
    %111 = vector.broadcast %100 : vector<256x1xf32> to vector<256x32xf32>
    %112 = arith.subf %96, %111 : vector<256x32xf32>
    %113 = vector.broadcast %110 : vector<256x1xf32> to vector<256x32xf32>
    %114 = arith.mulf %112, %113 : vector<256x32xf32>
    %115 = vector.broadcast %8 : vector<1x32xf32> to vector<256x32xf32>
    %116 = arith.mulf %114, %115 : vector<256x32xf32>
    %117 = vector.broadcast %9 : vector<1x32xf32> to vector<256x32xf32>
    %118 = arith.addf %116, %117 : vector<256x32xf32>
    %c0_30 = arith.constant 0 : index
    %c0_31 = arith.constant 0 : index
    %119 = vector.load %arg7[%c0_30, %c0_31] : memref<256x32xf32, #tpu.memory_space<vmem>>, vector<256x32xf32>
    tpu.vector_store %arg7[%c0_30, %c0_31], %118 {strides = array<i32>} : memref<256x32xf32, #tpu.memory_space<vmem>>, vector<256x32xf32>,
    %c0_32 = arith.constant 0 : index
    %c0_33 = arith.constant 0 : index
    %c0_34 = arith.constant 0 : index
    %120 = vector.load %arg8[%c0_32, %c0_33, %c0_34] : memref<32x8x8xf32, #tpu.memory_space<vmem>>, vector<32x8x8xf32>
    tpu.vector_store %arg8[%c0_32, %c0_33, %c0_34], %49 {strides = array<i32>} : memref<32x8x8xf32, #tpu.memory_space<vmem>>, vector<32x8x8xf32>,
    return
  }
  func.func @transform_0(%arg0: i32) -> (i32, i32) {
    %c0_i32 = arith.constant 0 : i32
    %c0_i32_0 = arith.constant 0 : i32
    return %arg0, %c0_i32 : i32, i32
  }
  func.func @transform_1(%arg0: i32) -> (i32, i32) {
    %c0_i32 = arith.constant 0 : i32
    %c0_i32_0 = arith.constant 0 : i32
    %c0_i32_1 = arith.constant 0 : i32
    return %c0_i32, %c0_i32_0 : i32, i32
  }
  func.func @transform_2(%arg0: i32) -> (i32, i32) {
    %c0_i32 = arith.constant 0 : i32
    %c0_i32_0 = arith.constant 0 : i32
    %c0_i32_1 = arith.constant 0 : i32
    return %c0_i32, %c0_i32_0 : i32, i32
  }
  func.func @transform_3(%arg0: i32) -> (i32, i32) {
    %c0_i32 = arith.constant 0 : i32
    %c0_i32_0 = arith.constant 0 : i32
    %c0_i32_1 = arith.constant 0 : i32
    return %c0_i32, %c0_i32_0 : i32, i32
  }
  func.func @transform_4(%arg0: i32) -> (i32, i32) {
    %c0_i32 = arith.constant 0 : i32
    %c0_i32_0 = arith.constant 0 : i32
    %c0_i32_1 = arith.constant 0 : i32
    return %c0_i32, %c0_i32_0 : i32, i32
  }
  func.func @transform_5(%arg0: i32) -> (i32, i32) {
    %c0_i32 = arith.constant 0 : i32
    %c0_i32_0 = arith.constant 0 : i32
    %c0_i32_1 = arith.constant 0 : i32
    return %c0_i32, %c0_i32_0 : i32, i32
  }
  func.func @transform_6(%arg0: i32) -> (i32, i32) {
    %c0_i32 = arith.constant 0 : i32
    %c0_i32_0 = arith.constant 0 : i32
    return %arg0, %c0_i32 : i32, i32
  }
  func.func @transform_7(%arg0: i32) -> (i32, i32, i32) {
    %c0_i32 = arith.constant 0 : i32
    %c0_i32_0 = arith.constant 0 : i32
    %c0_i32_1 = arith.constant 0 : i32
    return %arg0, %c0_i32, %c0_i32_0 : i32, i32, i32
  }
}

</mosaic_0001>

<bundles_post_ra>
// kernel: tpu_custom_call.1
= control target key start
LH: loop header
LB: loop body
LE: loop exit
PB: predicated region body
PF: predicated region fallthrough
CT: control target
= control target key end

     0   :  { %vm66_vm0 = vcmask 261120   ;;  %v62_v36 = vlaneseq  ;;  %v34564_v38 = vmov 0.0   ;;  %vm27602_vm1 = vmmov 0   ;;  %s27603_s26 = smov 120   ;;  %s27604_s27 = smov 96   ;;  %s34542_s1 = inlined_call_operand.vmem [shape: f32[32,96], index: 1, kind: input, shape index: {}]   ;;  %s34543_s0 = inlined_call_operand.vmem [shape: f32[256,32], index: 0, kind: input, shape index: {}]   ;;  %s34544_s5 = inlined_call_operand.vmem [shape: f32[8,96], index: 5, kind: input, shape index: {}]   ;;  %s34545_s7 = inlined_call_operand.vmem [shape: f32[32,8,8], index: 7, kind: output, shape index: {1}]   ;;  %s34546_s2 = inlined_call_operand.vmem [shape: f32[32,32], index: 2, kind: input, shape index: {}]   ;;  %s34547_s3 = inlined_call_operand.vmem [shape: f32[32,64], index: 3, kind: input, shape index: {}]   ;;  %s34548_s4 = inlined_call_operand.vmem [shape: f32[64,32], index: 4, kind: input, shape index: {}]   ;;  %s34549_s6 = inlined_call_operand.vmem [shape: f32[256,32], index: 6, kind: output, shape index: {0}]  }
   0x1   :  { %v61_v0 = vld [vmem:[%s34542_s1 + $0x18] sm:$0xff]  ;;  %v60_v1 = vld [vmem:[%s34542_s1 + $0x10] sm:$0xff]  ;;  %v25_v2 = vld [vmem:[%s34543_s0] sm:$0xff]  ;;  %25452 = vmatprep.subr.mxu1 %v34564_v38  ;;  %25454 = vmatprep.mubr.msk.f32.mxu1 %vm27602_vm1, %v34564_v38  ;;  %s27605_s28 = smov 112   ;;  %s27606_s29 = smov 104   ;;  %vm614_vm2 = vcmask 64512  }
   0x2   :  { %25396 = vmatprep.subr.mxu0 %v61_v0  ;;  %v59_v3 = vld [vmem:[%s34542_s1 + $0x8] sm:$0xff]  ;;  %25404 = vmatprep.mubr.msk.f32.mxu0 %vm66_vm0, %v25_v2  ;;  %v58_v4 = vld [vmem:[%s34542_s1] sm:$0xff]  ;;  %v27_v6 = vld [vmem:[%s34543_s0 + $0x10] sm:$0xff]  ;;  %v27791_v37 = vshrl.u32 %v62_v36, 7  ;;  %s27607_s30 = smov 64   ;;  %s27608_s8 = smov 8  }
   0x3   :  { %25397 = vmatpush3.msra.mxu0 %v61_v0  ;;  %v26_v5 = vld [vmem:[%s34543_s0 + $0x8] sm:$0xff]  ;;  %v28_v7 = vld [vmem:[%s34543_s0 + $0x18] sm:$0xff]  ;;  %v29_v8 = vld [vmem:[%s34543_s0 + $0x20] sm:$0xff]  ;;  %s27609_s11 = smov 16   ;;  %s27610_s15 = smov 24   ;;  %vm22021_vm3 = vcmask 130048  }
   0x4   :  { %25398 = vmatprep.subr.mxu0 %v60_v1  ;;  %v30_v9 = vld [vmem:[%s34543_s0 + $0x28] sm:$0xff]  ;;  %v31_v10 = vld [vmem:[%s34543_s0 + $0x30] sm:$0xff]  ;;  %v32_v11 = vld [vmem:[%s34543_s0 + $0x38] sm:$0xff]  ;;  %34948 = vst [vmem:[#allocation2_spill] sm:$0xff] %v27791_v37  ;;  %v64_v39 = vsub.s32 0, %v27791_v37  ;;  %vm22054_vm4 = vcmask 195584  }
   0x5   :  { %25399 = vmatpush3.msra.mxu0 %v60_v1  ;;  %v33_v12 = vld [vmem:[%s34543_s0 + $0x40] sm:$0xff]  ;;  %v34_v13 = vld [vmem:[%s34543_s0 + $0x48] sm:$0xff]  ;;  %v35_v14 = vld [vmem:[%s34543_s0 + $0x50] sm:$0xff]  ;;  %vm23310_vm5 = vcmask 523264  }
   0x6   :  { %25400 = vmatprep.subr.mxu0 %v59_v3  ;;  %v36_v15 = vld [vmem:[%s34543_s0 + $0x58] sm:$0xff]  ;;  %v37_v16 = vld [vmem:[%s34543_s0 + $0x60] sm:$0xff]  ;;  %v38_v17 = vld [vmem:[%s34543_s0 + $0x68] sm:$0xff] }
   0x7   :  { %25401 = vmatpush3.msra.mxu0 %v59_v3  ;;  %v39_v18 = vld [vmem:[%s34543_s0 + $0x70] sm:$0xff]  ;;  %v40_v19 = vld [vmem:[%s34543_s0 + $0x78] sm:$0xff]  ;;  %v41_v20 = vld [vmem:[%s34543_s0 + $0x80] sm:$0xff] }
   0x8   :  { %25402 = vmatprep.subr.mxu0 %v58_v4  ;;  %v42_v21 = vld [vmem:[%s34543_s0 + $0x88] sm:$0xff]  ;;  %v43_v22 = vld [vmem:[%s34543_s0 + $0x90] sm:$0xff]  ;;  %v44_v23 = vld [vmem:[%s34543_s0 + $0x98] sm:$0xff] }
   0x9   :  { %25403 = vmatpush3.msra.mxu0 %v58_v4  ;;  %v45_v24 = vld [vmem:[%s34543_s0 + $0xa0] sm:$0xff]  ;;  %v46_v25 = vld [vmem:[%s34543_s0 + $0xa8] sm:$0xff]  ;;  %v47_v26 = vld [vmem:[%s34543_s0 + $0xb0] sm:$0xff] }
   0xa   :  { %25405 = vmatmul.mubr.msk.f32.vlgmr.msra.gmra.mxu0 %vm66_vm0, %v26_v5  ;;  %v48_v27 = vld [vmem:[%s34543_s0 + $0xb8] sm:$0xff]  ;;  %v49_v28 = vld [vmem:[%s34543_s0 + $0xc0] sm:$0xff]  ;;  %v50_v29 = vld [vmem:[%s34543_s0 + $0xc8] sm:$0xff]  ;;  %25537 = vmatprep.subr.mxu0 %v34564_v38 }
   0xb   :  { %25407 = vmatprep.mubr.msk.f32.mxu0 %vm66_vm0, %v27_v6  ;;  %v51_v30 = vld [vmem:[%s34543_s0 + $0xd0] sm:$0xff]  ;;  %v52_v31 = vld [vmem:[%s34543_s0 + $0xd8] sm:$0xff]  ;;  %v53_v32 = vld [vmem:[%s34543_s0 + $0xe0] sm:$0xff] }
   0xc   :  { %v54_v33 = vld [vmem:[%s34543_s0 + $0xe8] sm:$0xff]  ;;  %v55_v34 = vld [vmem:[%s34543_s0 + $0xf0] sm:$0xff]  ;;  %v56_v35 = vld [vmem:[%s34543_s0 + $0xf8] sm:$0xff] }
   0xd   :  { %v57_v40 = vld [vmem:[%s34544_s5] sm:$0xff] }
   0xe   :  { %25408 = vmatmul.mubr.msk.f32.gmra.mxu0 %vm66_vm0, %v28_v7  ;;  %v27803_v41 = vrot.slane %v57_v40, %v64_v39 }
   0xf   :  { %25410 = vmatprep.mubr.msk.f32.mxu0 %vm66_vm0, %v29_v8 }
  0x12   :  { %25411 = vmatmul.mubr.msk.f32.gmra.mxu0 %vm66_vm0, %v30_v9 }
  0x13   :  { %25413 = vmatprep.mubr.msk.f32.mxu0 %vm66_vm0, %v31_v10 }
  0x16   :  { %25414 = vmatmul.mubr.msk.f32.gmra.mxu0 %vm66_vm0, %v32_v11 }
  0x17   :  { %25416 = vmatprep.mubr.msk.f32.mxu0 %vm66_vm0, %v33_v12 }
  0x1a   :  { %25417 = vmatmul.mubr.msk.f32.gmra.mxu0 %vm66_vm0, %v34_v13 }
  0x1b   :  { %25419 = vmatprep.mubr.msk.f32.mxu0 %vm66_vm0, %v35_v14 }
  0x1e   :  { %25420 = vmatmul.mubr.msk.f32.gmra.mxu0 %vm66_vm0, %v36_v15 }
  0x1f   :  { %25422 = vmatprep.mubr.msk.f32.mxu0 %vm66_vm0, %v37_v16 }
  0x22   :  { %25423 = vmatmul.mubr.msk.f32.gmra.mxu0 %vm66_vm0, %v38_v17 }
  0x23   :  { %25425 = vmatprep.mubr.msk.f32.mxu0 %vm66_vm0, %v39_v18 }
  0x26   :  { %25426 = vmatmul.mubr.msk.f32.gmra.mxu0 %vm66_vm0, %v40_v19 }
  0x27   :  { %25428 = vmatprep.mubr.msk.f32.mxu0 %vm66_vm0, %v41_v20 }
  0x2a   :  { %25429 = vmatmul.mubr.msk.f32.gmra.mxu0 %vm66_vm0, %v42_v21 }
  0x2b   :  { %25431 = vmatprep.mubr.msk.f32.mxu0 %vm66_vm0, %v43_v22 }
  0x2e   :  { %25432 = vmatmul.mubr.msk.f32.gmra.mxu0 %vm66_vm0, %v44_v23 }
  0x2f   :  { %25434 = vmatprep.mubr.msk.f32.mxu0 %vm66_vm0, %v45_v24 }
  0x32   :  { %25435 = vmatmul.mubr.msk.f32.gmra.mxu0 %vm66_vm0, %v46_v25 }
  0x33   :  { %25437 = vmatprep.mubr.msk.f32.mxu0 %vm66_vm0, %v47_v26 }
  0x36   :  { %25438 = vmatmul.mubr.msk.f32.gmra.mxu0 %vm66_vm0, %v48_v27 }
  0x37   :  { %25440 = vmatprep.mubr.msk.f32.mxu0 %vm66_vm0, %v49_v28 }
  0x3a   :  { %25441 = vmatmul.mubr.msk.f32.gmra.mxu0 %vm66_vm0, %v50_v29 }
  0x3b   :  { %25443 = vmatprep.mubr.msk.f32.mxu0 %vm66_vm0, %v51_v30 }
  0x3e   :  { %25444 = vmatmul.mubr.msk.f32.gmra.mxu0 %vm66_vm0, %v52_v31 }
  0x3f   :  { %25446 = vmatprep.mubr.msk.f32.mxu0 %vm66_vm0, %v53_v32 }
  0x42   :  { %25447 = vmatmul.mubr.msk.f32.gmra.mxu0 %vm66_vm0, %v54_v33 }
  0x43   :  { %25449 = vmatprep.mubr.msk.f32.mxu0 %vm66_vm0, %v55_v34 }
  0x46   :  { %25450 = vmatmul.mubr.msk.f32.gmra.mxu0 %vm66_vm0, %v56_v35 }
  0x47   :  { %25539 = vmatprep.mubr.msk.f32.mxu0 %vm27602_vm1, %v34564_v38 }
  0xca   :  { %v25406_v42 = vpop.f32.mrf.mxu0 }
  0xcb   :  { %v27806_v43 = vadd.f32 %v25406_v42, %v27803_v41 }
  0xcc   :  { %v229_v44 = vpop.f32.mrf.mxu0 }
  0xcd   :  { %34949 = vst [vmem:[#allocation3_spill] sm:$0xff] %v27806_v43  ;;  %422 = vrot.lane.b32.xlu1 %v27806_v43, %s27603_s26  ;;  %689 = vrot.lane.b32.xlu0 %v27806_v43, %s27604_s27  ;;  %v27813_v45 = vadd.f32 %v229_v44, %v27803_v41 }
  0xce   :  { %v25409_v46 = vpop.f32.mrf.mxu0 }
  0xcf   :  { %34950 = vst [vmem:[#allocation4_spill] sm:$0xff] %v27813_v45  ;;  %v27824_v47 = vadd.f32 %v25409_v46, %v27803_v41 }
  0xd0   :  { %v239_v48 = vpop.f32.mrf.mxu0 }
  0xd1   :  { %486 = vrot.lane.b32.xlu1 %v27806_v43, %s27605_s28  ;;  %612 = vrot.lane.b32.xlu0 %v27813_v45, %s27604_s27  ;;  %34951 = vst [vmem:[#allocation5_spill] sm:$0xff] %v27824_v47  ;;  %v27839_v49 = vadd.f32 %v239_v48, %v27803_v41 }
  0xd2   :  { %v25412_v50 = vpop.f32.mrf.mxu0 }
  0xd3   :  { %34952 = vst [vmem:[#allocation6_spill] sm:$0xff] %v27839_v49  ;;  %v27850_v52 = vadd.f32 %v25412_v50, %v27803_v41 }
  0xd4   :  { %v249_v51 = vpop.f32.mrf.mxu0 }
  0xd5   :  { %550 = vrot.lane.b32.xlu1 %v27806_v43, %s27606_s29  ;;  %420 = vrot.lane.b32.xlu0 %v27813_v45, %s27603_s26  ;;  %34953 = vst [vmem:[#allocation7_spill] sm:$0xff] %v27850_v52  ;;  %v27853_v53 = vadd.f32 %v249_v51, %v27803_v41 }
  0xd6   :  { %v25415_v54 = vpop.f32.mrf.mxu0 }
  0xd7   :  { %34954 = vst [vmem:[#allocation8_spill] sm:$0xff] %v27853_v53  ;;  %v27868_v55 = vadd.f32 %v25415_v54, %v27803_v41 }
  0xd8   :  { %v259_v56 = vpop.f32.mrf.mxu0 }
  0xd9   :  { %841 = vrot.lane.b32.xlu1 %v27824_v47, %s27604_s27  ;;  %484 = vrot.lane.b32.xlu0 %v27813_v45, %s27605_s28  ;;  %34955 = vst [vmem:[#allocation9_spill] sm:$0xff] %v27868_v55  ;;  %v27879_v57 = vadd.f32 %v259_v56, %v27803_v41 }
  0xda   :  { %v25418_v58 = vpop.f32.mrf.mxu0 }
  0xdb   :  { %34956 = vst [vmem:[#allocation10_spill] sm:$0xff] %v27879_v57  ;;  %v27894_v60 = vadd.f32 %v25418_v58, %v27803_v41 }
  0xdc   :  { %v269_v59 = vpop.f32.mrf.mxu0 }
  0xdd   :  { %490 = vrot.lane.b32.xlu1 %v27824_v47, %s27605_s28  ;;  %548 = vrot.lane.b32.xlu0 %v27813_v45, %s27606_s29  ;;  %34957 = vst [vmem:[#allocation11_spill] sm:$0xff] %v27894_v60  ;;  %v27897_v61 = vadd.f32 %v269_v59, %v27803_v41 }
  0xde   :  { %v25421_v62 = vpop.f32.mrf.mxu0 }
  0xdf   :  { %34958 = vst [vmem:[#allocation12_spill] sm:$0xff] %v27897_v61  ;;  %v27912_v63 = vadd.f32 %v25421_v62, %v27803_v41 }
  0xe0   :  { %v279_v0 = vpop.f32.mrf.mxu0 }
  0xe1   :  { %554 = vrot.lane.b32.xlu1 %v27824_v47, %s27606_s29  ;;  %426 = vrot.lane.b32.xlu0 %v27824_v47, %s27603_s26  ;;  %34959 = vst [vmem:[#allocation13_spill] sm:$0xff] %v27912_v63  ;;  %v27923_v1 = vadd.f32 %v279_v0, %v27803_v41 }
  0xe2   :  { %v25424_v2 = vpop.f32.mrf.mxu0 }
  0xe3   :  { %34960 = vst [vmem:[#allocation14_spill] sm:$0xff] %v27923_v1  ;;  %v27938_v4 = vadd.f32 %v25424_v2, %v27803_v41 }
  0xe4   :  { %v289_v3 = vpop.f32.mrf.mxu0 }
  0xe5   :  { %765 = vrot.lane.b32.xlu1 %v27839_v49, %s27604_s27  ;;  %488 = vrot.lane.b32.xlu0 %v27839_v49, %s27605_s28  ;;  %34961 = vst [vmem:[#allocation15_spill] sm:$0xff] %v27938_v4  ;;  %v27941_v5 = vadd.f32 %v289_v3, %v27803_v41 }
  0xe6   :  { %v25427_v6 = vpop.f32.mrf.mxu0 }
  0xe7   :  { %34962 = vst [vmem:[#allocation16_spill] sm:$0xff] %v27941_v5  ;;  %v27960_v8 = vadd.f32 %v25427_v6, %v27803_v41 }
  0xe8   :  { %v299_v7 = vpop.f32.mrf.mxu0 }
  0xe9   :  { %424 = vrot.lane.b32.xlu1 %v27839_v49, %s27603_s26  ;;  %552 = vrot.lane.b32.xlu0 %v27839_v49, %s27606_s29  ;;  %34963 = vst [vmem:[#allocation17_spill] sm:$0xff] %v27960_v8  ;;  %v27963_v9 = vadd.f32 %v299_v7, %v27803_v41 }
  0xea   :  { %v25430_v14 = vpop.f32.mrf.mxu0 }
  0xeb   :  { %34964 = vst [vmem:[#allocation18_spill] sm:$0xff] %v27963_v9  ;;  %v27998_v18 = vadd.f32 %v25430_v14, %v27803_v41 }
  0xec   :  { %v309_v17 = vpop.f32.mrf.mxu0 }
  0xed   :  { %993 = vrot.lane.b32.xlu1 %v27850_v52, %s27604_s27  ;;  %917 = vrot.lane.b32.xlu0 %v27853_v53, %s27604_s27  ;;  %34969 = vst [vmem:[#allocation23_spill] sm:$0xff] %v27998_v18  ;;  %v28001_v19 = vadd.f32 %v309_v17, %v27803_v41 }
  0xee   :  { %v25433_v26 = vpop.f32.mrf.mxu0 }
  0xef   :  { %34970 = vst [vmem:[#allocation24_spill] sm:$0xff] %v28001_v19  ;;  %v28038_v30 = vadd.f32 %v25433_v26, %v27803_v41 }
  0xf0   :  { %v319_v29 = vpop.f32.mrf.mxu0 }
  0xf1   :  { %430 = vrot.lane.b32.xlu1 %v27850_v52, %s27603_s26  ;;  %428 = vrot.lane.b32.xlu0 %v27853_v53, %s27603_s26  ;;  %34977 = vst [vmem:[#allocation31_spill] sm:$0xff] %v28038_v30  ;;  %v28041_v31 = vadd.f32 %v319_v29, %v27803_v41 }
  0xf2   :  { %v25436_v40 = vpop.f32.mrf.mxu0 }
  0xf3   :  { %34978 = vst [vmem:[#allocation32_spill] sm:$0xff] %v28041_v31  ;;  %v28094_v48 = vadd.f32 %v25436_v40, %v27803_v41 }
  0xf4   :  { %v329_v46 = vpop.f32.mrf.mxu0 }
  0xf5   :  { %494 = vrot.lane.b32.xlu1 %v27850_v52, %s27605_s28  ;;  %492 = vrot.lane.b32.xlu0 %v27853_v53, %s27605_s28  ;;  %34985 = vst [vmem:[#allocation39_spill] sm:$0xff] %v28094_v48  ;;  %v28097_v50 = vadd.f32 %v329_v46, %v27803_v41 }
  0xf6   :  { %v25439_v0 = vpop.f32.mrf.mxu0 }
  0xf7   :  { %34986 = vst [vmem:[#allocation40_spill] sm:$0xff] %v28097_v50  ;;  %v28136_v7 = vadd.f32 %v25439_v0, %v27803_v41 }
  0xf8   :  { %v339_v6 = vpop.f32.mrf.mxu0 }
  0xf9   :  { %558 = vrot.lane.b32.xlu1 %v27850_v52, %s27606_s29  ;;  %556 = vrot.lane.b32.xlu0 %v27853_v53, %s27606_s29  ;;  %34993 = vst [vmem:[#allocation47_spill] sm:$0xff] %v28136_v7 }
  0xfa   :  { %v25442_v29 = vpop.f32.mrf.mxu0 }
  0xfb   :  { %v28186_v46 = vadd.f32 %v25442_v29, %v27803_v41 }
  0xfc   :  { %v349_v40 = vpop.f32.mrf.mxu0 }
  0xfd   :  { %1145 = vrot.lane.b32.xlu1 %v27868_v55, %s27604_s27  ;;  %434 = vrot.lane.b32.xlu0 %v27868_v55, %s27603_s26  ;;  %35001 = vst [vmem:[#allocation55_spill] sm:$0xff] %v28186_v46 }
 0x101   :  { %498 = vrot.lane.b32.xlu1 %v27868_v55, %s27605_s28  ;;  %1069 = vrot.lane.b32.xlu0 %v27879_v57, %s27604_s27 }
 0x105   :  { %562 = vrot.lane.b32.xlu1 %v27868_v55, %s27606_s29  ;;  %496 = vrot.lane.b32.xlu0 %v27879_v57, %s27605_s28 }
 0x109   :  { %432 = vrot.lane.b32.xlu1 %v27879_v57, %s27603_s26  ;;  %560 = vrot.lane.b32.xlu0 %v27879_v57, %s27606_s29 }
 0x10d   :  { %1297 = vrot.lane.b32.xlu1 %v27894_v60, %s27604_s27  ;;  %1221 = vrot.lane.b32.xlu0 %v27897_v61, %s27604_s27 }
 0x111   :  { %438 = vrot.lane.b32.xlu1 %v27894_v60, %s27603_s26  ;;  %436 = vrot.lane.b32.xlu0 %v27897_v61, %s27603_s26 }
 0x115   :  { %502 = vrot.lane.b32.xlu1 %v27894_v60, %s27605_s28  ;;  %500 = vrot.lane.b32.xlu0 %v27897_v61, %s27605_s28 }
 0x119   :  { %566 = vrot.lane.b32.xlu1 %v27894_v60, %s27606_s29  ;;  %564 = vrot.lane.b32.xlu0 %v27897_v61, %s27606_s29 }
 0x11d   :  { %1449 = vrot.lane.b32.xlu1 %v27912_v63, %s27604_s27  ;;  %442 = vrot.lane.b32.xlu0 %v27912_v63, %s27603_s26 }
 0x121   :  { %506 = vrot.lane.b32.xlu1 %v27912_v63, %s27605_s28  ;;  %1373 = vrot.lane.b32.xlu0 %v27923_v1, %s27604_s27 }
 0x125   :  { %570 = vrot.lane.b32.xlu1 %v27912_v63, %s27606_s29  ;;  %504 = vrot.lane.b32.xlu0 %v27923_v1, %s27605_s28 }
 0x129   :  { %440 = vrot.lane.b32.xlu1 %v27923_v1, %s27603_s26  ;;  %568 = vrot.lane.b32.xlu0 %v27923_v1, %s27606_s29 }
 0x12d   :  { %1601 = vrot.lane.b32.xlu1 %v27938_v4, %s27604_s27  ;;  %1525 = vrot.lane.b32.xlu0 %v27941_v5, %s27604_s27 }
 0x131   :  { %446 = vrot.lane.b32.xlu1 %v27938_v4, %s27603_s26  ;;  %444 = vrot.lane.b32.xlu0 %v27941_v5, %s27603_s26 }
 0x135   :  { %510 = vrot.lane.b32.xlu1 %v27938_v4, %s27605_s28  ;;  %508 = vrot.lane.b32.xlu0 %v27941_v5, %s27605_s28 }
 0x139   :  { %574 = vrot.lane.b32.xlu1 %v27938_v4, %s27606_s29  ;;  %572 = vrot.lane.b32.xlu0 %v27941_v5, %s27606_s29 }
 0x13d   :  { %1753 = vrot.lane.b32.xlu1 %v27960_v8, %s27604_s27  ;;  %1677 = vrot.lane.b32.xlu0 %v27963_v9, %s27604_s27 }
 0x13f   :  { %v27969_v10 = vpop.permute.xlu1 %422  ;;  %v690_v11 = vpop.permute.xlu0 %689 }
 0x140   :  { %34965 = vst [vmem:[#allocation19_spill] sm:$0xff] %v27969_v10 }
 0x141   :  { %450 = vrot.lane.b32.xlu1 %v27960_v8, %s27603_s26  ;;  %448 = vrot.lane.b32.xlu0 %v27963_v9, %s27603_s26 }
 0x143   :  { %v27975_v12 = vpop.permute.xlu1 %486  ;;  %v613_v13 = vpop.permute.xlu0 %612 }
 0x144   :  { %34966 = vst [vmem:[#allocation20_spill] sm:$0xff] %v27975_v12  ;;  %25453 = vmatpush3.xpose.msk.msra.mxu1 %vm614_vm2, %v613_v13 }
 0x145   :  { %514 = vrot.lane.b32.xlu1 %v27960_v8, %s27605_s28  ;;  %512 = vrot.lane.b32.xlu0 %v27963_v9, %s27605_s28 }
 0x146   :  { %25457 = vmatprep.subr.mxu1 %v34564_v38 }
 0x147   :  { %v27983_v15 = vpop.permute.xlu1 %550  ;;  %25455 = vmatmul.mubr.msk.f32.vlgmr.msra.gmra.mxu1 %vm614_vm2, %v27813_v45  ;;  %v27987_v16 = vpop.permute.xlu0 %420 }
 0x148   :  { %34967 = vst [vmem:[#allocation21_spill] sm:$0xff] %v27983_v15  ;;  %34968 = vst [vmem:[#allocation22_spill] sm:$0xff] %v27987_v16  ;;  %25458 = vmatpush3.xpose.msk.msra.mxu1 %vm614_vm2, %v690_v11  ;;  %25459 = vmatprep.mubr.msk.f32.mxu1 %vm27602_vm1, %v34564_v38  ;;  %v28139_v11 = vadd.f32 %v339_v6, %v27803_v41 }
 0x149   :  { %578 = vrot.lane.b32.xlu1 %v27960_v8, %s27606_s29  ;;  %576 = vrot.lane.b32.xlu0 %v27963_v9, %s27606_s29 }
 0x14a   :  { %25462 = vmatprep.subr.mxu1 %v34564_v38  ;;  %34994 = vst [vmem:[#allocation48_spill] sm:$0xff] %v28139_v11 }
 0x14b   :  { %v842_v20 = vpop.permute.xlu1 %841  ;;  %25460 = vmatmul.mubr.msk.f32.vlgmr.msra.gmra.mxu1 %vm614_vm2, %v27806_v43  ;;  %v28005_v21 = vpop.permute.xlu0 %484 }
 0x14c   :  { %34971 = vst [vmem:[#allocation25_spill] sm:$0xff] %v28005_v21  ;;  %25464 = vmatprep.mubr.msk.f32.mxu1 %vm27602_vm1, %v34564_v38 }
 0x14d   :  { %1905 = vrot.lane.b32.xlu1 %v27998_v18, %s27604_s27  ;;  %1829 = vrot.lane.b32.xlu0 %v28001_v19, %s27604_s27 }
 0x14f   :  { %v28013_v22 = vpop.permute.xlu1 %490  ;;  %v28015_v23 = vpop.permute.xlu0 %548 }
 0x150   :  { %34972 = vst [vmem:[#allocation26_spill] sm:$0xff] %v28013_v22  ;;  %34973 = vst [vmem:[#allocation27_spill] sm:$0xff] %v28015_v23 }
 0x151   :  { %454 = vrot.lane.b32.xlu1 %v27998_v18, %s27603_s26  ;;  %452 = vrot.lane.b32.xlu0 %v28001_v19, %s27603_s26 }
 0x153   :  { %v28021_v24 = vpop.permute.xlu1 %554  ;;  %v28023_v25 = vpop.permute.xlu0 %426 }
 0x154   :  { %34974 = vst [vmem:[#allocation28_spill] sm:$0xff] %v28021_v24  ;;  %34975 = vst [vmem:[#allocation29_spill] sm:$0xff] %v28023_v25 }
 0x155   :  { %518 = vrot.lane.b32.xlu1 %v27998_v18, %s27605_s28  ;;  %516 = vrot.lane.b32.xlu0 %v28001_v19, %s27605_s28 }
 0x157   :  { %v766_v27 = vpop.permute.xlu1 %765  ;;  %v28029_v28 = vpop.permute.xlu0 %488 }
 0x158   :  { %34976 = vst [vmem:[#allocation30_spill] sm:$0xff] %v28029_v28  ;;  %25463 = vmatpush3.xpose.msk.msra.mxu1 %vm614_vm2, %v766_v27 }
 0x159   :  { %582 = vrot.lane.b32.xlu1 %v27998_v18, %s27606_s29  ;;  %580 = vrot.lane.b32.xlu0 %v28001_v19, %s27606_s29 }
 0x15a   :  { %25467 = vmatprep.subr.mxu1 %v34564_v38 }
 0x15b   :  { %v28043_v32 = vpop.permute.xlu1 %424  ;;  %25465 = vmatmul.mubr.msk.f32.vlgmr.msra.gmra.mxu1 %vm614_vm2, %v27839_v49  ;;  %v28047_v33 = vpop.permute.xlu0 %552 }
 0x15c   :  { %34979 = vst [vmem:[#allocation33_spill] sm:$0xff] %v28043_v32  ;;  %34980 = vst [vmem:[#allocation34_spill] sm:$0xff] %v28047_v33  ;;  %25468 = vmatpush3.xpose.msk.msra.mxu1 %vm614_vm2, %v842_v20  ;;  %25469 = vmatprep.mubr.msk.f32.mxu1 %vm27602_vm1, %v34564_v38 }
 0x15d   :  { %2057 = vrot.lane.b32.xlu1 %v28038_v30, %s27604_s27  ;;  %1981 = vrot.lane.b32.xlu0 %v28041_v31, %s27604_s27 }
 0x15e   :  { %25472 = vmatprep.subr.mxu1 %v34564_v38 }
 0x15f   :  { %v994_v34 = vpop.permute.xlu1 %993  ;;  %25470 = vmatmul.mubr.msk.f32.vlgmr.msra.gmra.mxu1 %vm614_vm2, %v27824_v47  ;;  %v918_v35 = vpop.permute.xlu0 %917 }
 0x160   :  { %25473 = vmatpush3.xpose.msk.msra.mxu1 %vm614_vm2, %v918_v35  ;;  %25474 = vmatprep.mubr.msk.f32.mxu1 %vm27602_vm1, %v34564_v38 }
 0x161   :  { %458 = vrot.lane.b32.xlu1 %v28038_v30, %s27603_s26  ;;  %456 = vrot.lane.b32.xlu0 %v28041_v31, %s27603_s26 }
 0x162   :  { %25477 = vmatprep.subr.mxu1 %v34564_v38 }
 0x163   :  { %v28067_v36 = vpop.permute.xlu1 %430  ;;  %25475 = vmatmul.mubr.msk.f32.vlgmr.msra.gmra.mxu1 %vm614_vm2, %v27853_v53  ;;  %v28071_v39 = vpop.permute.xlu0 %428 }
 0x164   :  { %34981 = vst [vmem:[#allocation35_spill] sm:$0xff] %v28067_v36  ;;  %34982 = vst [vmem:[#allocation36_spill] sm:$0xff] %v28071_v39  ;;  %25478 = vmatpush3.xpose.msk.msra.mxu1 %vm614_vm2, %v994_v34  ;;  %25479 = vmatprep.mubr.msk.f32.mxu1 %vm27602_vm1, %v34564_v38 }
 0x165   :  { %522 = vrot.lane.b32.xlu1 %v28038_v30, %s27605_s28  ;;  %520 = vrot.lane.b32.xlu0 %v28041_v31, %s27605_s28 }
 0x166   :  { %25482 = vmatprep.subr.mxu1 %v34564_v38 }
 0x167   :  { %v28081_v42 = vpop.permute.xlu1 %494  ;;  %25480 = vmatmul.mubr.msk.f32.vlgmr.msra.gmra.mxu1 %vm614_vm2, %v27850_v52  ;;  %v28085_v44 = vpop.permute.xlu0 %492 }
 0x168   :  { %34983 = vst [vmem:[#allocation37_spill] sm:$0xff] %v28081_v42  ;;  %34984 = vst [vmem:[#allocation38_spill] sm:$0xff] %v28085_v44  ;;  %25484 = vmatprep.mubr.msk.f32.mxu1 %vm27602_vm1, %v34564_v38 }
 0x169   :  { %586 = vrot.lane.b32.xlu1 %v28038_v30, %s27606_s29  ;;  %584 = vrot.lane.b32.xlu0 %v28041_v31, %s27606_s29 }
 0x16b   :  { %v28099_v51 = vpop.permute.xlu1 %558  ;;  %v28101_v54 = vpop.permute.xlu0 %556 }
 0x16c   :  { %34987 = vst [vmem:[#allocation41_spill] sm:$0xff] %v28099_v51  ;;  %34988 = vst [vmem:[#allocation42_spill] sm:$0xff] %v28101_v54 }
 0x16d   :  { %2209 = vrot.lane.b32.xlu1 %v28094_v48, %s27604_s27  ;;  %2133 = vrot.lane.b32.xlu0 %v28097_v50, %s27604_s27 }
 0x16f   :  { %v1146_v56 = vpop.permute.xlu1 %1145  ;;  %v28107_v58 = vpop.permute.xlu0 %434 }
 0x170   :  { %34989 = vst [vmem:[#allocation43_spill] sm:$0xff] %v28107_v58 }
 0x171   :  { %462 = vrot.lane.b32.xlu1 %v28094_v48, %s27603_s26  ;;  %460 = vrot.lane.b32.xlu0 %v28097_v50, %s27603_s26 }
 0x173   :  { %v28113_v59 = vpop.permute.xlu1 %498  ;;  %v1070_v62 = vpop.permute.xlu0 %1069 }
 0x174   :  { %34990 = vst [vmem:[#allocation44_spill] sm:$0xff] %v28113_v59  ;;  %25483 = vmatpush3.xpose.msk.msra.mxu1 %vm614_vm2, %v1070_v62 }
 0x175   :  { %526 = vrot.lane.b32.xlu1 %v28094_v48, %s27605_s28  ;;  %524 = vrot.lane.b32.xlu0 %v28097_v50, %s27605_s28 }
 0x176   :  { %25487 = vmatprep.subr.mxu1 %v34564_v38 }
 0x177   :  { %v28121_v2 = vpop.permute.xlu1 %562  ;;  %25485 = vmatmul.mubr.msk.f32.vlgmr.msra.gmra.mxu1 %vm614_vm2, %v27879_v57  ;;  %v28125_v3 = vpop.permute.xlu0 %496 }
 0x178   :  { %34991 = vst [vmem:[#allocation45_spill] sm:$0xff] %v28121_v2  ;;  %34992 = vst [vmem:[#allocation46_spill] sm:$0xff] %v28125_v3  ;;  %25488 = vmatpush3.xpose.msk.msra.mxu1 %vm614_vm2, %v1146_v56  ;;  %25489 = vmatprep.mubr.msk.f32.mxu1 %vm27602_vm1, %v34564_v38  ;;  %v28189_v56 = vadd.f32 %v349_v40, %v27803_v41  ;;  %v25445_v40 = vpop.f32.mrf.mxu0 }
 0x179   :  { %590 = vrot.lane.b32.xlu1 %v28094_v48, %s27606_s29  ;;  %588 = vrot.lane.b32.xlu0 %v28097_v50, %s27606_s29 }
 0x17a   :  { %25492 = vmatprep.subr.mxu1 %v34564_v38  ;;  %35002 = vst [vmem:[#allocation56_spill] sm:$0xff] %v28189_v56 }
 0x17b   :  { %v28141_v13 = vpop.permute.xlu1 %432  ;;  %25490 = vmatmul.mubr.msk.f32.vlgmr.msra.gmra.mxu1 %vm614_vm2, %v27868_v55  ;;  %v28145_v14 = vpop.permute.xlu0 %560 }
 0x17c   :  { %34995 = vst [vmem:[#allocation49_spill] sm:$0xff] %v28141_v13  ;;  %34996 = vst [vmem:[#allocation50_spill] sm:$0xff] %v28145_v14  ;;  %25494 = vmatprep.mubr.msk.f32.mxu1 %vm27602_vm1, %v34564_v38 }
 0x17d   :  { %2361 = vrot.lane.b32.xlu1 %v28136_v7, %s27604_s27  ;;  %2285 = vrot.lane.b32.xlu0 %v28139_v11, %s27604_s27 }
 0x17f   :  { %v1298_v17 = vpop.permute.xlu1 %1297  ;;  %v1222_v20 = vpop.permute.xlu0 %1221 }
 0x180   :  { %25493 = vmatpush3.xpose.msk.msra.mxu1 %vm614_vm2, %v1222_v20 }
 0x181   :  { %466 = vrot.lane.b32.xlu1 %v28136_v7, %s27603_s26  ;;  %464 = vrot.lane.b32.xlu0 %v28139_v11, %s27603_s26 }
 0x182   :  { %25497 = vmatprep.subr.mxu1 %v34564_v38 }
 0x183   :  { %v28159_v26 = vpop.permute.xlu1 %438  ;;  %25495 = vmatmul.mubr.msk.f32.vlgmr.msra.gmra.mxu1 %vm614_vm2, %v27897_v61  ;;  %v28163_v27 = vpop.permute.xlu0 %436 }
 0x184   :  { %34997 = vst [vmem:[#allocation51_spill] sm:$0xff] %v28159_v26  ;;  %34998 = vst [vmem:[#allocation52_spill] sm:$0xff] %v28163_v27  ;;  %25498 = vmatpush3.xpose.msk.msra.mxu1 %vm614_vm2, %v1298_v17  ;;  %25499 = vmatprep.mubr.msk.f32.mxu1 %vm27602_vm1, %v34564_v38  ;;  %v359_v61 = vpop.f32.mrf.mxu0 }
 0x185   :  { %530 = vrot.lane.b32.xlu1 %v28136_v7, %s27605_s28  ;;  %528 = vrot.lane.b32.xlu0 %v28139_v11, %s27605_s28 }
 0x186   :  { %25502 = vmatprep.subr.mxu1 %v34564_v38  ;;  %v25448_v52 = vpop.f32.mrf.mxu0 }
 0x187   :  { %v28173_v34 = vpop.permute.xlu1 %502  ;;  %25500 = vmatmul.mubr.msk.f32.vlgmr.msra.gmra.mxu1 %vm614_vm2, %v27894_v60  ;;  %v28177_v35 = vpop.permute.xlu0 %500  ;;  %v28278_v53 = vadd.f32 %v25448_v52, %v27803_v41  ;;  %v35021_v52 = vmov 0.0  }
 0x188   :  { %34999 = vst [vmem:[#allocation53_spill] sm:$0xff] %v28173_v34  ;;  %35000 = vst [vmem:[#allocation54_spill] sm:$0xff] %v28177_v35  ;;  %25504 = vmatprep.mubr.msk.f32.mxu1 %vm27602_vm1, %v34564_v38 }
 0x189   :  { %594 = vrot.lane.b32.xlu1 %v28136_v7, %s27606_s29  ;;  %592 = vrot.lane.b32.xlu0 %v28139_v11, %s27606_s29  ;;  %35017 = vst [vmem:[#allocation71_spill] sm:$0xff] %v28278_v53 }
 0x18b   :  { %v28191_v62 = vpop.permute.xlu1 %566  ;;  %v28193_v0 = vpop.permute.xlu0 %564 }
 0x18c   :  { %35003 = vst [vmem:[#allocation57_spill] sm:$0xff] %v28191_v62  ;;  %35004 = vst [vmem:[#allocation58_spill] sm:$0xff] %v28193_v0 }
 0x18d   :  { %2513 = vrot.lane.b32.xlu1 %v28186_v46, %s27604_s27  ;;  %2437 = vrot.lane.b32.xlu0 %v28189_v56, %s27604_s27 }
 0x18f   :  { %v1450_v6 = vpop.permute.xlu1 %1449  ;;  %v28199_v17 = vpop.permute.xlu0 %442 }
 0x190   :  { %35005 = vst [vmem:[#allocation59_spill] sm:$0xff] %v28199_v17 }
 0x191   :  { %470 = vrot.lane.b32.xlu1 %v28186_v46, %s27603_s26  ;;  %468 = vrot.lane.b32.xlu0 %v28189_v56, %s27603_s26 }
 0x193   :  { %v28205_v20 = vpop.permute.xlu1 %506  ;;  %v1374_v29 = vpop.permute.xlu0 %1373 }
 0x194   :  { %35006 = vst [vmem:[#allocation60_spill] sm:$0xff] %v28205_v20  ;;  %25503 = vmatpush3.xpose.msk.msra.mxu1 %vm614_vm2, %v1374_v29  ;;  %v28228_v29 = vadd.f32 %v25445_v40, %v27803_v41 }
 0x195   :  { %534 = vrot.lane.b32.xlu1 %v28186_v46, %s27605_s28  ;;  %532 = vrot.lane.b32.xlu0 %v28189_v56, %s27605_s28 }
 0x196   :  { %25507 = vmatprep.subr.mxu1 %v34564_v38  ;;  %35009 = vst [vmem:[#allocation63_spill] sm:$0xff] %v28228_v29 }
 0x197   :  { %v28213_v37 = vpop.permute.xlu1 %570  ;;  %25505 = vmatmul.mubr.msk.f32.vlgmr.msra.gmra.mxu1 %vm614_vm2, %v27923_v1  ;;  %v28217_v60 = vpop.permute.xlu0 %504  ;;  %v28231_v1 = vadd.f32 %v359_v61, %v27803_v41 }
 0x198   :  { %35007 = vst [vmem:[#allocation61_spill] sm:$0xff] %v28213_v37  ;;  %35008 = vst [vmem:[#allocation62_spill] sm:$0xff] %v28217_v60  ;;  %25508 = vmatpush3.xpose.msk.msra.mxu1 %vm614_vm2, %v1450_v6  ;;  %25509 = vmatprep.mubr.msk.f32.mxu1 %vm27602_vm1, %v34564_v38 }
 0x199   :  { %598 = vrot.lane.b32.xlu1 %v28186_v46, %s27606_s29  ;;  %596 = vrot.lane.b32.xlu0 %v28189_v56, %s27606_s29  ;;  %35010 = vst [vmem:[#allocation64_spill] sm:$0xff] %v28231_v1 }
 0x19a   :  { %25512 = vmatprep.subr.mxu1 %v34564_v38 }
 0x19b   :  { %v28233_v55 = vpop.permute.xlu1 %440  ;;  %25510 = vmatmul.mubr.msk.f32.vlgmr.msra.gmra.mxu1 %vm614_vm2, %v27912_v63  ;;  %v28237_v6 = vpop.permute.xlu0 %568 }
 0x19c   :  { %35011 = vst [vmem:[#allocation65_spill] sm:$0xff] %v28233_v55  ;;  %35012 = vst [vmem:[#allocation66_spill] sm:$0xff] %v28237_v6  ;;  %25514 = vmatprep.mubr.msk.f32.mxu1 %vm27602_vm1, %v34564_v38 }
 0x19d   :  { %2665 = vrot.lane.b32.xlu1 %v28228_v29, %s27604_s27  ;;  %2589 = vrot.lane.b32.xlu0 %v28231_v1, %s27604_s27 }
 0x19f   :  { %v1602_v40 = vpop.permute.xlu1 %1601  ;;  %v1526_v57 = vpop.permute.xlu0 %1525 }
 0x1a0   :  { %25513 = vmatpush3.xpose.msk.msra.mxu1 %vm614_vm2, %v1526_v57 }
 0x1a1   :  { %474 = vrot.lane.b32.xlu1 %v28228_v29, %s27603_s26  ;;  %472 = vrot.lane.b32.xlu0 %v28231_v1, %s27603_s26 }
 0x1a2   :  { %25517 = vmatprep.subr.mxu1 %v34564_v38 }
 0x1a3   :  { %v28251_v61 = vpop.permute.xlu1 %446  ;;  %25515 = vmatmul.mubr.msk.f32.vlgmr.msra.gmra.mxu1 %vm614_vm2, %v27941_v5  ;;  %v28255_v63 = vpop.permute.xlu0 %444 }
 0x1a4   :  { %35013 = vst [vmem:[#allocation67_spill] sm:$0xff] %v28251_v61  ;;  %35014 = vst [vmem:[#allocation68_spill] sm:$0xff] %v28255_v63  ;;  %25518 = vmatpush3.xpose.msk.msra.mxu1 %vm614_vm2, %v1602_v40  ;;  %25519 = vmatprep.mubr.msk.f32.mxu1 %vm27602_vm1, %v34564_v38  ;;  %v369_v40 = vpop.f32.mrf.mxu0 }
 0x1a5   :  { %538 = vrot.lane.b32.xlu1 %v28228_v29, %s27605_s28  ;;  %536 = vrot.lane.b32.xlu0 %v28231_v1, %s27605_s28  ;;  %v28281_v49 = vadd.f32 %v369_v40, %v27803_v41 }
 0x1a6   :  { %25522 = vmatprep.subr.mxu1 %v34564_v38 }
 0x1a7   :  { %v28265_v57 = vpop.permute.xlu1 %510  ;;  %25520 = vmatmul.mubr.msk.f32.vlgmr.msra.gmra.mxu1 %vm614_vm2, %v27938_v4  ;;  %v28269_v5 = vpop.permute.xlu0 %508  ;;  %35018 = vst [vmem:[#allocation72_spill] sm:$0xff] %v28281_v49 }
 0x1a8   :  { %35015 = vst [vmem:[#allocation69_spill] sm:$0xff] %v28265_v57  ;;  %35016 = vst [vmem:[#allocation70_spill] sm:$0xff] %v28269_v5  ;;  %25524 = vmatprep.mubr.msk.f32.mxu1 %vm27602_vm1, %v34564_v38 }
 0x1a9   :  { %602 = vrot.lane.b32.xlu1 %v28228_v29, %s27606_s29  ;;  %600 = vrot.lane.b32.xlu0 %v28231_v1, %s27606_s29 }
 0x1ab   :  { %v28283_v47 = vpop.permute.xlu1 %574  ;;  %v28285_v4 = vpop.permute.xlu0 %572 }
 0x1ac   :  { %35019 = vst [vmem:[#allocation73_spill] sm:$0xff] %v28283_v47  ;;  %35020 = vst [vmem:[#allocation74_spill] sm:$0xff] %v28285_v4  ;;  %v25451_v4 = vpop.f32.mrf.mxu0 }
 0x1ad   :  { %2817 = vrot.lane.b32.xlu1 %v28278_v53, %s27604_s27  ;;  %2741 = vrot.lane.b32.xlu0 %v28281_v49, %s27604_s27  ;;  %v28324_v47 = vadd.f32 %v25451_v4, %v27803_v41 }
 0x1af   :  { %v1754_v38 = vpop.permute.xlu1 %1753  ;;  %v1678_v45 = vpop.permute.xlu0 %1677  ;;  %35026 = vst [vmem:[#allocation79_spill] sm:$0xff] %v28324_v47 }
 0x1b0   :  { %25523 = vmatpush3.xpose.msk.msra.mxu1 %vm614_vm2, %v1678_v45 }
 0x1b1   :  { %478 = vrot.lane.b32.xlu1 %v28278_v53, %s27603_s26  ;;  %476 = vrot.lane.b32.xlu0 %v28281_v49, %s27603_s26 }
 0x1b2   :  { %25527 = vmatprep.subr.mxu1 %v35021_v52 }
 0x1b3   :  { %v28297_v40 = vpop.permute.xlu1 %450  ;;  %25525 = vmatmul.mubr.msk.f32.vlgmr.msra.gmra.mxu1 %vm614_vm2, %v27963_v9  ;;  %v28301_v43 = vpop.permute.xlu0 %448 }
 0x1b4   :  { %35022 = vst [vmem:[#allocation75_spill] sm:$0xff] %v28297_v40  ;;  %35023 = vst [vmem:[#allocation76_spill] sm:$0xff] %v28301_v43  ;;  %25528 = vmatpush3.xpose.msk.msra.mxu1 %vm614_vm2, %v1754_v38  ;;  %25529 = vmatprep.mubr.msk.f32.mxu1 %vm27602_vm1, %v35021_v52  ;;  %v379_v38 = vpop.f32.mrf.mxu0 }
 0x1b5   :  { %542 = vrot.lane.b32.xlu1 %v28278_v53, %s27605_s28  ;;  %540 = vrot.lane.b32.xlu0 %v28281_v49, %s27605_s28  ;;  %v28327_v6 = vadd.f32 %v379_v38, %v27803_v41 }
 0x1b6   :  { %25532 = vmatprep.subr.mxu1 %v35021_v52 }
 0x1b7   :  { %v28311_v45 = vpop.permute.xlu1 %514  ;;  %25530 = vmatmul.mubr.msk.f32.vlgmr.msra.gmra.mxu1 %vm614_vm2, %v27960_v8  ;;  %v28315_v9 = vpop.permute.xlu0 %512  ;;  %35027 = vst [vmem:[#allocation80_spill] sm:$0xff] %v28327_v6 }
 0x1b8   :  { %35024 = vst [vmem:[#allocation77_spill] sm:$0xff] %v28311_v45  ;;  %35025 = vst [vmem:[#allocation78_spill] sm:$0xff] %v28315_v9  ;;  %25534 = vmatprep.mubr.msk.f32.mxu1 %vm27602_vm1, %v35021_v52 }
 0x1b9   :  { %606 = vrot.lane.b32.xlu1 %v28278_v53, %s27606_s29  ;;  %604 = vrot.lane.b32.xlu0 %v28281_v49, %s27606_s29 }
 0x1bb   :  { %v28329_v37 = vpop.permute.xlu1 %578  ;;  %v28331_v8 = vpop.permute.xlu0 %576 }
 0x1bc   :  { %35028 = vst [vmem:[#allocation81_spill] sm:$0xff] %v28329_v37  ;;  %35029 = vst [vmem:[#allocation82_spill] sm:$0xff] %v28331_v8 }
 0x1bd   :  { %2969 = vrot.lane.b32.xlu1 %v28324_v47, %s27604_s27  ;;  %2893 = vrot.lane.b32.xlu0 %v28327_v6, %s27604_s27 }
 0x1bf   :  { %v1906_v0 = vpop.permute.xlu1 %1905  ;;  %v1830_v62 = vpop.permute.xlu0 %1829 }
 0x1c0   :  { %25533 = vmatpush3.xpose.msk.msra.mxu1 %vm614_vm2, %v1830_v62  ;;  %25538 = vmatpush3.xpose.msk.msra.mxu0 %vm614_vm2, %v1906_v0 }
 0x1c1   :  { %482 = vrot.lane.b32.xlu1 %v28324_v47, %s27603_s26  ;;  %480 = vrot.lane.b32.xlu0 %v28327_v6, %s27603_s26 }
 0x1c2   :  { %25547 = vmatprep.subr.mxu0 %v35021_v52  ;;  %25542 = vmatprep.subr.mxu1 %v35021_v52 }
 0x1c3   :  { %25540 = vmatmul.mubr.msk.f32.vlgmr.msra.gmra.mxu0 %vm614_vm2, %v27998_v18  ;;  %v28347_v41 = vpop.permute.xlu1 %454  ;;  %25535 = vmatmul.mubr.msk.f32.vlgmr.msra.gmra.mxu1 %vm614_vm2, %v28001_v19  ;;  %v28351_v4 = vpop.permute.xlu0 %452 }
 0x1c4   :  { %35030 = vst [vmem:[#allocation83_spill] sm:$0xff] %v28347_v41  ;;  %35031 = vst [vmem:[#allocation84_spill] sm:$0xff] %v28351_v4  ;;  %25544 = vmatprep.mubr.msk.f32.mxu1 %vm27602_vm1, %v35021_v52  ;;  %25549 = vmatprep.mubr.msk.f32.mxu0 %vm27602_vm1, %v35021_v52 }
 0x1c5   :  { %546 = vrot.lane.b32.xlu1 %v28324_v47, %s27605_s28  ;;  %544 = vrot.lane.b32.xlu0 %v28327_v6, %s27605_s28 }
 0x1c7   :  { %v28361_v62 = vpop.permute.xlu1 %518  ;;  %v28363_v0 = vpop.permute.xlu0 %516 }
 0x1c8   :  { %35032 = vst [vmem:[#allocation85_spill] sm:$0xff] %v28361_v62  ;;  %35033 = vst [vmem:[#allocation86_spill] sm:$0xff] %v28363_v0 }
 0x1c9   :  { %3121 = vrot.lane.b32.xlu1 %v27969_v10, %s27604_s27  ;;  %3045 = vrot.lane.b32.xlu0 %v27987_v16, %s27604_s27 }
 0x1cb   :  { %v28369_v38 = vpop.permute.xlu1 %582  ;;  %v28371_v18 = vpop.permute.xlu0 %580 }
 0x1cc   :  { %35034 = vst [vmem:[#allocation87_spill] sm:$0xff] %v28369_v38  ;;  %35035 = vst [vmem:[#allocation88_spill] sm:$0xff] %v28371_v18 }
 0x1cd   :  { %5553 = vrot.lane.b32.xlu1 %v27975_v12, %s27604_s27  ;;  %5477 = vrot.lane.b32.xlu0 %v28005_v21, %s27604_s27 }
 0x1cf   :  { %v2058_v19 = vpop.permute.xlu1 %2057  ;;  %v1982_v8 = vpop.permute.xlu0 %1981 }
 0x1d0   :  { %25543 = vmatpush3.xpose.msk.msra.mxu1 %vm614_vm2, %v1982_v8  ;;  %25548 = vmatpush3.xpose.msk.msra.mxu0 %vm614_vm2, %v2058_v19 }
 0x1d1   :  { %7985 = vrot.lane.b32.xlu1 %v27983_v15, %s27604_s27  ;;  %7909 = vrot.lane.b32.xlu0 %v28015_v23, %s27604_s27 }
 0x1d2   :  { %25557 = vmatprep.subr.mxu0 %v35021_v52  ;;  %25552 = vmatprep.subr.mxu1 %v35021_v52 }
 0x1d3   :  { %25550 = vmatmul.mubr.msk.f32.vlgmr.msra.gmra.mxu0 %vm614_vm2, %v28038_v30  ;;  %v28387_v21 = vpop.permute.xlu1 %458  ;;  %25545 = vmatmul.mubr.msk.f32.vlgmr.msra.gmra.mxu1 %vm614_vm2, %v28041_v31  ;;  %v28391_v8 = vpop.permute.xlu0 %456 }
 0x1d4   :  { %35036 = vst [vmem:[#allocation89_spill] sm:$0xff] %v28387_v21  ;;  %35037 = vst [vmem:[#allocation90_spill] sm:$0xff] %v28391_v8  ;;  %25554 = vmatprep.mubr.msk.f32.mxu1 %vm27602_vm1, %v35021_v52  ;;  %25559 = vmatprep.mubr.msk.f32.mxu0 %vm27602_vm1, %v35021_v52 }
 0x1d5   :  { %3273 = vrot.lane.b32.xlu1 %v28023_v25, %s27604_s27  ;;  %3197 = vrot.lane.b32.xlu0 %v28043_v32, %s27604_s27 }
 0x1d7   :  { %v28401_v19 = vpop.permute.xlu1 %522  ;;  %v28403_v30 = vpop.permute.xlu0 %520 }
 0x1d8   :  { %35038 = vst [vmem:[#allocation91_spill] sm:$0xff] %v28401_v19  ;;  %35039 = vst [vmem:[#allocation92_spill] sm:$0xff] %v28403_v30 }
 0x1d9   :  { %5705 = vrot.lane.b32.xlu1 %v28013_v22, %s27604_s27  ;;  %5629 = vrot.lane.b32.xlu0 %v28029_v28, %s27604_s27 }
 0x1db   :  { %v28409_v31 = vpop.permute.xlu1 %586  ;;  %v28411_v23 = vpop.permute.xlu0 %584 }
 0x1dc   :  { %35040 = vst [vmem:[#allocation93_spill] sm:$0xff] %v28409_v31  ;;  %35041 = vst [vmem:[#allocation94_spill] sm:$0xff] %v28411_v23 }
 0x1dd   :  { %3425 = vrot.lane.b32.xlu1 %v28067_v36, %s27604_s27  ;;  %3349 = vrot.lane.b32.xlu0 %v28071_v39, %s27604_s27 }
 0x1df   :  { %v2210_v15 = vpop.permute.xlu1 %2209  ;;  %v2134_v12 = vpop.permute.xlu0 %2133 }
 0x1e0   :  { %25553 = vmatpush3.xpose.msk.msra.mxu1 %vm614_vm2, %v2134_v12  ;;  %25558 = vmatpush3.xpose.msk.msra.mxu0 %vm614_vm2, %v2210_v15 }
 0x1e1   :  { %5857 = vrot.lane.b32.xlu1 %v28081_v42, %s27604_s27  ;;  %5781 = vrot.lane.b32.xlu0 %v28085_v44, %s27604_s27 }
 0x1e2   :  { %25567 = vmatprep.subr.mxu0 %v35021_v52  ;;  %25562 = vmatprep.subr.mxu1 %v35021_v52 }
 0x1e3   :  { %25560 = vmatmul.mubr.msk.f32.vlgmr.msra.gmra.mxu0 %vm614_vm2, %v28094_v48  ;;  %v28427_v28 = vpop.permute.xlu1 %462  ;;  %25555 = vmatmul.mubr.msk.f32.vlgmr.msra.gmra.mxu1 %vm614_vm2, %v28097_v50  ;;  %v28431_v12 = vpop.permute.xlu0 %460 }
 0x1e4   :  { %35042 = vst [vmem:[#allocation95_spill] sm:$0xff] %v28427_v28  ;;  %35043 = vst [vmem:[#allocation96_spill] sm:$0xff] %v28431_v12  ;;  %25564 = vmatprep.mubr.msk.f32.mxu1 %vm27602_vm1, %v35021_v52  ;;  %25569 = vmatprep.mubr.msk.f32.mxu0 %vm27602_vm1, %v35021_v52 }
 0x1e5   :  { %3577 = vrot.lane.b32.xlu1 %v28107_v58, %s27604_s27  ;;  %3501 = vrot.lane.b32.xlu0 %v28141_v13, %s27604_s27 }
 0x1e7   :  { %v28441_v15 = vpop.permute.xlu1 %526  ;;  %v28443_v48 = vpop.permute.xlu0 %524 }
 0x1e8   :  { %35044 = vst [vmem:[#allocation97_spill] sm:$0xff] %v28441_v15  ;;  %35045 = vst [vmem:[#allocation98_spill] sm:$0xff] %v28443_v48 }
 0x1e9   :  { %6009 = vrot.lane.b32.xlu1 %v28113_v59, %s27604_s27  ;;  %5933 = vrot.lane.b32.xlu0 %v28125_v3, %s27604_s27 }
 0x1eb   :  { %v28449_v50 = vpop.permute.xlu1 %590  ;;  %v28451_v44 = vpop.permute.xlu0 %588 }
 0x1ec   :  { %35046 = vst [vmem:[#allocation99_spill] sm:$0xff] %v28449_v50  ;;  %35047 = vst [vmem:[#allocation100_spill] sm:$0xff] %v28451_v44 }
 0x1ed   :  { %3729 = vrot.lane.b32.xlu1 %v28159_v26, %s27604_s27  ;;  %3653 = vrot.lane.b32.xlu0 %v28163_v27, %s27604_s27 }
 0x1ef   :  { %v2362_v42 = vpop.permute.xlu1 %2361  ;;  %v2286_v22 = vpop.permute.xlu0 %2285 }
 0x1f0   :  { %25563 = vmatpush3.xpose.msk.msra.mxu1 %vm614_vm2, %v2286_v22  ;;  %25568 = vmatpush3.xpose.msk.msra.mxu0 %vm614_vm2, %v2362_v42 }
 0x1f1   :  { %6161 = vrot.lane.b32.xlu1 %v28173_v34, %s27604_s27  ;;  %6085 = vrot.lane.b32.xlu0 %v28177_v35, %s27604_s27 }
 0x1f2   :  { %25577 = vmatprep.subr.mxu0 %v35021_v52  ;;  %25572 = vmatprep.subr.mxu1 %v35021_v52 }
 0x1f3   :  { %25570 = vmatmul.mubr.msk.f32.vlgmr.msra.gmra.mxu0 %vm614_vm2, %v28136_v7  ;;  %v28467_v3 = vpop.permute.xlu1 %466  ;;  %25565 = vmatmul.mubr.msk.f32.vlgmr.msra.gmra.mxu1 %vm614_vm2, %v28139_v11  ;;  %v28471_v22 = vpop.permute.xlu0 %464 }
 0x1f4   :  { %35048 = vst [vmem:[#allocation101_spill] sm:$0xff] %v28467_v3  ;;  %35049 = vst [vmem:[#allocation102_spill] sm:$0xff] %v28471_v22  ;;  %25574 = vmatprep.mubr.msk.f32.mxu1 %vm27602_vm1, %v35021_v52  ;;  %25579 = vmatprep.mubr.msk.f32.mxu0 %vm27602_vm1, %v35021_v52 }
 0x1f5   :  { %3881 = vrot.lane.b32.xlu1 %v28199_v17, %s27604_s27  ;;  %3805 = vrot.lane.b32.xlu0 %v28233_v55, %s27604_s27 }
 0x1f7   :  { %v28481_v42 = vpop.permute.xlu1 %530  ;;  %v28483_v7 = vpop.permute.xlu0 %528 }
 0x1f8   :  { %35050 = vst [vmem:[#allocation103_spill] sm:$0xff] %v28481_v42  ;;  %35051 = vst [vmem:[#allocation104_spill] sm:$0xff] %v28483_v7 }
 0x1f9   :  { %6313 = vrot.lane.b32.xlu1 %v28205_v20, %s27604_s27  ;;  %6237 = vrot.lane.b32.xlu0 %v28217_v60, %s27604_s27 }
 0x1fb   :  { %v28489_v11 = vpop.permute.xlu1 %594  ;;  %v28491_v35 = vpop.permute.xlu0 %592 }
 0x1fc   :  { %35052 = vst [vmem:[#allocation105_spill] sm:$0xff] %v28489_v11  ;;  %35053 = vst [vmem:[#allocation106_spill] sm:$0xff] %v28491_v35 }
 0x1fd   :  { %4033 = vrot.lane.b32.xlu1 %v28251_v61, %s27604_s27  ;;  %3957 = vrot.lane.b32.xlu0 %v28255_v63, %s27604_s27 }
 0x1ff   :  { %v2514_v34 = vpop.permute.xlu1 %2513  ;;  %v2438_v59 = vpop.permute.xlu0 %2437 }
 0x200   :  { %25573 = vmatpush3.xpose.msk.msra.mxu1 %vm614_vm2, %v2438_v59  ;;  %25578 = vmatpush3.xpose.msk.msra.mxu0 %vm614_vm2, %v2514_v34 }
 0x201   :  { %6465 = vrot.lane.b32.xlu1 %v28265_v57, %s27604_s27  ;;  %6389 = vrot.lane.b32.xlu0 %v28269_v5, %s27604_s27 }
 0x202   :  { %25587 = vmatprep.subr.mxu0 %v35021_v52  ;;  %25582 = vmatprep.subr.mxu1 %v35021_v52 }
 0x203   :  { %25580 = vmatmul.mubr.msk.f32.vlgmr.msra.gmra.mxu0 %vm614_vm2, %v28186_v46  ;;  %v28507_v60 = vpop.permute.xlu1 %470  ;;  %25575 = vmatmul.mubr.msk.f32.vlgmr.msra.gmra.mxu1 %vm614_vm2, %v28189_v56  ;;  %v28511_v59 = vpop.permute.xlu0 %468 }
 0x204   :  { %35054 = vst [vmem:[#allocation107_spill] sm:$0xff] %v28507_v60  ;;  %35055 = vst [vmem:[#allocation108_spill] sm:$0xff] %v28511_v59  ;;  %25584 = vmatprep.mubr.msk.f32.mxu1 %vm27602_vm1, %v35021_v52  ;;  %25589 = vmatprep.mubr.msk.f32.mxu0 %vm27602_vm1, %v35021_v52 }
 0x205   :  { %4185 = vrot.lane.b32.xlu1 %v28297_v40, %s27604_s27  ;;  %4109 = vrot.lane.b32.xlu0 %v28301_v43, %s27604_s27 }
 0x207   :  { %v28521_v34 = vpop.permute.xlu1 %534  ;;  %v28523_v46 = vpop.f32.mrf.mxu1 }
 0x208   :  { %35056 = vst [vmem:[#allocation109_spill] sm:$0xff] %v28521_v34  ;;  %35057 = vst [vmem:[#allocation110_spill] sm:$0xff] %v28523_v46  ;;  %v28525_v5 = vpop.permute.xlu0 %532 }
 0x209   :  { %35058 = vst [vmem:[#allocation111_spill] sm:$0xff] %v28525_v5  ;;  %v25456_v56 = vpop.f32.mrf.mxu1  ;;  %6617 = vrot.lane.b32.xlu1 %v28311_v45, %s27604_s27  ;;  %6541 = vrot.lane.b32.xlu0 %v28315_v9, %s27604_s27 }
 0x20b   :  { %v28531_v57 = vpop.permute.xlu1 %598  ;;  %v28533_v20 = vpop.f32.mrf.mxu1 }
 0x20c   :  { %35059 = vst [vmem:[#allocation112_spill] sm:$0xff] %v28531_v57  ;;  %35060 = vst [vmem:[#allocation113_spill] sm:$0xff] %v28533_v20  ;;  %v28535_v40 = vpop.permute.xlu0 %596 }
 0x20d   :  { %35061 = vst [vmem:[#allocation114_spill] sm:$0xff] %v28535_v40  ;;  %v25461_v43 = vpop.f32.mrf.mxu1  ;;  %4337 = vrot.lane.b32.xlu1 %v28347_v41, %s27604_s27  ;;  %4261 = vrot.lane.b32.xlu0 %v28351_v4, %s27604_s27 }
 0x20f   :  { %v2666_v56 = vpop.permute.xlu1 %2665 }
 0x210   :  { %v2590_v46 = vpop.permute.xlu0 %2589  ;;  %25588 = vmatpush3.xpose.msk.msra.mxu0 %vm614_vm2, %v2666_v56 }
 0x211   :  { %25583 = vmatpush3.xpose.msk.msra.mxu1 %vm614_vm2, %v2590_v46  ;;  %6769 = vrot.lane.b32.xlu1 %v28361_v62, %s27604_s27 }
 0x212   :  { %6693 = vrot.lane.b32.xlu0 %v28363_v0, %s27604_s27  ;;  %25597 = vmatprep.subr.mxu0 %v35021_v52 }
 0x213   :  { %25590 = vmatmul.mubr.msk.f32.vlgmr.msra.gmra.mxu0 %vm614_vm2, %v28228_v29  ;;  %v28550_v43 = vpop.permute.xlu1 %474  ;;  %25592 = vmatprep.subr.mxu1 %v35021_v52 }
 0x214   :  { %35062 = vst [vmem:[#allocation115_spill] sm:$0xff] %v28550_v43  ;;  %25585 = vmatmul.mubr.msk.f32.vlgmr.msra.gmra.mxu1 %vm614_vm2, %v28231_v1  ;;  %v28555_v56 = vpop.permute.xlu0 %472  ;;  %25599 = vmatprep.mubr.msk.f32.mxu0 %vm27602_vm1, %v35021_v52 }
 0x215   :  { %35063 = vst [vmem:[#allocation116_spill] sm:$0xff] %v28555_v56  ;;  %4489 = vrot.lane.b32.xlu1 %v28387_v21, %s27604_s27  ;;  %25594 = vmatprep.mubr.msk.f32.mxu1 %vm27602_vm1, %v35021_v52 }
 0x216   :  { %4413 = vrot.lane.b32.xlu0 %v28391_v8, %s27604_s27 }
 0x217   :  { %v28565_v46 = vpop.permute.xlu1 %538 }
 0x218   :  { %35064 = vst [vmem:[#allocation117_spill] sm:$0xff] %v28565_v46  ;;  %v28567_v29 = vpop.permute.xlu0 %536 }
 0x219   :  { %35065 = vst [vmem:[#allocation118_spill] sm:$0xff] %v28567_v29  ;;  %6921 = vrot.lane.b32.xlu1 %v28401_v19, %s27604_s27 }
 0x21a   :  { %6845 = vrot.lane.b32.xlu0 %v28403_v30, %s27604_s27 }
 0x21b   :  { %v28573_v1 = vpop.permute.xlu1 %602  ;;  %v28575_v20 = vpop.f32.mrf.mxu1 }
 0x21c   :  { %35066 = vst [vmem:[#allocation119_spill] sm:$0xff] %v28573_v1  ;;  %35067 = vst [vmem:[#allocation120_spill] sm:$0xff] %v28575_v20  ;;  %v28577_v0 = vpop.permute.xlu0 %600 }
 0x21d   :  { %35068 = vst [vmem:[#allocation121_spill] sm:$0xff] %v28577_v0  ;;  %v25466_v62 = vpop.f32.mrf.mxu1  ;;  %4641 = vrot.lane.b32.xlu1 %v28427_v28, %s27604_s27 }
 0x21e   :  { %4565 = vrot.lane.b32.xlu0 %v28431_v12, %s27604_s27 }
 0x21f   :  { %v2818_v9 = vpop.permute.xlu1 %2817  ;;  %v28583_v45 = vpop.f32.mrf.mxu1 }
 0x220   :  { %35069 = vst [vmem:[#allocation122_spill] sm:$0xff] %v28583_v45  ;;  %v2742_v19 = vpop.permute.xlu0 %2741  ;;  %25598 = vmatpush3.xpose.msk.msra.mxu0 %vm614_vm2, %v2818_v9 }
 0x221   :  { %25593 = vmatpush3.xpose.msk.msra.mxu1 %vm614_vm2, %v2742_v19  ;;  %v25471_v30 = vpop.f32.mrf.mxu1  ;;  %7073 = vrot.lane.b32.xlu1 %v28441_v15, %s27604_s27 }
 0x222   :  { %6997 = vrot.lane.b32.xlu0 %v28443_v48, %s27604_s27  ;;  %25607 = vmatprep.subr.mxu0 %v35021_v52 }
 0x223   :  { %25600 = vmatmul.mubr.msk.f32.vlgmr.msra.gmra.mxu0 %vm614_vm2, %v28278_v53  ;;  %v28594_v62 = vpop.permute.xlu1 %478  ;;  %v28596_v45 = vpop.f32.mrf.mxu1  ;;  %25602 = vmatprep.subr.mxu1 %v35021_v52 }
 0x224   :  { %35070 = vst [vmem:[#allocation123_spill] sm:$0xff] %v28594_v62  ;;  %35071 = vst [vmem:[#allocation124_spill] sm:$0xff] %v28596_v45  ;;  %25595 = vmatmul.mubr.msk.f32.vlgmr.msra.gmra.mxu1 %vm614_vm2, %v28281_v49  ;;  %v28601_v9 = vpop.permute.xlu0 %476  ;;  %25609 = vmatprep.mubr.msk.f32.mxu0 %vm27602_vm1, %v35021_v52 }
 0x225   :  { %35072 = vst [vmem:[#allocation125_spill] sm:$0xff] %v28601_v9  ;;  %v25476_v30 = vpop.f32.mrf.mxu1  ;;  %4793 = vrot.lane.b32.xlu1 %v28467_v3, %s27604_s27  ;;  %25604 = vmatprep.mubr.msk.f32.mxu1 %vm27602_vm1, %v35021_v52 }
 0x226   :  { %4717 = vrot.lane.b32.xlu0 %v28471_v22, %s27604_s27 }
 0x227   :  { %v28611_v19 = vpop.permute.xlu1 %542  ;;  %v28613_v53 = vpop.f32.mrf.mxu1 }
 0x228   :  { %35073 = vst [vmem:[#allocation126_spill] sm:$0xff] %v28611_v19  ;;  %35074 = vst [vmem:[#allocation127_spill] sm:$0xff] %v28613_v53  ;;  %v28615_v49 = vpop.permute.xlu0 %540 }
 0x229   :  { %35075 = vst [vmem:[#allocation128_spill] sm:$0xff] %v28615_v49  ;;  %v25481_v45 = vpop.f32.mrf.mxu1  ;;  %7225 = vrot.lane.b32.xlu1 %v28481_v42, %s27604_s27 }
 0x22a   :  { %7149 = vrot.lane.b32.xlu0 %v28483_v7, %s27604_s27 }
 0x22b   :  { %v28621_v30 = vpop.permute.xlu1 %606 }
 0x22c   :  { %35076 = vst [vmem:[#allocation129_spill] sm:$0xff] %v28621_v30  ;;  %v28623_v20 = vpop.permute.xlu0 %604 }
 0x22d   :  { %35077 = vst [vmem:[#allocation130_spill] sm:$0xff] %v28623_v20  ;;  %4945 = vrot.lane.b32.xlu1 %v28507_v60, %s27604_s27 }
 0x22e   :  { %4869 = vrot.lane.b32.xlu0 %v28511_v59, %s27604_s27 }
 0x22f   :  { %v2970_v53 = vpop.permute.xlu1 %2969 }
 0x230   :  { %v2894_v48 = vpop.permute.xlu0 %2893  ;;  %25608 = vmatpush3.xpose.msk.msra.mxu0 %vm614_vm2, %v2970_v53 }
 0x231   :  { %25603 = vmatpush3.xpose.msk.msra.mxu1 %vm614_vm2, %v2894_v48  ;;  %7377 = vrot.lane.b32.xlu1 %v28521_v34, %s27604_s27 }
 0x232   :  { %7301 = vrot.lane.b32.xlu0 %v28525_v5, %s27604_s27  ;;  %25617 = vmatprep.subr.mxu0 %v35021_v52 }
 0x233   :  { %25610 = vmatmul.mubr.msk.f32.vlgmr.msra.gmra.mxu0 %vm614_vm2, %v28324_v47  ;;  %v28638_v45 = vpop.permute.xlu1 %482  ;;  %25612 = vmatprep.subr.mxu1 %v35021_v52 }
 0x234   :  { %35078 = vst [vmem:[#allocation131_spill] sm:$0xff] %v28638_v45  ;;  %25605 = vmatmul.mubr.msk.f32.vlgmr.msra.gmra.mxu1 %vm614_vm2, %v28327_v6  ;;  %v28643_v53 = vpop.permute.xlu0 %480  ;;  %25619 = vmatprep.mubr.msk.f32.mxu0 %vm27602_vm1, %v35021_v52 }
 0x235   :  { %35079 = vst [vmem:[#allocation132_spill] sm:$0xff] %v28643_v53  ;;  %5097 = vrot.lane.b32.xlu1 %v28550_v43, %s27604_s27  ;;  %25614 = vmatprep.mubr.msk.f32.mxu1 %vm27602_vm1, %v35021_v52 }
 0x236   :  { %5021 = vrot.lane.b32.xlu0 %v28555_v56, %s27604_s27 }
 0x237   :  { %v28653_v48 = vpop.permute.xlu1 %546  ;;  %v28655_v5 = vpop.f32.mrf.mxu1 }
 0x238   :  { %35080 = vst [vmem:[#allocation133_spill] sm:$0xff] %v28653_v48  ;;  %v28657_v34 = vpop.permute.xlu0 %544 }
 0x239   :  { %35081 = vst [vmem:[#allocation134_spill] sm:$0xff] %v28657_v34  ;;  %v25486_v7 = vpop.f32.mrf.mxu1  ;;  %7529 = vrot.lane.b32.xlu1 %v28565_v46, %s27604_s27 }
 0x23a   :  { %7453 = vrot.lane.b32.xlu0 %v28567_v29, %s27604_s27 }
 0x23b   :  { %v3122_v42 = vpop.permute.xlu1 %3121  ;;  %v28663_v15 = vpop.f32.mrf.mxu1 }
 0x23c   :  { %35082 = vst [vmem:[#allocation135_spill] sm:$0xff] %v28663_v15  ;;  %v3046_v43 = vpop.permute.xlu0 %3045  ;;  %25618 = vmatpush3.xpose.msk.msra.mxu0 %vm614_vm2, %v3122_v42 }
 0x23d   :  { %25613 = vmatpush3.xpose.msk.msra.mxu1 %vm614_vm2, %v3046_v43  ;;  %v25491_v56 = vpop.f32.mrf.mxu1  ;;  %5249 = vrot.lane.b32.xlu1 %v28594_v62, %s27604_s27 }
 0x23e   :  { %5173 = vrot.lane.b32.xlu0 %v28601_v9, %s27604_s27  ;;  %25627 = vmatprep.subr.mxu0 %v35021_v52 }
 0x23f   :  { %25620 = vmatmul.mubr.msk.f32.vlgmr.msra.gmra.mxu0 %vm614_vm2, %v27969_v10  ;;  %v28674_v7 = vpop.permute.xlu1 %5553  ;;  %25622 = vmatprep.subr.mxu1 %v35021_v52 }
 0x240   :  { %25615 = vmatmul.mubr.msk.f32.vlgmr.msra.gmra.mxu1 %vm614_vm2, %v27987_v16  ;;  %v28679_v42 = vpop.permute.xlu0 %5477  ;;  %25629 = vmatprep.mubr.msk.f32.mxu0 %vm27602_vm1, %v35021_v52 }
 0x241   :  { %7681 = vrot.lane.b32.xlu1 %v28611_v19, %s27604_s27  ;;  %25624 = vmatprep.mubr.msk.f32.mxu1 %vm27602_vm1, %v35021_v52 }
 0x242   :  { %7605 = vrot.lane.b32.xlu0 %v28615_v49, %s27604_s27 }
 0x243   :  { %v28689_v43 = vpop.permute.xlu1 %7985  ;;  %v28691_v56 = vpop.f32.mrf.mxu1 }
 0x244   :  { %35083 = vst [vmem:[#allocation136_spill] sm:$0xff] %v28689_v43  ;;  %v28693_v10 = vpop.permute.xlu0 %7909 }
 0x245   :  { %v25496_v16 = vpop.f32.mrf.mxu1  ;;  %5401 = vrot.lane.b32.xlu1 %v28638_v45, %s27604_s27 }
 0x246   :  { %5325 = vrot.lane.b32.xlu0 %v28643_v53, %s27604_s27 }
 0x247   :  { %v3274_v19 = vpop.permute.xlu1 %3273  ;;  %v28699_v15 = vpop.f32.mrf.mxu1 }
 0x248   :  { %v3198_v29 = vpop.permute.xlu0 %3197  ;;  %25628 = vmatpush3.xpose.msk.msra.mxu0 %vm614_vm2, %v3274_v19 }
 0x249   :  { %25623 = vmatpush3.xpose.msk.msra.mxu1 %vm614_vm2, %v3198_v29  ;;  %v25501_v43 = vpop.f32.mrf.mxu1  ;;  %7833 = vrot.lane.b32.xlu1 %v28653_v48, %s27604_s27 }
 0x24a   :  { %7757 = vrot.lane.b32.xlu0 %v28657_v34, %s27604_s27  ;;  %25637 = vmatprep.subr.mxu0 %v35021_v52 }
 0x24b   :  { %25630 = vmatmul.mubr.msk.f32.vlgmr.msra.gmra.mxu0 %vm614_vm2, %v28023_v25  ;;  %v28710_v16 = vpop.permute.xlu1 %5705  ;;  %25632 = vmatprep.subr.mxu1 %v35021_v52 }
 0x24c   :  { %25625 = vmatmul.mubr.msk.f32.vlgmr.msra.gmra.mxu1 %vm614_vm2, %v28043_v32  ;;  %v28715_v29 = vpop.permute.xlu0 %5629  ;;  %25639 = vmatprep.mubr.msk.f32.mxu0 %vm27602_vm1, %v35021_v52 }
 0x24d   :  { %610 = vrot.lane.b32.xlu1 %v28324_v47, %s27606_s29  ;;  %25634 = vmatprep.mubr.msk.f32.mxu1 %vm27602_vm1, %v35021_v52 }
 0x24e   :  { %608 = vrot.lane.b32.xlu0 %v28327_v6, %s27606_s29 }
 0x24f   :  { %v3426_v19 = vpop.permute.xlu1 %3425 }
 0x250   :  { %v3350_v43 = vpop.permute.xlu0 %3349  ;;  %25638 = vmatpush3.xpose.msk.msra.mxu0 %vm614_vm2, %v3426_v19 }
 0x251   :  { %25633 = vmatpush3.xpose.msk.msra.mxu1 %vm614_vm2, %v3350_v43  ;;  %8137 = vrot.lane.b32.xlu1 %v28021_v24, %s27604_s27 }
 0x252   :  { %8061 = vrot.lane.b32.xlu0 %v28047_v33, %s27604_s27  ;;  %25647 = vmatprep.subr.mxu0 %v35021_v52 }
 0x253   :  { %25640 = vmatmul.mubr.msk.f32.vlgmr.msra.gmra.mxu0 %vm614_vm2, %v28067_v36  ;;  %v28734_v25 = vpop.permute.xlu1 %5857  ;;  %25642 = vmatprep.subr.mxu1 %v35021_v52 }
 0x254   :  { %25635 = vmatmul.mubr.msk.f32.vlgmr.msra.gmra.mxu1 %vm614_vm2, %v28071_v39  ;;  %v28739_v19 = vpop.permute.xlu0 %5781  ;;  %25649 = vmatprep.mubr.msk.f32.mxu0 %vm27602_vm1, %v35021_v52 }
 0x255   :  { %8289 = vrot.lane.b32.xlu1 %v28099_v51, %s27604_s27  ;;  %25644 = vmatprep.mubr.msk.f32.mxu1 %vm27602_vm1, %v35021_v52 }
 0x256   :  { %8213 = vrot.lane.b32.xlu0 %v28101_v54, %s27604_s27 }
 0x257   :  { %v3578_v43 = vpop.permute.xlu1 %3577  ;;  %v28749_v36 = vpop.f32.mrf.mxu1 }
 0x258   :  { %v3502_v32 = vpop.permute.xlu0 %3501  ;;  %25648 = vmatpush3.xpose.msk.msra.mxu0 %vm614_vm2, %v3578_v43 }
 0x259   :  { %25643 = vmatpush3.xpose.msk.msra.mxu1 %vm614_vm2, %v3502_v32  ;;  %8441 = vrot.lane.b32.xlu1 %v28121_v2, %s27604_s27  ;;  %v25506_v39 = vpop.f32.mrf.mxu1 }
 0x25a   :  { %8365 = vrot.lane.b32.xlu0 %v28145_v14, %s27604_s27  ;;  %25657 = vmatprep.subr.mxu0 %v35021_v52  ;;  %v35085_v39 = vld [vmem:[#allocation57_spill] sm:$0xff] }
 0x25b   :  { %25650 = vmatmul.mubr.msk.f32.vlgmr.msra.gmra.mxu0 %vm614_vm2, %v28107_v58  ;;  %v28760_v47 = vpop.permute.xlu1 %6009  ;;  %v28762_v6 = vpop.f32.mrf.mxu1  ;;  %25652 = vmatprep.subr.mxu1 %v35021_v52  ;;  %v35086_v58 = vld [vmem:[#allocation58_spill] sm:$0xff] }
 0x25c   :  { %35084 = vst [vmem:[#allocation137_spill] sm:$0xff] %v28762_v6  ;;  %25645 = vmatmul.mubr.msk.f32.vlgmr.msra.gmra.mxu1 %vm614_vm2, %v28141_v13  ;;  %v28767_v32 = vpop.permute.xlu0 %5933  ;;  %25659 = vmatprep.mubr.msk.f32.mxu0 %vm27602_vm1, %v35021_v52  ;;  %v35087_v13 = vld [vmem:[#allocation61_spill] sm:$0xff]  ;;  %v35088_v6 = vld [vmem:[#allocation66_spill] sm:$0xff] }
 0x25d   :  { %8593 = vrot.lane.b32.xlu1 %v35085_v39, %s27604_s27  ;;  %v25511_v43 = vpop.f32.mrf.mxu1  ;;  %25654 = vmatprep.mubr.msk.f32.mxu1 %vm27602_vm1, %v35021_v52 }
 0x25e   :  { %8517 = vrot.lane.b32.xlu0 %v35086_v58, %s27604_s27 }
 0x25f   :  { %v3730_v14 = vpop.permute.xlu1 %3729 }
 0x260   :  { %v3654_v2 = vpop.permute.xlu0 %3653  ;;  %25658 = vmatpush3.xpose.msk.msra.mxu0 %vm614_vm2, %v3730_v14  ;;  %v35089_v14 = vld [vmem:[#allocation73_spill] sm:$0xff] }
 0x261   :  { %25653 = vmatpush3.xpose.msk.msra.mxu1 %vm614_vm2, %v3654_v2  ;;  %8745 = vrot.lane.b32.xlu1 %v35087_v13, %s27604_s27 }
 0x262   :  { %8669 = vrot.lane.b32.xlu0 %v35088_v6, %s27604_s27  ;;  %25667 = vmatprep.subr.mxu0 %v35021_v52 }
 0x263   :  { %25660 = vmatmul.mubr.msk.f32.vlgmr.msra.gmra.mxu0 %vm614_vm2, %v28159_v26  ;;  %v28786_v43 = vpop.permute.xlu1 %6161  ;;  %v28788_v58 = vpop.f32.mrf.mxu1  ;;  %25662 = vmatprep.subr.mxu1 %v35021_v52  ;;  %v35090_v26 = vld [vmem:[#allocation74_spill] sm:$0xff] }
 0x264   :  { %25655 = vmatmul.mubr.msk.f32.vlgmr.msra.gmra.mxu1 %vm614_vm2, %v28163_v27  ;;  %v28793_v2 = vpop.permute.xlu0 %6085  ;;  %25669 = vmatprep.mubr.msk.f32.mxu0 %vm27602_vm1, %v35021_v52 }
 0x265   :  { %8897 = vrot.lane.b32.xlu1 %v35089_v14, %s27604_s27  ;;  %v25516_v6 = vpop.f32.mrf.mxu1  ;;  %25664 = vmatprep.mubr.msk.f32.mxu1 %vm27602_vm1, %v35021_v52 }
 0x266   :  { %8821 = vrot.lane.b32.xlu0 %v35090_v26, %s27604_s27  ;;  %v35091_v6 = vld [vmem:[#allocation82_spill] sm:$0xff] }
 0x267   :  { %v3882_v13 = vpop.permute.xlu1 %3881  ;;  %v28803_v39 = vpop.f32.mrf.mxu1 }
 0x268   :  { %v3806_v54 = vpop.permute.xlu0 %3805  ;;  %25668 = vmatpush3.xpose.msk.msra.mxu0 %vm614_vm2, %v3882_v13 }
 0x269   :  { %25663 = vmatpush3.xpose.msk.msra.mxu1 %vm614_vm2, %v3806_v54  ;;  %9049 = vrot.lane.b32.xlu1 %v28329_v37, %s27604_s27  ;;  %v25521_v27 = vpop.f32.mrf.mxu1 }
 0x26a   :  { %8973 = vrot.lane.b32.xlu0 %v35091_v6, %s27604_s27  ;;  %25677 = vmatprep.subr.mxu0 %v35021_v52 }
 0x26b   :  { %25670 = vmatmul.mubr.msk.f32.vlgmr.msra.gmra.mxu0 %vm614_vm2, %v28199_v17  ;;  %v28814_v26 = vpop.permute.xlu1 %6313  ;;  %25672 = vmatprep.subr.mxu1 %v35021_v52 }
 0x26c   :  { %25665 = vmatmul.mubr.msk.f32.vlgmr.msra.gmra.mxu1 %vm614_vm2, %v28233_v55  ;;  %v28819_v54 = vpop.permute.xlu0 %6237  ;;  %25679 = vmatprep.mubr.msk.f32.mxu0 %vm27602_vm1, %v35021_v52 }
 0x26d   :  { %9201 = vrot.lane.b32.xlu1 %v28369_v38, %s27604_s27  ;;  %25674 = vmatprep.mubr.msk.f32.mxu1 %vm27602_vm1, %v35021_v52 }
 0x26e   :  { %9125 = vrot.lane.b32.xlu0 %v28371_v18, %s27604_s27 }
 0x26f   :  { %v4034_v13 = vpop.permute.xlu1 %4033 }
 0x270   :  { %v3958_v27 = vpop.permute.xlu0 %3957  ;;  %25678 = vmatpush3.xpose.msk.msra.mxu0 %vm614_vm2, %v4034_v13 }
 0x271   :  { %25673 = vmatpush3.xpose.msk.msra.mxu1 %vm614_vm2, %v3958_v27  ;;  %9353 = vrot.lane.b32.xlu1 %v28409_v31, %s27604_s27 }
 0x272   :  { %9277 = vrot.lane.b32.xlu0 %v28411_v23, %s27604_s27  ;;  %25687 = vmatprep.subr.mxu0 %v35021_v52 }
 0x273   :  { %25680 = vmatmul.mubr.msk.f32.vlgmr.msra.gmra.mxu0 %vm614_vm2, %v28251_v61  ;;  %v28838_v17 = vpop.permute.xlu1 %6465  ;;  %v28840_v55 = vpop.f32.mrf.mxu1  ;;  %25682 = vmatprep.subr.mxu1 %v35021_v52 }
 0x274   :  { %25675 = vmatmul.mubr.msk.f32.vlgmr.msra.gmra.mxu1 %vm614_vm2, %v28255_v63  ;;  %v28845_v13 = vpop.permute.xlu0 %6389  ;;  %25689 = vmatprep.mubr.msk.f32.mxu0 %vm27602_vm1, %v35021_v52 }
 0x275   :  { %9505 = vrot.lane.b32.xlu1 %v28449_v50, %s27604_s27  ;;  %v25526_v27 = vpop.f32.mrf.mxu1  ;;  %25684 = vmatprep.mubr.msk.f32.mxu1 %vm27602_vm1, %v35021_v52 }
 0x276   :  { %9429 = vrot.lane.b32.xlu0 %v28451_v44, %s27604_s27  ;;  %v35093_v27 = vld [vmem:[#allocation75_spill] sm:$0xff]  ;;  %v35094_v44 = vld [vmem:[#allocation76_spill] sm:$0xff] }
 0x277   :  { %v4186_v61 = vpop.permute.xlu1 %4185  ;;  %v28855_v23 = vpop.f32.mrf.mxu1 }
 0x278   :  { %35092 = vst [vmem:[#allocation138_spill] sm:$0xff] %v28855_v23  ;;  %v4110_v31 = vpop.permute.xlu0 %4109  ;;  %25688 = vmatpush3.xpose.msk.msra.mxu0 %vm614_vm2, %v4186_v61 }
 0x279   :  { %25683 = vmatpush3.xpose.msk.msra.mxu1 %vm614_vm2, %v4110_v31  ;;  %9657 = vrot.lane.b32.xlu1 %v28489_v11, %s27604_s27  ;;  %v25531_v63 = vpop.f32.mrf.mxu1 }
 0x27a   :  { %9581 = vrot.lane.b32.xlu0 %v28491_v35, %s27604_s27  ;;  %25697 = vmatprep.subr.mxu0 %v35021_v52 }
 0x27b   :  { %25690 = vmatmul.mubr.msk.f32.vlgmr.msra.gmra.mxu0 %vm614_vm2, %v35093_v27  ;;  %v28866_v50 = vpop.permute.xlu1 %6617  ;;  %25692 = vmatprep.subr.mxu1 %v35021_v52 }
 0x27c   :  { %25685 = vmatmul.mubr.msk.f32.vlgmr.msra.gmra.mxu1 %vm614_vm2, %v35094_v44  ;;  %v28871_v31 = vpop.permute.xlu0 %6541  ;;  %25699 = vmatprep.mubr.msk.f32.mxu0 %vm27602_vm1, %v35021_v52 }
 0x27d   :  { %9809 = vrot.lane.b32.xlu1 %v28531_v57, %s27604_s27  ;;  %25694 = vmatprep.mubr.msk.f32.mxu1 %vm27602_vm1, %v35021_v52 }
 0x27e   :  { %9733 = vrot.lane.b32.xlu0 %v28535_v40, %s27604_s27 }
 0x27f   :  { %v4338_v63 = vpop.permute.xlu1 %4337 }
 0x280   :  { %v4262_v61 = vpop.permute.xlu0 %4261  ;;  %25698 = vmatpush3.xpose.msk.msra.mxu0 %vm614_vm2, %v4338_v63 }
 0x281   :  { %25693 = vmatpush3.xpose.msk.msra.mxu1 %vm614_vm2, %v4262_v61  ;;  %9961 = vrot.lane.b32.xlu1 %v28573_v1, %s27604_s27 }
 0x282   :  { %9885 = vrot.lane.b32.xlu0 %v28577_v0, %s27604_s27  ;;  %25707 = vmatprep.subr.mxu0 %v35021_v52 }
 0x283   :  { %v28888_v27 = vpop.f32.mrf.mxu0  ;;  %25700 = vmatmul.mubr.msk.f32.vlgmr.msra.gmra.mxu0 %vm614_vm2, %v28347_v41  ;;  %v28892_v44 = vpop.permute.xlu1 %6769  ;;  %25702 = vmatprep.subr.mxu1 %v35021_v52 }
 0x284   :  { %v28895_v63 = vpop.f32.mrf.mxu1  ;;  %25695 = vmatmul.mubr.msk.f32.vlgmr.msra.gmra.mxu1 %vm614_vm2, %v28351_v4  ;;  %v28899_v61 = vpop.permute.xlu0 %6693  ;;  %25709 = vmatprep.mubr.msk.f32.mxu0 %vm27602_vm1, %v35021_v52 }
 0x285   :  { %35095 = vst [vmem:[#allocation139_spill] sm:$0xff] %v28895_v63  ;;  %v25541_v1 = vpop.f32.mrf.mxu0  ;;  %10113 = vrot.lane.b32.xlu1 %v28621_v30, %s27604_s27  ;;  %25704 = vmatprep.mubr.msk.f32.mxu1 %vm27602_vm1, %v35021_v52 }
 0x286   :  { %v25536_v41 = vpop.f32.mrf.mxu1  ;;  %10037 = vrot.lane.b32.xlu0 %v28623_v20, %s27604_s27 }
 0x287   :  { %v4490_v63 = vpop.permute.xlu1 %4489 }
 0x288   :  { %v4414_v0 = vpop.permute.xlu0 %4413  ;;  %25708 = vmatpush3.xpose.msk.msra.mxu0 %vm614_vm2, %v4490_v63 }
 0x289   :  { %25703 = vmatpush3.xpose.msk.msra.mxu1 %vm614_vm2, %v4414_v0  ;;  %25717 = vmatprep.subr.mxu0 %v35021_v52 }
 0x28a   :  { %25712 = vmatprep.subr.mxu1 %v35021_v52 }
 0x28b   :  { %25710 = vmatmul.mubr.msk.f32.vlgmr.msra.gmra.mxu0 %vm614_vm2, %v28387_v21  ;;  %v28915_v1 = vpop.permute.xlu1 %6921 }
 0x28c   :  { %25705 = vmatmul.mubr.msk.f32.vlgmr.msra.gmra.mxu1 %vm614_vm2, %v28391_v8  ;;  %v28919_v41 = vpop.permute.xlu0 %6845  ;;  %25719 = vmatprep.mubr.msk.f32.mxu0 %vm27602_vm1, %v35021_v52 }
 0x28d   :  { %25714 = vmatprep.mubr.msk.f32.mxu1 %vm27602_vm1, %v35021_v52 }
 0x28f   :  { %v4642_v0 = vpop.permute.xlu1 %4641 }
 0x290   :  { %v4566_v63 = vpop.permute.xlu0 %4565  ;;  %25718 = vmatpush3.xpose.msk.msra.mxu0 %vm614_vm2, %v4642_v0 }
 0x291   :  { %25713 = vmatpush3.xpose.msk.msra.mxu1 %vm614_vm2, %v4566_v63  ;;  %25727 = vmatprep.subr.mxu0 %v35021_v52 }
 0x292   :  { %25722 = vmatprep.subr.mxu1 %v35021_v52 }
 0x293   :  { %v28929_v21 = vpop.f32.mrf.mxu0  ;;  %25720 = vmatmul.mubr.msk.f32.vlgmr.msra.gmra.mxu0 %vm614_vm2, %v28427_v28  ;;  %v28933_v8 = vpop.permute.xlu1 %7073 }
 0x294   :  { %v28935_v4 = vpop.f32.mrf.mxu1  ;;  %25715 = vmatmul.mubr.msk.f32.vlgmr.msra.gmra.mxu1 %vm614_vm2, %v28431_v12  ;;  %v28939_v30 = vpop.permute.xlu0 %6997  ;;  %25729 = vmatprep.mubr.msk.f32.mxu0 %vm27602_vm1, %v35021_v52 }
 0x295   :  { %35096 = vst [vmem:[#allocation140_spill] sm:$0xff] %v28935_v4  ;;  %v25551_v0 = vpop.f32.mrf.mxu0  ;;  %25724 = vmatprep.mubr.msk.f32.mxu1 %vm27602_vm1, %v35021_v52 }
 0x296   :  { %v25546_v63 = vpop.f32.mrf.mxu1 }
 0x297   :  { %v4794_v20 = vpop.permute.xlu1 %4793 }
 0x298   :  { %v4718_v57 = vpop.permute.xlu0 %4717  ;;  %25728 = vmatpush3.xpose.msk.msra.mxu0 %vm614_vm2, %v4794_v20 }
 0x299   :  { %25723 = vmatpush3.xpose.msk.msra.mxu1 %vm614_vm2, %v4718_v57  ;;  %25737 = vmatprep.subr.mxu0 %v35021_v52 }
 0x29a   :  { %25732 = vmatprep.subr.mxu1 %v35021_v52 }
 0x29b   :  { %25730 = vmatmul.mubr.msk.f32.vlgmr.msra.gmra.mxu0 %vm614_vm2, %v28467_v3  ;;  %v28951_v28 = vpop.permute.xlu1 %7225 }
 0x29c   :  { %25725 = vmatmul.mubr.msk.f32.vlgmr.msra.gmra.mxu1 %vm614_vm2, %v28471_v22  ;;  %v28955_v0 = vpop.permute.xlu0 %7149  ;;  %25739 = vmatprep.mubr.msk.f32.mxu0 %vm27602_vm1, %v35021_v52 }
 0x29d   :  { %25734 = vmatprep.mubr.msk.f32.mxu1 %vm27602_vm1, %v35021_v52 }
 0x29f   :  { %v4946_v20 = vpop.permute.xlu1 %4945 }
 0x2a0   :  { %v4870_v57 = vpop.permute.xlu0 %4869  ;;  %25738 = vmatpush3.xpose.msk.msra.mxu0 %vm614_vm2, %v4946_v20 }
 0x2a1   :  { %25733 = vmatpush3.xpose.msk.msra.mxu1 %vm614_vm2, %v4870_v57  ;;  %25747 = vmatprep.subr.mxu0 %v35021_v52 }
 0x2a2   :  { %25742 = vmatprep.subr.mxu1 %v35021_v52 }
 0x2a3   :  { %v28965_v63 = vpop.f32.mrf.mxu0  ;;  %25740 = vmatmul.mubr.msk.f32.vlgmr.msra.gmra.mxu0 %vm614_vm2, %v28507_v60  ;;  %v28969_v3 = vpop.permute.xlu1 %7377  ;;  %v35098_v60 = vld [vmem:[#allocation115_spill] sm:$0xff] }
 0x2a4   :  { %v28971_v22 = vpop.f32.mrf.mxu1  ;;  %25735 = vmatmul.mubr.msk.f32.vlgmr.msra.gmra.mxu1 %vm614_vm2, %v28511_v59  ;;  %v28975_v12 = vpop.permute.xlu0 %7301  ;;  %25749 = vmatprep.mubr.msk.f32.mxu0 %vm27602_vm1, %v35021_v52 }
 0x2a5   :  { %35097 = vst [vmem:[#allocation141_spill] sm:$0xff] %v28971_v22  ;;  %v25561_v20 = vpop.f32.mrf.mxu0  ;;  %25744 = vmatprep.mubr.msk.f32.mxu1 %vm27602_vm1, %v35021_v52 }
 0x2a6   :  { %v25556_v57 = vpop.f32.mrf.mxu1  ;;  %v35099_v20 = vld [vmem:[#allocation116_spill] sm:$0xff] }
 0x2a7   :  { %v5098_v4 = vpop.permute.xlu1 %5097 }
 0x2a8   :  { %v5022_v40 = vpop.permute.xlu0 %5021  ;;  %25748 = vmatpush3.xpose.msk.msra.mxu0 %vm614_vm2, %v5098_v4 }
 0x2a9   :  { %25743 = vmatpush3.xpose.msk.msra.mxu1 %vm614_vm2, %v5022_v40  ;;  %25757 = vmatprep.subr.mxu0 %v35021_v52 }
 0x2aa   :  { %25752 = vmatprep.subr.mxu1 %v35021_v52 }
 0x2ab   :  { %25750 = vmatmul.mubr.msk.f32.vlgmr.msra.gmra.mxu0 %vm614_vm2, %v35098_v60  ;;  %v28987_v59 = vpop.permute.xlu1 %7529 }
 0x2ac   :  { %25745 = vmatmul.mubr.msk.f32.vlgmr.msra.gmra.mxu1 %vm614_vm2, %v35099_v20  ;;  %v28991_v22 = vpop.permute.xlu0 %7453  ;;  %25759 = vmatprep.mubr.msk.f32.mxu0 %vm27602_vm1, %v35021_v52 }
 0x2ad   :  { %25754 = vmatprep.mubr.msk.f32.mxu1 %vm27602_vm1, %v35021_v52 }
 0x2af   :  { %v5250_v40 = vpop.permute.xlu1 %5249 }
 0x2b0   :  { %v5174_v4 = vpop.permute.xlu0 %5173  ;;  %25758 = vmatpush3.xpose.msk.msra.mxu0 %vm614_vm2, %v5250_v40 }
 0x2b1   :  { %25753 = vmatpush3.xpose.msk.msra.mxu1 %vm614_vm2, %v5174_v4  ;;  %25767 = vmatprep.subr.mxu0 %v35021_v52 }
 0x2b2   :  { %25762 = vmatprep.subr.mxu1 %v35021_v52 }
 0x2b3   :  { %v29001_v57 = vpop.f32.mrf.mxu0  ;;  %25760 = vmatmul.mubr.msk.f32.vlgmr.msra.gmra.mxu0 %vm614_vm2, %v28594_v62  ;;  %v29005_v60 = vpop.permute.xlu1 %7681 }
 0x2b4   :  { %v29007_v20 = vpop.f32.mrf.mxu1  ;;  %25755 = vmatmul.mubr.msk.f32.vlgmr.msra.gmra.mxu1 %vm614_vm2, %v28601_v9  ;;  %v29011_v11 = vpop.permute.xlu0 %7605  ;;  %25769 = vmatprep.mubr.msk.f32.mxu0 %vm27602_vm1, %v35021_v52 }
 0x2b5   :  { %v25571_v40 = vpop.f32.mrf.mxu0  ;;  %25764 = vmatprep.mubr.msk.f32.mxu1 %vm27602_vm1, %v35021_v52 }
 0x2b6   :  { %v25566_v4 = vpop.f32.mrf.mxu1 }
 0x2b7   :  { %v5402_v35 = vpop.permute.xlu1 %5401  ;;  %v35102_v4 = vld [vmem:[#allocation25_spill] sm:$0xff] }
 0x2b8   :  { %v5326_v23 = vpop.permute.xlu0 %5325  ;;  %25768 = vmatpush3.xpose.msk.msra.mxu0 %vm614_vm2, %v5402_v35 }
 0x2b9   :  { %25763 = vmatpush3.xpose.msk.msra.mxu1 %vm614_vm2, %v5326_v23  ;;  %25777 = vmatprep.subr.mxu0 %v35021_v52  ;;  %v35100_v23 = vld [vmem:[#allocation20_spill] sm:$0xff] }
 0x2ba   :  { %25772 = vmatprep.subr.mxu1 %v35021_v52 }
 0x2bb   :  { %25770 = vmatmul.mubr.msk.f32.vlgmr.msra.gmra.mxu0 %vm614_vm2, %v28638_v45  ;;  %v29023_v62 = vpop.permute.xlu1 %7833  ;;  %v35106_v45 = vld [vmem:[#allocation3_spill] sm:$0xff] }
 0x2bc   :  { %25765 = vmatmul.mubr.msk.f32.vlgmr.msra.gmra.mxu1 %vm614_vm2, %v28643_v53  ;;  %v29027_v40 = vpop.permute.xlu0 %7757  ;;  %25778 = vmatpush3.xpose.msk.msra.mxu0 %vm614_vm2, %v28674_v7 }
 0x2bd   :  { %25773 = vmatpush3.xpose.msk.msra.mxu1 %vm614_vm2, %v28679_v42  ;;  %25774 = vmatprep.mubr.msk.f32.mxu1 %vm27602_vm1, %v35021_v52 }
 0x2be   :  { %25779 = vmatprep.mubr.msk.f32.mxu0 %vm27602_vm1, %v35021_v52  ;;  %25787 = vmatprep.subr.mxu0 %v35021_v52 }
 0x2bf   :  { %25780 = vmatmul.mubr.msk.f32.vlgmr.msra.gmra.mxu0 %vm614_vm2, %v35100_v23  ;;  %v29040_v35 = vpop.permute.xlu1 %610  ;;  %25782 = vmatprep.subr.mxu1 %v35021_v52 }
 0x2c0   :  { %35101 = vst [vmem:[#allocation142_spill] sm:$0xff] %v29040_v35  ;;  %25775 = vmatmul.mubr.msk.f32.vlgmr.msra.gmra.mxu1 %vm614_vm2, %v35102_v4  ;;  %v29045_v7 = vpop.permute.xlu0 %608  ;;  %25788 = vmatpush3.xpose.msk.msra.mxu0 %vm614_vm2, %v28710_v16  ;;  %v35104_v16 = vld [vmem:[#allocation26_spill] sm:$0xff] }
 0x2c1   :  { %35103 = vst [vmem:[#allocation143_spill] sm:$0xff] %v29045_v7  ;;  %10265 = vrot.lane.b32.xlu1 %v29040_v35, %s27604_s27  ;;  %25783 = vmatpush3.xpose.msk.msra.mxu1 %vm614_vm2, %v28715_v29  ;;  %v35105_v4 = vld [vmem:[#allocation30_spill] sm:$0xff] }
 0x2c2   :  { %10189 = vrot.lane.b32.xlu0 %v29045_v7, %s27604_s27  ;;  %25784 = vmatprep.mubr.msk.f32.mxu1 %vm27602_vm1, %v35021_v52 }
 0x2c3   :  { %25789 = vmatprep.mubr.msk.f32.mxu0 %vm27602_vm1, %v35021_v52  ;;  %v29059_v42 = vpop.f32.mrf.mxu0  ;;  %25797 = vmatprep.subr.mxu0 %v35021_v52  ;;  %v29064_v23 = vpop.f32.mrf.mxu1 }
 0x2c4   :  { %25790 = vmatmul.mubr.msk.f32.vlgmr.msra.gmra.mxu0 %vm614_vm2, %v35104_v16  ;;  %25785 = vmatmul.mubr.msk.f32.vlgmr.msra.gmra.mxu1 %vm614_vm2, %v35105_v4  ;;  %v35107_v16 = vld [vmem:[#allocation4_spill] sm:$0xff] }
 0x2c5   :  { %25792 = vmatprep.subr.mxu1 %v35021_v52  ;;  %25798 = vmatpush3.xpose.msk.msra.mxu0 %vm614_vm2, %v28734_v25  ;;  %v25581_v29 = vpop.f32.mrf.mxu0  ;;  %v25576_v53 = vpop.f32.mrf.mxu1  ;;  %v35108_v25 = vld [vmem:[#allocation37_spill] sm:$0xff] }
 0x2c6   :  { %11825 = vrot.lane.b32.xlu1 %v35106_v45, %s27607_s30  ;;  %25793 = vmatpush3.xpose.msk.msra.mxu1 %vm614_vm2, %v28739_v19  ;;  %v35109_v29 = vld [vmem:[#allocation38_spill] sm:$0xff]  ;;  %v35110_v45 = vld [vmem:[#allocation44_spill] sm:$0xff] }
 0x2c7   :  { %11749 = vrot.lane.b32.xlu0 %v35107_v16, %s27607_s30  ;;  %25794 = vmatprep.mubr.msk.f32.mxu1 %vm27602_vm1, %v35021_v52  ;;  %v35111_v53 = vld [vmem:[#allocation46_spill] sm:$0xff] }
 0x2c8   :  { %25799 = vmatprep.mubr.msk.f32.mxu0 %vm27602_vm1, %v35021_v52  ;;  %25807 = vmatprep.subr.mxu0 %v35021_v52  ;;  %v35113_v19 = vld [vmem:[#allocation54_spill] sm:$0xff] }
 0x2c9   :  { %25800 = vmatmul.mubr.msk.f32.vlgmr.msra.gmra.mxu0 %vm614_vm2, %v35108_v25  ;;  %25795 = vmatmul.mubr.msk.f32.vlgmr.msra.gmra.mxu1 %vm614_vm2, %v35109_v29  ;;  %v35115_v16 = vld [vmem:[#allocation62_spill] sm:$0xff] }
 0x2ca   :  { %25802 = vmatprep.subr.mxu1 %v35021_v52  ;;  %25808 = vmatpush3.xpose.msk.msra.mxu0 %vm614_vm2, %v28760_v47  ;;  %v35112_v47 = vld [vmem:[#allocation53_spill] sm:$0xff] }
 0x2cb   :  { %25803 = vmatpush3.xpose.msk.msra.mxu1 %vm614_vm2, %v28767_v32  ;;  %25804 = vmatprep.mubr.msk.f32.mxu1 %vm27602_vm1, %v35021_v52 }
 0x2cc   :  { %25809 = vmatprep.mubr.msk.f32.mxu0 %vm27602_vm1, %v35021_v52  ;;  %25817 = vmatprep.subr.mxu0 %v35021_v52 }
 0x2cd   :  { %25810 = vmatmul.mubr.msk.f32.vlgmr.msra.gmra.mxu0 %vm614_vm2, %v35110_v45  ;;  %25812 = vmatprep.subr.mxu1 %v35021_v52 }
 0x2ce   :  { %25805 = vmatmul.mubr.msk.f32.vlgmr.msra.gmra.mxu1 %vm614_vm2, %v35111_v53  ;;  %25818 = vmatpush3.xpose.msk.msra.mxu0 %vm614_vm2, %v28786_v43 }
 0x2cf   :  { %25813 = vmatpush3.xpose.msk.msra.mxu1 %vm614_vm2, %v28793_v2  ;;  %25814 = vmatprep.mubr.msk.f32.mxu1 %vm27602_vm1, %v35021_v52  ;;  %v35114_v2 = vld [vmem:[#allocation60_spill] sm:$0xff] }
 0x2d0   :  { %25819 = vmatprep.mubr.msk.f32.mxu0 %vm27602_vm1, %v35021_v52  ;;  %25827 = vmatprep.subr.mxu0 %v35021_v52 }
 0x2d1   :  { %25820 = vmatmul.mubr.msk.f32.vlgmr.msra.gmra.mxu0 %vm614_vm2, %v35112_v47  ;;  %25822 = vmatprep.subr.mxu1 %v35021_v52 }
 0x2d2   :  { %25815 = vmatmul.mubr.msk.f32.vlgmr.msra.gmra.mxu1 %vm614_vm2, %v35113_v19  ;;  %25828 = vmatpush3.xpose.msk.msra.mxu0 %vm614_vm2, %v28814_v26  ;;  %v35187_v19 = vld [vmem:[#allocation140_spill] sm:$0xff] }
 0x2d3   :  { %25823 = vmatpush3.xpose.msk.msra.mxu1 %vm614_vm2, %v28819_v54  ;;  %25824 = vmatprep.mubr.msk.f32.mxu1 %vm27602_vm1, %v35021_v52  ;;  %v29121_v32 = vpop.f32.mrf.mxu0  ;;  %v10395_v45 = vsel %vm614_vm2, %v35187_v19, -inf }
 0x2d4   :  { %25829 = vmatprep.mubr.msk.f32.mxu0 %vm27602_vm1, %v35021_v52  ;;  %25837 = vmatprep.subr.mxu0 %v35021_v52  ;;  %v29126_v43 = vpop.f32.mrf.mxu1 }
 0x2d5   :  { %25830 = vmatmul.mubr.msk.f32.vlgmr.msra.gmra.mxu0 %vm614_vm2, %v35114_v2  ;;  %25832 = vmatprep.subr.mxu1 %v35021_v52  ;;  %v25591_v26 = vpop.f32.mrf.mxu0  ;;  %v35116_v2 = vld [vmem:[#allocation69_spill] sm:$0xff]  ;;  %v10419_v53 = vsel %vm614_vm2, %v29126_v43, -inf }
 0x2d6   :  { %25825 = vmatmul.mubr.msk.f32.vlgmr.msra.gmra.mxu1 %vm614_vm2, %v35115_v16  ;;  %25838 = vmatpush3.xpose.msk.msra.mxu0 %vm614_vm2, %v28838_v17  ;;  %v25586_v54 = vpop.f32.mrf.mxu1  ;;  %v35117_v26 = vld [vmem:[#allocation70_spill] sm:$0xff]  ;;  %v35118_v17 = vld [vmem:[#allocation77_spill] sm:$0xff] }
 0x2d7   :  { %25833 = vmatpush3.xpose.msk.msra.mxu1 %vm614_vm2, %v28845_v13  ;;  %25834 = vmatprep.mubr.msk.f32.mxu1 %vm27602_vm1, %v35021_v52  ;;  %v35119_v13 = vld [vmem:[#allocation78_spill] sm:$0xff]  ;;  %v35124_v54 = vld [vmem:[#allocation91_spill] sm:$0xff] }
 0x2d8   :  { %25839 = vmatprep.mubr.msk.f32.mxu0 %vm27602_vm1, %v35021_v52  ;;  %25847 = vmatprep.subr.mxu0 %v35021_v52  ;;  %v35161_v16 = vld [vmem:[#allocation66_spill] sm:$0xff] }
 0x2d9   :  { %25840 = vmatmul.mubr.msk.f32.vlgmr.msra.gmra.mxu0 %vm614_vm2, %v35116_v2  ;;  %25842 = vmatprep.subr.mxu1 %v35021_v52 }
 0x2da   :  { %25835 = vmatmul.mubr.msk.f32.vlgmr.msra.gmra.mxu1 %vm614_vm2, %v35117_v26  ;;  %25848 = vmatpush3.xpose.msk.msra.mxu0 %vm614_vm2, %v28866_v50  ;;  %v35120_v50 = vld [vmem:[#allocation85_spill] sm:$0xff] }
 0x2db   :  { %25843 = vmatpush3.xpose.msk.msra.mxu1 %vm614_vm2, %v28871_v31  ;;  %25844 = vmatprep.mubr.msk.f32.mxu1 %vm27602_vm1, %v35021_v52  ;;  %v35121_v31 = vld [vmem:[#allocation86_spill] sm:$0xff] }
 0x2dc   :  { %25849 = vmatprep.mubr.msk.f32.mxu0 %vm27602_vm1, %v35021_v52  ;;  %25857 = vmatprep.subr.mxu0 %v35021_v52 }
 0x2dd   :  { %25850 = vmatmul.mubr.msk.f32.vlgmr.msra.gmra.mxu0 %vm614_vm2, %v35118_v17  ;;  %25852 = vmatprep.subr.mxu1 %v35021_v52 }
 0x2de   :  { %25845 = vmatmul.mubr.msk.f32.vlgmr.msra.gmra.mxu1 %vm614_vm2, %v35119_v13  ;;  %25858 = vmatpush3.xpose.msk.msra.mxu0 %vm614_vm2, %v28892_v44 }
 0x2df   :  { %25853 = vmatpush3.xpose.msk.msra.mxu1 %vm614_vm2, %v28899_v61  ;;  %25854 = vmatprep.mubr.msk.f32.mxu1 %vm27602_vm1, %v35021_v52 }
 0x2e0   :  { %25859 = vmatprep.mubr.msk.f32.mxu0 %vm27602_vm1, %v35021_v52  ;;  %25867 = vmatprep.subr.mxu0 %v35021_v52 }
 0x2e1   :  { %25860 = vmatmul.mubr.msk.f32.vlgmr.msra.gmra.mxu0 %vm614_vm2, %v35120_v50  ;;  %25862 = vmatprep.subr.mxu1 %v35021_v52 }
 0x2e2   :  { %25855 = vmatmul.mubr.msk.f32.vlgmr.msra.gmra.mxu1 %vm614_vm2, %v35121_v31  ;;  %25868 = vmatpush3.xpose.msk.msra.mxu0 %vm614_vm2, %v28915_v1  ;;  %v35125_v1 = vld [vmem:[#allocation110_spill] sm:$0xff]  ;;  %v35126_v31 = vld [vmem:[#allocation92_spill] sm:$0xff] }
 0x2e3   :  { %25863 = vmatpush3.xpose.msk.msra.mxu1 %vm614_vm2, %v28919_v41  ;;  %25864 = vmatprep.mubr.msk.f32.mxu1 %vm27602_vm1, %v35021_v52  ;;  %v29181_v44 = vpop.f32.mrf.mxu0  ;;  %v10341_v41 = vsel %vm614_vm2, %v35125_v1, -inf }
 0x2e4   :  { %35122 = vst [vmem:[#allocation3_spill] sm:$0xff] %v29181_v44  ;;  %25869 = vmatprep.mubr.msk.f32.mxu0 %vm27602_vm1, %v35021_v52  ;;  %25877 = vmatprep.subr.mxu0 %v35021_v52  ;;  %v29186_v61 = vpop.f32.mrf.mxu1 }
 0x2e5   :  { %35123 = vst [vmem:[#allocation4_spill] sm:$0xff] %v29186_v61  ;;  %25870 = vmatmul.mubr.msk.f32.vlgmr.msra.gmra.mxu0 %vm614_vm2, %v35124_v54  ;;  %25872 = vmatprep.subr.mxu1 %v35021_v52  ;;  %v25601_v50 = vpop.f32.mrf.mxu0  ;;  %v10425_v29 = vsel %vm614_vm2, %v29186_v61, -inf }
 0x2e6   :  { %25865 = vmatmul.mubr.msk.f32.vlgmr.msra.gmra.mxu1 %vm614_vm2, %v35126_v31  ;;  %10342 = vmax.xlane.f32.xlu0 %v10341_v41  ;;  %v25596_v17 = vpop.f32.mrf.mxu1  ;;  %v35127_v50 = vld [vmem:[#allocation97_spill] sm:$0xff] }
 0x2e7   :  { %25873 = vmatpush3.xpose.msk.msra.mxu1 %vm614_vm2, %v28939_v30  ;;  %25878 = vmatpush3.xpose.msk.msra.mxu0 %vm614_vm2, %v28933_v8  ;;  %v35128_v17 = vld [vmem:[#allocation98_spill] sm:$0xff]  ;;  %v35129_v30 = vld [vmem:[#allocation120_spill] sm:$0xff]  ;;  %v35130_v8 = vld [vmem:[#allocation113_spill] sm:$0xff] }
 0x2e8   :  { %25874 = vmatprep.mubr.msk.f32.mxu1 %vm27602_vm1, %v35021_v52  ;;  %25879 = vmatprep.mubr.msk.f32.mxu0 %vm27602_vm1, %v35021_v52  ;;  %v10347_v41 = vsel %vm614_vm2, %v35129_v30, -inf  ;;  %v10344_v54 = vsel %vm614_vm2, %v35130_v8, -inf }
 0x2e9   :  { %25887 = vmatprep.subr.mxu0 %v35021_v52  ;;  %25882 = vmatprep.subr.mxu1 %v35021_v52 }
 0x2ea   :  { %25880 = vmatmul.mubr.msk.f32.vlgmr.msra.gmra.mxu0 %vm614_vm2, %v35127_v50  ;;  %25875 = vmatmul.mubr.msk.f32.vlgmr.msra.gmra.mxu1 %vm614_vm2, %v35128_v17  ;;  %v35131_v50 = vld [vmem:[#allocation103_spill] sm:$0xff] }
 0x2eb   :  { %10348 = vmax.xlane.f32.xlu0 %v10347_v41  ;;  %25888 = vmatpush3.xpose.msk.msra.mxu0 %vm614_vm2, %v28951_v28  ;;  %v35132_v41 = vld [vmem:[#allocation104_spill] sm:$0xff]  ;;  %v35133_v28 = vld [vmem:[#allocation122_spill] sm:$0xff] }
 0x2ec   :  { %10345 = vmax.xlane.f32.xlu1 %v10344_v54  ;;  %25883 = vmatpush3.xpose.msk.msra.mxu1 %vm614_vm2, %v28955_v0  ;;  %v10350_v54 = vsel %vm614_vm2, %v35133_v28, -inf  ;;  %v35134_v0 = vld [vmem:[#allocation124_spill] sm:$0xff] }
 0x2ed   :  { %25884 = vmatprep.mubr.msk.f32.mxu1 %vm27602_vm1, %v35021_v52  ;;  %25889 = vmatprep.mubr.msk.f32.mxu0 %vm27602_vm1, %v35021_v52  ;;  %v10353_v17 = vsel %vm614_vm2, %v35134_v0, -inf }
 0x2ee   :  { %25890 = vmatmul.mubr.msk.f32.vlgmr.msra.gmra.mxu0 %vm614_vm2, %v35131_v50  ;;  %25897 = vmatprep.subr.mxu0 %v35021_v52  ;;  %v29239_v50 = vpop.permute.xlu0 %8061 }
 0x2ef   :  { %25885 = vmatmul.mubr.msk.f32.vlgmr.msra.gmra.mxu1 %vm614_vm2, %v35132_v41  ;;  %25892 = vmatprep.subr.mxu1 %v35021_v52  ;;  %v35135_v41 = vld [vmem:[#allocation109_spill] sm:$0xff] }
 0x2f0   :  { %10351 = vmax.xlane.f32.xlu0 %v10350_v54  ;;  %25898 = vmatpush3.xpose.msk.msra.mxu0 %vm614_vm2, %v28969_v3  ;;  %v29246_v54 = vpop.permute.xlu1 %8137 }
 0x2f1   :  { %10354 = vmax.xlane.f32.xlu1 %v10353_v17  ;;  %25893 = vmatpush3.xpose.msk.msra.mxu1 %vm614_vm2, %v28975_v12  ;;  %v35137_v17 = vld [vmem:[#allocation111_spill] sm:$0xff] }
 0x2f2   :  { %25894 = vmatprep.mubr.msk.f32.mxu1 %vm27602_vm1, %v35021_v52  ;;  %25899 = vmatprep.mubr.msk.f32.mxu0 %vm27602_vm1, %v35021_v52  ;;  %v35138_v12 = vld [vmem:[#allocation127_spill] sm:$0xff] }
 0x2f3   :  { %25900 = vmatmul.mubr.msk.f32.vlgmr.msra.gmra.mxu0 %vm614_vm2, %v35135_v41  ;;  %25907 = vmatprep.subr.mxu0 %v35021_v52  ;;  %v29244_v3 = vpop.f32.mrf.mxu0  ;;  %v10356_v31 = vsel %vm614_vm2, %v35138_v12, -inf  ;;  %v10359_v41 = vsel %vm614_vm2, %v28655_v5, -inf }
 0x2f4   :  { %35136 = vst [vmem:[#allocation110_spill] sm:$0xff] %v29244_v3  ;;  %25895 = vmatmul.mubr.msk.f32.vlgmr.msra.gmra.mxu1 %vm614_vm2, %v35137_v17  ;;  %25902 = vmatprep.subr.mxu1 %v35021_v52  ;;  %v29253_v13 = vpop.f32.mrf.mxu1 }
 0x2f5   :  { %10357 = vmax.xlane.f32.xlu0 %v10356_v31  ;;  %25908 = vmatpush3.xpose.msk.msra.mxu0 %vm614_vm2, %v28987_v59  ;;  %v25611_v2 = vpop.f32.mrf.mxu0  ;;  %v29268_v59 = vpop.permute.xlu0 %8213  ;;  %v35139_v31 = vld [vmem:[#allocation118_spill] sm:$0xff] }
 0x2f6   :  { %10360 = vmax.xlane.f32.xlu1 %v10359_v41  ;;  %25903 = vmatpush3.xpose.msk.msra.mxu1 %vm614_vm2, %v28991_v22  ;;  %v25606_v17 = vpop.f32.mrf.mxu1  ;;  %v35140_v22 = vld [vmem:[#allocation135_spill] sm:$0xff]  ;;  %v29275_v41 = vpop.permute.xlu1 %8289 }
 0x2f7   :  { %25904 = vmatprep.mubr.msk.f32.mxu1 %vm27602_vm1, %v35021_v52  ;;  %25909 = vmatprep.mubr.msk.f32.mxu0 %vm27602_vm1, %v35021_v52  ;;  %v10362_v2 = vsel %vm614_vm2, %v35140_v22, -inf  ;;  %v10365_v17 = vsel %vm614_vm2, %v28691_v56, -inf }
 0x2f8   :  { %25910 = vmatmul.mubr.msk.f32.vlgmr.msra.gmra.mxu0 %vm614_vm2, %v28565_v46  ;;  %25917 = vmatprep.subr.mxu0 %v35021_v52  ;;  %v35141_v46 = vld [vmem:[#allocation126_spill] sm:$0xff] }
 0x2f9   :  { %25905 = vmatmul.mubr.msk.f32.vlgmr.msra.gmra.mxu1 %vm614_vm2, %v35139_v31  ;;  %25912 = vmatprep.subr.mxu1 %v35021_v52 }
 0x2fa   :  { %10363 = vmax.xlane.f32.xlu0 %v10362_v2  ;;  %25918 = vmatpush3.xpose.msk.msra.mxu0 %vm614_vm2, %v29005_v60  ;;  %v10392_v60 = vsel %vm614_vm2, %v28888_v27, -inf  ;;  %v10371_v2 = vsel %vm614_vm2, %v28749_v36, -inf }
 0x2fb   :  { %10366 = vmax.xlane.f32.xlu1 %v10365_v17  ;;  %25913 = vmatpush3.xpose.msk.msra.mxu1 %vm614_vm2, %v29011_v11  ;;  %v29295_v11 = vpop.permute.xlu0 %8365 }
 0x2fc   :  { %25914 = vmatprep.mubr.msk.f32.mxu1 %vm27602_vm1, %v35021_v52  ;;  %25919 = vmatprep.mubr.msk.f32.mxu0 %vm27602_vm1, %v35021_v52 }
 0x2fd   :  { %25920 = vmatmul.mubr.msk.f32.vlgmr.msra.gmra.mxu0 %vm614_vm2, %v35141_v46  ;;  %25927 = vmatprep.subr.mxu0 %v35021_v52  ;;  %v8442_v46 = vpop.permute.xlu1 %8441 }
 0x2fe   :  { %25915 = vmatmul.mubr.msk.f32.vlgmr.msra.gmra.mxu1 %vm614_vm2, %v28615_v49  ;;  %25922 = vmatprep.subr.mxu1 %v35021_v52 }
 0x2ff   :  { %10393 = vmax.xlane.f32.xlu0 %v10392_v60  ;;  %25928 = vmatpush3.xpose.msk.msra.mxu0 %vm614_vm2, %v29023_v62  ;;  %v29301_v17 = vpop.f32.mrf.mxu0  ;;  %v8518_v31 = vpop.permute.xlu0 %8517 }
 0x300   :  { %35142 = vst [vmem:[#allocation120_spill] sm:$0xff] %v29301_v17  ;;  %10372 = vmax.xlane.f32.xlu1 %v10371_v2  ;;  %25923 = vmatpush3.xpose.msk.msra.mxu1 %vm614_vm2, %v29027_v40  ;;  %v29305_v49 = vpop.f32.mrf.mxu1  ;;  %v10398_v40 = vsel %vm614_vm2, %v28929_v21, -inf  ;;  %v35144_v2 = vld [vmem:[#allocation136_spill] sm:$0xff]  ;;  %v10440_v61 = vsel %vm614_vm2, %v29301_v17, -inf }
 0x301   :  { %35143 = vst [vmem:[#allocation113_spill] sm:$0xff] %v29305_v49  ;;  %25924 = vmatprep.mubr.msk.f32.mxu1 %vm27602_vm1, %v35021_v52  ;;  %25929 = vmatprep.mubr.msk.f32.mxu0 %vm27602_vm1, %v35021_v52  ;;  %v25621_v60 = vpop.f32.mrf.mxu0 }
 0x302   :  { %25930 = vmatmul.mubr.msk.f32.vlgmr.msra.gmra.mxu0 %vm614_vm2, %v28653_v48  ;;  %25932 = vmatprep.subr.mxu1 %v35021_v52  ;;  %v25616_v62 = vpop.f32.mrf.mxu1  ;;  %v10377_v60 = vsel %vm614_vm2, %v28788_v58, -inf  ;;  %v35145_v48 = vld [vmem:[#allocation21_spill] sm:$0xff] }
 0x303   :  { %25925 = vmatmul.mubr.msk.f32.vlgmr.msra.gmra.mxu1 %vm614_vm2, %v28657_v34  ;;  %25937 = vmatprep.subr.mxu0 %v35021_v52  ;;  %v8594_v62 = vpop.permute.xlu1 %8593 }
 0x304   :  { %10399 = vmax.xlane.f32.xlu0 %v10398_v40  ;;  %25938 = vmatpush3.xpose.msk.msra.mxu0 %vm614_vm2, %v35144_v2  ;;  %v35146_v40 = vld [vmem:[#allocation27_spill] sm:$0xff]  ;;  %v10383_v2 = vsel %vm614_vm2, %v28840_v55, -inf }
 0x305   :  { %10378 = vmax.xlane.f32.xlu1 %v10377_v60  ;;  %25933 = vmatpush3.xpose.msk.msra.mxu1 %vm614_vm2, %v28693_v10  ;;  %v10368_v10 = vsel %vm614_vm2, %v28699_v15, -inf  ;;  %v8670_v60 = vpop.permute.xlu0 %8669 }
 0x306   :  { %25934 = vmatprep.mubr.msk.f32.mxu1 %vm27602_vm1, %v35021_v52  ;;  %25939 = vmatprep.mubr.msk.f32.mxu0 %vm27602_vm1, %v35021_v52 }
 0x307   :  { %25940 = vmatmul.mubr.msk.f32.vlgmr.msra.gmra.mxu0 %vm614_vm2, %v35145_v48  ;;  %25942 = vmatprep.subr.mxu1 %v35021_v52 }
 0x308   :  { %25935 = vmatmul.mubr.msk.f32.vlgmr.msra.gmra.mxu1 %vm614_vm2, %v35146_v40  ;;  %25947 = vmatprep.subr.mxu0 %v35021_v52 }
 0x309   :  { %10369 = vmax.xlane.f32.xlu0 %v10368_v10  ;;  %25948 = vmatpush3.xpose.msk.msra.mxu0 %vm614_vm2, %v29246_v54  ;;  %v8746_v10 = vpop.permute.xlu1 %8745  ;;  %v10404_v54 = vsel %vm614_vm2, %v28965_v63, -inf }
 0x30a   :  { %10384 = vmax.xlane.f32.xlu1 %v10383_v2  ;;  %25943 = vmatpush3.xpose.msk.msra.mxu1 %vm614_vm2, %v29239_v50 }
 0x30b   :  { %25944 = vmatprep.mubr.msk.f32.mxu1 %vm27602_vm1, %v35021_v52  ;;  %25949 = vmatprep.mubr.msk.f32.mxu0 %vm27602_vm1, %v35021_v52  ;;  %v29347_v48 = vpop.f32.mrf.mxu0 }
 0x30c   :  { %35147 = vst [vmem:[#allocation122_spill] sm:$0xff] %v29347_v48  ;;  %25950 = vmatmul.mubr.msk.f32.vlgmr.msra.gmra.mxu0 %vm614_vm2, %v28021_v24  ;;  %25957 = vmatprep.subr.mxu0 %v35021_v52  ;;  %v29354_v2 = vpop.f32.mrf.mxu1 }
 0x30d   :  { %35148 = vst [vmem:[#allocation124_spill] sm:$0xff] %v29354_v2  ;;  %10405 = vmax.xlane.f32.xlu0 %v10404_v54  ;;  %25945 = vmatmul.mubr.msk.f32.vlgmr.msra.gmra.mxu1 %vm614_vm2, %v28047_v33  ;;  %v25631_v50 = vpop.f32.mrf.mxu0  ;;  %v10410_v54 = vsel %vm614_vm2, %v29001_v57, -inf }
 0x30e   :  { %25952 = vmatprep.subr.mxu1 %v35021_v52  ;;  %25958 = vmatpush3.xpose.msk.msra.mxu0 %vm614_vm2, %v29275_v41  ;;  %v25626_v40 = vpop.f32.mrf.mxu1  ;;  %v8822_v50 = vpop.permute.xlu0 %8821 }
 0x30f   :  { %25953 = vmatpush3.xpose.msk.msra.mxu1 %vm614_vm2, %v29268_v59  ;;  %25954 = vmatprep.mubr.msk.f32.mxu1 %vm27602_vm1, %v35021_v52  ;;  %v8898_v41 = vpop.permute.xlu1 %8897  ;;  %v35149_v40 = vld [vmem:[#allocation42_spill] sm:$0xff] }
 0x310   :  { %25959 = vmatprep.mubr.msk.f32.mxu0 %vm27602_vm1, %v35021_v52  ;;  %25967 = vmatprep.subr.mxu0 %v35021_v52 }
 0x311   :  { %25960 = vmatmul.mubr.msk.f32.vlgmr.msra.gmra.mxu0 %vm614_vm2, %v28099_v51  ;;  %10411 = vmax.xlane.f32.xlu0 %v10410_v54  ;;  %v35151_v54 = vld [vmem:[#allocation137_spill] sm:$0xff] }
 0x312   :  { %25955 = vmatmul.mubr.msk.f32.vlgmr.msra.gmra.mxu1 %vm614_vm2, %v35149_v40  ;;  %25962 = vmatprep.subr.mxu1 %v35021_v52  ;;  %v10374_v51 = vsel %vm614_vm2, %v35151_v54, -inf  ;;  %v8974_v34 = vpop.permute.xlu0 %8973 }
 0x313   :  { %25963 = vmatpush3.xpose.msk.msra.mxu1 %vm614_vm2, %v29295_v11  ;;  %25968 = vmatpush3.xpose.msk.msra.mxu0 %vm614_vm2, %v8442_v46  ;;  %v29378_v59 = vpop.f32.mrf.mxu0  ;;  %v35153_v11 = vld [vmem:[#allocation45_spill] sm:$0xff]  ;;  %v35154_v46 = vld [vmem:[#allocation50_spill] sm:$0xff]  ;;  %v9050_v26 = vpop.permute.xlu1 %9049 }
 0x314   :  { %35150 = vst [vmem:[#allocation127_spill] sm:$0xff] %v29378_v59  ;;  %25964 = vmatprep.mubr.msk.f32.mxu1 %vm27602_vm1, %v35021_v52  ;;  %25969 = vmatprep.mubr.msk.f32.mxu0 %vm27602_vm1, %v35021_v52  ;;  %v29386_v24 = vpop.f32.mrf.mxu1 }
 0x315   :  { %35152 = vst [vmem:[#allocation135_spill] sm:$0xff] %v29386_v24  ;;  %25977 = vmatprep.subr.mxu0 %v35021_v52  ;;  %10375 = vmax.xlane.f32.xlu0 %v10374_v51  ;;  %v25641_v40 = vpop.f32.mrf.mxu0  ;;  %v10416_v51 = vsel %vm614_vm2, %v29059_v42, -inf }
 0x316   :  { %25970 = vmatmul.mubr.msk.f32.vlgmr.msra.gmra.mxu0 %vm614_vm2, %v35153_v11  ;;  %25965 = vmatmul.mubr.msk.f32.vlgmr.msra.gmra.mxu1 %vm614_vm2, %v35154_v46  ;;  %v25636_v33 = vpop.f32.mrf.mxu1  ;;  %v35156_v40 = vld [vmem:[#allocation58_spill] sm:$0xff]  ;;  %v9126_v11 = vpop.permute.xlu0 %9125  ;;  %v35159_v46 = vld [vmem:[#allocation5_spill] sm:$0xff] }
 0x317   :  { %25972 = vmatprep.subr.mxu1 %v35021_v52  ;;  %25978 = vmatpush3.xpose.msk.msra.mxu0 %vm614_vm2, %v8594_v62  ;;  %v35155_v33 = vld [vmem:[#allocation57_spill] sm:$0xff] }
 0x318   :  { %25973 = vmatpush3.xpose.msk.msra.mxu1 %vm614_vm2, %v8518_v31  ;;  %25974 = vmatprep.mubr.msk.f32.mxu1 %vm27602_vm1, %v35021_v52 }
 0x319   :  { %25979 = vmatprep.mubr.msk.f32.mxu0 %vm27602_vm1, %v35021_v52  ;;  %25987 = vmatprep.subr.mxu0 %v35021_v52 }
 0x31a   :  { %25980 = vmatmul.mubr.msk.f32.vlgmr.msra.gmra.mxu0 %vm614_vm2, %v35155_v33  ;;  %10417 = vmax.xlane.f32.xlu0 %v10416_v51  ;;  %v9202_v33 = vpop.permute.xlu1 %9201 }
 0x31b   :  { %25975 = vmatmul.mubr.msk.f32.vlgmr.msra.gmra.mxu1 %vm614_vm2, %v35156_v40  ;;  %25982 = vmatprep.subr.mxu1 %v35021_v52  ;;  %v29408_v31 = vpop.f32.mrf.mxu0  ;;  %v35160_v40 = vld [vmem:[#allocation61_spill] sm:$0xff] }
 0x31c   :  { %35157 = vst [vmem:[#allocation136_spill] sm:$0xff] %v29408_v31  ;;  %25983 = vmatpush3.xpose.msk.msra.mxu1 %vm614_vm2, %v8670_v60  ;;  %25988 = vmatpush3.xpose.msk.msra.mxu0 %vm614_vm2, %v8746_v10  ;;  %v29412_v62 = vpop.f32.mrf.mxu1  ;;  %v10422_v60 = vsel %vm614_vm2, %v29121_v32, -inf }
 0x31d   :  { %35158 = vst [vmem:[#allocation137_spill] sm:$0xff] %v29412_v62  ;;  %11977 = vrot.lane.b32.xlu1 %v35159_v46, %s27607_s30  ;;  %25984 = vmatprep.mubr.msk.f32.mxu1 %vm27602_vm1, %v35021_v52  ;;  %v25651_v51 = vpop.f32.mrf.mxu0  ;;  %v10380_v46 = vsel %vm614_vm2, %v28803_v39, -inf }
 0x31e   :  { %25989 = vmatprep.mubr.msk.f32.mxu0 %vm27602_vm1, %v35021_v52  ;;  %25997 = vmatprep.subr.mxu0 %v35021_v52  ;;  %v25646_v10 = vpop.f32.mrf.mxu1  ;;  %v9278_v51 = vpop.permute.xlu0 %9277 }
 0x31f   :  { %25990 = vmatmul.mubr.msk.f32.vlgmr.msra.gmra.mxu0 %vm614_vm2, %v35160_v40  ;;  %10423 = vmax.xlane.f32.xlu0 %v10422_v60  ;;  %v9354_v10 = vpop.permute.xlu1 %9353 }
 0x320   :  { %25985 = vmatmul.mubr.msk.f32.vlgmr.msra.gmra.mxu1 %vm614_vm2, %v35161_v16  ;;  %25992 = vmatprep.subr.mxu1 %v35021_v52 }
 0x321   :  { %25993 = vmatpush3.xpose.msk.msra.mxu1 %vm614_vm2, %v8822_v50  ;;  %25998 = vmatpush3.xpose.msk.msra.mxu0 %vm614_vm2, %v8898_v41  ;;  %v35163_v50 = vld [vmem:[#allocation74_spill] sm:$0xff] }
 0x322   :  { %25994 = vmatprep.mubr.msk.f32.mxu1 %vm27602_vm1, %v35021_v52  ;;  %25999 = vmatprep.mubr.msk.f32.mxu0 %vm27602_vm1, %v35021_v52 }
 0x323   :  { %26007 = vmatprep.subr.mxu0 %v35021_v52  ;;  %10381 = vmax.xlane.f32.xlu0 %v10380_v46  ;;  %v29437_v60 = vpop.f32.mrf.mxu0 }
 0x324   :  { %35162 = vst [vmem:[#allocation5_spill] sm:$0xff] %v29437_v60  ;;  %26000 = vmatmul.mubr.msk.f32.vlgmr.msra.gmra.mxu0 %vm614_vm2, %v35089_v14  ;;  %25995 = vmatmul.mubr.msk.f32.vlgmr.msra.gmra.mxu1 %vm614_vm2, %v35163_v50  ;;  %v29443_v41 = vpop.f32.mrf.mxu1  ;;  %v10428_v14 = vsel %vm614_vm2, %v29181_v44, -inf }
 0x325   :  { %35164 = vst [vmem:[#allocation144_spill] sm:$0xff] %v29443_v41  ;;  %26002 = vmatprep.subr.mxu1 %v35021_v52  ;;  %26008 = vmatpush3.xpose.msk.msra.mxu0 %vm614_vm2, %v9050_v26  ;;  %v25661_v40 = vpop.f32.mrf.mxu0  ;;  %v9430_v26 = vpop.permute.xlu0 %9429 }
 0x326   :  { %26003 = vmatpush3.xpose.msk.msra.mxu1 %vm614_vm2, %v8974_v34  ;;  %26004 = vmatprep.mubr.msk.f32.mxu1 %vm27602_vm1, %v35021_v52  ;;  %v25656_v46 = vpop.f32.mrf.mxu1  ;;  %v9506_v34 = vpop.permute.xlu1 %9505 }
 0x327   :  { %26009 = vmatprep.mubr.msk.f32.mxu0 %vm27602_vm1, %v35021_v52  ;;  %26017 = vmatprep.subr.mxu0 %v35021_v52 }
 0x328   :  { %26010 = vmatmul.mubr.msk.f32.vlgmr.msra.gmra.mxu0 %vm614_vm2, %v28329_v37  ;;  %10429 = vmax.xlane.f32.xlu0 %v10428_v14  ;;  %v10434_v14 = vsel %vm614_vm2, %v29244_v3, -inf  ;;  %v10431_v3 = vsel %vm614_vm2, %v29253_v13, -inf }
 0x329   :  { %26005 = vmatmul.mubr.msk.f32.vlgmr.msra.gmra.mxu1 %vm614_vm2, %v35091_v6  ;;  %26012 = vmatprep.subr.mxu1 %v35021_v52  ;;  %v9582_v37 = vpop.permute.xlu0 %9581 }
 0x32a   :  { %26013 = vmatpush3.xpose.msk.msra.mxu1 %vm614_vm2, %v9126_v11  ;;  %26018 = vmatpush3.xpose.msk.msra.mxu0 %vm614_vm2, %v9202_v33 }
 0x32b   :  { %26014 = vmatprep.mubr.msk.f32.mxu1 %vm27602_vm1, %v35021_v52  ;;  %26019 = vmatprep.mubr.msk.f32.mxu0 %vm27602_vm1, %v35021_v52  ;;  %v29468_v40 = vpop.f32.mrf.mxu0 }
 0x32c   :  { %35165 = vst [vmem:[#allocation145_spill] sm:$0xff] %v29468_v40  ;;  %26027 = vmatprep.subr.mxu0 %v35021_v52  ;;  %10435 = vmax.xlane.f32.xlu0 %v10434_v14  ;;  %v29471_v46 = vpop.f32.mrf.mxu1  ;;  %v9658_v14 = vpop.permute.xlu1 %9657 }
 0x32d   :  { %35166 = vst [vmem:[#allocation146_spill] sm:$0xff] %v29471_v46  ;;  %26020 = vmatmul.mubr.msk.f32.vlgmr.msra.gmra.mxu0 %vm614_vm2, %v28369_v38  ;;  %26015 = vmatmul.mubr.msk.f32.vlgmr.msra.gmra.mxu1 %vm614_vm2, %v28371_v18  ;;  %v25671_v11 = vpop.f32.mrf.mxu0  ;;  %v35167_v38 = vld [vmem:[#allocation138_spill] sm:$0xff]  ;;  %v35168_v18 = vld [vmem:[#allocation93_spill] sm:$0xff] }
 0x32e   :  { %26022 = vmatprep.subr.mxu1 %v35021_v52  ;;  %26028 = vmatpush3.xpose.msk.msra.mxu0 %vm614_vm2, %v9354_v10  ;;  %v25666_v33 = vpop.f32.mrf.mxu1  ;;  %v10386_v11 = vsel %vm614_vm2, %v35167_v38, -inf  ;;  %v35169_v10 = vld [vmem:[#allocation94_spill] sm:$0xff] }
 0x32f   :  { %26023 = vmatpush3.xpose.msk.msra.mxu1 %vm614_vm2, %v9278_v51  ;;  %26024 = vmatprep.mubr.msk.f32.mxu1 %vm27602_vm1, %v35021_v52 }
 0x330   :  { %26029 = vmatprep.mubr.msk.f32.mxu0 %vm27602_vm1, %v35021_v52  ;;  %26037 = vmatprep.subr.mxu0 %v35021_v52 }
 0x331   :  { %26030 = vmatmul.mubr.msk.f32.vlgmr.msra.gmra.mxu0 %vm614_vm2, %v35168_v18  ;;  %10387 = vmax.xlane.f32.xlu0 %v10386_v11  ;;  %v9734_v11 = vpop.permute.xlu0 %9733 }
 0x332   :  { %26025 = vmatmul.mubr.msk.f32.vlgmr.msra.gmra.mxu1 %vm614_vm2, %v35169_v10  ;;  %26032 = vmatprep.subr.mxu1 %v35021_v52  ;;  %v9810_v10 = vpop.permute.xlu1 %9809 }
 0x333   :  { %26033 = vmatpush3.xpose.msk.msra.mxu1 %vm614_vm2, %v9430_v26  ;;  %26038 = vmatpush3.xpose.msk.msra.mxu0 %vm614_vm2, %v9506_v34  ;;  %v29494_v51 = vpop.f32.mrf.mxu0  ;;  %v35172_v26 = vld [vmem:[#allocation100_spill] sm:$0xff]  ;;  %v35173_v34 = vld [vmem:[#allocation99_spill] sm:$0xff] }
 0x334   :  { %35170 = vst [vmem:[#allocation138_spill] sm:$0xff] %v29494_v51  ;;  %26034 = vmatprep.mubr.msk.f32.mxu1 %vm27602_vm1, %v35021_v52  ;;  %26039 = vmatprep.mubr.msk.f32.mxu0 %vm27602_vm1, %v35021_v52  ;;  %v29500_v33 = vpop.f32.mrf.mxu1 }
 0x335   :  { %35171 = vst [vmem:[#allocation147_spill] sm:$0xff] %v29500_v33  ;;  %26042 = vmatprep.subr.mxu1 %v35021_v52  ;;  %26047 = vmatprep.subr.mxu0 %v35021_v52  ;;  %v25681_v18 = vpop.f32.mrf.mxu0 }
 0x336   :  { %26035 = vmatmul.mubr.msk.f32.vlgmr.msra.gmra.mxu1 %vm614_vm2, %v35172_v26  ;;  %26040 = vmatmul.mubr.msk.f32.vlgmr.msra.gmra.mxu0 %vm614_vm2, %v35173_v34  ;;  %v25676_v6 = vpop.f32.mrf.mxu1  ;;  %v35174_v18 = vld [vmem:[#allocation106_spill] sm:$0xff]  ;;  %v35175_v26 = vld [vmem:[#allocation105_spill] sm:$0xff] }
 0x337   :  { %26043 = vmatpush3.xpose.msk.msra.mxu1 %vm614_vm2, %v9582_v37  ;;  %26048 = vmatpush3.xpose.msk.msra.mxu0 %vm614_vm2, %v9658_v14  ;;  %v9886_v6 = vpop.permute.xlu0 %9885  ;;  %v9962_v14 = vpop.permute.xlu1 %9961 }
 0x338   :  { %26044 = vmatprep.mubr.msk.f32.mxu1 %vm27602_vm1, %v35021_v52  ;;  %26049 = vmatprep.mubr.msk.f32.mxu0 %vm27602_vm1, %v35021_v52 }
 0x339   :  { %26052 = vmatprep.subr.mxu1 %v35021_v52  ;;  %26057 = vmatprep.subr.mxu0 %v35021_v52 }
 0x33a   :  { %26045 = vmatmul.mubr.msk.f32.vlgmr.msra.gmra.mxu1 %vm614_vm2, %v35174_v18  ;;  %26050 = vmatmul.mubr.msk.f32.vlgmr.msra.gmra.mxu0 %vm614_vm2, %v35175_v26  ;;  %v35178_v18 = vld [vmem:[#allocation114_spill] sm:$0xff] }
 0x33b   :  { %26053 = vmatpush3.xpose.msk.msra.mxu1 %vm614_vm2, %v9734_v11  ;;  %26058 = vmatpush3.xpose.msk.msra.mxu0 %vm614_vm2, %v9810_v10  ;;  %v29522_v37 = vpop.f32.mrf.mxu0  ;;  %v35179_v10 = vld [vmem:[#allocation112_spill] sm:$0xff]  ;;  %v10038_v50 = vpop.permute.xlu0 %10037 }
 0x33c   :  { %35176 = vst [vmem:[#allocation148_spill] sm:$0xff] %v29522_v37  ;;  %26054 = vmatprep.mubr.msk.f32.mxu1 %vm27602_vm1, %v35021_v52  ;;  %26059 = vmatprep.mubr.msk.f32.mxu0 %vm27602_vm1, %v35021_v52  ;;  %v29528_v34 = vpop.f32.mrf.mxu1 }
 0x33d   :  { %35177 = vst [vmem:[#allocation149_spill] sm:$0xff] %v29528_v34  ;;  %26062 = vmatprep.subr.mxu1 %v35021_v52  ;;  %26067 = vmatprep.subr.mxu0 %v35021_v52  ;;  %v25691_v26 = vpop.f32.mrf.mxu0 }
 0x33e   :  { %26055 = vmatmul.mubr.msk.f32.vlgmr.msra.gmra.mxu1 %vm614_vm2, %v35178_v18  ;;  %26060 = vmatmul.mubr.msk.f32.vlgmr.msra.gmra.mxu0 %vm614_vm2, %v35179_v10  ;;  %v25686_v11 = vpop.f32.mrf.mxu1  ;;  %v10114_v26 = vpop.permute.xlu1 %10113  ;;  %v35180_v18 = vld [vmem:[#allocation121_spill] sm:$0xff] }
 0x33f   :  { %26063 = vmatpush3.xpose.msk.msra.mxu1 %vm614_vm2, %v9886_v6  ;;  %26068 = vmatpush3.xpose.msk.msra.mxu0 %vm614_vm2, %v9962_v14  ;;  %v35181_v11 = vld [vmem:[#allocation119_spill] sm:$0xff]  ;;  %v10190_v47 = vpop.permute.xlu0 %10189 }
 0x340   :  { %26069 = vmatprep.mubr.msk.f32.mxu0 %vm27602_vm1, %v35021_v52  ;;  %26064 = vmatprep.mubr.msk.f32.mxu1 %vm27602_vm1, %v35021_v52  ;;  %v35182_v6 = vld [vmem:[#allocation139_spill] sm:$0xff] }
 0x341   :  { %26072 = vmatprep.subr.mxu1 %v35021_v52  ;;  %26077 = vmatprep.subr.mxu0 %v35021_v52  ;;  %v10389_v14 = vsel %vm614_vm2, %v35182_v6, -inf }
 0x342   :  { %26065 = vmatmul.mubr.msk.f32.vlgmr.msra.gmra.mxu1 %vm614_vm2, %v35180_v18  ;;  %26070 = vmatmul.mubr.msk.f32.vlgmr.msra.gmra.mxu0 %vm614_vm2, %v35181_v11  ;;  %v10266_v11 = vpop.permute.xlu1 %10265  ;;  %v35186_v18 = vld [vmem:[#allocation129_spill] sm:$0xff] }
 0x343   :  { %26073 = vmatpush3.xpose.msk.msra.mxu1 %vm614_vm2, %v10038_v50  ;;  %26078 = vmatpush3.xpose.msk.msra.mxu0 %vm614_vm2, %v10114_v26  ;;  %v29552_v10 = vpop.f32.mrf.mxu0  ;;  %v35185_v26 = vld [vmem:[#allocation130_spill] sm:$0xff] }
 0x344   :  { %35183 = vst [vmem:[#allocation139_spill] sm:$0xff] %v29552_v10  ;;  %10390 = vmax.xlane.f32.xlu1 %v10389_v14  ;;  %26079 = vmatprep.mubr.msk.f32.mxu0 %vm27602_vm1, %v35021_v52  ;;  %v29556_v16 = vpop.f32.mrf.mxu1 }
 0x345   :  { %35184 = vst [vmem:[#allocation150_spill] sm:$0xff] %v29556_v16  ;;  %26074 = vmatprep.mubr.msk.f32.mxu1 %vm27602_vm1, %v35021_v52  ;;  %26082 = vmatprep.subr.mxu1 %v35021_v52  ;;  %v25701_v50 = vpop.f32.mrf.mxu0 }
 0x346   :  { %26075 = vmatmul.mubr.msk.f32.vlgmr.msra.gmra.mxu1 %vm614_vm2, %v35185_v26  ;;  %26080 = vmatmul.mubr.msk.f32.vlgmr.msra.gmra.mxu0 %vm614_vm2, %v35186_v18  ;;  %v25696_v14 = vpop.f32.mrf.mxu1  ;;  %v35188_v50 = vld [vmem:[#allocation6_spill] sm:$0xff] }
 0x347   :  { %26087 = vmatprep.subr.mxu0 %v35021_v52  ;;  %26083 = vmatpush3.xpose.msk.msra.mxu1 %vm614_vm2, %v10190_v47  ;;  %v11750_v14 = vpop.permute.xlu0 %11749 }
 0x348   :  { %26088 = vmatpush3.xpose.msk.msra.mxu0 %vm614_vm2, %v10266_v11  ;;  %10396 = vmax.xlane.f32.xlu1 %v10395_v45  ;;  %v11826_v45 = vpop.permute.xlu1 %11825  ;;  %v35190_v11 = vld [vmem:[#allocation141_spill] sm:$0xff] }
 0x349   :  { %11901 = vrot.lane.b32.xlu0 %v35188_v50, %s27607_s30  ;;  %26084 = vmatprep.mubr.msk.f32.mxu1 %vm27602_vm1, %v35021_v52  ;;  %v10401_v50 = vsel %vm614_vm2, %v35190_v11, -inf }
 0x34a   :  { %26089 = vmatprep.mubr.msk.f32.mxu0 %vm27602_vm1, %v35021_v52  ;;  %26085 = vmatmul.mubr.msk.f32.vlgmr.msra.gmra.mxu1 %vm614_vm2, %v29045_v7 }
 0x34b   :  { %26090 = vmatmul.mubr.msk.f32.vlgmr.msra.gmra.mxu0 %vm614_vm2, %v29040_v35  ;;  %26092 = vmatprep.subr.mxu1 %v35021_v52  ;;  %v29581_v47 = vpop.f32.mrf.mxu0 }
 0x34c   :  { %35189 = vst [vmem:[#allocation140_spill] sm:$0xff] %v29581_v47  ;;  %26097 = vmatprep.subr.mxu0 %v35021_v52  ;;  %26093 = vmatpush3.msra.mxu1 %v11750_v14  ;;  %v29586_v18 = vpop.f32.mrf.mxu1  ;;  %v10407_v14 = vsel %vm614_vm2, %v29007_v20, -inf }
 0x34d   :  { %35191 = vst [vmem:[#allocation6_spill] sm:$0xff] %v29586_v18  ;;  %26098 = vmatpush3.msra.mxu0 %v11826_v45  ;;  %10402 = vmax.xlane.f32.xlu1 %v10401_v50  ;;  %v25711_v7 = vpop.f32.mrf.mxu0 }
 0x34e   :  { %v25706_v26 = vpop.f32.mrf.mxu1  ;;  %26094 = vmatprep.mubr.msk.f32.mxu1 %vm27602_vm1, %v35021_v52  ;;  %26102 = vmatprep.subr.mxu1 %v35021_v52  ;;  %v10413_v7 = vsel %vm614_vm2, %v29064_v23, -inf }
 0x34f   :  { %26099 = vmatprep.mubr.msk.f32.mxu0 %vm27602_vm1, %v35021_v52  ;;  %26107 = vmatprep.subr.mxu0 %v35021_v52 }
 0x351   :  { %10408 = vmax.xlane.f32.xlu1 %v10407_v14 }
 0x353   :  { %v29596_v35 = vpop.f32.mrf.mxu0 }
 0x354   :  { %35192 = vst [vmem:[#allocation141_spill] sm:$0xff] %v29596_v35  ;;  %v29600_v26 = vpop.f32.mrf.mxu1 }
 0x355   :  { %35193 = vst [vmem:[#allocation151_spill] sm:$0xff] %v29600_v26  ;;  %10414 = vmax.xlane.f32.xlu1 %v10413_v7  ;;  %v25721_v45 = vpop.f32.mrf.mxu0 }
 0x356   :  { %v25716_v50 = vpop.f32.mrf.mxu1  ;;  %v10437_v45 = vsel %vm614_vm2, %v29305_v49, -inf }
 0x359   :  { %10420 = vmax.xlane.f32.xlu1 %v10419_v53 }
 0x35b   :  { %v29604_v25 = vpop.f32.mrf.mxu0 }
 0x35c   :  { %35194 = vst [vmem:[#allocation152_spill] sm:$0xff] %v29604_v25  ;;  %v29608_v14 = vpop.f32.mrf.mxu1 }
 0x35d   :  { %35195 = vst [vmem:[#allocation153_spill] sm:$0xff] %v29608_v14  ;;  %10426 = vmax.xlane.f32.xlu1 %v10425_v29  ;;  %v25731_v4 = vpop.f32.mrf.mxu0 }
 0x35e   :  { %v25726_v9 = vpop.f32.mrf.mxu1  ;;  %v10446_v4 = vsel %vm614_vm2, %v29347_v48, -inf }
 0x35f   :  { %v10443_v9 = vsel %vm614_vm2, %v29354_v2, -inf }
 0x361   :  { %10432 = vmax.xlane.f32.xlu1 %v10431_v3  ;;  %v10449_v3 = vsel %vm614_vm2, %v29386_v24, -inf }
 0x363   :  { %v29612_v7 = vpop.f32.mrf.mxu0 }
 0x364   :  { %35196 = vst [vmem:[#allocation154_spill] sm:$0xff] %v29612_v7  ;;  %v29616_v53 = vpop.f32.mrf.mxu1 }
 0x365   :  { %35197 = vst [vmem:[#allocation155_spill] sm:$0xff] %v29616_v53  ;;  %10438 = vmax.xlane.f32.xlu1 %v10437_v45  ;;  %v25741_v50 = vpop.f32.mrf.mxu0 }
 0x366   :  { %v25736_v44 = vpop.f32.mrf.mxu1 }
 0x368   :  { %10441 = vmax.xlane.f32.xlu0 %v10440_v61  ;;  %v10452_v61 = vsel %vm614_vm2, %v29378_v59, -inf }
 0x369   :  { %10444 = vmax.xlane.f32.xlu1 %v10443_v9  ;;  %v10455_v9 = vsel %vm614_vm2, %v29412_v62, -inf }
 0x36b   :  { %v29624_v29 = vpop.f32.mrf.mxu0 }
 0x36c   :  { %35198 = vst [vmem:[#allocation156_spill] sm:$0xff] %v29624_v29  ;;  %10447 = vmax.xlane.f32.xlu0 %v10446_v4  ;;  %v29628_v45 = vpop.f32.mrf.mxu1  ;;  %v10458_v4 = vsel %vm614_vm2, %v29408_v31, -inf  ;;  %v10467_v31 = vsel %vm614_vm2, %v29471_v46, -inf }
 0x36d   :  { %35199 = vst [vmem:[#allocation157_spill] sm:$0xff] %v29628_v45  ;;  %10450 = vmax.xlane.f32.xlu1 %v10449_v3  ;;  %v25751_v44 = vpop.f32.mrf.mxu0  ;;  %v10461_v3 = vsel %vm614_vm2, %v29443_v41, -inf  ;;  %v10470_v41 = vsel %vm614_vm2, %v29468_v40, -inf }
 0x36e   :  { %v25746_v50 = vpop.f32.mrf.mxu1 }
 0x36f   :  { %v10343_v17 = vpop.xlane.xlu0 %10342 }
 0x370   :  { %10453 = vmax.xlane.f32.xlu0 %v10452_v61  ;;  %v10725_v61 = vsub.f32 %v35125_v1, %v10343_v17  ;;  %v10473_v1 = vsel %vm614_vm2, %v29500_v33, -inf }
 0x371   :  { %10456 = vmax.xlane.f32.xlu1 %v10455_v9  ;;  %v10464_v9 = vsel %vm614_vm2, %v29437_v60, -inf }
 0x372   :  { %v10853_v62 = vmul.f32 1.442695, %v10725_v61 }
 0x373   :  { %v29636_v48 = vpop.f32.mrf.mxu0 }
 0x374   :  { %35200 = vst [vmem:[#allocation158_spill] sm:$0xff] %v29636_v48  ;;  %10459 = vmax.xlane.f32.xlu0 %v10458_v4  ;;  %v10349_v44 = vpop.xlane.xlu0 %10348  ;;  %v29640_v50 = vpop.f32.mrf.mxu1  ;;  %26926 = vpow2.f32 %v10853_v62  ;;  %v10482_v62 = vsel %vm614_vm2, %v29522_v37, -inf }
 0x375   :  { %35201 = vst [vmem:[#allocation159_spill] sm:$0xff] %v29640_v50  ;;  %10462 = vmax.xlane.f32.xlu1 %v10461_v3  ;;  %v25761_v59 = vpop.f32.mrf.mxu0 }
 0x376   :  { %v25756_v24 = vpop.f32.mrf.mxu1 }
 0x377   :  { %v10346_v24 = vpop.xlane.xlu1 %10345 }
 0x378   :  { %10465 = vmax.xlane.f32.xlu0 %v10464_v9  ;;  %v10726_v61 = vsub.f32 %v35130_v8, %v10346_v24  ;;  %v10485_v8 = vsel %vm614_vm2, %v29556_v16, -inf }
 0x379   :  { %10468 = vmax.xlane.f32.xlu1 %v10467_v31  ;;  %v10352_v4 = vpop.xlane.xlu0 %10351  ;;  %v10476_v31 = vsel %vm614_vm2, %v29494_v51, -inf  ;;  %v10727_v51 = vsub.f32 %v35129_v30, %v10349_v44  ;;  %v10491_v30 = vsel %vm614_vm2, %v29586_v18, -inf }
 0x37b   :  { %v29649_v2 = vpop.f32.mrf.mxu0 }
 0x37c   :  { %35202 = vst [vmem:[#allocation160_spill] sm:$0xff] %v29649_v2  ;;  %10471 = vmax.xlane.f32.xlu0 %v10470_v41  ;;  %v29653_v17 = vpop.f32.mrf.mxu1  ;;  %v10479_v41 = vsel %vm614_vm2, %v29528_v34, -inf }
 0x37d   :  { %35203 = vst [vmem:[#allocation161_spill] sm:$0xff] %v29653_v17  ;;  %10474 = vmax.xlane.f32.xlu1 %v10473_v1  ;;  %v25771_v59 = vpop.f32.mrf.mxu0 }
 0x37e   :  { %v10358_v3 = vpop.xlane.xlu0 %10357  ;;  %v25766_v9 = vpop.f32.mrf.mxu1  ;;  %v10855_v59 = vmul.f32 1.442695, %v10726_v61  ;;  %v10488_v61 = vsel %vm614_vm2, %v29552_v10, -inf }
 0x37f   :  { %v29658_v40 = vpop.f32.mrf.mxu0 }
 0x380   :  { %35204 = vst [vmem:[#allocation162_spill] sm:$0xff] %v29658_v40  ;;  %10477 = vmax.xlane.f32.xlu0 %v10476_v31  ;;  %v29662_v33 = vpop.f32.mrf.mxu1  ;;  %26928 = vpow2.f32 %v10855_v59 }
 0x381   :  { %35205 = vst [vmem:[#allocation163_spill] sm:$0xff] %v29662_v33  ;;  %10480 = vmax.xlane.f32.xlu1 %v10479_v41  ;;  %v25781_v46 = vpop.f32.mrf.mxu0 }
 0x382   :  { %v25776_v1 = vpop.f32.mrf.mxu1  ;;  %v10728_v46 = vsub.f32 %v35133_v28, %v10352_v4  ;;  %v10730_v28 = vsub.f32 %v35138_v12, %v10358_v3  ;;  %v10494_v4 = vsel %vm614_vm2, %v29581_v47, -inf }
 0x383   :  { %v10364_v9 = vpop.xlane.xlu0 %10363  ;;  %v10857_v1 = vmul.f32 1.442695, %v10727_v51 }
 0x384   :  { %10483 = vmax.xlane.f32.xlu0 %v10482_v62  ;;  %v29669_v24 = vpop.f32.mrf.mxu1  ;;  %v29671_v31 = vpop.f32.mrf.mxu0  ;;  %v10859_v59 = vmul.f32 1.442695, %v10728_v46  ;;  %v10863_v12 = vmul.f32 1.442695, %v10730_v28  ;;  %v10732_v46 = vsub.f32 %v35140_v22, %v10364_v9  ;;  %v10506_v28 = vsel %vm614_vm2, %v29604_v25, -inf }
 0x385   :  { %35206 = vst [vmem:[#allocation164_spill] sm:$0xff] %v29669_v24  ;;  %10486 = vmax.xlane.f32.xlu1 %v10485_v8  ;;  %35207 = vst [vmem:[#allocation165_spill] sm:$0xff] %v29671_v31  ;;  %v10355_v62 = vpop.xlane.xlu1 %10354  ;;  %26930 = vpow2.f32 %v10857_v1  ;;  %v10500_v1 = vsel %vm614_vm2, %v29596_v35, -inf }
 0x386   :  { %v25786_v34 = vpop.f32.mrf.mxu1  ;;  %v25791_v41 = vpop.f32.mrf.mxu0  ;;  %26932 = vpow2.f32 %v10859_v59  ;;  %v10867_v47 = vmul.f32 1.442695, %v10732_v46 }
 0x387   :  { %v29682_v34 = vpop.eup %26926  ;;  %26934 = vpow2.f32 %v10863_v12 }
 0x388   :  { %10489 = vmax.xlane.f32.xlu0 %v10488_v61  ;;  %v10394_v44 = vpop.xlane.xlu0 %10393  ;;  %v10497_v61 = vsel %vm614_vm2, %v29600_v26, -inf  ;;  %v11109_v18 = vsel %vm614_vm2, %v29682_v34, 0.0  ;;  %26936 = vpow2.f32 %v10867_v47 }
 0x389   :  { %10492 = vmax.xlane.f32.xlu1 %v10491_v30  ;;  %v29678_v16 = vpop.f32.mrf.mxu1  ;;  %v29680_v8 = vpop.f32.mrf.mxu0  ;;  %v10742_v59 = vsub.f32 %v28888_v27, %v10394_v44 }
 0x38a   :  { %35208 = vst [vmem:[#allocation166_spill] sm:$0xff] %v29678_v16  ;;  %v10361_v3 = vpop.xlane.xlu1 %10360 }
 0x38b   :  { %v25796_v51 = vpop.f32.mrf.mxu1  ;;  %v25801_v41 = vpop.f32.mrf.mxu0  ;;  %v10887_v27 = vmul.f32 1.442695, %v10742_v59 }
 0x38c   :  { %10495 = vmax.xlane.f32.xlu0 %v10494_v4 }
 0x38d   :  { %10498 = vmax.xlane.f32.xlu1 %v10497_v61  ;;  %v29689_v30 = vpop.xlane.xlu0 %10399  ;;  %v29698_v4 = vpop.f32.mrf.mxu0  ;;  %26938 = vpow2.f32 %v10887_v27 }
 0x38e   :  { %v29693_v10 = vpop.f32.mrf.mxu1  ;;  %v29707_v9 = vpop.eup %26928 }
 0x38f   :  { %v25811_v61 = vpop.f32.mrf.mxu0  ;;  %v11112_v44 = vsel %vm614_vm2, %v29707_v9, 0.0 }
 0x390   :  { %10501 = vmax.xlane.f32.xlu0 %v10500_v1  ;;  %v25806_v51 = vpop.f32.mrf.mxu1  ;;  %v10503_v1 = vsel %vm614_vm2, %v29608_v14, -inf }
 0x391   :  { %11110 = vadd.xlane.f32.xlu1 %v11109_v18  ;;  %v29705_v22 = vpop.f32.mrf.mxu0  ;;  %v10367_v51 = vpop.xlane.xlu1 %10366 }
 0x392   :  { %v10370_v41 = vpop.xlane.xlu0 %10369  ;;  %v29700_v26 = vpop.f32.mrf.mxu1  ;;  %35210 = vst [vmem:[#allocation168_spill] sm:$0xff] %v29705_v22 }
 0x393   :  { %35209 = vst [vmem:[#allocation167_spill] sm:$0xff] %v29700_v26  ;;  %v25821_v61 = vpop.f32.mrf.mxu0  ;;  %v10734_v46 = vsub.f32 %v28699_v15, %v10370_v41  ;;  %v10512_v15 = vsel %vm614_vm2, %v29612_v7, -inf }
 0x394   :  { %10507 = vmax.xlane.f32.xlu0 %v10506_v28  ;;  %v25816_v18 = vpop.f32.mrf.mxu1  ;;  %v10729_v28 = vsub.f32 %v35134_v0, %v10355_v62  ;;  %v29723_v61 = vpop.eup %26930 }
 0x395   :  { %10504 = vmax.xlane.f32.xlu1 %v10503_v1  ;;  %v29718_v25 = vpop.f32.mrf.mxu0  ;;  %v10509_v1 = vsel %vm614_vm2, %v29616_v53, -inf  ;;  %v10871_v37 = vmul.f32 1.442695, %v10734_v46  ;;  %v29733_v0 = vpop.eup %26932 }
 0x396   :  { %v29711_v35 = vpop.xlane.xlu0 %10405  ;;  %v29713_v12 = vpop.f32.mrf.mxu1  ;;  %35212 = vst [vmem:[#allocation170_spill] sm:$0xff] %v29718_v25  ;;  %v10861_v62 = vmul.f32 1.442695, %v10729_v28  ;;  %v11118_v7 = vsel %vm614_vm2, %v29733_v0, 0.0 }
 0x397   :  { %35211 = vst [vmem:[#allocation169_spill] sm:$0xff] %v29713_v12  ;;  %v25831_v14 = vpop.f32.mrf.mxu0  ;;  %26940 = vpow2.f32 %v10871_v37 }
 0x398   :  { %11113 = vadd.xlane.f32.xlu0 %v11112_v44  ;;  %v25826_v18 = vpop.f32.mrf.mxu1  ;;  %v10731_v44 = vsub.f32 %v28655_v5, %v10361_v3  ;;  %v11115_v14 = vsel %vm614_vm2, %v29723_v61, 0.0  ;;  %v29745_v5 = vpop.eup %26934  ;;  %26942 = vpow2.f32 %v10861_v62 }
 0x399   :  { %10510 = vmax.xlane.f32.xlu1 %v10509_v1  ;;  %v29731_v41 = vpop.f32.mrf.mxu0  ;;  %v10373_v18 = vpop.xlane.xlu1 %10372 }
 0x39a   :  { %v29725_v47 = vpop.xlane.xlu0 %10411  ;;  %v29727_v59 = vpop.f32.mrf.mxu1  ;;  %35214 = vst [vmem:[#allocation172_spill] sm:$0xff] %v29731_v41  ;;  %v10865_v3 = vmul.f32 1.442695, %v10731_v44 }
 0x39b   :  { %35213 = vst [vmem:[#allocation171_spill] sm:$0xff] %v29727_v59  ;;  %v25841_v53 = vpop.f32.mrf.mxu0 }
 0x39c   :  { %10513 = vmax.xlane.f32.xlu0 %v10512_v15  ;;  %v25836_v1 = vpop.f32.mrf.mxu1  ;;  %v10733_v15 = vsub.f32 %v28691_v56, %v10367_v51  ;;  %v10518_v53 = vsel %vm614_vm2, %v29624_v29, -inf  ;;  %v29758_v56 = vpop.eup %26936  ;;  %v10735_v51 = vsub.f32 %v28749_v36, %v10373_v18  ;;  %v10524_v18 = vsel %vm614_vm2, %v29636_v48, -inf }
 0x39d   :  { %11116 = vadd.xlane.f32.xlu1 %v11115_v14  ;;  %v29743_v28 = vpop.f32.mrf.mxu0  ;;  %v29769_v29 = vpop.eup %26938 }
 0x39e   :  { %v10376_v27 = vpop.xlane.xlu0 %10375  ;;  %v29738_v46 = vpop.f32.mrf.mxu1  ;;  %35216 = vst [vmem:[#allocation174_spill] sm:$0xff] %v29743_v28  ;;  %35221 = vst [vmem:[#allocation179_spill] sm:$0xff] %v29769_v29 }
 0x39f   :  { %35215 = vst [vmem:[#allocation173_spill] sm:$0xff] %v29738_v46  ;;  %v10736_v60 = vsub.f32 %v35151_v54, %v10376_v27  ;;  %v25851_v1 = vpop.f32.mrf.mxu0  ;;  %v10379_v46 = vpop.xlane.xlu1 %10378  ;;  %v11124_v54 = vsel %vm614_vm2, %v29745_v5, 0.0 }
 0x3a0   :  { %11119 = vadd.xlane.f32.xlu0 %v11118_v7  ;;  %v25846_v14 = vpop.f32.mrf.mxu1  ;;  %v10869_v7 = vmul.f32 1.442695, %v10733_v15  ;;  %v10737_v36 = vsub.f32 %v28788_v58, %v10379_v46 }
 0x3a1   :  { %10519 = vmax.xlane.f32.xlu1 %v10518_v53  ;;  %v10875_v37 = vmul.f32 1.442695, %v10736_v60  ;;  %v29756_v62 = vpop.f32.mrf.mxu0  ;;  %v10515_v60 = vsel %vm614_vm2, %v29628_v45, -inf  ;;  %v11160_v45 = vsel %vm614_vm2, %v29769_v29, 0.0 }
 0x3a2   :  { %v29750_v41 = vpop.f32.mrf.mxu1  ;;  %35218 = vst [vmem:[#allocation176_spill] sm:$0xff] %v29756_v62  ;;  %v10877_v58 = vmul.f32 1.442695, %v10737_v36 }
 0x3a3   :  { %35217 = vst [vmem:[#allocation175_spill] sm:$0xff] %v29750_v41  ;;  %26944 = vpow2.f32 %v10875_v37  ;;  %v29754_v27 = vpop.xlane.xlu0 %10417  ;;  %v25861_v53 = vpop.f32.mrf.mxu0  ;;  %v11130_v37 = vsel %vm614_vm2, %v29758_v56, 0.0 }
 0x3a4   :  { %26946 = vpow2.f32 %v10865_v3  ;;  %11125 = vadd.xlane.f32.xlu0 %v11124_v54  ;;  %v25856_v44 = vpop.f32.mrf.mxu1  ;;  %v10873_v3 = vmul.f32 1.442695, %v10735_v51  ;;  %v10521_v51 = vsel %vm614_vm2, %v29640_v50, -inf }
 0x3a5   :  { %10516 = vmax.xlane.f32.xlu1 %v10515_v60  ;;  %v29767_v1 = vpop.f32.mrf.mxu0  ;;  %26948 = vpow2.f32 %v10869_v7  ;;  %v10385_v60 = vpop.xlane.xlu1 %10384 }
 0x3a6   :  { %v29763_v14 = vpop.f32.mrf.mxu1  ;;  %35220 = vst [vmem:[#allocation178_spill] sm:$0xff] %v29767_v1  ;;  %v29782_v7 = vpop.eup %26940  ;;  %26950 = vpow2.f32 %v10873_v3  ;;  %v10739_v46 = vsub.f32 %v28840_v55, %v10385_v60 }
 0x3a7   :  { %35219 = vst [vmem:[#allocation177_spill] sm:$0xff] %v29763_v14  ;;  %v25871_v44 = vpop.f32.mrf.mxu0  ;;  %26952 = vpow2.f32 %v10877_v58 }
 0x3a8   :  { %11131 = vadd.xlane.f32.xlu0 %v11130_v37  ;;  %v29774_v15 = vpop.xlane.xlu0 %10423  ;;  %v25866_v54 = vpop.f32.mrf.mxu1 }
 0x3a9   :  { %10525 = vmax.xlane.f32.xlu1 %v10524_v18  ;;  %v29787_v54 = vpop.eup %26942  ;;  %v29851_v41 = vpop.permute.xlu1 %11977 }
 0x3aa   :  { %v29776_v53 = vpop.f32.mrf.mxu1  ;;  %v29780_v1 = vpop.f32.mrf.mxu0  ;;  %v11121_v60 = vsel %vm614_vm2, %v29787_v54, 0.0 }
 0x3ab   :  { %35222 = vst [vmem:[#allocation180_spill] sm:$0xff] %v29776_v53  ;;  %35223 = vst [vmem:[#allocation181_spill] sm:$0xff] %v29780_v1  ;;  %v11136_v1 = vsel %vm614_vm2, %v29782_v7, 0.0 }
 0x3ac   :  { %11161 = vadd.xlane.f32.xlu0 %v11160_v45  ;;  %v10382_v37 = vpop.xlane.xlu0 %10381  ;;  %v25876_v18 = vpop.f32.mrf.mxu1  ;;  %v10881_v45 = vmul.f32 1.442695, %v10739_v46 }
 0x3ad   :  { %10522 = vmax.xlane.f32.xlu1 %v10521_v51  ;;  %v10738_v44 = vsub.f32 %v28803_v39, %v10382_v37  ;;  %v25881_v48 = vpop.f32.mrf.mxu0 }
 0x3af   :  { %v10879_v53 = vmul.f32 1.442695, %v10738_v44  ;;  %v29792_v3 = vpop.f32.mrf.mxu1  ;;  %v29794_v36 = vpop.f32.mrf.mxu0 }
 0x3b0   :  { %35224 = vst [vmem:[#allocation182_spill] sm:$0xff] %v29792_v3  ;;  %35225 = vst [vmem:[#allocation183_spill] sm:$0xff] %v29794_v36  ;;  %v29796_v55 = vpop.eup %26944  ;;  %11137 = vadd.xlane.f32.xlu0 %v11136_v1 }
 0x3b1   :  { %v29800_v51 = vpop.eup %26946  ;;  %26954 = vpow2.f32 %v10879_v53  ;;  %11122 = vadd.xlane.f32.xlu1 %v11121_v60  ;;  %v29802_v48 = vpop.xlane.xlu0 %10429  ;;  %v11142_v39 = vsel %vm614_vm2, %v29796_v55, 0.0 }
 0x3b2   :  { %v25886_v37 = vpop.f32.mrf.mxu1  ;;  %v25891_v18 = vpop.f32.mrf.mxu0  ;;  %26956 = vpow2.f32 %v10881_v45  ;;  %v11127_v58 = vsel %vm614_vm2, %v29800_v51, 0.0 }
 0x3b3   :  { %v29812_v44 = vpop.eup %26948 }
 0x3b4   :  { %11143 = vadd.xlane.f32.xlu0 %v11142_v39  ;;  %v29808_v1 = vpop.f32.mrf.mxu1  ;;  %v29810_v46 = vpop.f32.mrf.mxu0  ;;  %v11133_v37 = vsel %vm614_vm2, %v29812_v44, 0.0 }
 0x3b5   :  { %35226 = vst [vmem:[#allocation184_spill] sm:$0xff] %v29808_v1  ;;  %35227 = vst [vmem:[#allocation185_spill] sm:$0xff] %v29810_v46  ;;  %11128 = vadd.xlane.f32.xlu1 %v11127_v58  ;;  %v29814_v53 = vpop.xlane.xlu0 %10435  ;;  %v29820_v45 = vpop.eup %26950 }
 0x3b6   :  { %v25896_v60 = vpop.f32.mrf.mxu1  ;;  %v25901_v50 = vpop.f32.mrf.mxu0  ;;  %v11139_v58 = vsel %vm614_vm2, %v29820_v45, 0.0 }
 0x3b7   :  { %v29827_v60 = vpop.eup %26952 }
 0x3b8   :  { %v29818_v18 = vpop.f32.mrf.mxu0 }
 0x3b9   :  { %35228 = vst [vmem:[#allocation186_spill] sm:$0xff] %v29818_v18  ;;  %11134 = vadd.xlane.f32.xlu1 %v11133_v37  ;;  %v29822_v39 = vpop.f32.mrf.mxu1 }
 0x3ba   :  { %35229 = vst [vmem:[#allocation187_spill] sm:$0xff] %v29822_v39  ;;  %v10388_v1 = vpop.xlane.xlu0 %10387  ;;  %v25911_v36 = vpop.f32.mrf.mxu0 }
 0x3bb   :  { %v10740_v46 = vsub.f32 %v35167_v38, %v10388_v1  ;;  %v25906_v3 = vpop.f32.mrf.mxu1  ;;  %v11145_v38 = vsel %vm614_vm2, %v29827_v60, 0.0 }
 0x3bd   :  { %v10883_v50 = vmul.f32 1.442695, %v10740_v46  ;;  %11140 = vadd.xlane.f32.xlu1 %v11139_v58  ;;  %v29829_v14 = vpop.f32.mrf.mxu0 }
 0x3be   :  { %35230 = vst [vmem:[#allocation188_spill] sm:$0xff] %v29829_v14  ;;  %v29831_v18 = vpop.eup %26954  ;;  %v29833_v62 = vpop.f32.mrf.mxu1 }
 0x3bf   :  { %35231 = vst [vmem:[#allocation189_spill] sm:$0xff] %v29833_v62  ;;  %26958 = vpow2.f32 %v10883_v50  ;;  %v11148_v36 = vsel %vm614_vm2, %v29831_v18, 0.0  ;;  %v25921_v37 = vpop.f32.mrf.mxu0  ;;  %v29839_v1 = vpop.eup %26956 }
 0x3c0   :  { %11149 = vadd.xlane.f32.xlu0 %v11148_v36  ;;  %v25916_v3 = vpop.f32.mrf.mxu1  ;;  %35232 = vst [vmem:[#allocation190_spill] sm:$0xff] %v29839_v1  ;;  %v11151_v14 = vsel %vm614_vm2, %v29839_v1, 0.0 }
 0x3c1   :  { %11146 = vadd.xlane.f32.xlu1 %v11145_v38 }
 0x3c2   :  { %v29841_v46 = vpop.f32.mrf.mxu0 }
 0x3c3   :  { %35233 = vst [vmem:[#allocation191_spill] sm:$0xff] %v29841_v46  ;;  %v29843_v58 = vpop.f32.mrf.mxu1 }
 0x3c4   :  { %35234 = vst [vmem:[#allocation192_spill] sm:$0xff] %v29843_v58  ;;  %v25931_v50 = vpop.f32.mrf.mxu0 }
 0x3c5   :  { %11152 = vadd.xlane.f32.xlu1 %v11151_v14  ;;  %v25926_v62 = vpop.f32.mrf.mxu1 }
 0x3c7   :  { %v29847_v39 = vpop.f32.mrf.mxu0 }
 0x3c8   :  { %35235 = vst [vmem:[#allocation193_spill] sm:$0xff] %v29847_v39  ;;  %v29849_v37 = vpop.f32.mrf.mxu1 }
 0x3c9   :  { %35236 = vst [vmem:[#allocation194_spill] sm:$0xff] %v29849_v37  ;;  %v25941_v36 = vpop.f32.mrf.mxu0 }
 0x3ca   :  { %v25936_v3 = vpop.f32.mrf.mxu1 }
 0x3cc   :  { %v29853_v29 = vpop.eup %26958  ;;  %v29855_v38 = vpop.f32.mrf.mxu0 }
 0x3cd   :  { %35237 = vst [vmem:[#allocation195_spill] sm:$0xff] %v29853_v29  ;;  %35238 = vst [vmem:[#allocation196_spill] sm:$0xff] %v29855_v38  ;;  %v10391_v46 = vpop.xlane.xlu1 %10390  ;;  %v11154_v58 = vsel %vm614_vm2, %v29853_v29, 0.0  ;;  %v29859_v28 = vpop.f32.mrf.mxu1 }
 0x3ce   :  { %35239 = vst [vmem:[#allocation197_spill] sm:$0xff] %v29859_v28  ;;  %v10741_v62 = vsub.f32 %v35182_v6, %v10391_v46  ;;  %11155 = vadd.xlane.f32.xlu0 %v11154_v58  ;;  %v25951_v14 = vpop.f32.mrf.mxu0  ;;  %v10744_v6 = vsub.f32 %v28929_v21, %v29689_v30 }
 0x3cf   :  { %v25946_v50 = vpop.f32.mrf.mxu1 }
 0x3d0   :  { %v10885_v39 = vmul.f32 1.442695, %v10741_v62 }
 0x3d1   :  { %v10397_v37 = vpop.xlane.xlu1 %10396  ;;  %v29862_v1 = vpop.f32.mrf.mxu0 }
 0x3d2   :  { %35240 = vst [vmem:[#allocation198_spill] sm:$0xff] %v29862_v1  ;;  %26960 = vpow2.f32 %v10885_v39  ;;  %v29864_v36 = vpop.f32.mrf.mxu1  ;;  %v10743_v38 = vsub.f32 %v35187_v19, %v10397_v37 }
 0x3d3   :  { %35241 = vst [vmem:[#allocation199_spill] sm:$0xff] %v29864_v36  ;;  %v25961_v3 = vpop.f32.mrf.mxu0 }
 0x3d4   :  { %v25956_v59 = vpop.f32.mrf.mxu1  ;;  %v10889_v46 = vmul.f32 1.442695, %v10743_v38  ;;  %v10891_v3 = vmul.f32 1.442695, %v10744_v6 }
 0x3d6   :  { %v10403_v49 = vpop.xlane.xlu1 %10402  ;;  %v29867_v29 = vpop.f32.mrf.mxu1  ;;  %26962 = vpow2.f32 %v10889_v46  ;;  %v10527_v46 = vsel %vm614_vm2, %v29653_v17, -inf }
 0x3d7   :  { %35242 = vst [vmem:[#allocation200_spill] sm:$0xff] %v29867_v29  ;;  %v29869_v28 = vpop.f32.mrf.mxu0  ;;  %26964 = vpow2.f32 %v10891_v3  ;;  %v10745_v1 = vsub.f32 %v35190_v11, %v10403_v49 }
 0x3d8   :  { %35243 = vst [vmem:[#allocation201_spill] sm:$0xff] %v29869_v28  ;;  %v25966_v58 = vpop.f32.mrf.mxu1 }
 0x3d9   :  { %v25971_v62 = vpop.f32.mrf.mxu0 }
 0x3da   :  { %v29873_v14 = vpop.xlane.xlu1 %10408  ;;  %v35249_v62 = vld [vmem:[#allocation8_spill] sm:$0xff] }
 0x3db   :  { %v29875_v39 = vpop.f32.mrf.mxu1  ;;  %v29877_v50 = vpop.f32.mrf.mxu0 }
 0x3dc   :  { %35244 = vst [vmem:[#allocation202_spill] sm:$0xff] %v29875_v39  ;;  %35245 = vst [vmem:[#allocation203_spill] sm:$0xff] %v29877_v50  ;;  %v29913_v50 = vpop.permute.xlu0 %11901 }
 0x3dd   :  { %v25976_v19 = vpop.f32.mrf.mxu1  ;;  %v25981_v59 = vpop.f32.mrf.mxu0 }
 0x3de   :  { %v29879_v37 = vpop.xlane.xlu1 %10414 }
 0x3df   :  { %v29881_v29 = vpop.eup %26960  ;;  %v29883_v28 = vpop.f32.mrf.mxu0 }
 0x3e0   :  { %35246 = vst [vmem:[#allocation204_spill] sm:$0xff] %v29881_v29  ;;  %35247 = vst [vmem:[#allocation205_spill] sm:$0xff] %v29883_v28  ;;  %v11157_v21 = vsel %vm614_vm2, %v29881_v29, 0.0  ;;  %v29887_v30 = vpop.f32.mrf.mxu1 }
 0x3e1   :  { %35248 = vst [vmem:[#allocation206_spill] sm:$0xff] %v29887_v30  ;;  %11158 = vadd.xlane.f32.xlu1 %v11157_v21  ;;  %v25991_v38 = vpop.f32.mrf.mxu0  ;;  %v10530_v21 = vsel %vm614_vm2, %v29649_v2, -inf }
 0x3e2   :  { %v29889_v58 = vpop.xlane.xlu1 %10420  ;;  %v25986_v6 = vpop.f32.mrf.mxu1  ;;  %v35252_v38 = vld [vmem:[#allocation7_spill] sm:$0xff] }
 0x3e3   :  { %v29905_v6 = vpop.eup %26962 }
 0x3e4   :  { %12053 = vrot.lane.b32.xlu0 %v35249_v62, %s27607_s30  ;;  %v29895_v19 = vpop.f32.mrf.mxu1  ;;  %v29897_v59 = vpop.f32.mrf.mxu0  ;;  %35253 = vst [vmem:[#allocation7_spill] sm:$0xff] %v29905_v6 }
 0x3e5   :  { %35250 = vst [vmem:[#allocation8_spill] sm:$0xff] %v29895_v19  ;;  %35251 = vst [vmem:[#allocation207_spill] sm:$0xff] %v29897_v59  ;;  %10528 = vmax.xlane.f32.xlu1 %v10527_v46 }
 0x3e6   :  { %v29899_v3 = vpop.xlane.xlu1 %10426  ;;  %v25996_v28 = vpop.f32.mrf.mxu1 }
 0x3e7   :  { %v26001_v30 = vpop.f32.mrf.mxu0  ;;  %v11163_v28 = vsel %vm614_vm2, %v29905_v6, 0.0 }
 0x3e8   :  { %12129 = vrot.lane.b32.xlu0 %v35252_v38, %s27607_s30  ;;  %v29917_v30 = vpop.eup %26964 }
 0x3e9   :  { %10531 = vmax.xlane.f32.xlu1 %v10530_v21  ;;  %v29907_v17 = vpop.f32.mrf.mxu1  ;;  %v29909_v62 = vpop.f32.mrf.mxu0  ;;  %35256 = vst [vmem:[#allocation210_spill] sm:$0xff] %v29917_v30 }
 0x3ea   :  { %35254 = vst [vmem:[#allocation208_spill] sm:$0xff] %v29907_v17  ;;  %35255 = vst [vmem:[#allocation209_spill] sm:$0xff] %v29909_v62  ;;  %v29911_v19 = vpop.xlane.xlu1 %10432 }
 0x3eb   :  { %v26006_v46 = vpop.f32.mrf.mxu1  ;;  %v26011_v59 = vpop.f32.mrf.mxu0 }
 0x3ec   :  { %v11166_v46 = vsel %vm614_vm2, %v29917_v30, 0.0 }
 0x3ed   :  { %11164 = vadd.xlane.f32.xlu1 %v11163_v28  ;;  %v29919_v38 = vpop.f32.mrf.mxu1  ;;  %v29921_v2 = vpop.f32.mrf.mxu0 }
 0x3ee   :  { %35257 = vst [vmem:[#allocation211_spill] sm:$0xff] %v29919_v38  ;;  %35258 = vst [vmem:[#allocation212_spill] sm:$0xff] %v29921_v2  ;;  %v29923_v21 = vpop.xlane.xlu1 %10438 }
 0x3ef   :  { %v26016_v17 = vpop.f32.mrf.mxu1  ;;  %v26021_v62 = vpop.f32.mrf.mxu0 }
 0x3f0   :  { %v10893_v17 = vmul.f32 1.442695, %v10745_v1 }
 0x3f1   :  { %v29927_v59 = vpop.xlane.xlu0 %10441  ;;  %11167 = vadd.xlane.f32.xlu1 %v11166_v46  ;;  %v29929_v39 = vpop.f32.mrf.mxu0 }
 0x3f2   :  { %35259 = vst [vmem:[#allocation213_spill] sm:$0xff] %v29927_v59  ;;  %35260 = vst [vmem:[#allocation214_spill] sm:$0xff] %v29929_v39  ;;  %v29932_v36 = vpop.xlane.xlu1 %10444  ;;  %v29934_v28 = vpop.f32.mrf.mxu1  ;;  %26966 = vpow2.f32 %v10893_v17 }
 0x3f3   :  { %35261 = vst [vmem:[#allocation215_spill] sm:$0xff] %v29934_v28  ;;  %v26031_v38 = vpop.f32.mrf.mxu0 }
 0x3f4   :  { %v26026_v2 = vpop.f32.mrf.mxu1 }
 0x3f5   :  { %v29936_v6 = vpop.xlane.xlu0 %10447 }
 0x3f6   :  { %v29938_v62 = vpop.xlane.xlu1 %10450  ;;  %v29940_v29 = vpop.f32.mrf.mxu1 }
 0x3f7   :  { %35262 = vst [vmem:[#allocation216_spill] sm:$0xff] %v29938_v62  ;;  %35263 = vst [vmem:[#allocation217_spill] sm:$0xff] %v29940_v29  ;;  %v29942_v30 = vpop.f32.mrf.mxu0 }
 0x3f8   :  { %35264 = vst [vmem:[#allocation218_spill] sm:$0xff] %v29942_v30  ;;  %v26036_v46 = vpop.f32.mrf.mxu1 }
 0x3f9   :  { %v26041_v59 = vpop.f32.mrf.mxu0  ;;  %v29944_v39 = vpop.xlane.xlu0 %10453 }
 0x3fa   :  { %35265 = vst [vmem:[#allocation219_spill] sm:$0xff] %v29944_v39  ;;  %v29946_v49 = vpop.xlane.xlu1 %10456  ;;  %v29948_v11 = vpop.f32.mrf.mxu1 }
 0x3fb   :  { %35266 = vst [vmem:[#allocation220_spill] sm:$0xff] %v29946_v49  ;;  %35267 = vst [vmem:[#allocation221_spill] sm:$0xff] %v29948_v11  ;;  %v29950_v38 = vpop.f32.mrf.mxu0 }
 0x3fc   :  { %35268 = vst [vmem:[#allocation222_spill] sm:$0xff] %v29950_v38  ;;  %v26046_v2 = vpop.f32.mrf.mxu1  ;;  %v35275_v38 = vld [vmem:[#allocation10_spill] sm:$0xff] }
 0x3fd   :  { %v26051_v28 = vpop.f32.mrf.mxu0  ;;  %v29952_v1 = vpop.xlane.xlu0 %10459 }
 0x3fe   :  { %v29954_v62 = vpop.xlane.xlu1 %10462  ;;  %v29956_v29 = vpop.f32.mrf.mxu1 }
 0x3ff   :  { %35269 = vst [vmem:[#allocation223_spill] sm:$0xff] %v29954_v62  ;;  %35270 = vst [vmem:[#allocation224_spill] sm:$0xff] %v29956_v29  ;;  %v29958_v30 = vpop.f32.mrf.mxu0 }
 0x400   :  { %35271 = vst [vmem:[#allocation225_spill] sm:$0xff] %v29958_v30  ;;  %v26056_v59 = vpop.f32.mrf.mxu1 }
 0x401   :  { %v26061_v46 = vpop.f32.mrf.mxu0  ;;  %v29960_v39 = vpop.xlane.xlu0 %10465  ;;  %v10533_v59 = vsel %vm614_vm2, %v29662_v33, -inf }
 0x402   :  { %35272 = vst [vmem:[#allocation226_spill] sm:$0xff] %v29960_v39  ;;  %v29962_v17 = vpop.xlane.xlu1 %10468  ;;  %v29964_v49 = vpop.f32.mrf.mxu1  ;;  %12205 = vrot.lane.b32.xlu1 %v35275_v38, %s27607_s30 }
 0x403   :  { %35273 = vst [vmem:[#allocation227_spill] sm:$0xff] %v29962_v17  ;;  %35274 = vst [vmem:[#allocation228_spill] sm:$0xff] %v29964_v49  ;;  %v29968_v28 = vpop.f32.mrf.mxu0  ;;  %v29978_v46 = vpop.eup %26966 }
 0x404   :  { %35276 = vst [vmem:[#allocation10_spill] sm:$0xff] %v29968_v28  ;;  %v26066_v2 = vpop.f32.mrf.mxu1  ;;  %v11169_v28 = vsel %vm614_vm2, %v29978_v46, 0.0 }
 0x405   :  { %v26071_v11 = vpop.f32.mrf.mxu0  ;;  %v29970_v62 = vpop.xlane.xlu0 %10471 }
 0x406   :  { %35277 = vst [vmem:[#allocation229_spill] sm:$0xff] %v29970_v62  ;;  %v29972_v29 = vpop.xlane.xlu1 %10474  ;;  %v29974_v30 = vpop.f32.mrf.mxu1 }
 0x407   :  { %35278 = vst [vmem:[#allocation230_spill] sm:$0xff] %v29972_v29  ;;  %35279 = vst [vmem:[#allocation231_spill] sm:$0xff] %v29974_v30  ;;  %v29980_v17 = vpop.f32.mrf.mxu0  ;;  %10534 = vmax.xlane.f32.xlu0 %v10533_v59 }
 0x408   :  { %35280 = vst [vmem:[#allocation232_spill] sm:$0xff] %v29980_v17  ;;  %v26076_v49 = vpop.f32.mrf.mxu1 }
 0x409   :  { %v26081_v38 = vpop.f32.mrf.mxu0  ;;  %v29982_v39 = vpop.xlane.xlu0 %10477  ;;  %v10746_v49 = vsub.f32 %v28965_v63, %v29711_v35  ;;  %v35290_v63 = vld [vmem:[#allocation9_spill] sm:$0xff] }
 0x40a   :  { %35281 = vst [vmem:[#allocation233_spill] sm:$0xff] %v29982_v39  ;;  %v29984_v2 = vpop.xlane.xlu1 %10480  ;;  %v29986_v11 = vpop.f32.mrf.mxu1 }
 0x40b   :  { %35282 = vst [vmem:[#allocation234_spill] sm:$0xff] %v29984_v2  ;;  %35283 = vst [vmem:[#allocation235_spill] sm:$0xff] %v29986_v11  ;;  %v29990_v30 = vpop.f32.mrf.mxu0  ;;  %11170 = vadd.xlane.f32.xlu0 %v11169_v28  ;;  %v10895_v11 = vmul.f32 1.442695, %v10746_v49 }
 0x40c   :  { %35284 = vst [vmem:[#allocation236_spill] sm:$0xff] %v29990_v30  ;;  %v26086_v33 = vpop.f32.mrf.mxu1 }
 0x40d   :  { %v26091_v29 = vpop.f32.mrf.mxu0  ;;  %v29992_v62 = vpop.xlane.xlu0 %10483  ;;  %26968 = vpow2.f32 %v10895_v11  ;;  %v10536_v11 = vsel %vm614_vm2, %v29658_v40, -inf }
 0x40e   :  { %v29994_v17 = vpop.xlane.xlu1 %10486 }
 0x40f   :  { %35285 = vst [vmem:[#allocation237_spill] sm:$0xff] %v29994_v17 }
 0x411   :  { %v29998_v59 = vpop.xlane.xlu0 %10489 }
 0x412   :  { %v30000_v38 = vpop.xlane.xlu1 %10492 }
 0x415   :  { %v30002_v2 = vpop.xlane.xlu0 %10495 }
 0x416   :  { %v30004_v39 = vpop.xlane.xlu1 %10498 }
 0x417   :  { %35286 = vst [vmem:[#allocation238_spill] sm:$0xff] %v30004_v39 }
 0x419   :  { %v30006_v28 = vpop.xlane.xlu0 %10501 }
 0x41a   :  { %35287 = vst [vmem:[#allocation239_spill] sm:$0xff] %v30006_v28  ;;  %v11111_v33 = vpop.xlane.xlu1 %11110  ;;  %v30020_v39 = vpop.eup %26968 }
 0x41b   :  { %26970 = vrcp.f32 %v11111_v33 }
 0x41d   :  { %v30008_v29 = vpop.xlane.xlu0 %10507 }
 0x41e   :  { %35288 = vst [vmem:[#allocation240_spill] sm:$0xff] %v30008_v29  ;;  %v30010_v30 = vpop.xlane.xlu1 %10504 }
 0x41f   :  { %35289 = vst [vmem:[#allocation241_spill] sm:$0xff] %v30010_v30  ;;  %v11172_v30 = vsel %vm614_vm2, %v30020_v39, 0.0 }
 0x421   :  { %v11114_v17 = vpop.xlane.xlu0 %11113  ;;  %12281 = vrot.lane.b32.xlu0 %v35290_v63, %s27607_s30 }
 0x422   :  { %v30014_v35 = vpop.xlane.xlu1 %10510  ;;  %26972 = vrcp.f32 %v11114_v17  ;;  %v10747_v17 = vsub.f32 %v29007_v20, %v29873_v14 }
 0x425   :  { %v30016_v49 = vpop.xlane.xlu0 %10513 }
 0x426   :  { %v11117_v28 = vpop.xlane.xlu1 %11116  ;;  %10537 = vmax.xlane.f32.xlu1 %v10536_v11 }
 0x427   :  { %26974 = vrcp.f32 %v11117_v28  ;;  %v10897_v28 = vmul.f32 1.442695, %v10747_v17 }
 0x428   :  { %v26971_v33 = vpop.eup %26970 }
 0x429   :  { %v11120_v29 = vpop.xlane.xlu0 %11119  ;;  %v30025_v63 = vmul.f32 %v26971_v33, %v29682_v34 }
 0x42a   :  { %11173 = vadd.xlane.f32.xlu1 %v11172_v30  ;;  %26976 = vrcp.f32 %v11120_v29  ;;  %v30035_v11 = vpop.xlane.xlu1 %10519 }
 0x42b   :  { %35291 = vst [vmem:[#allocation9_spill] sm:$0xff] %v30025_v63  ;;  %26095 = vmatmul.mubr.msk.f32.vlgmr.msra.gmra.mxu1 %vm614_vm2, %v30025_v63  ;;  %35292 = vst [vmem:[#allocation242_spill] sm:$0xff] %v30035_v11  ;;  %26978 = vpow2.f32 %v10897_v28 }
 0x42c   :  { %26103 = vmatpush3.msra.mxu1 %v29913_v50  ;;  %26104 = vmatprep.mubr.msk.f32.mxu1 %vm27602_vm1, %v35021_v52 }
 0x42d   :  { %26112 = vmatprep.subr.mxu1 %v35021_v52  ;;  %v11126_v33 = vpop.xlane.xlu0 %11125 }
 0x42e   :  { %v30048_v50 = vpop.xlane.xlu1 %10516 }
 0x42f   :  { %v26973_v34 = vpop.eup %26972 }
 0x430   :  { %v30038_v30 = vmul.f32 %v26973_v34, %v29707_v9 }
 0x431   :  { %v30066_v17 = vpop.xlane.xlu0 %11131 }
 0x432   :  { %35293 = vst [vmem:[#allocation243_spill] sm:$0xff] %v30038_v30  ;;  %26100 = vmatmul.mubr.msk.f32.vlgmr.msra.gmra.mxu0 %vm614_vm2, %v30038_v30 }
 0x433   :  { %26108 = vmatpush3.msra.mxu0 %v29851_v41  ;;  %26109 = vmatprep.mubr.msk.f32.mxu0 %vm27602_vm1, %v35021_v52  ;;  %v30062_v41 = vpop.xlane.xlu1 %10525 }
 0x434   :  { %v26975_v20 = vpop.eup %26974  ;;  %26117 = vmatprep.subr.mxu0 %v35021_v52 }
 0x435   :  { %v30046_v14 = vmul.f32 %v26975_v20, %v29723_v61  ;;  %v35296_v61 = vld [vmem:[#allocation12_spill] sm:$0xff] }
 0x436   :  { %35297 = vst [vmem:[#allocation12_spill] sm:$0xff] %v30062_v41 }
 0x437   :  { %35294 = vst [vmem:[#allocation244_spill] sm:$0xff] %v30046_v14  ;;  %v26977_v29 = vpop.eup %26976  ;;  %26105 = vmatmul.mubr.msk.f32.vlgmr.msra.gmra.mxu1 %vm614_vm2, %v30046_v14  ;;  %v30072_v34 = vpop.xlane.xlu1 %10522 }
 0x438   :  { %v30054_v9 = vmul.f32 %v26977_v29, %v29733_v0  ;;  %26114 = vmatprep.mubr.msk.f32.mxu1 %vm27602_vm1, %v35021_v52  ;;  %v10539_v0 = vsel %vm614_vm2, %v29669_v24, -inf  ;;  %v30070_v28 = vpop.eup %26978  ;;  %35298 = vst [vmem:[#allocation246_spill] sm:$0xff] %v30072_v34  ;;  %v30076_v29 = vpop.xlane.xlu0 %11161 }
 0x439   :  { %v11175_v20 = vsel %vm614_vm2, %v30070_v28, 0.0 }
 0x43a   :  { %35295 = vst [vmem:[#allocation245_spill] sm:$0xff] %v30054_v9  ;;  %26110 = vmatmul.mubr.msk.f32.vlgmr.msra.gmra.mxu0 %vm614_vm2, %v30054_v9  ;;  %v10748_v9 = vsub.f32 %v29001_v57, %v29725_v47  ;;  %v35299_v57 = vld [vmem:[#allocation11_spill] sm:$0xff] }
 0x43b   :  { %12357 = vrot.lane.b32.xlu1 %v35296_v61, %s27607_s30  ;;  %26119 = vmatprep.mubr.msk.f32.mxu0 %vm27602_vm1, %v35021_v52  ;;  %v11123_v61 = vpop.xlane.xlu1 %11122 }
 0x43c   :  { %v30080_v14 = vpop.xlane.xlu0 %11137  ;;  %26980 = vrcp.f32 %v11123_v61  ;;  %v10899_v30 = vmul.f32 1.442695, %v10748_v9 }
 0x43d   :  { %26982 = vrcp.f32 %v11126_v33 }
 0x43e   :  { %26984 = vpow2.f32 %v10899_v30  ;;  %v10542_v30 = vsel %vm614_vm2, %v29671_v31, -inf  ;;  %v35304_v31 = vld [vmem:[#allocation14_spill] sm:$0xff] }
 0x43f   :  { %v11129_v63 = vpop.xlane.xlu1 %11128 }
 0x440   :  { %10540 = vmax.xlane.f32.xlu0 %v10539_v0  ;;  %v30082_v24 = vpop.xlane.xlu0 %11143 }
 0x443   :  { %v30086_v40 = vpop.xlane.xlu1 %11134 }
 0x444   :  { %11176 = vadd.xlane.f32.xlu0 %v11175_v20 }
 0x447   :  { %v30090_v34 = vpop.xlane.xlu1 %11140 }
 0x449   :  { %v30084_v0 = vpop.xlane.xlu0 %11149  ;;  %v26981_v41 = vpop.eup %26980 }
 0x44a   :  { %v30095_v47 = vmul.f32 %v26981_v41, %v29787_v54  ;;  %v26983_v33 = vpop.eup %26982 }
 0x44b   :  { %v30104_v61 = vpop.eup %26984  ;;  %v30109_v41 = vpop.xlane.xlu1 %11146 }
 0x44c   :  { %35300 = vst [vmem:[#allocation11_spill] sm:$0xff] %v30095_v47 }
 0x457   :  { %v30088_v20 = vpop.xlane.xlu0 %11155 }
 0x45a   :  { %12433 = vrot.lane.b32.xlu0 %v35299_v57, %s27607_s30  ;;  %v30107_v57 = vmul.f32 %v26983_v33, %v29745_v5  ;;  %v10749_v5 = vsub.f32 %v29064_v23, %v29879_v37  ;;  %v30120_v33 = vpop.xlane.xlu1 %11152 }
 0x45b   :  { %v12054_v9 = vpop.permute.xlu0 %12053 }
 0x45c   :  { %26113 = vmatpush3.msra.mxu1 %v12054_v9  ;;  %35301 = vst [vmem:[#allocation247_spill] sm:$0xff] %v30107_v57  ;;  %v11178_v9 = vsel %vm614_vm2, %v30104_v61, 0.0 }
 0x45d   :  { %26115 = vmatmul.mubr.msk.f32.vlgmr.msra.gmra.mxu1 %vm614_vm2, %v30095_v47  ;;  %26122 = vmatprep.subr.mxu1 %v35021_v52 }
 0x45e   :  { %26124 = vmatprep.mubr.msk.f32.mxu1 %vm27602_vm1, %v35021_v52 }
 0x45f   :  { %10543 = vmax.xlane.f32.xlu1 %v10542_v30  ;;  %v12130_v54 = vpop.permute.xlu0 %12129  ;;  %v10901_v30 = vmul.f32 1.442695, %v10749_v5 }
 0x460   :  { %26118 = vmatpush3.msra.mxu0 %v12130_v54 }
 0x461   :  { %26120 = vmatmul.mubr.msk.f32.vlgmr.msra.gmra.mxu0 %vm614_vm2, %v30107_v57  ;;  %26127 = vmatprep.subr.mxu0 %v35021_v52  ;;  %26986 = vpow2.f32 %v10901_v30 }
 0x462   :  { %26129 = vmatprep.mubr.msk.f32.mxu0 %vm27602_vm1, %v35021_v52  ;;  %26988 = vrcp.f32 %v11129_v63 }
 0x463   :  { %11179 = vadd.xlane.f32.xlu1 %v11178_v9  ;;  %v10545_v9 = vsel %vm614_vm2, %v29678_v16, -inf  ;;  %26990 = vrcp.f32 %v30066_v17  ;;  %v10751_v17 = vsub.f32 %v29126_v43, %v29889_v58 }
 0x46a   :  { %v30122_v47 = vpop.xlane.xlu1 %11158 }
 0x46e   :  { %v30124_v54 = vpop.xlane.xlu1 %10528  ;;  %v30134_v23 = vpop.eup %26986 }
 0x46f   :  { %35302 = vst [vmem:[#allocation248_spill] sm:$0xff] %v30124_v54  ;;  %v26989_v5 = vpop.eup %26988  ;;  %v11181_v63 = vsel %vm614_vm2, %v30134_v23, 0.0 }
 0x470   :  { %v30141_v30 = vmul.f32 %v26989_v5, %v29800_v51  ;;  %v35306_v51 = vld [vmem:[#allocation13_spill] sm:$0xff]  ;;  %v26991_v5 = vpop.eup %26990 }
 0x471   :  { %v30162_v54 = vmul.f32 %v26991_v5, %v29758_v56  ;;  %v10905_v56 = vmul.f32 1.442695, %v10751_v17 }
 0x472   :  { %v30126_v57 = vpop.xlane.xlu1 %10531  ;;  %35305 = vst [vmem:[#allocation14_spill] sm:$0xff] %v30141_v30 }
 0x473   :  { %35303 = vst [vmem:[#allocation249_spill] sm:$0xff] %v30126_v57  ;;  %35307 = vst [vmem:[#allocation13_spill] sm:$0xff] %v30162_v54 }
 0x474   :  { %12509 = vrot.lane.b32.xlu1 %v35304_v31, %s27607_s30  ;;  %v10750_v31 = vsub.f32 %v29059_v42, %v29754_v27 }
 0x476   :  { %v30130_v11 = vpop.xlane.xlu1 %11164 }
 0x479   :  { %10546 = vmax.xlane.f32.xlu0 %v10545_v9  ;;  %v10903_v9 = vmul.f32 1.442695, %v10750_v31 }
 0x47a   :  { %v30136_v37 = vpop.xlane.xlu1 %11167 }
 0x47b   :  { %26992 = vpow2.f32 %v10903_v9  ;;  %v10551_v9 = vsel %vm614_vm2, %v29693_v10, -inf }
 0x47c   :  { %26994 = vpow2.f32 %v10905_v56 }
 0x47d   :  { %11182 = vadd.xlane.f32.xlu0 %v11181_v63  ;;  %26996 = vrcp.f32 %v30086_v40 }
 0x47e   :  { %v12206_v57 = vpop.permute.xlu1 %12205  ;;  %26998 = vrcp.f32 %v30080_v14  ;;  %v35312_v14 = vld [vmem:[#allocation4_spill] sm:$0xff] }
 0x47f   :  { %26123 = vmatpush3.msra.mxu1 %v12206_v57 }
 0x480   :  { %26125 = vmatmul.mubr.msk.f32.vlgmr.msra.gmra.mxu1 %vm614_vm2, %v30141_v30  ;;  %26132 = vmatprep.subr.mxu1 %v35021_v52  ;;  %v10548_v30 = vsel %vm614_vm2, %v29680_v8, -inf }
 0x481   :  { %26134 = vmatprep.mubr.msk.f32.mxu1 %vm27602_vm1, %v35021_v52 }
 0x488   :  { %v30159_v16 = vpop.eup %26992 }
 0x489   :  { %v11184_v27 = vsel %vm614_vm2, %v30159_v16, 0.0 }
 0x490   :  { %v30151_v63 = vpop.xlane.xlu0 %10534 }
 0x493   :  { %12585 = vrot.lane.b32.xlu0 %v35306_v51, %s27607_s30  ;;  %v30180_v51 = vpop.eup %26994 }
 0x494   :  { %v30155_v57 = vpop.xlane.xlu0 %11170  ;;  %v11187_v43 = vsel %vm614_vm2, %v30180_v51, 0.0 }
 0x498   :  { %10549 = vmax.xlane.f32.xlu1 %v10548_v30  ;;  %v12282_v42 = vpop.permute.xlu0 %12281  ;;  %v35308_v30 = vld [vmem:[#allocation16_spill] sm:$0xff] }
 0x499   :  { %26128 = vmatpush3.msra.mxu0 %v12282_v42  ;;  %v26997_v42 = vpop.eup %26996 }
 0x49a   :  { %26130 = vmatmul.mubr.msk.f32.vlgmr.msra.gmra.mxu0 %vm614_vm2, %v30162_v54  ;;  %26137 = vmatprep.subr.mxu0 %v35021_v52  ;;  %v30187_v40 = vmul.f32 %v26997_v42, %v29812_v44  ;;  %v35310_v44 = vld [vmem:[#allocation15_spill] sm:$0xff]  ;;  %v10554_v42 = vsel %vm614_vm2, %v29698_v4, -inf }
 0x49b   :  { %26139 = vmatprep.mubr.msk.f32.mxu0 %vm27602_vm1, %v35021_v52 }
 0x49c   :  { %11185 = vadd.xlane.f32.xlu1 %v11184_v27  ;;  %35309 = vst [vmem:[#allocation16_spill] sm:$0xff] %v30187_v40  ;;  %v10752_v27 = vsub.f32 %v29121_v32, %v29774_v15 }
 0x49e   :  { %v10907_v17 = vmul.f32 1.442695, %v10752_v27  ;;  %v10753_v27 = vsub.f32 %v35312_v14, %v29899_v3 }
 0x4a0   :  { %27000 = vpow2.f32 %v10907_v17  ;;  %v35313_v17 = vld [vmem:[#allocation18_spill] sm:$0xff] }
 0x4ad   :  { %12661 = vrot.lane.b32.xlu1 %v35308_v30, %s27607_s30 }
 0x4af   :  { %v30176_v31 = vpop.xlane.xlu1 %10537 }
 0x4b2   :  { %10552 = vmax.xlane.f32.xlu0 %v10551_v9  ;;  %v26999_v9 = vpop.eup %26998 }
 0x4b3   :  { %v30182_v5 = vpop.xlane.xlu1 %11173 }
 0x4b6   :  { %11188 = vadd.xlane.f32.xlu0 %v11187_v43  ;;  %v30205_v43 = vpop.eup %27000 }
 0x4b7   :  { %v12358_v58 = vpop.permute.xlu1 %12357  ;;  %v11190_v15 = vsel %vm614_vm2, %v30205_v43, 0.0 }
 0x4b8   :  { %26133 = vmatpush3.msra.mxu1 %v12358_v58  ;;  %v30208_v58 = vmul.f32 %v26999_v9, %v29782_v7  ;;  %v10909_v7 = vmul.f32 1.442695, %v10753_v27  ;;  %v10557_v9 = vsel %vm614_vm2, %v29700_v26, -inf }
 0x4b9   :  { %26135 = vmatmul.mubr.msk.f32.vlgmr.msra.gmra.mxu1 %vm614_vm2, %v30187_v40  ;;  %26142 = vmatprep.subr.mxu1 %v35021_v52  ;;  %v35320_v40 = vld [vmem:[#allocation17_spill] sm:$0xff] }
 0x4ba   :  { %26144 = vmatprep.mubr.msk.f32.mxu1 %vm27602_vm1, %v35021_v52  ;;  %35311 = vst [vmem:[#allocation15_spill] sm:$0xff] %v30208_v58  ;;  %27002 = vpow2.f32 %v10909_v7 }
 0x4bb   :  { %27004 = vrcp.f32 %v30090_v34 }
 0x4bc   :  { %27006 = vrcp.f32 %v30082_v24 }
 0x4c9   :  { %v30197_v56 = vpop.xlane.xlu0 %10540 }
 0x4cc   :  { %12737 = vrot.lane.b32.xlu0 %v35310_v44, %s27607_s30 }
 0x4cd   :  { %v30201_v30 = vpop.xlane.xlu0 %11176 }
 0x4d1   :  { %10555 = vmax.xlane.f32.xlu1 %v10554_v42  ;;  %v12434_v32 = vpop.permute.xlu0 %12433  ;;  %v30226_v42 = vpop.eup %27002 }
 0x4d2   :  { %26138 = vmatpush3.msra.mxu0 %v12434_v32  ;;  %v27005_v3 = vpop.eup %27004  ;;  %v11193_v34 = vsel %vm614_vm2, %v30226_v42, 0.0 }
 0x4d3   :  { %26140 = vmatmul.mubr.msk.f32.vlgmr.msra.gmra.mxu0 %vm614_vm2, %v30208_v58  ;;  %26147 = vmatprep.subr.mxu0 %v35021_v52  ;;  %v30235_v27 = vmul.f32 %v27005_v3, %v29820_v45  ;;  %v27007_v54 = vpop.eup %27006 }
 0x4d4   :  { %26149 = vmatprep.mubr.msk.f32.mxu0 %vm27602_vm1, %v35021_v52  ;;  %v30262_v24 = vmul.f32 %v27007_v54, %v29796_v55 }
 0x4d5   :  { %11191 = vadd.xlane.f32.xlu1 %v11190_v15  ;;  %35315 = vst [vmem:[#allocation18_spill] sm:$0xff] %v30235_v27 }
 0x4d6   :  { %35321 = vst [vmem:[#allocation17_spill] sm:$0xff] %v30262_v24 }
 0x4e6   :  { %12813 = vrot.lane.b32.xlu1 %v35313_v17, %s27607_s30 }
 0x4e8   :  { %v30222_v44 = vpop.xlane.xlu1 %10543 }
 0x4eb   :  { %10558 = vmax.xlane.f32.xlu0 %v10557_v9  ;;  %v30228_v32 = vpop.f32.mrf.mxu1  ;;  %v35317_v9 = vld [vmem:[#allocation3_spill] sm:$0xff] }
 0x4ec   :  { %35314 = vst [vmem:[#allocation4_spill] sm:$0xff] %v30228_v32  ;;  %v30230_v15 = vpop.xlane.xlu1 %11179 }
 0x4ed   :  { %v26096_v14 = vpop.f32.mrf.mxu1 }
 0x4ee   :  { %v10754_v14 = vsub.f32 %v35317_v9, %v29802_v48  ;;  %v10560_v48 = vsel %vm614_vm2, %v29705_v22, -inf }
 0x4ef   :  { %11194 = vadd.xlane.f32.xlu0 %v11193_v34 }
 0x4f0   :  { %v12510_v7 = vpop.permute.xlu1 %12509  ;;  %v10911_v45 = vmul.f32 1.442695, %v10754_v14  ;;  %v35323_v14 = vld [vmem:[#allocation24_spill] sm:$0xff] }
 0x4f1   :  { %26143 = vmatpush3.msra.mxu1 %v12510_v7 }
 0x4f2   :  { %26145 = vmatmul.mubr.msk.f32.vlgmr.msra.gmra.mxu1 %vm614_vm2, %v30235_v27  ;;  %26152 = vmatprep.subr.mxu1 %v35021_v52  ;;  %v30242_v17 = vpop.f32.mrf.mxu0  ;;  %27008 = vpow2.f32 %v10911_v45 }
 0x4f3   :  { %26154 = vmatprep.mubr.msk.f32.mxu1 %vm27602_vm1, %v35021_v52  ;;  %35316 = vst [vmem:[#allocation250_spill] sm:$0xff] %v30242_v17 }
 0x4f4   :  { %v26101_v32 = vpop.f32.mrf.mxu0 }
 0x4f7   :  { %v30246_v34 = vpop.f32.mrf.mxu1 }
 0x4f8   :  { %35318 = vst [vmem:[#allocation3_spill] sm:$0xff] %v30246_v34 }
 0x4f9   :  { %v26106_v3 = vpop.f32.mrf.mxu1 }
 0x4fa   :  { %v30249_v7 = vpop.f32.mrf.mxu0 }
 0x4fb   :  { %35319 = vst [vmem:[#allocation251_spill] sm:$0xff] %v30249_v7 }
 0x4fc   :  { %v26111_v27 = vpop.f32.mrf.mxu0 }
 0x4fd   :  { %v10755_v27 = vsub.f32 %v29253_v13, %v29911_v19 }
 0x4ff   :  { %v30259_v32 = vpop.eup %27008  ;;  %v10913_v55 = vmul.f32 1.442695, %v10755_v27 }
 0x501   :  { %27010 = vpow2.f32 %v10913_v55 }
 0x502   :  { %v30251_v58 = vpop.xlane.xlu0 %10546  ;;  %27012 = vrcp.f32 %v30109_v41 }
 0x503   :  { %27014 = vrcp.f32 %v30084_v0 }
 0x505   :  { %12889 = vrot.lane.b32.xlu0 %v35320_v40, %s27607_s30  ;;  %v11196_v40 = vsel %vm614_vm2, %v30259_v32, 0.0 }
 0x506   :  { %v30255_v17 = vpop.xlane.xlu0 %11182 }
 0x50a   :  { %10561 = vmax.xlane.f32.xlu1 %v10560_v48  ;;  %v12586_v9 = vpop.permute.xlu0 %12585 }
 0x50b   :  { %26148 = vmatpush3.msra.mxu0 %v12586_v9 }
 0x50c   :  { %26150 = vmatmul.mubr.msk.f32.vlgmr.msra.gmra.mxu0 %vm614_vm2, %v30262_v24  ;;  %26157 = vmatprep.subr.mxu0 %v35021_v52  ;;  %v35340_v24 = vld [vmem:[#allocation172_spill] sm:$0xff] }
 0x50d   :  { %26159 = vmatprep.mubr.msk.f32.mxu0 %vm27602_vm1, %v35021_v52 }
 0x50e   :  { %11197 = vadd.xlane.f32.xlu1 %v11196_v40  ;;  %v10563_v40 = vsel %vm614_vm2, %v29713_v12, -inf  ;;  %v30284_v7 = vpop.eup %27010 }
 0x50f   :  { %v27013_v19 = vpop.eup %27012  ;;  %v11199_v41 = vsel %vm614_vm2, %v30284_v7, 0.0 }
 0x510   :  { %v30291_v27 = vmul.f32 %v27013_v19, %v29827_v60  ;;  %v35327_v60 = vld [vmem:[#allocation23_spill] sm:$0xff] }
 0x512   :  { %35325 = vst [vmem:[#allocation253_spill] sm:$0xff] %v30291_v27 }
 0x51d   :  { %v30274_v54 = vpop.f32.mrf.mxu1 }
 0x51e   :  { %35322 = vst [vmem:[#allocation252_spill] sm:$0xff] %v30274_v54  ;;  %v10566_v54 = vsel %vm614_vm2, %v29718_v25, -inf }
 0x51f   :  { %12965 = vrot.lane.b32.xlu1 %v35323_v14, %s27607_s30  ;;  %v26116_v45 = vpop.f32.mrf.mxu1  ;;  %v35326_v14 = vld [vmem:[#allocation110_spill] sm:$0xff] }
 0x520   :  { %v10756_v45 = vsub.f32 %v35326_v14, %v29814_v53 }
 0x521   :  { %v30278_v3 = vpop.xlane.xlu1 %10549  ;;  %v30280_v48 = vpop.f32.mrf.mxu0 }
 0x522   :  { %35324 = vst [vmem:[#allocation24_spill] sm:$0xff] %v30280_v48 }
 0x523   :  { %v26121_v9 = vpop.f32.mrf.mxu0 }
 0x524   :  { %10564 = vmax.xlane.f32.xlu0 %v10563_v40  ;;  %v10915_v9 = vmul.f32 1.442695, %v10756_v45 }
 0x525   :  { %v30286_v13 = vpop.xlane.xlu1 %11185 }
 0x526   :  { %27016 = vpow2.f32 %v10915_v9 }
 0x528   :  { %11200 = vadd.xlane.f32.xlu0 %v11199_v41  ;;  %v27015_v41 = vpop.eup %27014 }
 0x529   :  { %v12662_v55 = vpop.permute.xlu1 %12661  ;;  %v30314_v53 = vmul.f32 %v27015_v41, %v29831_v18 }
 0x52a   :  { %26153 = vmatpush3.msra.mxu1 %v12662_v55 }
 0x52b   :  { %26155 = vmatmul.mubr.msk.f32.vlgmr.msra.gmra.mxu1 %vm614_vm2, %v30291_v27  ;;  %26162 = vmatprep.subr.mxu1 %v35021_v52  ;;  %35329 = vst [vmem:[#allocation23_spill] sm:$0xff] %v30314_v53 }
 0x52c   :  { %26164 = vmatprep.mubr.msk.f32.mxu1 %vm27602_vm1, %v35021_v52 }
 0x533   :  { %v30311_v34 = vpop.eup %27016 }
 0x534   :  { %v11202_v14 = vsel %vm614_vm2, %v30311_v34, 0.0 }
 0x53b   :  { %v30301_v40 = vpop.xlane.xlu0 %10552 }
 0x53e   :  { %13041 = vrot.lane.b32.xlu0 %v35327_v60, %s27607_s30 }
 0x53f   :  { %v30305_v19 = vpop.xlane.xlu0 %11188 }
 0x540   :  { %v30307_v55 = vpop.f32.mrf.mxu1 }
 0x541   :  { %35328 = vst [vmem:[#allocation110_spill] sm:$0xff] %v30307_v55 }
 0x542   :  { %v26126_v48 = vpop.f32.mrf.mxu1 }
 0x543   :  { %10567 = vmax.xlane.f32.xlu1 %v10566_v54  ;;  %v12738_v0 = vpop.permute.xlu0 %12737  ;;  %v35330_v48 = vld [vmem:[#allocation113_spill] sm:$0xff]  ;;  %v35331_v54 = vld [vmem:[#allocation32_spill] sm:$0xff] }
 0x544   :  { %26158 = vmatpush3.msra.mxu0 %v12738_v0  ;;  %v10757_v45 = vsub.f32 %v35330_v48, %v29923_v21  ;;  %v35333_v0 = vld [vmem:[#allocation171_spill] sm:$0xff]  ;;  %v35334_v48 = vld [vmem:[#allocation190_spill] sm:$0xff] }
 0x545   :  { %26160 = vmatmul.mubr.msk.f32.vlgmr.msra.gmra.mxu0 %vm614_vm2, %v30314_v53  ;;  %26167 = vmatprep.subr.mxu0 %v35021_v52  ;;  %v10569_v55 = vsel %vm614_vm2, %v35333_v0, -inf  ;;  %v10572_v0 = vsel %vm614_vm2, %v35340_v24, -inf }
 0x546   :  { %26169 = vmatprep.mubr.msk.f32.mxu0 %vm27602_vm1, %v35021_v52  ;;  %v10917_v18 = vmul.f32 1.442695, %v10757_v45 }
 0x547   :  { %11203 = vadd.xlane.f32.xlu1 %v11202_v14 }
 0x548   :  { %27018 = vpow2.f32 %v10917_v18 }
 0x549   :  { %27020 = vrcp.f32 %v30120_v33 }
 0x54a   :  { %27022 = vrcp.f32 %v30088_v20 }
 0x555   :  { %v30334_v53 = vpop.eup %27018 }
 0x556   :  { %v27021_v21 = vpop.eup %27020  ;;  %v11205_v33 = vsel %vm614_vm2, %v30334_v53, 0.0 }
 0x557   :  { %v30341_v45 = vmul.f32 %v27021_v21, %v35334_v48  ;;  %v35338_v21 = vld [vmem:[#allocation31_spill] sm:$0xff] }
 0x558   :  { %13117 = vrot.lane.b32.xlu1 %v35331_v54, %s27607_s30  ;;  %v35337_v54 = vld [vmem:[#allocation120_spill] sm:$0xff] }
 0x559   :  { %35335 = vst [vmem:[#allocation32_spill] sm:$0xff] %v30341_v45 }
 0x55a   :  { %v30328_v9 = vpop.xlane.xlu1 %10555  ;;  %v30330_v60 = vpop.f32.mrf.mxu0 }
 0x55b   :  { %35332 = vst [vmem:[#allocation113_spill] sm:$0xff] %v30330_v60 }
 0x55c   :  { %v26131_v41 = vpop.f32.mrf.mxu0 }
 0x55d   :  { %10570 = vmax.xlane.f32.xlu0 %v10569_v55  ;;  %v35336_v55 = vld [vmem:[#allocation213_spill] sm:$0xff] }
 0x55e   :  { %v30336_v14 = vpop.xlane.xlu1 %11191  ;;  %v10758_v41 = vsub.f32 %v35337_v54, %v35336_v55  ;;  %v35341_v55 = vld [vmem:[#allocation195_spill] sm:$0xff] }
 0x560   :  { %v10919_v60 = vmul.f32 1.442695, %v10758_v41 }
 0x561   :  { %11206 = vadd.xlane.f32.xlu0 %v11205_v33 }
 0x562   :  { %v12814_v18 = vpop.permute.xlu1 %12813  ;;  %27024 = vpow2.f32 %v10919_v60 }
 0x563   :  { %26163 = vmatpush3.msra.mxu1 %v12814_v18  ;;  %v27023_v18 = vpop.eup %27022 }
 0x564   :  { %26165 = vmatmul.mubr.msk.f32.vlgmr.msra.gmra.mxu1 %vm614_vm2, %v30341_v45  ;;  %26172 = vmatprep.subr.mxu1 %v35021_v52  ;;  %v30364_v54 = vmul.f32 %v27023_v18, %v35341_v55 }
 0x565   :  { %26174 = vmatprep.mubr.msk.f32.mxu1 %vm27602_vm1, %v35021_v52 }
 0x566   :  { %35342 = vst [vmem:[#allocation213_spill] sm:$0xff] %v30364_v54 }
 0x56f   :  { %v30361_v25 = vpop.eup %27024 }
 0x570   :  { %v11208_v60 = vsel %vm614_vm2, %v30361_v25, 0.0 }
 0x574   :  { %v30351_v33 = vpop.xlane.xlu0 %10558 }
 0x577   :  { %13193 = vrot.lane.b32.xlu0 %v35338_v21, %s27607_s30 }
 0x578   :  { %v30355_v48 = vpop.xlane.xlu0 %11194 }
 0x579   :  { %v30357_v45 = vpop.f32.mrf.mxu1 }
 0x57a   :  { %35339 = vst [vmem:[#allocation190_spill] sm:$0xff] %v30357_v45  ;;  %v35347_v45 = vld [vmem:[#allocation173_spill] sm:$0xff] }
 0x57b   :  { %v26136_v27 = vpop.f32.mrf.mxu1 }
 0x57c   :  { %10573 = vmax.xlane.f32.xlu1 %v10572_v0  ;;  %v12890_v20 = vpop.permute.xlu0 %12889  ;;  %v35343_v27 = vld [vmem:[#allocation124_spill] sm:$0xff] }
 0x57d   :  { %26168 = vmatpush3.msra.mxu0 %v12890_v20  ;;  %v10759_v41 = vsub.f32 %v35343_v27, %v29932_v36  ;;  %v35344_v0 = vld [vmem:[#allocation40_spill] sm:$0xff] }
 0x57e   :  { %26170 = vmatmul.mubr.msk.f32.vlgmr.msra.gmra.mxu0 %vm614_vm2, %v30364_v54  ;;  %26177 = vmatprep.subr.mxu0 %v35021_v52  ;;  %v10575_v54 = vsel %vm614_vm2, %v35347_v45, -inf  ;;  %v35348_v27 = vld [vmem:[#allocation204_spill] sm:$0xff]  ;;  %v35354_v45 = vld [vmem:[#allocation174_spill] sm:$0xff] }
 0x57f   :  { %26179 = vmatprep.mubr.msk.f32.mxu0 %vm27602_vm1, %v35021_v52  ;;  %v10921_v21 = vmul.f32 1.442695, %v10759_v41  ;;  %v10578_v12 = vsel %vm614_vm2, %v35354_v45, -inf }
 0x580   :  { %11209 = vadd.xlane.f32.xlu1 %v11208_v60 }
 0x581   :  { %27026 = vpow2.f32 %v10921_v21 }
 0x582   :  { %27028 = vrcp.f32 %v30122_v47 }
 0x583   :  { %27030 = vrcp.f32 %v30076_v29 }
 0x58e   :  { %v30384_v24 = vpop.eup %27026 }
 0x58f   :  { %v27029_v36 = vpop.eup %27028  ;;  %v11211_v47 = vsel %vm614_vm2, %v30384_v24, 0.0 }
 0x590   :  { %v30391_v41 = vmul.f32 %v27029_v36, %v35348_v27  ;;  %v35352_v36 = vld [vmem:[#allocation39_spill] sm:$0xff] }
 0x591   :  { %13269 = vrot.lane.b32.xlu1 %v35344_v0, %s27607_s30 }
 0x592   :  { %35349 = vst [vmem:[#allocation195_spill] sm:$0xff] %v30391_v41 }
 0x593   :  { %v30378_v18 = vpop.xlane.xlu1 %10561  ;;  %v30380_v55 = vpop.f32.mrf.mxu0 }
 0x594   :  { %35345 = vst [vmem:[#allocation120_spill] sm:$0xff] %v30378_v18  ;;  %35346 = vst [vmem:[#allocation31_spill] sm:$0xff] %v30380_v55 }
 0x595   :  { %v26141_v20 = vpop.f32.mrf.mxu0 }
 0x596   :  { %10576 = vmax.xlane.f32.xlu0 %v10575_v54  ;;  %v35350_v54 = vld [vmem:[#allocation122_spill] sm:$0xff] }
 0x597   :  { %v30386_v60 = vpop.xlane.xlu1 %11197  ;;  %v10760_v0 = vsub.f32 %v35350_v54, %v29936_v6  ;;  %v35355_v6 = vld [vmem:[#allocation179_spill] sm:$0xff] }
 0x599   :  { %v10923_v20 = vmul.f32 1.442695, %v10760_v0 }
 0x59a   :  { %11212 = vadd.xlane.f32.xlu0 %v11211_v47 }
 0x59b   :  { %v12966_v21 = vpop.permute.xlu1 %12965  ;;  %27032 = vpow2.f32 %v10923_v20  ;;  %v35358_v20 = vld [vmem:[#allocation135_spill] sm:$0xff] }
 0x59c   :  { %26173 = vmatpush3.msra.mxu1 %v12966_v21  ;;  %v27031_v21 = vpop.eup %27030 }
 0x59d   :  { %26175 = vmatmul.mubr.msk.f32.vlgmr.msra.gmra.mxu1 %vm614_vm2, %v30391_v41  ;;  %26182 = vmatprep.subr.mxu1 %v35021_v52  ;;  %v30414_v54 = vmul.f32 %v27031_v21, %v35355_v6 }
 0x59e   :  { %26184 = vmatprep.mubr.msk.f32.mxu1 %vm27602_vm1, %v35021_v52 }
 0x59f   :  { %35356 = vst [vmem:[#allocation204_spill] sm:$0xff] %v30414_v54 }
 0x5a8   :  { %v30411_v22 = vpop.eup %27032 }
 0x5a9   :  { %v11214_v0 = vsel %vm614_vm2, %v30411_v22, 0.0 }
 0x5ad   :  { %v30401_v47 = vpop.xlane.xlu0 %10564 }
 0x5ae   :  { %35351 = vst [vmem:[#allocation124_spill] sm:$0xff] %v30401_v47 }
 0x5b0   :  { %13345 = vrot.lane.b32.xlu0 %v35352_v36, %s27607_s30 }
 0x5b1   :  { %v30405_v27 = vpop.xlane.xlu0 %11200 }
 0x5b2   :  { %v30407_v55 = vpop.f32.mrf.mxu1 }
 0x5b3   :  { %35353 = vst [vmem:[#allocation40_spill] sm:$0xff] %v30407_v55 }
 0x5b4   :  { %v26146_v41 = vpop.f32.mrf.mxu1 }
 0x5b5   :  { %10579 = vmax.xlane.f32.xlu1 %v10578_v12  ;;  %v13042_v29 = vpop.permute.xlu0 %13041  ;;  %v35357_v41 = vld [vmem:[#allocation216_spill] sm:$0xff] }
 0x5b6   :  { %26178 = vmatpush3.msra.mxu0 %v13042_v29  ;;  %v10761_v36 = vsub.f32 %v35358_v20, %v35357_v41  ;;  %v35359_v12 = vld [vmem:[#allocation48_spill] sm:$0xff]  ;;  %v35363_v20 = vld [vmem:[#allocation7_spill] sm:$0xff] }
 0x5b7   :  { %26180 = vmatmul.mubr.msk.f32.vlgmr.msra.gmra.mxu0 %vm614_vm2, %v30414_v54  ;;  %26187 = vmatprep.subr.mxu0 %v35021_v52  ;;  %v35362_v54 = vld [vmem:[#allocation175_spill] sm:$0xff] }
 0x5b8   :  { %26189 = vmatprep.mubr.msk.f32.mxu0 %vm27602_vm1, %v35021_v52  ;;  %v10925_v21 = vmul.f32 1.442695, %v10761_v36  ;;  %v10581_v45 = vsel %vm614_vm2, %v35362_v54, -inf }
 0x5b9   :  { %11215 = vadd.xlane.f32.xlu1 %v11214_v0 }
 0x5ba   :  { %27034 = vpow2.f32 %v10925_v21 }
 0x5bb   :  { %27036 = vrcp.f32 %v30130_v11 }
 0x5bc   :  { %27038 = vrcp.f32 %v30136_v37 }
 0x5c7   :  { %v30434_v47 = vpop.eup %27034 }
 0x5c8   :  { %v27037_v41 = vpop.eup %27036  ;;  %v11217_v11 = vsel %vm614_vm2, %v30434_v47, 0.0 }
 0x5c9   :  { %v30441_v36 = vmul.f32 %v27037_v41, %v35363_v20  ;;  %v35368_v41 = vld [vmem:[#allocation47_spill] sm:$0xff] }
 0x5ca   :  { %13421 = vrot.lane.b32.xlu1 %v35359_v12, %s27607_s30 }
 0x5cb   :  { %35364 = vst [vmem:[#allocation179_spill] sm:$0xff] %v30441_v36 }
 0x5cc   :  { %v30428_v6 = vpop.xlane.xlu1 %10567  ;;  %v30430_v29 = vpop.f32.mrf.mxu0 }
 0x5cd   :  { %35360 = vst [vmem:[#allocation122_spill] sm:$0xff] %v30428_v6  ;;  %35361 = vst [vmem:[#allocation39_spill] sm:$0xff] %v30430_v29  ;;  %v35370_v6 = vld [vmem:[#allocation176_spill] sm:$0xff] }
 0x5ce   :  { %v26151_v55 = vpop.f32.mrf.mxu0  ;;  %v10584_v18 = vsel %vm614_vm2, %v35370_v6, -inf }
 0x5cf   :  { %10582 = vmax.xlane.f32.xlu0 %v10581_v45  ;;  %v35365_v45 = vld [vmem:[#allocation219_spill] sm:$0xff] }
 0x5d0   :  { %v30436_v0 = vpop.xlane.xlu1 %11203  ;;  %v35366_v55 = vld [vmem:[#allocation127_spill] sm:$0xff] }
 0x5d1   :  { %v10762_v12 = vsub.f32 %v35366_v55, %v35365_v45  ;;  %v35371_v45 = vld [vmem:[#allocation210_spill] sm:$0xff] }
 0x5d3   :  { %11218 = vadd.xlane.f32.xlu0 %v11217_v11  ;;  %v10927_v29 = vmul.f32 1.442695, %v10762_v12  ;;  %v35374_v12 = vld [vmem:[#allocation137_spill] sm:$0xff] }
 0x5d4   :  { %v13118_v21 = vpop.permute.xlu1 %13117 }
 0x5d5   :  { %26183 = vmatpush3.msra.mxu1 %v13118_v21  ;;  %27040 = vpow2.f32 %v10927_v29  ;;  %v27039_v21 = vpop.eup %27038 }
 0x5d6   :  { %26185 = vmatmul.mubr.msk.f32.vlgmr.msra.gmra.mxu1 %vm614_vm2, %v30441_v36  ;;  %26192 = vmatprep.subr.mxu1 %v35021_v52  ;;  %v30464_v55 = vmul.f32 %v27039_v21, %v35371_v45 }
 0x5d7   :  { %26194 = vmatprep.mubr.msk.f32.mxu1 %vm27602_vm1, %v35021_v52 }
 0x5d8   :  { %35372 = vst [vmem:[#allocation48_spill] sm:$0xff] %v30464_v55 }
 0x5e2   :  { %v30461_v26 = vpop.eup %27040 }
 0x5e3   :  { %v11220_v29 = vsel %vm614_vm2, %v30461_v26, 0.0 }
 0x5e6   :  { %v30451_v11 = vpop.xlane.xlu0 %10570 }
 0x5e7   :  { %35367 = vst [vmem:[#allocation216_spill] sm:$0xff] %v30451_v11 }
 0x5e9   :  { %13497 = vrot.lane.b32.xlu0 %v35368_v41, %s27607_s30 }
 0x5ea   :  { %v30455_v20 = vpop.xlane.xlu0 %11206 }
 0x5eb   :  { %v30457_v36 = vpop.f32.mrf.mxu1 }
 0x5ec   :  { %35369 = vst [vmem:[#allocation135_spill] sm:$0xff] %v30457_v36 }
 0x5ed   :  { %v26156_v54 = vpop.f32.mrf.mxu1 }
 0x5ee   :  { %10585 = vmax.xlane.f32.xlu1 %v10584_v18  ;;  %v13194_v37 = vpop.permute.xlu0 %13193  ;;  %v35373_v54 = vld [vmem:[#allocation220_spill] sm:$0xff] }
 0x5ef   :  { %26188 = vmatpush3.msra.mxu0 %v13194_v37  ;;  %v10763_v41 = vsub.f32 %v35374_v12, %v35373_v54  ;;  %v35375_v18 = vld [vmem:[#allocation56_spill] sm:$0xff] }
 0x5f0   :  { %26190 = vmatmul.mubr.msk.f32.vlgmr.msra.gmra.mxu0 %vm614_vm2, %v30464_v55  ;;  %26197 = vmatprep.subr.mxu0 %v35021_v52  ;;  %v35378_v55 = vld [vmem:[#allocation177_spill] sm:$0xff] }
 0x5f1   :  { %26199 = vmatprep.mubr.msk.f32.mxu0 %vm27602_vm1, %v35021_v52  ;;  %v10929_v21 = vmul.f32 1.442695, %v10763_v41  ;;  %v10587_v6 = vsel %vm614_vm2, %v35378_v55, -inf }
 0x5f2   :  { %11221 = vadd.xlane.f32.xlu1 %v11220_v29 }
 0x5f3   :  { %27042 = vpow2.f32 %v10929_v21 }
 0x5f4   :  { %27044 = vrcp.f32 %v30155_v57 }
 0x5f5   :  { %27046 = vrcp.f32 %v30182_v5 }
 0x600   :  { %v30484_v11 = vpop.eup %27042 }
 0x601   :  { %v27045_v54 = vpop.eup %27044  ;;  %v11223_v57 = vsel %vm614_vm2, %v30484_v11, 0.0 }
 0x602   :  { %v30491_v12 = vmul.f32 %v27045_v54, %v29978_v46  ;;  %v35382_v46 = vld [vmem:[#allocation55_spill] sm:$0xff] }
 0x603   :  { %13573 = vrot.lane.b32.xlu1 %v35375_v18, %s27607_s30 }
 0x604   :  { %35379 = vst [vmem:[#allocation127_spill] sm:$0xff] %v30491_v12 }
 0x605   :  { %v30478_v45 = vpop.xlane.xlu1 %10573  ;;  %v30480_v37 = vpop.f32.mrf.mxu0 }
 0x606   :  { %35376 = vst [vmem:[#allocation7_spill] sm:$0xff] %v30478_v45  ;;  %35377 = vst [vmem:[#allocation219_spill] sm:$0xff] %v30480_v37 }
 0x607   :  { %v26161_v36 = vpop.f32.mrf.mxu0 }
 0x608   :  { %10588 = vmax.xlane.f32.xlu0 %v10587_v6  ;;  %v35380_v6 = vld [vmem:[#allocation136_spill] sm:$0xff] }
 0x609   :  { %v30486_v29 = vpop.xlane.xlu1 %11209  ;;  %v10764_v36 = vsub.f32 %v35380_v6, %v29952_v1 }
 0x60b   :  { %v10931_v21 = vmul.f32 1.442695, %v10764_v36  ;;  %v35387_v36 = vld [vmem:[#allocation144_spill] sm:$0xff] }
 0x60c   :  { %11224 = vadd.xlane.f32.xlu0 %v11223_v57  ;;  %v27047_v57 = vpop.eup %27046 }
 0x60d   :  { %v13270_v41 = vpop.permute.xlu1 %13269  ;;  %27048 = vpow2.f32 %v10931_v21  ;;  %v30514_v1 = vmul.f32 %v27047_v57, %v30020_v39 }
 0x60e   :  { %26193 = vmatpush3.msra.mxu1 %v13270_v41 }
 0x60f   :  { %26195 = vmatmul.mubr.msk.f32.vlgmr.msra.gmra.mxu1 %vm614_vm2, %v30491_v12  ;;  %26202 = vmatprep.subr.mxu1 %v35021_v52  ;;  %v35384_v12 = vld [vmem:[#allocation178_spill] sm:$0xff]  ;;  %35385 = vst [vmem:[#allocation220_spill] sm:$0xff] %v30514_v1 }
 0x610   :  { %26204 = vmatprep.mubr.msk.f32.mxu1 %vm27602_vm1, %v35021_v52  ;;  %v10590_v55 = vsel %vm614_vm2, %v35384_v12, -inf }
 0x61a   :  { %v30511_v45 = vpop.eup %27048 }
 0x61b   :  { %v11226_v6 = vsel %vm614_vm2, %v30511_v45, 0.0 }
 0x61f   :  { %v30501_v18 = vpop.xlane.xlu0 %10576 }
 0x620   :  { %35381 = vst [vmem:[#allocation47_spill] sm:$0xff] %v30501_v18 }
 0x622   :  { %13649 = vrot.lane.b32.xlu0 %v35382_v46, %s27607_s30 }
 0x623   :  { %v30505_v54 = vpop.xlane.xlu0 %11212 }
 0x624   :  { %v30507_v41 = vpop.f32.mrf.mxu1 }
 0x625   :  { %35383 = vst [vmem:[#allocation210_spill] sm:$0xff] %v30507_v41  ;;  %v35391_v41 = vld [vmem:[#allocation180_spill] sm:$0xff] }
 0x626   :  { %v26166_v37 = vpop.f32.mrf.mxu1 }
 0x627   :  { %10591 = vmax.xlane.f32.xlu1 %v10590_v55  ;;  %v13346_v5 = vpop.permute.xlu0 %13345  ;;  %v35386_v37 = vld [vmem:[#allocation223_spill] sm:$0xff]  ;;  %v35388_v55 = vld [vmem:[#allocation64_spill] sm:$0xff] }
 0x628   :  { %26198 = vmatpush3.msra.mxu0 %v13346_v5  ;;  %v10765_v21 = vsub.f32 %v35387_v36, %v35386_v37 }
 0x629   :  { %26200 = vmatmul.mubr.msk.f32.vlgmr.msra.gmra.mxu0 %vm614_vm2, %v30514_v1  ;;  %26207 = vmatprep.subr.mxu0 %v35021_v52  ;;  %v10593_v1 = vsel %vm614_vm2, %v35391_v41, -inf  ;;  %v35398_v41 = vld [vmem:[#allocation181_spill] sm:$0xff] }
 0x62a   :  { %26209 = vmatprep.mubr.msk.f32.mxu0 %vm27602_vm1, %v35021_v52  ;;  %v10933_v39 = vmul.f32 1.442695, %v10765_v21 }
 0x62b   :  { %11227 = vadd.xlane.f32.xlu1 %v11226_v6 }
 0x62c   :  { %27050 = vpow2.f32 %v10933_v39  ;;  %v35394_v39 = vld [vmem:[#allocation5_spill] sm:$0xff] }
 0x62d   :  { %27052 = vrcp.f32 %v30201_v30 }
 0x62e   :  { %27054 = vrcp.f32 %v30230_v15 }
 0x639   :  { %v30534_v12 = vpop.eup %27050 }
 0x63a   :  { %v27053_v37 = vpop.eup %27052  ;;  %v11229_v30 = vsel %vm614_vm2, %v30534_v12, 0.0 }
 0x63b   :  { %v30541_v36 = vmul.f32 %v27053_v37, %v30070_v28  ;;  %v35396_v28 = vld [vmem:[#allocation63_spill] sm:$0xff] }
 0x63c   :  { %13725 = vrot.lane.b32.xlu1 %v35388_v55, %s27607_s30 }
 0x63d   :  { %35392 = vst [vmem:[#allocation136_spill] sm:$0xff] %v30541_v36 }
 0x63e   :  { %v30528_v46 = vpop.xlane.xlu1 %10579  ;;  %v30530_v57 = vpop.f32.mrf.mxu0 }
 0x63f   :  { %35389 = vst [vmem:[#allocation137_spill] sm:$0xff] %v30528_v46  ;;  %35390 = vst [vmem:[#allocation56_spill] sm:$0xff] %v30530_v57  ;;  %v10596_v46 = vsel %vm614_vm2, %v35398_v41, -inf }
 0x640   :  { %v26171_v5 = vpop.f32.mrf.mxu0 }
 0x641   :  { %10594 = vmax.xlane.f32.xlu0 %v10593_v1  ;;  %v35393_v1 = vld [vmem:[#allocation226_spill] sm:$0xff] }
 0x642   :  { %v30536_v6 = vpop.xlane.xlu1 %11215  ;;  %v10766_v55 = vsub.f32 %v35394_v39, %v35393_v1 }
 0x644   :  { %v10935_v5 = vmul.f32 1.442695, %v10766_v55  ;;  %v35401_v55 = vld [vmem:[#allocation146_spill] sm:$0xff] }
 0x645   :  { %11230 = vadd.xlane.f32.xlu0 %v11229_v30 }
 0x646   :  { %v13422_v21 = vpop.permute.xlu1 %13421  ;;  %27056 = vpow2.f32 %v10935_v5 }
 0x647   :  { %26203 = vmatpush3.msra.mxu1 %v13422_v21  ;;  %v27055_v21 = vpop.eup %27054 }
 0x648   :  { %26205 = vmatmul.mubr.msk.f32.vlgmr.msra.gmra.mxu1 %vm614_vm2, %v30541_v36  ;;  %26212 = vmatprep.subr.mxu1 %v35021_v52  ;;  %v30564_v1 = vmul.f32 %v27055_v21, %v30104_v61 }
 0x649   :  { %26214 = vmatprep.mubr.msk.f32.mxu1 %vm27602_vm1, %v35021_v52 }
 0x64a   :  { %35399 = vst [vmem:[#allocation144_spill] sm:$0xff] %v30564_v1 }
 0x653   :  { %v30561_v18 = vpop.eup %27056 }
 0x654   :  { %v11232_v39 = vsel %vm614_vm2, %v30561_v18, 0.0 }
 0x658   :  { %v30551_v30 = vpop.xlane.xlu0 %10582 }
 0x659   :  { %35395 = vst [vmem:[#allocation55_spill] sm:$0xff] %v30551_v30 }
 0x65b   :  { %13801 = vrot.lane.b32.xlu0 %v35396_v28, %s27607_s30 }
 0x65c   :  { %v30555_v37 = vpop.xlane.xlu0 %11218 }
 0x65d   :  { %v30557_v57 = vpop.f32.mrf.mxu1 }
 0x65e   :  { %35397 = vst [vmem:[#allocation223_spill] sm:$0xff] %v30557_v57  ;;  %v35405_v57 = vld [vmem:[#allocation182_spill] sm:$0xff] }
 0x65f   :  { %v26176_v36 = vpop.f32.mrf.mxu1 }
 0x660   :  { %10597 = vmax.xlane.f32.xlu1 %v10596_v46  ;;  %v13498_v15 = vpop.permute.xlu0 %13497  ;;  %v35400_v36 = vld [vmem:[#allocation227_spill] sm:$0xff]  ;;  %v35402_v46 = vld [vmem:[#allocation72_spill] sm:$0xff] }
 0x661   :  { %26208 = vmatpush3.msra.mxu0 %v13498_v15  ;;  %v10767_v5 = vsub.f32 %v35401_v55, %v35400_v36 }
 0x662   :  { %26210 = vmatmul.mubr.msk.f32.vlgmr.msra.gmra.mxu0 %vm614_vm2, %v30564_v1  ;;  %26217 = vmatprep.subr.mxu0 %v35021_v52  ;;  %v10599_v1 = vsel %vm614_vm2, %v35405_v57, -inf  ;;  %v35412_v57 = vld [vmem:[#allocation183_spill] sm:$0xff] }
 0x663   :  { %26219 = vmatprep.mubr.msk.f32.mxu0 %vm27602_vm1, %v35021_v52  ;;  %v10937_v61 = vmul.f32 1.442695, %v10767_v5 }
 0x664   :  { %11233 = vadd.xlane.f32.xlu1 %v11232_v39 }
 0x665   :  { %27058 = vpow2.f32 %v10937_v61  ;;  %v35408_v61 = vld [vmem:[#allocation145_spill] sm:$0xff] }
 0x666   :  { %27060 = vrcp.f32 %v30255_v17 }
 0x667   :  { %27062 = vrcp.f32 %v30286_v13 }
 0x672   :  { %v30584_v41 = vpop.eup %27058 }
 0x673   :  { %v27061_v36 = vpop.eup %27060  ;;  %v11235_v17 = vsel %vm614_vm2, %v30584_v41, 0.0 }
 0x674   :  { %v30591_v55 = vmul.f32 %v27061_v36, %v30134_v23  ;;  %v35410_v23 = vld [vmem:[#allocation71_spill] sm:$0xff] }
 0x675   :  { %13877 = vrot.lane.b32.xlu1 %v35402_v46, %s27607_s30 }
 0x676   :  { %35406 = vst [vmem:[#allocation5_spill] sm:$0xff] %v30591_v55 }
 0x677   :  { %v30578_v28 = vpop.xlane.xlu1 %10585  ;;  %v30580_v21 = vpop.f32.mrf.mxu0 }
 0x678   :  { %35403 = vst [vmem:[#allocation64_spill] sm:$0xff] %v30578_v28  ;;  %35404 = vst [vmem:[#allocation226_spill] sm:$0xff] %v30580_v21  ;;  %v10602_v28 = vsel %vm614_vm2, %v35412_v57, -inf }
 0x679   :  { %v26181_v15 = vpop.f32.mrf.mxu0 }
 0x67a   :  { %10600 = vmax.xlane.f32.xlu0 %v10599_v1  ;;  %v35407_v1 = vld [vmem:[#allocation229_spill] sm:$0xff] }
 0x67b   :  { %v30586_v39 = vpop.xlane.xlu1 %11221  ;;  %v10768_v46 = vsub.f32 %v35408_v61, %v35407_v1 }
 0x67d   :  { %v10939_v15 = vmul.f32 1.442695, %v10768_v46  ;;  %v35415_v46 = vld [vmem:[#allocation147_spill] sm:$0xff] }
 0x67e   :  { %11236 = vadd.xlane.f32.xlu0 %v11235_v17 }
 0x67f   :  { %v13574_v5 = vpop.permute.xlu1 %13573  ;;  %27064 = vpow2.f32 %v10939_v15 }
 0x680   :  { %26213 = vmatpush3.msra.mxu1 %v13574_v5  ;;  %v27063_v5 = vpop.eup %27062 }
 0x681   :  { %26215 = vmatmul.mubr.msk.f32.vlgmr.msra.gmra.mxu1 %vm614_vm2, %v30591_v55  ;;  %26222 = vmatprep.subr.mxu1 %v35021_v52  ;;  %v30614_v1 = vmul.f32 %v27063_v5, %v30159_v16 }
 0x682   :  { %26224 = vmatprep.mubr.msk.f32.mxu1 %vm27602_vm1, %v35021_v52 }
 0x683   :  { %35413 = vst [vmem:[#allocation146_spill] sm:$0xff] %v30614_v1 }
 0x68c   :  { %v30611_v30 = vpop.eup %27064 }
 0x68d   :  { %v11238_v61 = vsel %vm614_vm2, %v30611_v30, 0.0 }
 0x691   :  { %v30601_v17 = vpop.xlane.xlu0 %10588 }
 0x692   :  { %35409 = vst [vmem:[#allocation63_spill] sm:$0xff] %v30601_v17 }
 0x694   :  { %13953 = vrot.lane.b32.xlu0 %v35410_v23, %s27607_s30 }
 0x695   :  { %v30605_v36 = vpop.xlane.xlu0 %11224 }
 0x696   :  { %v30607_v21 = vpop.f32.mrf.mxu1 }
 0x697   :  { %35411 = vst [vmem:[#allocation227_spill] sm:$0xff] %v30607_v21  ;;  %v35419_v21 = vld [vmem:[#allocation184_spill] sm:$0xff] }
 0x698   :  { %v26186_v55 = vpop.f32.mrf.mxu1 }
 0x699   :  { %10603 = vmax.xlane.f32.xlu1 %v10602_v28  ;;  %v13650_v13 = vpop.permute.xlu0 %13649  ;;  %v35414_v55 = vld [vmem:[#allocation230_spill] sm:$0xff]  ;;  %v35416_v28 = vld [vmem:[#allocation80_spill] sm:$0xff] }
 0x69a   :  { %26218 = vmatpush3.msra.mxu0 %v13650_v13  ;;  %v10769_v15 = vsub.f32 %v35415_v46, %v35414_v55 }
 0x69b   :  { %26220 = vmatmul.mubr.msk.f32.vlgmr.msra.gmra.mxu0 %vm614_vm2, %v30614_v1  ;;  %26227 = vmatprep.subr.mxu0 %v35021_v52  ;;  %v10605_v1 = vsel %vm614_vm2, %v35419_v21, -inf  ;;  %v35425_v21 = vld [vmem:[#allocation185_spill] sm:$0xff] }
 0x69c   :  { %26229 = vmatprep.mubr.msk.f32.mxu0 %vm27602_vm1, %v35021_v52  ;;  %v10941_v16 = vmul.f32 1.442695, %v10769_v15 }
 0x69d   :  { %11239 = vadd.xlane.f32.xlu1 %v11238_v61 }
 0x69e   :  { %27066 = vpow2.f32 %v10941_v16  ;;  %v35422_v16 = vld [vmem:[#allocation138_spill] sm:$0xff] }
 0x69f   :  { %27068 = vrcp.f32 %v30305_v19 }
 0x6a0   :  { %27070 = vrcp.f32 %v30336_v14 }
 0x6ab   :  { %v30634_v57 = vpop.eup %27066 }
 0x6ac   :  { %v27069_v55 = vpop.eup %27068  ;;  %v11241_v19 = vsel %vm614_vm2, %v30634_v57, 0.0 }
 0x6ad   :  { %v30641_v46 = vmul.f32 %v27069_v55, %v30180_v51  ;;  %v35423_v51 = vld [vmem:[#allocation79_spill] sm:$0xff] }
 0x6ae   :  { %14029 = vrot.lane.b32.xlu1 %v35416_v28, %s27607_s30 }
 0x6af   :  { %35420 = vst [vmem:[#allocation145_spill] sm:$0xff] %v30641_v46 }
 0x6b0   :  { %v30628_v23 = vpop.xlane.xlu1 %10591  ;;  %v30630_v5 = vpop.f32.mrf.mxu0 }
 0x6b1   :  { %35417 = vst [vmem:[#allocation72_spill] sm:$0xff] %v30628_v23  ;;  %35418 = vst [vmem:[#allocation229_spill] sm:$0xff] %v30630_v5  ;;  %v10608_v23 = vsel %vm614_vm2, %v35425_v21, -inf }
 0x6b2   :  { %v26191_v13 = vpop.f32.mrf.mxu0 }
 0x6b3   :  { %10606 = vmax.xlane.f32.xlu0 %v10605_v1  ;;  %v35421_v1 = vld [vmem:[#allocation233_spill] sm:$0xff] }
 0x6b4   :  { %v30636_v61 = vpop.xlane.xlu1 %11227  ;;  %v10770_v28 = vsub.f32 %v35422_v16, %v35421_v1 }
 0x6b6   :  { %v10943_v13 = vmul.f32 1.442695, %v10770_v28  ;;  %v35428_v28 = vld [vmem:[#allocation149_spill] sm:$0xff] }
 0x6b7   :  { %11242 = vadd.xlane.f32.xlu0 %v11241_v19 }
 0x6b8   :  { %v13726_v15 = vpop.permute.xlu1 %13725  ;;  %27072 = vpow2.f32 %v10943_v13 }
 0x6b9   :  { %26223 = vmatpush3.msra.mxu1 %v13726_v15  ;;  %v27071_v15 = vpop.eup %27070 }
 0x6ba   :  { %26225 = vmatmul.mubr.msk.f32.vlgmr.msra.gmra.mxu1 %vm614_vm2, %v30641_v46  ;;  %26232 = vmatprep.subr.mxu1 %v35021_v52  ;;  %v30664_v1 = vmul.f32 %v27071_v15, %v30205_v43 }
 0x6bb   :  { %26234 = vmatprep.mubr.msk.f32.mxu1 %vm27602_vm1, %v35021_v52 }
 0x6bc   :  { %35426 = vst [vmem:[#allocation230_spill] sm:$0xff] %v30664_v1 }
 0x6c5   :  { %v30661_v17 = vpop.eup %27072 }
 0x6c6   :  { %v11244_v16 = vsel %vm614_vm2, %v30661_v17, 0.0 }
 0x6ca   :  { %v30651_v19 = vpop.xlane.xlu0 %10594 }
 0x6cd   :  { %14105 = vrot.lane.b32.xlu0 %v35423_v51, %s27607_s30 }
 0x6ce   :  { %v30655_v55 = vpop.xlane.xlu0 %11230 }
 0x6cf   :  { %v30657_v5 = vpop.f32.mrf.mxu1 }
 0x6d0   :  { %35424 = vst [vmem:[#allocation71_spill] sm:$0xff] %v30657_v5  ;;  %v35432_v5 = vld [vmem:[#allocation187_spill] sm:$0xff] }
 0x6d1   :  { %v26196_v46 = vpop.f32.mrf.mxu1 }
 0x6d2   :  { %10609 = vmax.xlane.f32.xlu1 %v10608_v23  ;;  %v13802_v14 = vpop.permute.xlu0 %13801  ;;  %v35427_v46 = vld [vmem:[#allocation234_spill] sm:$0xff] }
 0x6d3   :  { %26228 = vmatpush3.msra.mxu0 %v13802_v14  ;;  %v10771_v13 = vsub.f32 %v35428_v28, %v35427_v46  ;;  %v35429_v23 = vld [vmem:[#allocation22_spill] sm:$0xff] }
 0x6d4   :  { %26230 = vmatmul.mubr.msk.f32.vlgmr.msra.gmra.mxu0 %vm614_vm2, %v30664_v1  ;;  %26237 = vmatprep.subr.mxu0 %v35021_v52  ;;  %v10611_v1 = vsel %vm614_vm2, %v35432_v5, -inf }
 0x6d5   :  { %26239 = vmatprep.mubr.msk.f32.mxu0 %vm27602_vm1, %v35021_v52  ;;  %v10945_v43 = vmul.f32 1.442695, %v10771_v13 }
 0x6d6   :  { %11245 = vadd.xlane.f32.xlu1 %v11244_v16 }
 0x6d7   :  { %27074 = vpow2.f32 %v10945_v43 }
 0x6d8   :  { %27076 = vrcp.f32 %v30355_v48 }
 0x6d9   :  { %27078 = vrcp.f32 %v30386_v60 }
 0x6e4   :  { %v30684_v21 = vpop.eup %27074 }
 0x6e5   :  { %v27077_v46 = vpop.eup %27076  ;;  %v11247_v48 = vsel %vm614_vm2, %v30684_v21, 0.0 }
 0x6e6   :  { %v30691_v28 = vmul.f32 %v27077_v46, %v30226_v42  ;;  %v35435_v42 = vld [vmem:[#allocation19_spill] sm:$0xff] }
 0x6e7   :  { %14181 = vrot.lane.b32.xlu1 %v35429_v23, %s27607_s30 }
 0x6e8   :  { %35433 = vst [vmem:[#allocation233_spill] sm:$0xff] %v30691_v28 }
 0x6e9   :  { %v30678_v51 = vpop.xlane.xlu1 %10597  ;;  %v30680_v15 = vpop.f32.mrf.mxu0 }
 0x6ea   :  { %35430 = vst [vmem:[#allocation147_spill] sm:$0xff] %v30678_v51  ;;  %35431 = vst [vmem:[#allocation80_spill] sm:$0xff] %v30680_v15 }
 0x6eb   :  { %v26201_v14 = vpop.f32.mrf.mxu0 }
 0x6ec   :  { %10612 = vmax.xlane.f32.xlu0 %v10611_v1  ;;  %v35434_v1 = vld [vmem:[#allocation148_spill] sm:$0xff] }
 0x6ed   :  { %v30686_v16 = vpop.xlane.xlu1 %11233  ;;  %v10772_v43 = vsub.f32 %v35434_v1, %v29992_v62 }
 0x6ef   :  { %v10947_v23 = vmul.f32 1.442695, %v10772_v43  ;;  %v35440_v43 = vld [vmem:[#allocation150_spill] sm:$0xff] }
 0x6f0   :  { %11248 = vadd.xlane.f32.xlu0 %v11247_v48  ;;  %v27079_v48 = vpop.eup %27078 }
 0x6f1   :  { %v13878_v13 = vpop.permute.xlu1 %13877  ;;  %27080 = vpow2.f32 %v10947_v23  ;;  %v30714_v62 = vmul.f32 %v27079_v48, %v30259_v32 }
 0x6f2   :  { %26233 = vmatpush3.msra.mxu1 %v13878_v13 }
 0x6f3   :  { %26235 = vmatmul.mubr.msk.f32.vlgmr.msra.gmra.mxu1 %vm614_vm2, %v30691_v28  ;;  %26242 = vmatprep.subr.mxu1 %v35021_v52  ;;  %v35437_v28 = vld [vmem:[#allocation186_spill] sm:$0xff]  ;;  %35438 = vst [vmem:[#allocation79_spill] sm:$0xff] %v30714_v62 }
 0x6f4   :  { %26244 = vmatprep.mubr.msk.f32.mxu1 %vm27602_vm1, %v35021_v52  ;;  %v10614_v5 = vsel %vm614_vm2, %v35437_v28, -inf }
 0x6fe   :  { %v30711_v51 = vpop.eup %27080 }
 0x6ff   :  { %v11250_v1 = vsel %vm614_vm2, %v30711_v51, 0.0 }
 0x703   :  { %v30701_v14 = vpop.xlane.xlu0 %10600 }
 0x706   :  { %14257 = vrot.lane.b32.xlu0 %v35435_v42, %s27607_s30 }
 0x707   :  { %v30705_v46 = vpop.xlane.xlu0 %11236 }
 0x708   :  { %v30707_v13 = vpop.f32.mrf.mxu1 }
 0x709   :  { %35436 = vst [vmem:[#allocation138_spill] sm:$0xff] %v30707_v13  ;;  %v35444_v13 = vld [vmem:[#allocation189_spill] sm:$0xff] }
 0x70a   :  { %v26206_v15 = vpop.f32.mrf.mxu1 }
 0x70b   :  { %10615 = vmax.xlane.f32.xlu1 %v10614_v5  ;;  %v13954_v60 = vpop.permute.xlu0 %13953  ;;  %v35439_v15 = vld [vmem:[#allocation237_spill] sm:$0xff] }
 0x70c   :  { %26238 = vmatpush3.msra.mxu0 %v13954_v60  ;;  %v10773_v23 = vsub.f32 %v35440_v43, %v35439_v15  ;;  %v35441_v5 = vld [vmem:[#allocation33_spill] sm:$0xff] }
 0x70d   :  { %26240 = vmatmul.mubr.msk.f32.vlgmr.msra.gmra.mxu0 %vm614_vm2, %v30714_v62  ;;  %26247 = vmatprep.subr.mxu0 %v35021_v52  ;;  %v10617_v62 = vsel %vm614_vm2, %v35444_v13, -inf }
 0x70e   :  { %26249 = vmatprep.mubr.msk.f32.mxu0 %vm27602_vm1, %v35021_v52  ;;  %v10949_v32 = vmul.f32 1.442695, %v10773_v23 }
 0x70f   :  { %11251 = vadd.xlane.f32.xlu1 %v11250_v1 }
 0x710   :  { %27082 = vpow2.f32 %v10949_v32 }
 0x711   :  { %27084 = vrcp.f32 %v30405_v27 }
 0x712   :  { %27086 = vrcp.f32 %v30436_v0 }
 0x71d   :  { %v30734_v28 = vpop.eup %27082 }
 0x71e   :  { %v27085_v15 = vpop.eup %27084  ;;  %v11253_v27 = vsel %vm614_vm2, %v30734_v28, 0.0 }
 0x71f   :  { %v30741_v43 = vmul.f32 %v27085_v15, %v30284_v7  ;;  %v35447_v7 = vld [vmem:[#allocation29_spill] sm:$0xff] }
 0x720   :  { %14333 = vrot.lane.b32.xlu1 %v35441_v5, %s27607_s30 }
 0x721   :  { %35445 = vst [vmem:[#allocation22_spill] sm:$0xff] %v30741_v43 }
 0x722   :  { %v30728_v42 = vpop.xlane.xlu1 %10603  ;;  %v30730_v48 = vpop.f32.mrf.mxu0 }
 0x723   :  { %35442 = vst [vmem:[#allocation234_spill] sm:$0xff] %v30728_v42  ;;  %35443 = vst [vmem:[#allocation149_spill] sm:$0xff] %v30730_v48 }
 0x724   :  { %v26211_v60 = vpop.f32.mrf.mxu0 }
 0x725   :  { %10618 = vmax.xlane.f32.xlu0 %v10617_v62  ;;  %v35446_v62 = vld [vmem:[#allocation139_spill] sm:$0xff] }
 0x726   :  { %v30736_v1 = vpop.xlane.xlu1 %11239  ;;  %v10774_v32 = vsub.f32 %v35446_v62, %v29998_v59 }
 0x728   :  { %v10951_v5 = vmul.f32 1.442695, %v10774_v32 }
 0x729   :  { %11254 = vadd.xlane.f32.xlu0 %v11253_v27  ;;  %v27087_v27 = vpop.eup %27086 }
 0x72a   :  { %v14030_v23 = vpop.permute.xlu1 %14029  ;;  %27088 = vpow2.f32 %v10951_v5  ;;  %v30764_v59 = vmul.f32 %v27087_v27, %v30311_v34 }
 0x72b   :  { %26243 = vmatpush3.msra.mxu1 %v14030_v23 }
 0x72c   :  { %26245 = vmatmul.mubr.msk.f32.vlgmr.msra.gmra.mxu1 %vm614_vm2, %v30741_v43  ;;  %26252 = vmatprep.subr.mxu1 %v35021_v52  ;;  %v35449_v43 = vld [vmem:[#allocation188_spill] sm:$0xff]  ;;  %35450 = vst [vmem:[#allocation19_spill] sm:$0xff] %v30764_v59 }
 0x72d   :  { %26254 = vmatprep.mubr.msk.f32.mxu1 %vm27602_vm1, %v35021_v52  ;;  %v10620_v13 = vsel %vm614_vm2, %v35449_v43, -inf }
 0x737   :  { %v30761_v42 = vpop.eup %27088 }
 0x738   :  { %v11256_v62 = vsel %vm614_vm2, %v30761_v42, 0.0 }
 0x73c   :  { %v30751_v60 = vpop.xlane.xlu0 %10606 }
 0x73f   :  { %14409 = vrot.lane.b32.xlu0 %v35447_v7, %s27607_s30 }
 0x740   :  { %v30755_v15 = vpop.xlane.xlu0 %11242 }
 0x741   :  { %v30757_v23 = vpop.f32.mrf.mxu1 }
 0x742   :  { %35448 = vst [vmem:[#allocation148_spill] sm:$0xff] %v30757_v23 }
 0x743   :  { %v26216_v48 = vpop.f32.mrf.mxu1 }
 0x744   :  { %10621 = vmax.xlane.f32.xlu1 %v10620_v13  ;;  %v14106_v0 = vpop.permute.xlu0 %14105  ;;  %v35451_v48 = vld [vmem:[#allocation6_spill] sm:$0xff]  ;;  %v35452_v13 = vld [vmem:[#allocation36_spill] sm:$0xff] }
 0x745   :  { %26248 = vmatpush3.msra.mxu0 %v14106_v0  ;;  %v10775_v32 = vsub.f32 %v35451_v48, %v30000_v38  ;;  %v35454_v0 = vld [vmem:[#allocation192_spill] sm:$0xff] }
 0x746   :  { %26250 = vmatmul.mubr.msk.f32.vlgmr.msra.gmra.mxu0 %vm614_vm2, %v30764_v59  ;;  %26257 = vmatprep.subr.mxu0 %v35021_v52  ;;  %v10623_v23 = vsel %vm614_vm2, %v35454_v0, -inf }
 0x747   :  { %26259 = vmatprep.mubr.msk.f32.mxu0 %vm27602_vm1, %v35021_v52  ;;  %v10953_v34 = vmul.f32 1.442695, %v10775_v32 }
 0x748   :  { %11257 = vadd.xlane.f32.xlu1 %v11256_v62 }
 0x749   :  { %27090 = vpow2.f32 %v10953_v34 }
 0x74a   :  { %27092 = vrcp.f32 %v30455_v20 }
 0x74b   :  { %27094 = vrcp.f32 %v30486_v29 }
 0x756   :  { %v30784_v59 = vpop.eup %27090 }
 0x757   :  { %v27093_v38 = vpop.eup %27092  ;;  %v11259_v20 = vsel %vm614_vm2, %v30784_v59, 0.0 }
 0x758   :  { %v30791_v48 = vmul.f32 %v27093_v38, %v30334_v53  ;;  %v35458_v53 = vld [vmem:[#allocation35_spill] sm:$0xff] }
 0x759   :  { %14485 = vrot.lane.b32.xlu1 %v35452_v13, %s27607_s30 }
 0x75a   :  { %35455 = vst [vmem:[#allocation150_spill] sm:$0xff] %v30791_v48 }
 0x75b   :  { %v30778_v5 = vpop.xlane.xlu1 %10609  ;;  %v30780_v7 = vpop.f32.mrf.mxu0 }
 0x75c   :  { %35453 = vst [vmem:[#allocation237_spill] sm:$0xff] %v30780_v7 }
 0x75d   :  { %v26221_v27 = vpop.f32.mrf.mxu0 }
 0x75e   :  { %10624 = vmax.xlane.f32.xlu0 %v10623_v23  ;;  %v35456_v23 = vld [vmem:[#allocation140_spill] sm:$0xff] }
 0x75f   :  { %v30786_v62 = vpop.xlane.xlu1 %11245  ;;  %v10776_v34 = vsub.f32 %v35456_v23, %v30002_v2 }
 0x761   :  { %v10955_v13 = vmul.f32 1.442695, %v10776_v34  ;;  %v35463_v34 = vld [vmem:[#allocation151_spill] sm:$0xff] }
 0x762   :  { %11260 = vadd.xlane.f32.xlu0 %v11259_v20  ;;  %v27095_v20 = vpop.eup %27094 }
 0x763   :  { %v14182_v32 = vpop.permute.xlu1 %14181  ;;  %27096 = vpow2.f32 %v10955_v13  ;;  %v30814_v2 = vmul.f32 %v27095_v20, %v30361_v25 }
 0x764   :  { %26253 = vmatpush3.msra.mxu1 %v14182_v32 }
 0x765   :  { %26255 = vmatmul.mubr.msk.f32.vlgmr.msra.gmra.mxu1 %vm614_vm2, %v30791_v48  ;;  %26262 = vmatprep.subr.mxu1 %v35021_v52  ;;  %v35460_v48 = vld [vmem:[#allocation191_spill] sm:$0xff]  ;;  %35461 = vst [vmem:[#allocation29_spill] sm:$0xff] %v30814_v2 }
 0x766   :  { %26264 = vmatprep.mubr.msk.f32.mxu1 %vm27602_vm1, %v35021_v52  ;;  %v10626_v0 = vsel %vm614_vm2, %v35460_v48, -inf }
 0x770   :  { %v30811_v43 = vpop.eup %27096 }
 0x771   :  { %v11262_v23 = vsel %vm614_vm2, %v30811_v43, 0.0 }
 0x775   :  { %v30801_v27 = vpop.xlane.xlu0 %10612 }
 0x776   :  { %35457 = vst [vmem:[#allocation33_spill] sm:$0xff] %v30801_v27 }
 0x778   :  { %14561 = vrot.lane.b32.xlu0 %v35458_v53, %s27607_s30 }
 0x779   :  { %v30805_v38 = vpop.xlane.xlu0 %11248 }
 0x77a   :  { %v30807_v32 = vpop.f32.mrf.mxu1 }
 0x77b   :  { %35459 = vst [vmem:[#allocation139_spill] sm:$0xff] %v30807_v32  ;;  %v35467_v32 = vld [vmem:[#allocation194_spill] sm:$0xff] }
 0x77c   :  { %v26226_v7 = vpop.f32.mrf.mxu1 }
 0x77d   :  { %10627 = vmax.xlane.f32.xlu1 %v10626_v0  ;;  %v14258_v29 = vpop.permute.xlu0 %14257  ;;  %v35462_v7 = vld [vmem:[#allocation238_spill] sm:$0xff]  ;;  %v35464_v0 = vld [vmem:[#allocation49_spill] sm:$0xff] }
 0x77e   :  { %26258 = vmatpush3.msra.mxu0 %v14258_v29  ;;  %v10777_v13 = vsub.f32 %v35463_v34, %v35462_v7 }
 0x77f   :  { %26260 = vmatmul.mubr.msk.f32.vlgmr.msra.gmra.mxu0 %vm614_vm2, %v30814_v2  ;;  %26267 = vmatprep.subr.mxu0 %v35021_v52  ;;  %v10629_v2 = vsel %vm614_vm2, %v35467_v32, -inf  ;;  %v35474_v32 = vld [vmem:[#allocation193_spill] sm:$0xff] }
 0x780   :  { %26269 = vmatprep.mubr.msk.f32.mxu0 %vm27602_vm1, %v35021_v52  ;;  %v10957_v25 = vmul.f32 1.442695, %v10777_v13 }
 0x781   :  { %11263 = vadd.xlane.f32.xlu1 %v11262_v23 }
 0x782   :  { %27098 = vpow2.f32 %v10957_v25  ;;  %v35470_v25 = vld [vmem:[#allocation141_spill] sm:$0xff] }
 0x783   :  { %27100 = vrcp.f32 %v30505_v54 }
 0x784   :  { %27102 = vrcp.f32 %v30536_v6 }
 0x78f   :  { %v30834_v48 = vpop.eup %27098 }
 0x790   :  { %v27101_v7 = vpop.eup %27100  ;;  %v11265_v54 = vsel %vm614_vm2, %v30834_v48, 0.0 }
 0x791   :  { %v30841_v34 = vmul.f32 %v27101_v7, %v30384_v24  ;;  %v35472_v24 = vld [vmem:[#allocation43_spill] sm:$0xff] }
 0x792   :  { %14637 = vrot.lane.b32.xlu1 %v35464_v0, %s27607_s30 }
 0x793   :  { %35468 = vst [vmem:[#allocation140_spill] sm:$0xff] %v30841_v34 }
 0x794   :  { %v30828_v53 = vpop.xlane.xlu1 %10615  ;;  %v30830_v20 = vpop.f32.mrf.mxu0 }
 0x795   :  { %35465 = vst [vmem:[#allocation6_spill] sm:$0xff] %v30828_v53  ;;  %35466 = vst [vmem:[#allocation36_spill] sm:$0xff] %v30830_v20  ;;  %v10632_v53 = vsel %vm614_vm2, %v35474_v32, -inf }
 0x796   :  { %v26231_v29 = vpop.f32.mrf.mxu0 }
 0x797   :  { %10630 = vmax.xlane.f32.xlu0 %v10629_v2  ;;  %v35469_v2 = vld [vmem:[#allocation239_spill] sm:$0xff] }
 0x798   :  { %v30836_v23 = vpop.xlane.xlu1 %11251  ;;  %v10778_v0 = vsub.f32 %v35470_v25, %v35469_v2 }
 0x79a   :  { %v10959_v29 = vmul.f32 1.442695, %v10778_v0  ;;  %v35477_v0 = vld [vmem:[#allocation153_spill] sm:$0xff] }
 0x79b   :  { %11266 = vadd.xlane.f32.xlu0 %v11265_v54 }
 0x79c   :  { %v14334_v13 = vpop.permute.xlu1 %14333  ;;  %27104 = vpow2.f32 %v10959_v29 }
 0x79d   :  { %26263 = vmatpush3.msra.mxu1 %v14334_v13  ;;  %v27103_v13 = vpop.eup %27102 }
 0x79e   :  { %26265 = vmatmul.mubr.msk.f32.vlgmr.msra.gmra.mxu1 %vm614_vm2, %v30841_v34  ;;  %26272 = vmatprep.subr.mxu1 %v35021_v52  ;;  %v30864_v2 = vmul.f32 %v27103_v13, %v30411_v22 }
 0x79f   :  { %26274 = vmatprep.mubr.msk.f32.mxu1 %vm27602_vm1, %v35021_v52 }
 0x7a0   :  { %35475 = vst [vmem:[#allocation151_spill] sm:$0xff] %v30864_v2 }
 0x7a9   :  { %v30861_v27 = vpop.eup %27104 }
 0x7aa   :  { %v11268_v25 = vsel %vm614_vm2, %v30861_v27, 0.0 }
 0x7ae   :  { %v30851_v54 = vpop.xlane.xlu0 %10618 }
 0x7af   :  { %35471 = vst [vmem:[#allocation35_spill] sm:$0xff] %v30851_v54 }
 0x7b1   :  { %14713 = vrot.lane.b32.xlu0 %v35472_v24, %s27607_s30 }
 0x7b2   :  { %v30855_v7 = vpop.xlane.xlu0 %11254 }
 0x7b3   :  { %v30857_v20 = vpop.f32.mrf.mxu1 }
 0x7b4   :  { %35473 = vst [vmem:[#allocation238_spill] sm:$0xff] %v30857_v20  ;;  %v35481_v20 = vld [vmem:[#allocation197_spill] sm:$0xff] }
 0x7b5   :  { %v26236_v34 = vpop.f32.mrf.mxu1 }
 0x7b6   :  { %10633 = vmax.xlane.f32.xlu1 %v10632_v53  ;;  %v14410_v6 = vpop.permute.xlu0 %14409  ;;  %v35476_v34 = vld [vmem:[#allocation241_spill] sm:$0xff]  ;;  %v35478_v53 = vld [vmem:[#allocation52_spill] sm:$0xff] }
 0x7b7   :  { %26268 = vmatpush3.msra.mxu0 %v14410_v6  ;;  %v10779_v29 = vsub.f32 %v35477_v0, %v35476_v34 }
 0x7b8   :  { %26270 = vmatmul.mubr.msk.f32.vlgmr.msra.gmra.mxu0 %vm614_vm2, %v30864_v2  ;;  %26277 = vmatprep.subr.mxu0 %v35021_v52  ;;  %v10635_v2 = vsel %vm614_vm2, %v35481_v20, -inf  ;;  %v35487_v20 = vld [vmem:[#allocation196_spill] sm:$0xff] }
 0x7b9   :  { %26279 = vmatprep.mubr.msk.f32.mxu0 %vm27602_vm1, %v35021_v52  ;;  %v10961_v22 = vmul.f32 1.442695, %v10779_v29 }
 0x7ba   :  { %11269 = vadd.xlane.f32.xlu1 %v11268_v25 }
 0x7bb   :  { %27106 = vpow2.f32 %v10961_v22  ;;  %v35484_v22 = vld [vmem:[#allocation152_spill] sm:$0xff] }
 0x7bc   :  { %27108 = vrcp.f32 %v30555_v37 }
 0x7bd   :  { %27110 = vrcp.f32 %v30586_v39 }
 0x7c8   :  { %v30884_v32 = vpop.eup %27106 }
 0x7c9   :  { %v27109_v34 = vpop.eup %27108  ;;  %v11271_v37 = vsel %vm614_vm2, %v30884_v32, 0.0 }
 0x7ca   :  { %v30891_v0 = vmul.f32 %v27109_v34, %v30434_v47  ;;  %v35485_v47 = vld [vmem:[#allocation51_spill] sm:$0xff] }
 0x7cb   :  { %14789 = vrot.lane.b32.xlu1 %v35478_v53, %s27607_s30 }
 0x7cc   :  { %35482 = vst [vmem:[#allocation141_spill] sm:$0xff] %v30891_v0 }
 0x7cd   :  { %v30878_v24 = vpop.xlane.xlu1 %10621  ;;  %v30880_v13 = vpop.f32.mrf.mxu0 }
 0x7ce   :  { %35479 = vst [vmem:[#allocation49_spill] sm:$0xff] %v30878_v24  ;;  %35480 = vst [vmem:[#allocation239_spill] sm:$0xff] %v30880_v13  ;;  %v10638_v24 = vsel %vm614_vm2, %v35487_v20, -inf }
 0x7cf   :  { %v26241_v6 = vpop.f32.mrf.mxu0 }
 0x7d0   :  { %10636 = vmax.xlane.f32.xlu0 %v10635_v2  ;;  %v35483_v2 = vld [vmem:[#allocation240_spill] sm:$0xff] }
 0x7d1   :  { %v30886_v25 = vpop.xlane.xlu1 %11257  ;;  %v10780_v53 = vsub.f32 %v35484_v22, %v35483_v2 }
 0x7d3   :  { %v10963_v6 = vmul.f32 1.442695, %v10780_v53 }
 0x7d4   :  { %11272 = vadd.xlane.f32.xlu0 %v11271_v37 }
 0x7d5   :  { %v14486_v29 = vpop.permute.xlu1 %14485  ;;  %27112 = vpow2.f32 %v10963_v6 }
 0x7d6   :  { %26273 = vmatpush3.msra.mxu1 %v14486_v29  ;;  %v27111_v29 = vpop.eup %27110 }
 0x7d7   :  { %26275 = vmatmul.mubr.msk.f32.vlgmr.msra.gmra.mxu1 %vm614_vm2, %v30891_v0  ;;  %26282 = vmatprep.subr.mxu1 %v35021_v52  ;;  %v30914_v2 = vmul.f32 %v27111_v29, %v30461_v26 }
 0x7d8   :  { %26284 = vmatprep.mubr.msk.f32.mxu1 %vm27602_vm1, %v35021_v52 }
 0x7d9   :  { %35488 = vst [vmem:[#allocation241_spill] sm:$0xff] %v30914_v2 }
 0x7e2   :  { %v30911_v54 = vpop.eup %27112 }
 0x7e3   :  { %v11274_v22 = vsel %vm614_vm2, %v30911_v54, 0.0 }
 0x7e7   :  { %v30901_v37 = vpop.xlane.xlu0 %10624 }
 0x7ea   :  { %14865 = vrot.lane.b32.xlu0 %v35485_v47, %s27607_s30 }
 0x7eb   :  { %v30905_v34 = vpop.xlane.xlu0 %11260 }
 0x7ec   :  { %v30907_v13 = vpop.f32.mrf.mxu1 }
 0x7ed   :  { %35486 = vst [vmem:[#allocation43_spill] sm:$0xff] %v30907_v13 }
 0x7ee   :  { %v26246_v0 = vpop.f32.mrf.mxu1 }
 0x7ef   :  { %10639 = vmax.xlane.f32.xlu1 %v10638_v24  ;;  %v14562_v39 = vpop.permute.xlu0 %14561  ;;  %v35489_v0 = vld [vmem:[#allocation155_spill] sm:$0xff]  ;;  %v35490_v24 = vld [vmem:[#allocation65_spill] sm:$0xff] }
 0x7f0   :  { %26278 = vmatpush3.msra.mxu0 %v14562_v39  ;;  %v10781_v53 = vsub.f32 %v35489_v0, %v30014_v35  ;;  %v35492_v39 = vld [vmem:[#allocation199_spill] sm:$0xff] }
 0x7f1   :  { %26280 = vmatmul.mubr.msk.f32.vlgmr.msra.gmra.mxu0 %vm614_vm2, %v30914_v2  ;;  %26287 = vmatprep.subr.mxu0 %v35021_v52  ;;  %v10641_v13 = vsel %vm614_vm2, %v35492_v39, -inf }
 0x7f2   :  { %26289 = vmatprep.mubr.msk.f32.mxu0 %vm27602_vm1, %v35021_v52  ;;  %v10965_v26 = vmul.f32 1.442695, %v10781_v53 }
 0x7f3   :  { %11275 = vadd.xlane.f32.xlu1 %v11274_v22 }
 0x7f4   :  { %27114 = vpow2.f32 %v10965_v26 }
 0x7f5   :  { %27116 = vrcp.f32 %v30605_v36 }
 0x7f6   :  { %27118 = vrcp.f32 %v30636_v61 }
 0x801   :  { %v30934_v2 = vpop.eup %27114 }
 0x802   :  { %v27117_v35 = vpop.eup %27116  ;;  %v11277_v36 = vsel %vm614_vm2, %v30934_v2, 0.0 }
 0x803   :  { %v30941_v0 = vmul.f32 %v27117_v35, %v30484_v11  ;;  %v35495_v11 = vld [vmem:[#allocation59_spill] sm:$0xff] }
 0x804   :  { %14941 = vrot.lane.b32.xlu1 %v35490_v24, %s27607_s30 }
 0x805   :  { %35493 = vst [vmem:[#allocation52_spill] sm:$0xff] %v30941_v0 }
 0x806   :  { %v30928_v6 = vpop.xlane.xlu1 %10627  ;;  %v30930_v47 = vpop.f32.mrf.mxu0 }
 0x807   :  { %35491 = vst [vmem:[#allocation153_spill] sm:$0xff] %v30930_v47 }
 0x808   :  { %v26251_v29 = vpop.f32.mrf.mxu0 }
 0x809   :  { %10642 = vmax.xlane.f32.xlu0 %v10641_v13  ;;  %v35494_v13 = vld [vmem:[#allocation154_spill] sm:$0xff] }
 0x80a   :  { %v30936_v22 = vpop.xlane.xlu1 %11263  ;;  %v10782_v26 = vsub.f32 %v35494_v13, %v30016_v49 }
 0x80c   :  { %v10967_v24 = vmul.f32 1.442695, %v10782_v26 }
 0x80d   :  { %11278 = vadd.xlane.f32.xlu0 %v11277_v36  ;;  %v27119_v36 = vpop.eup %27118 }
 0x80e   :  { %v14638_v53 = vpop.permute.xlu1 %14637  ;;  %27120 = vpow2.f32 %v10967_v24  ;;  %v30964_v49 = vmul.f32 %v27119_v36, %v30511_v45 }
 0x80f   :  { %26283 = vmatpush3.msra.mxu1 %v14638_v53 }
 0x810   :  { %26285 = vmatmul.mubr.msk.f32.vlgmr.msra.gmra.mxu1 %vm614_vm2, %v30941_v0  ;;  %26292 = vmatprep.subr.mxu1 %v35021_v52  ;;  %v35497_v0 = vld [vmem:[#allocation198_spill] sm:$0xff]  ;;  %35498 = vst [vmem:[#allocation152_spill] sm:$0xff] %v30964_v49 }
 0x811   :  { %26294 = vmatprep.mubr.msk.f32.mxu1 %vm27602_vm1, %v35021_v52  ;;  %v10644_v39 = vsel %vm614_vm2, %v35497_v0, -inf }
 0x81b   :  { %v30961_v20 = vpop.eup %27120 }
 0x81c   :  { %v11280_v13 = vsel %vm614_vm2, %v30961_v20, 0.0 }
 0x820   :  { %v30951_v29 = vpop.xlane.xlu0 %10630 }
 0x823   :  { %15017 = vrot.lane.b32.xlu0 %v35495_v11, %s27607_s30 }
 0x824   :  { %v30955_v35 = vpop.xlane.xlu0 %11266 }
 0x825   :  { %v30957_v53 = vpop.f32.mrf.mxu1 }
 0x826   :  { %35496 = vst [vmem:[#allocation240_spill] sm:$0xff] %v30957_v53 }
 0x827   :  { %v26256_v47 = vpop.f32.mrf.mxu1 }
 0x828   :  { %10645 = vmax.xlane.f32.xlu1 %v10644_v39  ;;  %v14714_v61 = vpop.permute.xlu0 %14713  ;;  %v35499_v47 = vld [vmem:[#allocation157_spill] sm:$0xff]  ;;  %v35500_v39 = vld [vmem:[#allocation68_spill] sm:$0xff] }
 0x829   :  { %26288 = vmatpush3.msra.mxu0 %v14714_v61  ;;  %v10783_v26 = vsub.f32 %v35499_v47, %v30048_v50  ;;  %v35503_v61 = vld [vmem:[#allocation200_spill] sm:$0xff] }
 0x82a   :  { %26290 = vmatmul.mubr.msk.f32.vlgmr.msra.gmra.mxu0 %vm614_vm2, %v30964_v49  ;;  %26297 = vmatprep.subr.mxu0 %v35021_v52  ;;  %v10647_v49 = vsel %vm614_vm2, %v35503_v61, -inf  ;;  %v35510_v61 = vld [vmem:[#allocation201_spill] sm:$0xff] }
 0x82b   :  { %26299 = vmatprep.mubr.msk.f32.mxu0 %vm27602_vm1, %v35021_v52  ;;  %v10969_v45 = vmul.f32 1.442695, %v10783_v26  ;;  %v10650_v0 = vsel %vm614_vm2, %v35510_v61, -inf }
 0x82c   :  { %11281 = vadd.xlane.f32.xlu1 %v11280_v13 }
 0x82d   :  { %27122 = vpow2.f32 %v10969_v45  ;;  %v35506_v45 = vld [vmem:[#allocation156_spill] sm:$0xff] }
 0x82e   :  { %27124 = vrcp.f32 %v30655_v55 }
 0x82f   :  { %27126 = vrcp.f32 %v30686_v16 }
 0x83a   :  { %v30984_v53 = vpop.eup %27122 }
 0x83b   :  { %v27125_v50 = vpop.eup %27124  ;;  %v11283_v55 = vsel %vm614_vm2, %v30984_v53, 0.0 }
 0x83c   :  { %v30991_v47 = vmul.f32 %v27125_v50, %v30534_v12  ;;  %v35508_v12 = vld [vmem:[#allocation67_spill] sm:$0xff] }
 0x83d   :  { %15093 = vrot.lane.b32.xlu1 %v35500_v39, %s27607_s30 }
 0x83e   :  { %35504 = vst [vmem:[#allocation65_spill] sm:$0xff] %v30991_v47 }
 0x83f   :  { %v30978_v24 = vpop.xlane.xlu1 %10633  ;;  %v30980_v11 = vpop.f32.mrf.mxu0 }
 0x840   :  { %35501 = vst [vmem:[#allocation51_spill] sm:$0xff] %v30978_v24  ;;  %35502 = vst [vmem:[#allocation155_spill] sm:$0xff] %v30980_v11 }
 0x841   :  { %v26261_v36 = vpop.f32.mrf.mxu0 }
 0x842   :  { %10648 = vmax.xlane.f32.xlu0 %v10647_v49  ;;  %v35505_v49 = vld [vmem:[#allocation242_spill] sm:$0xff] }
 0x843   :  { %v30986_v13 = vpop.xlane.xlu1 %11269  ;;  %v10784_v39 = vsub.f32 %v35506_v45, %v35505_v49 }
 0x845   :  { %v10971_v36 = vmul.f32 1.442695, %v10784_v39  ;;  %v35513_v39 = vld [vmem:[#allocation159_spill] sm:$0xff] }
 0x846   :  { %11284 = vadd.xlane.f32.xlu0 %v11283_v55 }
 0x847   :  { %v14790_v26 = vpop.permute.xlu1 %14789  ;;  %27128 = vpow2.f32 %v10971_v36 }
 0x848   :  { %26293 = vmatpush3.msra.mxu1 %v14790_v26  ;;  %v27127_v26 = vpop.eup %27126 }
 0x849   :  { %26295 = vmatmul.mubr.msk.f32.vlgmr.msra.gmra.mxu1 %vm614_vm2, %v30991_v47  ;;  %26302 = vmatprep.subr.mxu1 %v35021_v52  ;;  %v31014_v49 = vmul.f32 %v27127_v26, %v30561_v18 }
 0x84a   :  { %26304 = vmatprep.mubr.msk.f32.mxu1 %vm27602_vm1, %v35021_v52 }
 0x84b   :  { %35511 = vst [vmem:[#allocation157_spill] sm:$0xff] %v31014_v49 }
 0x854   :  { %v31011_v24 = vpop.eup %27128 }
 0x855   :  { %v11286_v45 = vsel %vm614_vm2, %v31011_v24, 0.0 }
 0x859   :  { %v31001_v55 = vpop.xlane.xlu0 %10636 }
 0x85a   :  { %35507 = vst [vmem:[#allocation154_spill] sm:$0xff] %v31001_v55 }
 0x85c   :  { %15169 = vrot.lane.b32.xlu0 %v35508_v12, %s27607_s30 }
 0x85d   :  { %v31005_v50 = vpop.xlane.xlu0 %11272 }
 0x85e   :  { %v31007_v47 = vpop.f32.mrf.mxu1 }
 0x85f   :  { %35509 = vst [vmem:[#allocation59_spill] sm:$0xff] %v31007_v47  ;;  %v35517_v47 = vld [vmem:[#allocation202_spill] sm:$0xff] }
 0x860   :  { %v26266_v11 = vpop.f32.mrf.mxu1 }
 0x861   :  { %10651 = vmax.xlane.f32.xlu1 %v10650_v0  ;;  %v14866_v16 = vpop.permute.xlu0 %14865  ;;  %v35512_v11 = vld [vmem:[#allocation246_spill] sm:$0xff]  ;;  %v35514_v0 = vld [vmem:[#allocation76_spill] sm:$0xff] }
 0x862   :  { %26298 = vmatpush3.msra.mxu0 %v14866_v16  ;;  %v10785_v36 = vsub.f32 %v35513_v39, %v35512_v11 }
 0x863   :  { %26300 = vmatmul.mubr.msk.f32.vlgmr.msra.gmra.mxu0 %vm614_vm2, %v31014_v49  ;;  %26307 = vmatprep.subr.mxu0 %v35021_v52  ;;  %v10653_v49 = vsel %vm614_vm2, %v35517_v47, -inf  ;;  %v35524_v47 = vld [vmem:[#allocation203_spill] sm:$0xff] }
 0x864   :  { %26309 = vmatprep.mubr.msk.f32.mxu0 %vm27602_vm1, %v35021_v52  ;;  %v10973_v18 = vmul.f32 1.442695, %v10785_v36 }
 0x865   :  { %11287 = vadd.xlane.f32.xlu1 %v11286_v45 }
 0x866   :  { %27130 = vpow2.f32 %v10973_v18  ;;  %v35520_v18 = vld [vmem:[#allocation158_spill] sm:$0xff] }
 0x867   :  { %27132 = vrcp.f32 %v30705_v46 }
 0x868   :  { %27134 = vrcp.f32 %v30736_v1 }
 0x873   :  { %v31034_v61 = vpop.eup %27130 }
 0x874   :  { %v27133_v11 = vpop.eup %27132  ;;  %v11289_v46 = vsel %vm614_vm2, %v31034_v61, 0.0 }
 0x875   :  { %v31041_v39 = vmul.f32 %v27133_v11, %v30584_v41  ;;  %v35522_v41 = vld [vmem:[#allocation75_spill] sm:$0xff] }
 0x876   :  { %15245 = vrot.lane.b32.xlu1 %v35514_v0, %s27607_s30 }
 0x877   :  { %35518 = vst [vmem:[#allocation156_spill] sm:$0xff] %v31041_v39 }
 0x878   :  { %v31028_v12 = vpop.xlane.xlu1 %10639  ;;  %v31030_v26 = vpop.f32.mrf.mxu0 }
 0x879   :  { %35515 = vst [vmem:[#allocation68_spill] sm:$0xff] %v31028_v12  ;;  %35516 = vst [vmem:[#allocation242_spill] sm:$0xff] %v31030_v26  ;;  %v10656_v12 = vsel %vm614_vm2, %v35524_v47, -inf }
 0x87a   :  { %v26271_v16 = vpop.f32.mrf.mxu0 }
 0x87b   :  { %10654 = vmax.xlane.f32.xlu0 %v10653_v49  ;;  %v35519_v49 = vld [vmem:[#allocation12_spill] sm:$0xff] }
 0x87c   :  { %v31036_v45 = vpop.xlane.xlu1 %11275  ;;  %v10786_v0 = vsub.f32 %v35520_v18, %v35519_v49 }
 0x87e   :  { %v10975_v16 = vmul.f32 1.442695, %v10786_v0  ;;  %v35527_v0 = vld [vmem:[#allocation161_spill] sm:$0xff] }
 0x87f   :  { %11290 = vadd.xlane.f32.xlu0 %v11289_v46 }
 0x880   :  { %v14942_v36 = vpop.permute.xlu1 %14941  ;;  %27136 = vpow2.f32 %v10975_v16 }
 0x881   :  { %26303 = vmatpush3.msra.mxu1 %v14942_v36  ;;  %v27135_v36 = vpop.eup %27134 }
 0x882   :  { %26305 = vmatmul.mubr.msk.f32.vlgmr.msra.gmra.mxu1 %vm614_vm2, %v31041_v39  ;;  %26312 = vmatprep.subr.mxu1 %v35021_v52  ;;  %v31064_v49 = vmul.f32 %v27135_v36, %v30611_v30 }
 0x883   :  { %26314 = vmatprep.mubr.msk.f32.mxu1 %vm27602_vm1, %v35021_v52 }
 0x884   :  { %35525 = vst [vmem:[#allocation159_spill] sm:$0xff] %v31064_v49 }
 0x88d   :  { %v31061_v55 = vpop.eup %27136 }
 0x88e   :  { %v11292_v18 = vsel %vm614_vm2, %v31061_v55, 0.0 }
 0x892   :  { %v31051_v46 = vpop.xlane.xlu0 %10642 }
 0x893   :  { %35521 = vst [vmem:[#allocation67_spill] sm:$0xff] %v31051_v46 }
 0x895   :  { %15321 = vrot.lane.b32.xlu0 %v35522_v41, %s27607_s30 }
 0x896   :  { %v31055_v11 = vpop.xlane.xlu0 %11278 }
 0x897   :  { %v31057_v26 = vpop.f32.mrf.mxu1 }
 0x898   :  { %35523 = vst [vmem:[#allocation246_spill] sm:$0xff] %v31057_v26  ;;  %v35531_v26 = vld [vmem:[#allocation206_spill] sm:$0xff] }
 0x899   :  { %v26276_v39 = vpop.f32.mrf.mxu1 }
 0x89a   :  { %10657 = vmax.xlane.f32.xlu1 %v10656_v12  ;;  %v15018_v1 = vpop.permute.xlu0 %15017  ;;  %v35526_v39 = vld [vmem:[#allocation248_spill] sm:$0xff] }
 0x89b   :  { %26308 = vmatpush3.msra.mxu0 %v15018_v1  ;;  %v10787_v16 = vsub.f32 %v35527_v0, %v35526_v39  ;;  %v35528_v12 = vld [vmem:[#allocation84_spill] sm:$0xff] }
 0x89c   :  { %26310 = vmatmul.mubr.msk.f32.vlgmr.msra.gmra.mxu0 %vm614_vm2, %v31064_v49  ;;  %26317 = vmatprep.subr.mxu0 %v35021_v52  ;;  %v10659_v49 = vsel %vm614_vm2, %v35531_v26, -inf  ;;  %v35537_v26 = vld [vmem:[#allocation205_spill] sm:$0xff] }
 0x89d   :  { %26319 = vmatprep.mubr.msk.f32.mxu0 %vm27602_vm1, %v35021_v52  ;;  %v10977_v30 = vmul.f32 1.442695, %v10787_v16 }
 0x89e   :  { %11293 = vadd.xlane.f32.xlu1 %v11292_v18 }
 0x89f   :  { %27138 = vpow2.f32 %v10977_v30  ;;  %v35534_v30 = vld [vmem:[#allocation160_spill] sm:$0xff] }
 0x8a0   :  { %27140 = vrcp.f32 %v30755_v15 }
 0x8a1   :  { %27142 = vrcp.f32 %v30786_v62 }
 0x8ac   :  { %v31084_v47 = vpop.eup %27138 }
 0x8ad   :  { %v27141_v39 = vpop.eup %27140  ;;  %v11295_v15 = vsel %vm614_vm2, %v31084_v47, 0.0 }
 0x8ae   :  { %v31091_v0 = vmul.f32 %v27141_v39, %v30634_v57  ;;  %v35535_v57 = vld [vmem:[#allocation83_spill] sm:$0xff] }
 0x8af   :  { %15397 = vrot.lane.b32.xlu1 %v35528_v12, %s27607_s30 }
 0x8b0   :  { %35532 = vst [vmem:[#allocation158_spill] sm:$0xff] %v31091_v0 }
 0x8b1   :  { %v31078_v41 = vpop.xlane.xlu1 %10645  ;;  %v31080_v36 = vpop.f32.mrf.mxu0 }
 0x8b2   :  { %35529 = vst [vmem:[#allocation76_spill] sm:$0xff] %v31078_v41  ;;  %35530 = vst [vmem:[#allocation12_spill] sm:$0xff] %v31080_v36  ;;  %v10662_v41 = vsel %vm614_vm2, %v35537_v26, -inf }
 0x8b3   :  { %v26281_v1 = vpop.f32.mrf.mxu0 }
 0x8b4   :  { %10660 = vmax.xlane.f32.xlu0 %v10659_v49  ;;  %v35533_v49 = vld [vmem:[#allocation249_spill] sm:$0xff] }
 0x8b5   :  { %v31086_v18 = vpop.xlane.xlu1 %11281  ;;  %v10788_v12 = vsub.f32 %v35534_v30, %v35533_v49 }
 0x8b7   :  { %v10979_v1 = vmul.f32 1.442695, %v10788_v12 }
 0x8b8   :  { %11296 = vadd.xlane.f32.xlu0 %v11295_v15 }
 0x8b9   :  { %v15094_v16 = vpop.permute.xlu1 %15093  ;;  %27144 = vpow2.f32 %v10979_v1 }
 0x8ba   :  { %26313 = vmatpush3.msra.mxu1 %v15094_v16  ;;  %v27143_v16 = vpop.eup %27142 }
 0x8bb   :  { %26315 = vmatmul.mubr.msk.f32.vlgmr.msra.gmra.mxu1 %vm614_vm2, %v31091_v0  ;;  %26322 = vmatprep.subr.mxu1 %v35021_v52  ;;  %v31114_v49 = vmul.f32 %v27143_v16, %v30661_v17 }
 0x8bc   :  { %26324 = vmatprep.mubr.msk.f32.mxu1 %vm27602_vm1, %v35021_v52 }
 0x8bd   :  { %35538 = vst [vmem:[#allocation248_spill] sm:$0xff] %v31114_v49 }
 0x8c6   :  { %v31111_v46 = vpop.eup %27144 }
 0x8c7   :  { %v11298_v30 = vsel %vm614_vm2, %v31111_v46, 0.0 }
 0x8cb   :  { %v31101_v15 = vpop.xlane.xlu0 %10648 }
 0x8ce   :  { %15473 = vrot.lane.b32.xlu0 %v35535_v57, %s27607_s30 }
 0x8cf   :  { %v31105_v39 = vpop.xlane.xlu0 %11284 }
 0x8d0   :  { %v31107_v36 = vpop.f32.mrf.mxu1 }
 0x8d1   :  { %35536 = vst [vmem:[#allocation75_spill] sm:$0xff] %v31107_v36 }
 0x8d2   :  { %v26286_v0 = vpop.f32.mrf.mxu1 }
 0x8d3   :  { %10663 = vmax.xlane.f32.xlu1 %v10662_v41  ;;  %v15170_v62 = vpop.permute.xlu0 %15169  ;;  %v35539_v0 = vld [vmem:[#allocation163_spill] sm:$0xff]  ;;  %v35540_v41 = vld [vmem:[#allocation90_spill] sm:$0xff] }
 0x8d4   :  { %26318 = vmatpush3.msra.mxu0 %v15170_v62  ;;  %v10789_v12 = vsub.f32 %v35539_v0, %v30151_v63  ;;  %v35542_v62 = vld [vmem:[#allocation8_spill] sm:$0xff] }
 0x8d5   :  { %26320 = vmatmul.mubr.msk.f32.vlgmr.msra.gmra.mxu0 %vm614_vm2, %v31114_v49  ;;  %26327 = vmatprep.subr.mxu0 %v35021_v52  ;;  %v10665_v36 = vsel %vm614_vm2, %v35542_v62, -inf }
 0x8d6   :  { %26329 = vmatprep.mubr.msk.f32.mxu0 %vm27602_vm1, %v35021_v52  ;;  %v10981_v17 = vmul.f32 1.442695, %v10789_v12 }
 0x8d7   :  { %11299 = vadd.xlane.f32.xlu1 %v11298_v30 }
 0x8d8   :  { %27146 = vpow2.f32 %v10981_v17 }
 0x8d9   :  { %27148 = vrcp.f32 %v30805_v38 }
 0x8da   :  { %27150 = vrcp.f32 %v30836_v23 }
 0x8e5   :  { %v31134_v49 = vpop.eup %27146 }
 0x8e6   :  { %v27149_v63 = vpop.eup %27148  ;;  %v11301_v38 = vsel %vm614_vm2, %v31134_v49, 0.0 }
 0x8e7   :  { %v31141_v0 = vmul.f32 %v27149_v63, %v30684_v21  ;;  %v35545_v21 = vld [vmem:[#allocation89_spill] sm:$0xff] }
 0x8e8   :  { %15549 = vrot.lane.b32.xlu1 %v35540_v41, %s27607_s30 }
 0x8e9   :  { %35543 = vst [vmem:[#allocation84_spill] sm:$0xff] %v31141_v0 }
 0x8ea   :  { %v31128_v1 = vpop.xlane.xlu1 %10651  ;;  %v31130_v57 = vpop.f32.mrf.mxu0 }
 0x8eb   :  { %35541 = vst [vmem:[#allocation161_spill] sm:$0xff] %v31130_v57 }
 0x8ec   :  { %v26291_v16 = vpop.f32.mrf.mxu0 }
 0x8ed   :  { %10666 = vmax.xlane.f32.xlu0 %v10665_v36  ;;  %v35544_v36 = vld [vmem:[#allocation162_spill] sm:$0xff] }
 0x8ee   :  { %v31136_v30 = vpop.xlane.xlu1 %11287  ;;  %v10790_v17 = vsub.f32 %v35544_v36, %v30176_v31 }
 0x8f0   :  { %v10983_v41 = vmul.f32 1.442695, %v10790_v17 }
 0x8f1   :  { %11302 = vadd.xlane.f32.xlu0 %v11301_v38  ;;  %v27151_v38 = vpop.eup %27150 }
 0x8f2   :  { %v15246_v12 = vpop.permute.xlu1 %15245  ;;  %27152 = vpow2.f32 %v10983_v41  ;;  %v31164_v31 = vmul.f32 %v27151_v38, %v30711_v51 }
 0x8f3   :  { %26323 = vmatpush3.msra.mxu1 %v15246_v12 }
 0x8f4   :  { %26325 = vmatmul.mubr.msk.f32.vlgmr.msra.gmra.mxu1 %vm614_vm2, %v31141_v0  ;;  %26332 = vmatprep.subr.mxu1 %v35021_v52  ;;  %v35547_v0 = vld [vmem:[#allocation207_spill] sm:$0xff]  ;;  %35548 = vst [vmem:[#allocation160_spill] sm:$0xff] %v31164_v31 }
 0x8f5   :  { %26334 = vmatprep.mubr.msk.f32.mxu1 %vm27602_vm1, %v35021_v52  ;;  %v10668_v62 = vsel %vm614_vm2, %v35547_v0, -inf }
 0x8ff   :  { %v31161_v26 = vpop.eup %27152 }
 0x900   :  { %v11304_v36 = vsel %vm614_vm2, %v31161_v26, 0.0 }
 0x904   :  { %v31151_v16 = vpop.xlane.xlu0 %10654 }
 0x907   :  { %15625 = vrot.lane.b32.xlu0 %v35545_v21, %s27607_s30 }
 0x908   :  { %v31155_v63 = vpop.xlane.xlu0 %11290 }
 0x909   :  { %v31157_v12 = vpop.f32.mrf.mxu1 }
 0x90a   :  { %35546 = vst [vmem:[#allocation249_spill] sm:$0xff] %v31157_v12 }
 0x90b   :  { %v26296_v57 = vpop.f32.mrf.mxu1 }
 0x90c   :  { %10669 = vmax.xlane.f32.xlu1 %v10668_v62  ;;  %v15322_v23 = vpop.permute.xlu0 %15321  ;;  %v35549_v57 = vld [vmem:[#allocation164_spill] sm:$0xff] }
 0x90d   :  { %26328 = vmatpush3.msra.mxu0 %v15322_v23  ;;  %v10791_v17 = vsub.f32 %v35549_v57, %v30197_v56  ;;  %v35550_v62 = vld [vmem:[#allocation96_spill] sm:$0xff] }
 0x90e   :  { %26330 = vmatmul.mubr.msk.f32.vlgmr.msra.gmra.mxu0 %vm614_vm2, %v31164_v31  ;;  %26337 = vmatprep.subr.mxu0 %v35021_v52  ;;  %v35552_v23 = vld [vmem:[#allocation208_spill] sm:$0xff] }
 0x90f   :  { %26339 = vmatprep.mubr.msk.f32.mxu0 %vm27602_vm1, %v35021_v52  ;;  %v10985_v51 = vmul.f32 1.442695, %v10791_v17  ;;  %v10671_v12 = vsel %vm614_vm2, %v35552_v23, -inf }
 0x910   :  { %11305 = vadd.xlane.f32.xlu1 %v11304_v36 }
 0x911   :  { %27154 = vpow2.f32 %v10985_v51 }
 0x912   :  { %27156 = vrcp.f32 %v30855_v7 }
 0x913   :  { %27158 = vrcp.f32 %v30886_v25 }
 0x91e   :  { %v31184_v31 = vpop.eup %27154 }
 0x91f   :  { %v27157_v56 = vpop.eup %27156  ;;  %v11307_v7 = vsel %vm614_vm2, %v31184_v31, 0.0 }
 0x920   :  { %v31191_v57 = vmul.f32 %v27157_v56, %v30734_v28  ;;  %v35555_v28 = vld [vmem:[#allocation95_spill] sm:$0xff] }
 0x921   :  { %15701 = vrot.lane.b32.xlu1 %v35550_v62, %s27607_s30 }
 0x922   :  { %35553 = vst [vmem:[#allocation163_spill] sm:$0xff] %v31191_v57 }
 0x923   :  { %v31178_v41 = vpop.xlane.xlu1 %10657  ;;  %v31180_v21 = vpop.f32.mrf.mxu0 }
 0x924   :  { %35551 = vst [vmem:[#allocation83_spill] sm:$0xff] %v31180_v21 }
 0x925   :  { %v26301_v38 = vpop.f32.mrf.mxu0 }
 0x926   :  { %10672 = vmax.xlane.f32.xlu0 %v10671_v12  ;;  %v35554_v12 = vld [vmem:[#allocation165_spill] sm:$0xff] }
 0x927   :  { %v31186_v36 = vpop.xlane.xlu1 %11293  ;;  %v10792_v51 = vsub.f32 %v35554_v12, %v30222_v44 }
 0x929   :  { %v10987_v62 = vmul.f32 1.442695, %v10792_v51 }
 0x92a   :  { %11308 = vadd.xlane.f32.xlu0 %v11307_v7  ;;  %v27159_v7 = vpop.eup %27158 }
 0x92b   :  { %v15398_v17 = vpop.permute.xlu1 %15397  ;;  %27160 = vpow2.f32 %v10987_v62  ;;  %v31214_v44 = vmul.f32 %v27159_v7, %v30761_v42 }
 0x92c   :  { %26333 = vmatpush3.msra.mxu1 %v15398_v17 }
 0x92d   :  { %26335 = vmatmul.mubr.msk.f32.vlgmr.msra.gmra.mxu1 %vm614_vm2, %v31191_v57  ;;  %26342 = vmatprep.subr.mxu1 %v35021_v52  ;;  %v35557_v57 = vld [vmem:[#allocation209_spill] sm:$0xff]  ;;  %35558 = vst [vmem:[#allocation162_spill] sm:$0xff] %v31214_v44 }
 0x92e   :  { %26344 = vmatprep.mubr.msk.f32.mxu1 %vm27602_vm1, %v35021_v52  ;;  %v10674_v23 = vsel %vm614_vm2, %v35557_v57, -inf }
 0x938   :  { %v31211_v0 = vpop.eup %27160 }
 0x939   :  { %v11310_v12 = vsel %vm614_vm2, %v31211_v0, 0.0 }
 0x93d   :  { %v31201_v38 = vpop.xlane.xlu0 %10660 }
 0x940   :  { %15777 = vrot.lane.b32.xlu0 %v35555_v28, %s27607_s30 }
 0x941   :  { %v31205_v56 = vpop.xlane.xlu0 %11296 }
 0x942   :  { %v31207_v17 = vpop.f32.mrf.mxu1 }
 0x943   :  { %35556 = vst [vmem:[#allocation90_spill] sm:$0xff] %v31207_v17 }
 0x944   :  { %v26306_v21 = vpop.f32.mrf.mxu1 }
 0x945   :  { %10675 = vmax.xlane.f32.xlu1 %v10674_v23  ;;  %v15474_v25 = vpop.permute.xlu0 %15473  ;;  %v35559_v21 = vld [vmem:[#allocation166_spill] sm:$0xff] }
 0x946   :  { %26338 = vmatpush3.msra.mxu0 %v15474_v25  ;;  %v10793_v51 = vsub.f32 %v35559_v21, %v30251_v58  ;;  %v35560_v23 = vld [vmem:[#allocation102_spill] sm:$0xff]  ;;  %v35562_v25 = vld [vmem:[#allocation211_spill] sm:$0xff] }
 0x947   :  { %26340 = vmatmul.mubr.msk.f32.vlgmr.msra.gmra.mxu0 %vm614_vm2, %v31214_v44  ;;  %26347 = vmatprep.subr.mxu0 %v35021_v52  ;;  %v10677_v17 = vsel %vm614_vm2, %v35562_v25, -inf }
 0x948   :  { %26349 = vmatprep.mubr.msk.f32.mxu0 %vm27602_vm1, %v35021_v52  ;;  %v10989_v42 = vmul.f32 1.442695, %v10793_v51 }
 0x949   :  { %11311 = vadd.xlane.f32.xlu1 %v11310_v12 }
 0x94a   :  { %27162 = vpow2.f32 %v10989_v42 }
 0x94b   :  { %27164 = vrcp.f32 %v30905_v34 }
 0x94c   :  { %27166 = vrcp.f32 %v30936_v22 }
 0x957   :  { %v31234_v44 = vpop.eup %27162 }
 0x958   :  { %v27165_v58 = vpop.eup %27164  ;;  %v11313_v34 = vsel %vm614_vm2, %v31234_v44, 0.0 }
 0x959   :  { %v31241_v21 = vmul.f32 %v27165_v58, %v30784_v59  ;;  %v35564_v59 = vld [vmem:[#allocation101_spill] sm:$0xff]  ;;  %v27167_v58 = vpop.eup %27166 }
 0x95a   :  { %15853 = vrot.lane.b32.xlu1 %v35560_v23, %s27607_s30 }
 0x95b   :  { %35563 = vst [vmem:[#allocation164_spill] sm:$0xff] %v31241_v21 }
 0x95c   :  { %v31228_v62 = vpop.xlane.xlu1 %10663  ;;  %v31230_v28 = vpop.f32.mrf.mxu0 }
 0x95d   :  { %35561 = vst [vmem:[#allocation89_spill] sm:$0xff] %v31230_v28  ;;  %v35566_v28 = vld [vmem:[#allocation212_spill] sm:$0xff] }
 0x95e   :  { %v26311_v7 = vpop.f32.mrf.mxu0 }
 0x95f   :  { %10678 = vmax.xlane.f32.xlu0 %v10677_v17  ;;  %v10794_v17 = vsub.f32 %v29680_v8, %v30278_v3  ;;  %v31264_v8 = vmul.f32 %v27167_v58, %v30811_v43 }
 0x960   :  { %v31236_v12 = vpop.xlane.xlu1 %11299 }
 0x961   :  { %v10991_v42 = vmul.f32 1.442695, %v10794_v17  ;;  %35567 = vst [vmem:[#allocation165_spill] sm:$0xff] %v31264_v8  ;;  %v10795_v17 = vsub.f32 %v29693_v10, %v30301_v40 }
 0x963   :  { %11314 = vadd.xlane.f32.xlu0 %v11313_v34  ;;  %27168 = vpow2.f32 %v10991_v42  ;;  %v10993_v43 = vmul.f32 1.442695, %v10795_v17 }
 0x964   :  { %v15550_v51 = vpop.permute.xlu1 %15549 }
 0x965   :  { %26343 = vmatpush3.msra.mxu1 %v15550_v51  ;;  %27170 = vpow2.f32 %v10993_v43  ;;  %v10796_v43 = vsub.f32 %v29698_v4, %v30328_v9 }
 0x966   :  { %26345 = vmatmul.mubr.msk.f32.vlgmr.msra.gmra.mxu1 %vm614_vm2, %v31241_v21  ;;  %26352 = vmatprep.subr.mxu1 %v35021_v52  ;;  %v10680_v21 = vsel %vm614_vm2, %v35566_v28, -inf  ;;  %27172 = vrcp.f32 %v30955_v35 }
 0x967   :  { %26354 = vmatprep.mubr.msk.f32.mxu1 %vm27602_vm1, %v35021_v52  ;;  %27174 = vrcp.f32 %v30986_v13 }
 0x970   :  { %v31261_v25 = vpop.eup %27168 }
 0x971   :  { %v11316_v22 = vsel %vm614_vm2, %v31261_v25, 0.0 }
 0x976   :  { %v31251_v23 = vpop.xlane.xlu0 %10666 }
 0x979   :  { %15929 = vrot.lane.b32.xlu0 %v35564_v59, %s27607_s30 }
 0x97a   :  { %v31255_v7 = vpop.xlane.xlu0 %11302 }
 0x97b   :  { %v31257_v34 = vpop.f32.mrf.mxu1 }
 0x97c   :  { %35565 = vst [vmem:[#allocation96_spill] sm:$0xff] %v31257_v34  ;;  %v31284_v34 = vpop.eup %27170 }
 0x97d   :  { %v26316_v51 = vpop.f32.mrf.mxu1  ;;  %35571 = vst [vmem:[#allocation209_spill] sm:$0xff] %v31284_v34  ;;  %v27173_v10 = vpop.eup %27172  ;;  %v11319_v40 = vsel %vm614_vm2, %v31284_v34, 0.0 }
 0x97e   :  { %10681 = vmax.xlane.f32.xlu1 %v10680_v21  ;;  %v15626_v3 = vpop.permute.xlu0 %15625  ;;  %v35568_v21 = vld [vmem:[#allocation108_spill] sm:$0xff]  ;;  %v35570_v51 = vld [vmem:[#allocation215_spill] sm:$0xff]  ;;  %v31291_v35 = vmul.f32 %v27173_v10, %v30834_v48  ;;  %v27175_v10 = vpop.eup %27174 }
 0x97f   :  { %26348 = vmatpush3.msra.mxu0 %v15626_v3  ;;  %v10683_v3 = vsel %vm614_vm2, %v35570_v51, -inf  ;;  %v35573_v48 = vld [vmem:[#allocation107_spill] sm:$0xff]  ;;  %v31314_v4 = vmul.f32 %v27175_v10, %v30861_v27 }
 0x980   :  { %26350 = vmatmul.mubr.msk.f32.vlgmr.msra.gmra.mxu0 %vm614_vm2, %v31264_v8  ;;  %26357 = vmatprep.subr.mxu0 %v35021_v52  ;;  %35572 = vst [vmem:[#allocation166_spill] sm:$0xff] %v31291_v35 }
 0x981   :  { %26359 = vmatprep.mubr.msk.f32.mxu0 %vm27602_vm1, %v35021_v52  ;;  %35577 = vst [vmem:[#allocation212_spill] sm:$0xff] %v31314_v4 }
 0x982   :  { %11317 = vadd.xlane.f32.xlu1 %v11316_v22 }
 0x993   :  { %16005 = vrot.lane.b32.xlu1 %v35568_v21, %s27607_s30  ;;  %v10995_v21 = vmul.f32 1.442695, %v10796_v43  ;;  %v35578_v43 = vld [vmem:[#allocation167_spill] sm:$0xff] }
 0x995   :  { %v31278_v42 = vpop.xlane.xlu1 %10669  ;;  %v31280_v59 = vpop.f32.mrf.mxu0  ;;  %27176 = vpow2.f32 %v10995_v21  ;;  %v10797_v21 = vsub.f32 %v35578_v43, %v30351_v33 }
 0x996   :  { %35569 = vst [vmem:[#allocation95_spill] sm:$0xff] %v31280_v59  ;;  %v35575_v59 = vld [vmem:[#allocation214_spill] sm:$0xff] }
 0x997   :  { %v26321_v58 = vpop.f32.mrf.mxu0  ;;  %v10997_v27 = vmul.f32 1.442695, %v10797_v21 }
 0x998   :  { %10684 = vmax.xlane.f32.xlu0 %v10683_v3 }
 0x999   :  { %v31286_v22 = vpop.xlane.xlu1 %11305  ;;  %27178 = vpow2.f32 %v10997_v27  ;;  %v35585_v27 = vld [vmem:[#allocation168_spill] sm:$0xff] }
 0x99a   :  { %27180 = vrcp.f32 %v31005_v50 }
 0x99b   :  { %27182 = vrcp.f32 %v31036_v45 }
 0x99c   :  { %11320 = vadd.xlane.f32.xlu0 %v11319_v40 }
 0x99d   :  { %v15702_v17 = vpop.permute.xlu1 %15701 }
 0x99e   :  { %26353 = vmatpush3.msra.mxu1 %v15702_v17 }
 0x99f   :  { %26355 = vmatmul.mubr.msk.f32.vlgmr.msra.gmra.mxu1 %vm614_vm2, %v31291_v35  ;;  %26362 = vmatprep.subr.mxu1 %v35021_v52  ;;  %v10686_v35 = vsel %vm614_vm2, %v35575_v59, -inf }
 0x9a0   :  { %26364 = vmatprep.mubr.msk.f32.mxu1 %vm27602_vm1, %v35021_v52 }
 0x9a2   :  { %v31311_v8 = vpop.eup %27176 }
 0x9a3   :  { %35576 = vst [vmem:[#allocation101_spill] sm:$0xff] %v31311_v8  ;;  %v11322_v13 = vsel %vm614_vm2, %v31311_v8, 0.0 }
 0x9af   :  { %v31301_v58 = vpop.xlane.xlu0 %10672 }
 0x9b2   :  { %16081 = vrot.lane.b32.xlu0 %v35573_v48, %s27607_s30 }
 0x9b3   :  { %v31305_v3 = vpop.xlane.xlu0 %11308 }
 0x9b4   :  { %v31307_v40 = vpop.f32.mrf.mxu1 }
 0x9b5   :  { %35574 = vst [vmem:[#allocation102_spill] sm:$0xff] %v31307_v40 }
 0x9b6   :  { %v26326_v17 = vpop.f32.mrf.mxu1 }
 0x9b7   :  { %10687 = vmax.xlane.f32.xlu1 %v10686_v35  ;;  %v15778_v9 = vpop.permute.xlu0 %15777  ;;  %v35579_v35 = vld [vmem:[#allocation116_spill] sm:$0xff] }
 0x9b8   :  { %26358 = vmatpush3.msra.mxu0 %v15778_v9  ;;  %v35581_v9 = vld [vmem:[#allocation217_spill] sm:$0xff] }
 0x9b9   :  { %26360 = vmatmul.mubr.msk.f32.vlgmr.msra.gmra.mxu0 %vm614_vm2, %v31314_v4  ;;  %26367 = vmatprep.subr.mxu0 %v35021_v52  ;;  %v10689_v40 = vsel %vm614_vm2, %v35581_v9, -inf  ;;  %v31334_v4 = vpop.eup %27178 }
 0x9ba   :  { %26369 = vmatprep.mubr.msk.f32.mxu0 %vm27602_vm1, %v35021_v52  ;;  %35582 = vst [vmem:[#allocation215_spill] sm:$0xff] %v31334_v4  ;;  %v27181_v33 = vpop.eup %27180  ;;  %v11325_v50 = vsel %vm614_vm2, %v31334_v4, 0.0  ;;  %v35588_v4 = vld [vmem:[#allocation218_spill] sm:$0xff] }
 0x9bb   :  { %11323 = vadd.xlane.f32.xlu1 %v11322_v13  ;;  %v31341_v43 = vmul.f32 %v27181_v33, %v30884_v32  ;;  %v35586_v32 = vld [vmem:[#allocation115_spill] sm:$0xff]  ;;  %v10692_v8 = vsel %vm614_vm2, %v35588_v4, -inf }
 0x9bd   :  { %35583 = vst [vmem:[#allocation107_spill] sm:$0xff] %v31341_v43 }
 0x9cc   :  { %16157 = vrot.lane.b32.xlu1 %v35579_v35, %s27607_s30 }
 0x9ce   :  { %v31328_v48 = vpop.xlane.xlu1 %10675  ;;  %v31330_v10 = vpop.f32.mrf.mxu0 }
 0x9cf   :  { %35580 = vst [vmem:[#allocation108_spill] sm:$0xff] %v31330_v10 }
 0x9d0   :  { %v26331_v17 = vpop.f32.mrf.mxu0 }
 0x9d1   :  { %10690 = vmax.xlane.f32.xlu0 %v10689_v40  ;;  %v35584_v40 = vld [vmem:[#allocation120_spill] sm:$0xff] }
 0x9d2   :  { %v31336_v13 = vpop.xlane.xlu1 %11311  ;;  %v10798_v35 = vsub.f32 %v35585_v27, %v35584_v40 }
 0x9d4   :  { %v10999_v17 = vmul.f32 1.442695, %v10798_v35  ;;  %v35592_v35 = vld [vmem:[#allocation169_spill] sm:$0xff] }
 0x9d5   :  { %11326 = vadd.xlane.f32.xlu0 %v11325_v50 }
 0x9d6   :  { %v15854_v21 = vpop.permute.xlu1 %15853  ;;  %27184 = vpow2.f32 %v10999_v17 }
 0x9d7   :  { %26363 = vmatpush3.msra.mxu1 %v15854_v21  ;;  %v27183_v21 = vpop.eup %27182 }
 0x9d8   :  { %26365 = vmatmul.mubr.msk.f32.vlgmr.msra.gmra.mxu1 %vm614_vm2, %v31341_v43  ;;  %26372 = vmatprep.subr.mxu1 %v35021_v52  ;;  %v31364_v40 = vmul.f32 %v27183_v21, %v30911_v54 }
 0x9d9   :  { %26374 = vmatprep.mubr.msk.f32.mxu1 %vm27602_vm1, %v35021_v52 }
 0x9da   :  { %35590 = vst [vmem:[#allocation116_spill] sm:$0xff] %v31364_v40 }
 0x9e3   :  { %v31361_v34 = vpop.eup %27184 }
 0x9e4   :  { %35589 = vst [vmem:[#allocation167_spill] sm:$0xff] %v31361_v34  ;;  %v11328_v27 = vsel %vm614_vm2, %v31361_v34, 0.0 }
 0x9e8   :  { %v31351_v50 = vpop.xlane.xlu0 %10678 }
 0x9eb   :  { %16233 = vrot.lane.b32.xlu0 %v35586_v32, %s27607_s30 }
 0x9ec   :  { %v31355_v33 = vpop.xlane.xlu0 %11314 }
 0x9ed   :  { %v31357_v10 = vpop.f32.mrf.mxu1 }
 0x9ee   :  { %35587 = vst [vmem:[#allocation214_spill] sm:$0xff] %v31357_v10  ;;  %v35595_v10 = vld [vmem:[#allocation221_spill] sm:$0xff] }
 0x9ef   :  { %v26336_v43 = vpop.f32.mrf.mxu1 }
 0x9f0   :  { %10693 = vmax.xlane.f32.xlu1 %v10692_v8  ;;  %v15930_v45 = vpop.permute.xlu0 %15929  ;;  %v35591_v43 = vld [vmem:[#allocation124_spill] sm:$0xff]  ;;  %v35593_v8 = vld [vmem:[#allocation125_spill] sm:$0xff] }
 0x9f1   :  { %26368 = vmatpush3.msra.mxu0 %v15930_v45  ;;  %v10799_v17 = vsub.f32 %v35592_v35, %v35591_v43 }
 0x9f2   :  { %26370 = vmatmul.mubr.msk.f32.vlgmr.msra.gmra.mxu0 %vm614_vm2, %v31364_v40  ;;  %26377 = vmatprep.subr.mxu0 %v35021_v52  ;;  %v10695_v40 = vsel %vm614_vm2, %v35595_v10, -inf }
 0x9f3   :  { %26379 = vmatprep.mubr.msk.f32.mxu0 %vm27602_vm1, %v35021_v52  ;;  %v11001_v54 = vmul.f32 1.442695, %v10799_v17 }
 0x9f4   :  { %11329 = vadd.xlane.f32.xlu1 %v11328_v27 }
 0x9f5   :  { %27186 = vpow2.f32 %v11001_v54  ;;  %v35599_v54 = vld [vmem:[#allocation170_spill] sm:$0xff] }
 0x9f6   :  { %27188 = vrcp.f32 %v31055_v11 }
 0x9f7   :  { %27190 = vrcp.f32 %v31086_v18 }
 0xa02   :  { %v31384_v34 = vpop.eup %27186 }
 0xa03   :  { %35596 = vst [vmem:[#allocation120_spill] sm:$0xff] %v31384_v34  ;;  %v27189_v43 = vpop.eup %27188  ;;  %v11331_v11 = vsel %vm614_vm2, %v31384_v34, 0.0  ;;  %v35602_v34 = vld [vmem:[#allocation222_spill] sm:$0xff] }
 0xa04   :  { %v31391_v35 = vmul.f32 %v27189_v43, %v30934_v2  ;;  %v35600_v2 = vld [vmem:[#allocation123_spill] sm:$0xff]  ;;  %v10698_v10 = vsel %vm614_vm2, %v35602_v34, -inf }
 0xa05   :  { %16309 = vrot.lane.b32.xlu1 %v35593_v8, %s27607_s30 }
 0xa06   :  { %35597 = vst [vmem:[#allocation168_spill] sm:$0xff] %v31391_v35 }
 0xa07   :  { %v31378_v32 = vpop.xlane.xlu1 %10681  ;;  %v31380_v21 = vpop.f32.mrf.mxu0 }
 0xa08   :  { %35594 = vst [vmem:[#allocation217_spill] sm:$0xff] %v31380_v21 }
 0xa09   :  { %v26341_v45 = vpop.f32.mrf.mxu0 }
 0xa0a   :  { %10696 = vmax.xlane.f32.xlu0 %v10695_v40  ;;  %v35598_v40 = vld [vmem:[#allocation122_spill] sm:$0xff] }
 0xa0b   :  { %v31386_v27 = vpop.xlane.xlu1 %11317  ;;  %v10800_v8 = vsub.f32 %v35599_v54, %v35598_v40 }
 0xa0d   :  { %v11003_v45 = vmul.f32 1.442695, %v10800_v8  ;;  %v35606_v8 = vld [vmem:[#allocation171_spill] sm:$0xff] }
 0xa0e   :  { %11332 = vadd.xlane.f32.xlu0 %v11331_v11 }
 0xa0f   :  { %v16006_v17 = vpop.permute.xlu1 %16005  ;;  %27192 = vpow2.f32 %v11003_v45 }
 0xa10   :  { %26373 = vmatpush3.msra.mxu1 %v16006_v17  ;;  %v27191_v17 = vpop.eup %27190 }
 0xa11   :  { %26375 = vmatmul.mubr.msk.f32.vlgmr.msra.gmra.mxu1 %vm614_vm2, %v31391_v35  ;;  %26382 = vmatprep.subr.mxu1 %v35021_v52  ;;  %v31414_v40 = vmul.f32 %v27191_v17, %v30961_v20 }
 0xa12   :  { %26384 = vmatprep.mubr.msk.f32.mxu1 %vm27602_vm1, %v35021_v52 }
 0xa13   :  { %35604 = vst [vmem:[#allocation169_spill] sm:$0xff] %v31414_v40 }
 0xa1c   :  { %v31411_v4 = vpop.eup %27192 }
 0xa1d   :  { %35603 = vst [vmem:[#allocation124_spill] sm:$0xff] %v31411_v4  ;;  %v11334_v54 = vsel %vm614_vm2, %v31411_v4, 0.0 }
 0xa21   :  { %v31401_v11 = vpop.xlane.xlu0 %10684 }
 0xa24   :  { %16385 = vrot.lane.b32.xlu0 %v35600_v2, %s27607_s30 }
 0xa25   :  { %v31405_v43 = vpop.xlane.xlu0 %11320 }
 0xa26   :  { %v31407_v21 = vpop.f32.mrf.mxu1 }
 0xa27   :  { %35601 = vst [vmem:[#allocation115_spill] sm:$0xff] %v31407_v21  ;;  %v35609_v21 = vld [vmem:[#allocation224_spill] sm:$0xff] }
 0xa28   :  { %v26346_v35 = vpop.f32.mrf.mxu1 }
 0xa29   :  { %10699 = vmax.xlane.f32.xlu1 %v10698_v10  ;;  %v16082_v18 = vpop.permute.xlu0 %16081  ;;  %v35605_v35 = vld [vmem:[#allocation216_spill] sm:$0xff] }
 0xa2a   :  { %26378 = vmatpush3.msra.mxu0 %v16082_v18  ;;  %v10801_v45 = vsub.f32 %v35606_v8, %v35605_v35  ;;  %v35607_v10 = vld [vmem:[#allocation132_spill] sm:$0xff] }
 0xa2b   :  { %26380 = vmatmul.mubr.msk.f32.vlgmr.msra.gmra.mxu0 %vm614_vm2, %v31414_v40  ;;  %26387 = vmatprep.subr.mxu0 %v35021_v52  ;;  %v10701_v40 = vsel %vm614_vm2, %v35609_v21, -inf }
 0xa2c   :  { %26389 = vmatprep.mubr.msk.f32.mxu0 %vm27602_vm1, %v35021_v52  ;;  %v11005_v20 = vmul.f32 1.442695, %v10801_v45 }
 0xa2d   :  { %11335 = vadd.xlane.f32.xlu1 %v11334_v54 }
 0xa2e   :  { %27194 = vpow2.f32 %v11005_v20  ;;  %v35613_v20 = vld [vmem:[#allocation172_spill] sm:$0xff] }
 0xa2f   :  { %27196 = vrcp.f32 %v31105_v39 }
 0xa30   :  { %27198 = vrcp.f32 %v31136_v30 }
 0xa3b   :  { %v31434_v4 = vpop.eup %27194 }
 0xa3c   :  { %35610 = vst [vmem:[#allocation122_spill] sm:$0xff] %v31434_v4  ;;  %v27197_v35 = vpop.eup %27196  ;;  %v11337_v39 = vsel %vm614_vm2, %v31434_v4, 0.0  ;;  %v35616_v4 = vld [vmem:[#allocation225_spill] sm:$0xff] }
 0xa3d   :  { %v31441_v8 = vmul.f32 %v27197_v35, %v30984_v53  ;;  %v35614_v53 = vld [vmem:[#allocation131_spill] sm:$0xff]  ;;  %v10704_v21 = vsel %vm614_vm2, %v35616_v4, -inf }
 0xa3e   :  { %16461 = vrot.lane.b32.xlu1 %v35607_v10, %s27607_s30 }
 0xa3f   :  { %35611 = vst [vmem:[#allocation170_spill] sm:$0xff] %v31441_v8 }
 0xa40   :  { %v31428_v2 = vpop.xlane.xlu1 %10687  ;;  %v31430_v17 = vpop.f32.mrf.mxu0 }
 0xa41   :  { %35608 = vst [vmem:[#allocation125_spill] sm:$0xff] %v31430_v17 }
 0xa42   :  { %v26351_v18 = vpop.f32.mrf.mxu0 }
 0xa43   :  { %10702 = vmax.xlane.f32.xlu0 %v10701_v40  ;;  %v35612_v40 = vld [vmem:[#allocation7_spill] sm:$0xff] }
 0xa44   :  { %v31436_v54 = vpop.xlane.xlu1 %11323  ;;  %v10802_v10 = vsub.f32 %v35613_v20, %v35612_v40 }
 0xa46   :  { %v11007_v18 = vmul.f32 1.442695, %v10802_v10  ;;  %v35620_v10 = vld [vmem:[#allocation173_spill] sm:$0xff] }
 0xa47   :  { %11338 = vadd.xlane.f32.xlu0 %v11337_v39 }
 0xa48   :  { %v16158_v45 = vpop.permute.xlu1 %16157  ;;  %27200 = vpow2.f32 %v11007_v18 }
 0xa49   :  { %26383 = vmatpush3.msra.mxu1 %v16158_v45  ;;  %v27199_v45 = vpop.eup %27198 }
 0xa4a   :  { %26385 = vmatmul.mubr.msk.f32.vlgmr.msra.gmra.mxu1 %vm614_vm2, %v31441_v8  ;;  %26392 = vmatprep.subr.mxu1 %v35021_v52  ;;  %v31464_v40 = vmul.f32 %v27199_v45, %v31011_v24 }
 0xa4b   :  { %26394 = vmatprep.mubr.msk.f32.mxu1 %vm27602_vm1, %v35021_v52 }
 0xa4c   :  { %35618 = vst [vmem:[#allocation171_spill] sm:$0xff] %v31464_v40 }
 0xa55   :  { %v31461_v34 = vpop.eup %27200 }
 0xa56   :  { %35617 = vst [vmem:[#allocation216_spill] sm:$0xff] %v31461_v34  ;;  %v11340_v20 = vsel %vm614_vm2, %v31461_v34, 0.0 }
 0xa5a   :  { %v31451_v39 = vpop.xlane.xlu0 %10690 }
 0xa5d   :  { %16537 = vrot.lane.b32.xlu0 %v35614_v53, %s27607_s30 }
 0xa5e   :  { %v31455_v35 = vpop.xlane.xlu0 %11326 }
 0xa5f   :  { %v31457_v17 = vpop.f32.mrf.mxu1 }
 0xa60   :  { %35615 = vst [vmem:[#allocation123_spill] sm:$0xff] %v31457_v17  ;;  %v35623_v17 = vld [vmem:[#allocation228_spill] sm:$0xff] }
 0xa61   :  { %v26356_v8 = vpop.f32.mrf.mxu1 }
 0xa62   :  { %10705 = vmax.xlane.f32.xlu1 %v10704_v21  ;;  %v16234_v30 = vpop.permute.xlu0 %16233  ;;  %v35619_v8 = vld [vmem:[#allocation47_spill] sm:$0xff]  ;;  %v35621_v21 = vld [vmem:[#allocation25_spill] sm:$0xff] }
 0xa63   :  { %26388 = vmatpush3.msra.mxu0 %v16234_v30  ;;  %v10803_v18 = vsub.f32 %v35620_v10, %v35619_v8 }
 0xa64   :  { %26390 = vmatmul.mubr.msk.f32.vlgmr.msra.gmra.mxu0 %vm614_vm2, %v31464_v40  ;;  %26397 = vmatprep.subr.mxu0 %v35021_v52  ;;  %v10707_v40 = vsel %vm614_vm2, %v35623_v17, -inf }
 0xa65   :  { %26399 = vmatprep.mubr.msk.f32.mxu0 %vm27602_vm1, %v35021_v52  ;;  %v11009_v24 = vmul.f32 1.442695, %v10803_v18 }
 0xa66   :  { %11341 = vadd.xlane.f32.xlu1 %v11340_v20 }
 0xa67   :  { %27202 = vpow2.f32 %v11009_v24  ;;  %v35627_v24 = vld [vmem:[#allocation174_spill] sm:$0xff] }
 0xa68   :  { %27204 = vrcp.f32 %v31155_v63 }
 0xa69   :  { %27206 = vrcp.f32 %v31186_v36 }
 0xa74   :  { %v31484_v34 = vpop.eup %27202 }
 0xa75   :  { %35624 = vst [vmem:[#allocation7_spill] sm:$0xff] %v31484_v34  ;;  %v27205_v8 = vpop.eup %27204  ;;  %v11343_v63 = vsel %vm614_vm2, %v31484_v34, 0.0  ;;  %v35630_v34 = vld [vmem:[#allocation10_spill] sm:$0xff] }
 0xa76   :  { %v31491_v10 = vmul.f32 %v27205_v8, %v31034_v61  ;;  %v35628_v61 = vld [vmem:[#allocation20_spill] sm:$0xff]  ;;  %v10710_v17 = vsel %vm614_vm2, %v35630_v34, -inf }
 0xa77   :  { %16613 = vrot.lane.b32.xlu1 %v35621_v21, %s27607_s30 }
 0xa78   :  { %35625 = vst [vmem:[#allocation172_spill] sm:$0xff] %v31491_v10 }
 0xa79   :  { %v31478_v53 = vpop.xlane.xlu1 %10693  ;;  %v31480_v45 = vpop.f32.mrf.mxu0 }
 0xa7a   :  { %35622 = vst [vmem:[#allocation132_spill] sm:$0xff] %v31480_v45 }
 0xa7b   :  { %v26361_v30 = vpop.f32.mrf.mxu0 }
 0xa7c   :  { %10708 = vmax.xlane.f32.xlu0 %v10707_v40  ;;  %v35626_v40 = vld [vmem:[#allocation137_spill] sm:$0xff] }
 0xa7d   :  { %v31486_v20 = vpop.xlane.xlu1 %11329  ;;  %v10804_v21 = vsub.f32 %v35627_v24, %v35626_v40 }
 0xa7f   :  { %v11011_v30 = vmul.f32 1.442695, %v10804_v21  ;;  %v35634_v21 = vld [vmem:[#allocation175_spill] sm:$0xff] }
 0xa80   :  { %11344 = vadd.xlane.f32.xlu0 %v11343_v63 }
 0xa81   :  { %v16310_v18 = vpop.permute.xlu1 %16309  ;;  %27208 = vpow2.f32 %v11011_v30 }
 0xa82   :  { %26393 = vmatpush3.msra.mxu1 %v16310_v18  ;;  %v27207_v18 = vpop.eup %27206 }
 0xa83   :  { %26395 = vmatmul.mubr.msk.f32.vlgmr.msra.gmra.mxu1 %vm614_vm2, %v31491_v10  ;;  %26402 = vmatprep.subr.mxu1 %v35021_v52  ;;  %v31514_v40 = vmul.f32 %v27207_v18, %v31061_v55 }
 0xa84   :  { %26404 = vmatprep.mubr.msk.f32.mxu1 %vm27602_vm1, %v35021_v52 }
 0xa85   :  { %35632 = vst [vmem:[#allocation173_spill] sm:$0xff] %v31514_v40 }
 0xa8e   :  { %v31511_v4 = vpop.eup %27208 }
 0xa8f   :  { %35631 = vst [vmem:[#allocation47_spill] sm:$0xff] %v31511_v4  ;;  %v11346_v24 = vsel %vm614_vm2, %v31511_v4, 0.0 }
 0xa93   :  { %v31501_v63 = vpop.xlane.xlu0 %10696 }
 0xa96   :  { %16689 = vrot.lane.b32.xlu0 %v35628_v61, %s27607_s30 }
 0xa97   :  { %v31505_v8 = vpop.xlane.xlu0 %11332 }
 0xa98   :  { %v31507_v45 = vpop.f32.mrf.mxu1 }
 0xa99   :  { %35629 = vst [vmem:[#allocation131_spill] sm:$0xff] %v31507_v45  ;;  %v35637_v45 = vld [vmem:[#allocation231_spill] sm:$0xff] }
 0xa9a   :  { %v26366_v10 = vpop.f32.mrf.mxu1 }
 0xa9b   :  { %10711 = vmax.xlane.f32.xlu1 %v10710_v17  ;;  %v16386_v36 = vpop.permute.xlu0 %16385  ;;  %v35633_v10 = vld [vmem:[#allocation55_spill] sm:$0xff]  ;;  %v35635_v17 = vld [vmem:[#allocation30_spill] sm:$0xff] }
 0xa9c   :  { %26398 = vmatpush3.msra.mxu0 %v16386_v36  ;;  %v10805_v30 = vsub.f32 %v35634_v21, %v35633_v10 }
 0xa9d   :  { %26400 = vmatmul.mubr.msk.f32.vlgmr.msra.gmra.mxu0 %vm614_vm2, %v31514_v40  ;;  %26407 = vmatprep.subr.mxu0 %v35021_v52  ;;  %v10713_v40 = vsel %vm614_vm2, %v35637_v45, -inf }
 0xa9e   :  { %26409 = vmatprep.mubr.msk.f32.mxu0 %vm27602_vm1, %v35021_v52  ;;  %v11013_v55 = vmul.f32 1.442695, %v10805_v30 }
 0xa9f   :  { %11347 = vadd.xlane.f32.xlu1 %v11346_v24 }
 0xaa0   :  { %27210 = vpow2.f32 %v11013_v55  ;;  %v35641_v55 = vld [vmem:[#allocation176_spill] sm:$0xff] }
 0xaa1   :  { %27212 = vrcp.f32 %v31205_v56 }
 0xaa2   :  { %27214 = vrcp.f32 %v31236_v12 }
 0xaad   :  { %v31534_v4 = vpop.eup %27210 }
 0xaae   :  { %35638 = vst [vmem:[#allocation137_spill] sm:$0xff] %v31534_v4  ;;  %v27213_v10 = vpop.eup %27212  ;;  %v11349_v56 = vsel %vm614_vm2, %v31534_v4, 0.0  ;;  %v35644_v4 = vld [vmem:[#allocation232_spill] sm:$0xff] }
 0xaaf   :  { %v31541_v21 = vmul.f32 %v27213_v10, %v31084_v47  ;;  %v35642_v47 = vld [vmem:[#allocation26_spill] sm:$0xff]  ;;  %v10716_v45 = vsel %vm614_vm2, %v35644_v4, -inf }
 0xab0   :  { %16765 = vrot.lane.b32.xlu1 %v35635_v17, %s27607_s30 }
 0xab1   :  { %35639 = vst [vmem:[#allocation174_spill] sm:$0xff] %v31541_v21 }
 0xab2   :  { %v31528_v61 = vpop.xlane.xlu1 %10699  ;;  %v31530_v18 = vpop.f32.mrf.mxu0 }
 0xab3   :  { %35636 = vst [vmem:[#allocation25_spill] sm:$0xff] %v31530_v18 }
 0xab4   :  { %v26371_v36 = vpop.f32.mrf.mxu0 }
 0xab5   :  { %10714 = vmax.xlane.f32.xlu0 %v10713_v40  ;;  %v35640_v40 = vld [vmem:[#allocation64_spill] sm:$0xff] }
 0xab6   :  { %v31536_v24 = vpop.xlane.xlu1 %11335  ;;  %v10806_v17 = vsub.f32 %v35641_v55, %v35640_v40 }
 0xab8   :  { %v11015_v36 = vmul.f32 1.442695, %v10806_v17  ;;  %v35648_v17 = vld [vmem:[#allocation177_spill] sm:$0xff] }
 0xab9   :  { %11350 = vadd.xlane.f32.xlu0 %v11349_v56 }
 0xaba   :  { %v16462_v30 = vpop.permute.xlu1 %16461  ;;  %27216 = vpow2.f32 %v11015_v36 }
 0xabb   :  { %26403 = vmatpush3.msra.mxu1 %v16462_v30  ;;  %v27215_v30 = vpop.eup %27214 }
 0xabc   :  { %26405 = vmatmul.mubr.msk.f32.vlgmr.msra.gmra.mxu1 %vm614_vm2, %v31541_v21  ;;  %26412 = vmatprep.subr.mxu1 %v35021_v52  ;;  %v31564_v40 = vmul.f32 %v27215_v30, %v31111_v46 }
 0xabd   :  { %26414 = vmatprep.mubr.msk.f32.mxu1 %vm27602_vm1, %v35021_v52 }
 0xabe   :  { %35646 = vst [vmem:[#allocation175_spill] sm:$0xff] %v31564_v40 }
 0xac7   :  { %v31561_v34 = vpop.eup %27216 }
 0xac8   :  { %35645 = vst [vmem:[#allocation55_spill] sm:$0xff] %v31561_v34  ;;  %v11352_v55 = vsel %vm614_vm2, %v31561_v34, 0.0 }
 0xacc   :  { %v31551_v56 = vpop.xlane.xlu0 %10702 }
 0xacf   :  { %16841 = vrot.lane.b32.xlu0 %v35642_v47, %s27607_s30 }
 0xad0   :  { %v31555_v10 = vpop.xlane.xlu0 %11338 }
 0xad1   :  { %v31557_v18 = vpop.f32.mrf.mxu1 }
 0xad2   :  { %35643 = vst [vmem:[#allocation20_spill] sm:$0xff] %v31557_v18  ;;  %v35652_v18 = vld [vmem:[#allocation235_spill] sm:$0xff] }
 0xad3   :  { %v26376_v21 = vpop.f32.mrf.mxu1 }
 0xad4   :  { %10717 = vmax.xlane.f32.xlu1 %v10716_v45  ;;  %v16538_v12 = vpop.permute.xlu0 %16537  ;;  %v35647_v21 = vld [vmem:[#allocation63_spill] sm:$0xff]  ;;  %v35649_v45 = vld [vmem:[#allocation38_spill] sm:$0xff] }
 0xad5   :  { %26408 = vmatpush3.msra.mxu0 %v16538_v12  ;;  %v10807_v36 = vsub.f32 %v35648_v17, %v35647_v21 }
 0xad6   :  { %26410 = vmatmul.mubr.msk.f32.vlgmr.msra.gmra.mxu0 %vm614_vm2, %v31564_v40  ;;  %26417 = vmatprep.subr.mxu0 %v35021_v52  ;;  %v10719_v40 = vsel %vm614_vm2, %v35652_v18, -inf  ;;  %v35661_v18 = vld [vmem:[#allocation182_spill] sm:$0xff] }
 0xad7   :  { %26419 = vmatprep.mubr.msk.f32.mxu0 %vm27602_vm1, %v35021_v52  ;;  %v11017_v46 = vmul.f32 1.442695, %v10807_v36  ;;  %v10811_v4 = vsub.f32 %v35661_v18, %v30701_v14 }
 0xad8   :  { %11353 = vadd.xlane.f32.xlu1 %v11352_v55 }
 0xad9   :  { %27218 = vpow2.f32 %v11017_v46  ;;  %v35657_v46 = vld [vmem:[#allocation178_spill] sm:$0xff] }
 0xada   :  { %27220 = vrcp.f32 %v31255_v7 }
 0xadb   :  { %27222 = vrcp.f32 %v31286_v22 }
 0xae6   :  { %v31584_v34 = vpop.eup %27218 }
 0xae7   :  { %35653 = vst [vmem:[#allocation176_spill] sm:$0xff] %v31584_v34  ;;  %v27221_v21 = vpop.eup %27220  ;;  %v11355_v7 = vsel %vm614_vm2, %v31584_v34, 0.0 }
 0xae8   :  { %v31591_v17 = vmul.f32 %v27221_v21, %v31134_v49  ;;  %v35659_v21 = vld [vmem:[#allocation147_spill] sm:$0xff] }
 0xae9   :  { %16917 = vrot.lane.b32.xlu1 %v35649_v45, %s27607_s30 }
 0xaea   :  { %35655 = vst [vmem:[#allocation63_spill] sm:$0xff] %v31591_v17 }
 0xaeb   :  { %v31578_v47 = vpop.xlane.xlu1 %10705  ;;  %v31580_v30 = vpop.f32.mrf.mxu0 }
 0xaec   :  { %35650 = vst [vmem:[#allocation30_spill] sm:$0xff] %v31578_v47  ;;  %35651 = vst [vmem:[#allocation64_spill] sm:$0xff] %v31580_v30  ;;  %v35658_v30 = vld [vmem:[#allocation180_spill] sm:$0xff] }
 0xaed   :  { %v26381_v12 = vpop.f32.mrf.mxu0 }
 0xaee   :  { %10720 = vmax.xlane.f32.xlu0 %v10719_v40  ;;  %v35656_v40 = vld [vmem:[#allocation72_spill] sm:$0xff] }
 0xaef   :  { %v31586_v55 = vpop.xlane.xlu1 %11341  ;;  %v10808_v45 = vsub.f32 %v35657_v46, %v35656_v40  ;;  %v11025_v40 = vmul.f32 1.442695, %v10811_v4  ;;  %v35662_v46 = vld [vmem:[#allocation234_spill] sm:$0xff] }
 0xaf0   :  { %35654 = vst [vmem:[#allocation26_spill] sm:$0xff] %v31586_v55 }
 0xaf1   :  { %v11019_v12 = vmul.f32 1.442695, %v10808_v45  ;;  %v35663_v45 = vld [vmem:[#allocation183_spill] sm:$0xff] }
 0xaf2   :  { %11356 = vadd.xlane.f32.xlu0 %v11355_v7  ;;  %v10809_v7 = vsub.f32 %v35658_v30, %v30651_v19  ;;  %v10812_v55 = vsub.f32 %v35663_v45, %v35662_v46  ;;  %v35664_v19 = vld [vmem:[#allocation37_spill] sm:$0xff]  ;;  %v27223_v30 = vpop.eup %27222 }
 0xaf3   :  { %v16614_v36 = vpop.permute.xlu1 %16613  ;;  %27224 = vpow2.f32 %v11019_v12 }
 0xaf4   :  { %26413 = vmatpush3.msra.mxu1 %v16614_v36  ;;  %v11021_v49 = vmul.f32 1.442695, %v10809_v7  ;;  %v35660_v36 = vld [vmem:[#allocation181_spill] sm:$0xff]  ;;  %v35666_v7 = vld [vmem:[#allocation184_spill] sm:$0xff] }
 0xaf5   :  { %26415 = vmatmul.mubr.msk.f32.vlgmr.msra.gmra.mxu1 %vm614_vm2, %v31591_v17  ;;  %26422 = vmatprep.subr.mxu1 %v35021_v52  ;;  %v10810_v34 = vsub.f32 %v35660_v36, %v35659_v21  ;;  %v10813_v14 = vsub.f32 %v35666_v7, %v30751_v60  ;;  %v31626_v36 = vmul.f32 %v27223_v30, %v31161_v26  ;;  %v35672_v30 = vld [vmem:[#allocation33_spill] sm:$0xff]  ;;  %v35673_v7 = vld [vmem:[#allocation187_spill] sm:$0xff] }
 0xaf6   :  { %26424 = vmatprep.mubr.msk.f32.mxu1 %vm27602_vm1, %v35021_v52  ;;  %27226 = vpow2.f32 %v11021_v49  ;;  %v35667_v49 = vld [vmem:[#allocation236_spill] sm:$0xff] }
 0xaf7   :  { %v11023_v17 = vmul.f32 1.442695, %v10810_v34  ;;  %v11027_v34 = vmul.f32 1.442695, %v10812_v55  ;;  %v10722_v4 = vsel %vm614_vm2, %v35667_v49, -inf  ;;  %35669 = vst [vmem:[#allocation38_spill] sm:$0xff] %v31626_v36 }
 0xaf8   :  { %v11029_v60 = vmul.f32 1.442695, %v10813_v14  ;;  %v35670_v55 = vld [vmem:[#allocation185_spill] sm:$0xff]  ;;  %v35674_v14 = vld [vmem:[#allocation54_spill] sm:$0xff] }
 0xaf9   :  { %27228 = vpow2.f32 %v11023_v17  ;;  %v35668_v17 = vld [vmem:[#allocation46_spill] sm:$0xff] }
 0xafa   :  { %27230 = vpow2.f32 %v11025_v40  ;;  %v10814_v40 = vsub.f32 %v35670_v55, %v30778_v5  ;;  %v35676_v55 = vld [vmem:[#allocation186_spill] sm:$0xff] }
 0xafb   :  { %27232 = vpow2.f32 %v11027_v34 }
 0xafc   :  { %27234 = vpow2.f32 %v11029_v60  ;;  %v11031_v34 = vmul.f32 1.442695, %v10814_v40  ;;  %v35677_v60 = vld [vmem:[#allocation53_spill] sm:$0xff] }
 0xafe   :  { %27236 = vpow2.f32 %v11031_v34  ;;  %v35680_v34 = vld [vmem:[#allocation62_spill] sm:$0xff] }
 0xb00   :  { %v31623_v21 = vpop.eup %27224 }
 0xb01   :  { %v11358_v45 = vsel %vm614_vm2, %v31623_v21, 0.0 }
 0xb03   :  { %v31639_v26 = vpop.eup %27226 }
 0xb04   :  { %v11361_v5 = vsel %vm614_vm2, %v31639_v26, 0.0 }
 0xb05   :  { %v31607_v47 = vpop.xlane.xlu0 %10708 }
 0xb08   :  { %16993 = vrot.lane.b32.xlu0 %v35664_v19, %s27607_s30  ;;  %v35671_v19 = vld [vmem:[#allocation44_spill] sm:$0xff] }
 0xb09   :  { %v31613_v22 = vpop.xlane.xlu0 %11344 }
 0xb0a   :  { %v31615_v12 = vpop.f32.mrf.mxu1 }
 0xb0b   :  { %35665 = vst [vmem:[#allocation177_spill] sm:$0xff] %v31615_v12 }
 0xb0c   :  { %v26386_v18 = vpop.f32.mrf.mxu1  ;;  %17069 = vrot.lane.b32.xlu0 %v35668_v17, %s27607_s30 }
 0xb0d   :  { %10723 = vmax.xlane.f32.xlu1 %v10722_v4  ;;  %v16690_v46 = vpop.permute.xlu0 %16689  ;;  %v10815_v18 = vsub.f32 %v35673_v7, %v35672_v30  ;;  %v31647_v4 = vpop.eup %27228  ;;  %v35678_v7 = vld [vmem:[#allocation35_spill] sm:$0xff] }
 0xb0e   :  { %26418 = vmatpush3.msra.mxu0 %v16690_v46  ;;  %v35675_v46 = vld [vmem:[#allocation6_spill] sm:$0xff]  ;;  %v31655_v40 = vpop.eup %27230 }
 0xb0f   :  { %26420 = vmatmul.mubr.msk.f32.vlgmr.msra.gmra.mxu0 %vm614_vm2, %v31626_v36  ;;  %26427 = vmatprep.subr.mxu0 %v35021_v52  ;;  %v11033_v17 = vmul.f32 1.442695, %v10815_v18  ;;  %v11367_v18 = vsel %vm614_vm2, %v31655_v40, 0.0 }
 0xb10   :  { %17145 = vrot.lane.b32.xlu0 %v35671_v19, %s27607_s30  ;;  %26429 = vmatprep.mubr.msk.f32.mxu0 %vm27602_vm1, %v35021_v52  ;;  %v10816_v19 = vsub.f32 %v35676_v55, %v35675_v46  ;;  %v35681_v55 = vld [vmem:[#allocation49_spill] sm:$0xff] }
 0xb11   :  { %11359 = vadd.xlane.f32.xlu1 %v11358_v45  ;;  %v11364_v45 = vsel %vm614_vm2, %v31647_v4, 0.0  ;;  %27238 = vpow2.f32 %v11033_v17 }
 0xb12   :  { %v11035_v30 = vmul.f32 1.442695, %v10816_v19  ;;  %27240 = vrcp.f32 %v31305_v3 }
 0xb14   :  { %17221 = vrot.lane.b32.xlu0 %v35674_v14, %s27607_s30  ;;  %v35679_v14 = vld [vmem:[#allocation189_spill] sm:$0xff]  ;;  %27242 = vpow2.f32 %v11035_v30  ;;  %v35686_v30 = vld [vmem:[#allocation70_spill] sm:$0xff] }
 0xb15   :  { %11362 = vadd.xlane.f32.xlu1 %v11361_v5  ;;  %v10817_v12 = vsub.f32 %v35679_v14, %v35678_v7  ;;  %v31664_v5 = vpop.eup %27232  ;;  %v35685_v14 = vld [vmem:[#allocation192_spill] sm:$0xff] }
 0xb16   :  { %v11370_v19 = vsel %vm614_vm2, %v31664_v5, 0.0  ;;  %v31672_v3 = vpop.eup %27234 }
 0xb17   :  { %v11037_v46 = vmul.f32 1.442695, %v10817_v12  ;;  %35684 = vst [vmem:[#allocation72_spill] sm:$0xff] %v31672_v3  ;;  %v11373_v12 = vsel %vm614_vm2, %v31672_v3, 0.0  ;;  %v35693_v3 = vld [vmem:[#allocation78_spill] sm:$0xff] }
 0xb18   :  { %17297 = vrot.lane.b32.xlu0 %v35677_v60, %s27607_s30  ;;  %v35683_v60 = vld [vmem:[#allocation60_spill] sm:$0xff] }
 0xb19   :  { %11365 = vadd.xlane.f32.xlu1 %v11364_v45  ;;  %v35682_v45 = vld [vmem:[#allocation188_spill] sm:$0xff]  ;;  %27244 = vpow2.f32 %v11037_v46 }
 0xb1a   :  { %v10818_v17 = vsub.f32 %v35682_v45, %v35681_v55  ;;  %v31684_v45 = vpop.eup %27236 }
 0xb1b   :  { %35688 = vst [vmem:[#allocation180_spill] sm:$0xff] %v31684_v45  ;;  %v11376_v36 = vsel %vm614_vm2, %v31684_v45, 0.0 }
 0xb1c   :  { %17373 = vrot.lane.b32.xlu0 %v35680_v34, %s27607_s30  ;;  %v11039_v7 = vmul.f32 1.442695, %v10818_v17  ;;  %v10819_v34 = vsub.f32 %v35685_v14, %v30901_v37  ;;  %v35689_v37 = vld [vmem:[#allocation191_spill] sm:$0xff] }
 0xb1d   :  { %11368 = vadd.xlane.f32.xlu1 %v11367_v18  ;;  %v10820_v17 = vsub.f32 %v35689_v37, %v30928_v6 }
 0xb1e   :  { %27246 = vpow2.f32 %v11039_v7  ;;  %v11041_v46 = vmul.f32 1.442695, %v10819_v34  ;;  %v35691_v7 = vld [vmem:[#allocation194_spill] sm:$0xff] }
 0xb1f   :  { %v10821_v34 = vsub.f32 %v35691_v7, %v30951_v29  ;;  %v35700_v7 = vld [vmem:[#allocation197_spill] sm:$0xff] }
 0xb20   :  { %17449 = vrot.lane.b32.xlu0 %v35683_v60, %s27607_s30  ;;  %27248 = vpow2.f32 %v11041_v46  ;;  %v35697_v46 = vld [vmem:[#allocation77_spill] sm:$0xff] }
 0xb21   :  { %11371 = vadd.xlane.f32.xlu1 %v11370_v19  ;;  %v31686_v19 = vpop.eup %27238  ;;  %v11045_v29 = vmul.f32 1.442695, %v10821_v34  ;;  %v35701_v34 = vld [vmem:[#allocation86_spill] sm:$0xff] }
 0xb24   :  { %v31676_v18 = vpop.xlane.xlu1 %10711  ;;  %17525 = vrot.lane.b32.xlu0 %v35686_v30, %s27607_s30  ;;  %v31682_v55 = vpop.f32.mrf.mxu0  ;;  %v35690_v30 = vld [vmem:[#allocation69_spill] sm:$0xff] }
 0xb25   :  { %35687 = vst [vmem:[#allocation178_spill] sm:$0xff] %v31682_v55  ;;  %11374 = vadd.xlane.f32.xlu1 %v11373_v12  ;;  %v27241_v55 = vpop.eup %27240  ;;  %v11379_v12 = vsel %vm614_vm2, %v31686_v19, 0.0 }
 0xb26   :  { %v26391_v60 = vpop.f32.mrf.mxu0  ;;  %v31701_v6 = vmul.f32 %v27241_v55, %v31184_v31  ;;  %v31705_v45 = vpop.eup %27242  ;;  %v35695_v31 = vld [vmem:[#allocation51_spill] sm:$0xff] }
 0xb27   :  { %v11043_v60 = vmul.f32 1.442695, %v10820_v17  ;;  %35694 = vst [vmem:[#allocation181_spill] sm:$0xff] %v31705_v45  ;;  %v31718_v17 = vpop.eup %27244 }
 0xb28   :  { %v31690_v14 = vpop.xlane.xlu1 %11347  ;;  %17601 = vrot.lane.b32.xlu0 %v35690_v30, %s27607_s30  ;;  %35692 = vst [vmem:[#allocation147_spill] sm:$0xff] %v31701_v6  ;;  %35698 = vst [vmem:[#allocation182_spill] sm:$0xff] %v31718_v17 }
 0xb29   :  { %11377 = vadd.xlane.f32.xlu1 %v11376_v36  ;;  %27250 = vpow2.f32 %v11043_v60  ;;  %v35696_v36 = vld [vmem:[#allocation193_spill] sm:$0xff]  ;;  %v11385_v60 = vsel %vm614_vm2, %v31718_v17, 0.0 }
 0xb2a   :  { %v10822_v55 = vsub.f32 %v35696_v36, %v35695_v31  ;;  %27252 = vpow2.f32 %v11045_v29 }
 0xb2b   :  { %v31726_v31 = vpop.eup %27246  ;;  %27254 = vrcp.f32 %v31336_v13 }
 0xb2c   :  { %v16766_v37 = vpop.permute.xlu1 %16765  ;;  %17677 = vrot.lane.b32.xlu0 %v35693_v3, %s27607_s30  ;;  %v11382_v3 = vsel %vm614_vm2, %v31705_v45, 0.0  ;;  %v11047_v30 = vmul.f32 1.442695, %v10822_v55  ;;  %35702 = vst [vmem:[#allocation234_spill] sm:$0xff] %v31726_v31  ;;  %v11388_v55 = vsel %vm614_vm2, %v31726_v31, 0.0 }
 0xb2d   :  { %11380 = vadd.xlane.f32.xlu1 %v11379_v12  ;;  %26423 = vmatpush3.msra.mxu1 %v16766_v37  ;;  %v35699_v12 = vld [vmem:[#allocation154_spill] sm:$0xff] }
 0xb2e   :  { %26425 = vmatmul.mubr.msk.f32.vlgmr.msra.gmra.mxu1 %vm614_vm2, %v31701_v6  ;;  %26432 = vmatprep.subr.mxu1 %v35021_v52  ;;  %v10823_v37 = vsub.f32 %v35700_v7, %v35699_v12  ;;  %27256 = vpow2.f32 %v11047_v30  ;;  %v35705_v12 = vld [vmem:[#allocation85_spill] sm:$0xff]  ;;  %v31735_v7 = vpop.eup %27248  ;;  %v35707_v6 = vld [vmem:[#allocation67_spill] sm:$0xff]  ;;  %v35709_v30 = vld [vmem:[#allocation92_spill] sm:$0xff] }
 0xb2f   :  { %26434 = vmatprep.mubr.msk.f32.mxu1 %vm27602_vm1, %v35021_v52  ;;  %35706 = vst [vmem:[#allocation183_spill] sm:$0xff] %v31735_v7  ;;  %v11391_v13 = vsel %vm614_vm2, %v31735_v7, 0.0 }
 0xb30   :  { %17753 = vrot.lane.b32.xlu0 %v35697_v46, %s27607_s30  ;;  %v11049_v36 = vmul.f32 1.442695, %v10823_v37  ;;  %v35703_v46 = vld [vmem:[#allocation68_spill] sm:$0xff] }
 0xb31   :  { %11383 = vadd.xlane.f32.xlu1 %v11382_v3  ;;  %v35704_v3 = vld [vmem:[#allocation196_spill] sm:$0xff] }
 0xb32   :  { %v10824_v29 = vsub.f32 %v35704_v3, %v35703_v46  ;;  %27258 = vpow2.f32 %v11049_v36 }
 0xb34   :  { %17829 = vrot.lane.b32.xlu0 %v35701_v34, %s27607_s30  ;;  %v11051_v34 = vmul.f32 1.442695, %v10824_v29 }
 0xb35   :  { %11386 = vadd.xlane.f32.xlu1 %v11385_v60  ;;  %v35708_v60 = vld [vmem:[#allocation199_spill] sm:$0xff] }
 0xb36   :  { %v10825_v17 = vsub.f32 %v35708_v60, %v35707_v6  ;;  %v31743_v37 = vpop.eup %27250  ;;  %27260 = vpow2.f32 %v11051_v34  ;;  %v35713_v6 = vld [vmem:[#allocation91_spill] sm:$0xff] }
 0xb37   :  { %35710 = vst [vmem:[#allocation37_spill] sm:$0xff] %v31743_v37  ;;  %v11394_v29 = vsel %vm614_vm2, %v31743_v37, 0.0  ;;  %v31753_v60 = vpop.eup %27252 }
 0xb38   :  { %17905 = vrot.lane.b32.xlu0 %v35705_v12, %s27607_s30  ;;  %v11053_v3 = vmul.f32 1.442695, %v10825_v17  ;;  %v35711_v12 = vld [vmem:[#allocation76_spill] sm:$0xff]  ;;  %v27255_v7 = vpop.eup %27254 }
 0xb39   :  { %11389 = vadd.xlane.f32.xlu1 %v11388_v55  ;;  %v35712_v55 = vld [vmem:[#allocation198_spill] sm:$0xff]  ;;  %v35715_v17 = vld [vmem:[#allocation200_spill] sm:$0xff]  ;;  %v31768_v37 = vmul.f32 %v27255_v7, %v31211_v0 }
 0xb3a   :  { %v10826_v36 = vsub.f32 %v35712_v55, %v35711_v12  ;;  %27262 = vpow2.f32 %v11053_v3  ;;  %v10827_v31 = vsub.f32 %v35715_v17, %v31101_v15  ;;  %v11397_v12 = vsel %vm614_vm2, %v31753_v60, 0.0  ;;  %v35716_v55 = vld [vmem:[#allocation98_spill] sm:$0xff]  ;;  %v35720_v7 = vld [vmem:[#allocation104_spill] sm:$0xff] }
 0xb3c   :  { %17981 = vrot.lane.b32.xlu0 %v35709_v30, %s27607_s30  ;;  %v11055_v34 = vmul.f32 1.442695, %v10826_v36  ;;  %v11057_v3 = vmul.f32 1.442695, %v10827_v31  ;;  %v35717_v36 = vld [vmem:[#allocation201_spill] sm:$0xff] }
 0xb3d   :  { %11392 = vadd.xlane.f32.xlu1 %v11391_v13  ;;  %v10828_v15 = vsub.f32 %v35717_v36, %v31128_v1  ;;  %v35719_v1 = vld [vmem:[#allocation202_spill] sm:$0xff]  ;;  %v35722_v36 = vld [vmem:[#allocation103_spill] sm:$0xff] }
 0xb3e   :  { %v31745_v46 = vpop.xlane.xlu0 %10714  ;;  %27264 = vpow2.f32 %v11055_v34 }
 0xb3f   :  { %27266 = vpow2.f32 %v11057_v3  ;;  %v11059_v0 = vmul.f32 1.442695, %v10828_v15 }
 0xb40   :  { %18057 = vrot.lane.b32.xlu0 %v35713_v6, %s27607_s30  ;;  %v31765_v6 = vpop.eup %27256 }
 0xb41   :  { %11395 = vadd.xlane.f32.xlu1 %v11394_v29  ;;  %v11400_v17 = vsel %vm614_vm2, %v31765_v6, 0.0  ;;  %27268 = vpow2.f32 %v11059_v0 }
 0xb42   :  { %v31755_v30 = vpop.xlane.xlu0 %11350 }
 0xb43   :  { %v31757_v13 = vpop.f32.mrf.mxu1 }
 0xb44   :  { %35714 = vst [vmem:[#allocation184_spill] sm:$0xff] %v31757_v13  ;;  %18133 = vrot.lane.b32.xlu0 %v35716_v55, %s27607_s30  ;;  %v35718_v13 = vld [vmem:[#allocation97_spill] sm:$0xff]  ;;  %v35721_v55 = vld [vmem:[#allocation203_spill] sm:$0xff] }
 0xb45   :  { %11398 = vadd.xlane.f32.xlu1 %v11397_v12  ;;  %v26396_v29 = vpop.f32.mrf.mxu1  ;;  %v31778_v12 = vpop.eup %27258 }
 0xb46   :  { %v16842_v45 = vpop.permute.xlu0 %16841  ;;  %v11403_v31 = vsel %vm614_vm2, %v31778_v12, 0.0  ;;  %v10830_v29 = vsub.f32 %v35721_v55, %v31178_v41 }
 0xb47   :  { %26428 = vmatpush3.msra.mxu0 %v16842_v45  ;;  %v10829_v45 = vsub.f32 %v35719_v1, %v31151_v16 }
 0xb48   :  { %18209 = vrot.lane.b32.xlu0 %v35718_v13, %s27607_s30  ;;  %26430 = vmatmul.mubr.msk.f32.vlgmr.msra.gmra.mxu0 %vm614_vm2, %v31768_v37  ;;  %v31789_v13 = vpop.eup %27260  ;;  %v11063_v15 = vmul.f32 1.442695, %v10830_v29 }
 0xb49   :  { %11401 = vadd.xlane.f32.xlu1 %v11400_v17  ;;  %26437 = vmatprep.subr.mxu0 %v35021_v52  ;;  %v11061_v34 = vmul.f32 1.442695, %v10829_v45  ;;  %v11406_v3 = vsel %vm614_vm2, %v31789_v13, 0.0  ;;  %v31797_v16 = vpop.eup %27262  ;;  %v35723_v17 = vld [vmem:[#allocation206_spill] sm:$0xff]  ;;  %v35724_v45 = vld [vmem:[#allocation111_spill] sm:$0xff] }
 0xb4a   :  { %26439 = vmatprep.mubr.msk.f32.mxu0 %vm27602_vm1, %v35021_v52  ;;  %v10831_v1 = vsub.f32 %v35723_v17, %v31201_v38  ;;  %v11409_v0 = vsel %vm614_vm2, %v31797_v16, 0.0  ;;  %v35726_v38 = vld [vmem:[#allocation109_spill] sm:$0xff]  ;;  %v35728_v17 = vld [vmem:[#allocation118_spill] sm:$0xff] }
 0xb4b   :  { %27270 = vpow2.f32 %v11061_v34  ;;  %v31805_v41 = vpop.eup %27264 }
 0xb4c   :  { %18285 = vrot.lane.b32.xlu0 %v35720_v7, %s27607_s30  ;;  %27272 = vrcp.f32 %v31355_v33  ;;  %v35725_v7 = vld [vmem:[#allocation205_spill] sm:$0xff]  ;;  %v11412_v55 = vsel %vm614_vm2, %v31805_v41, 0.0  ;;  %v31814_v29 = vpop.eup %27266 }
 0xb4d   :  { %11404 = vadd.xlane.f32.xlu1 %v11403_v31  ;;  %27274 = vpow2.f32 %v11063_v15  ;;  %v11065_v31 = vmul.f32 1.442695, %v10831_v1  ;;  %v10832_v34 = vsub.f32 %v35725_v7, %v31228_v62  ;;  %v11415_v15 = vsel %vm614_vm2, %v31814_v29, 0.0  ;;  %v35730_v7 = vld [vmem:[#allocation207_spill] sm:$0xff] }
 0xb4e   :  { %v31822_v62 = vpop.eup %27268 }
 0xb4f   :  { %27276 = vpow2.f32 %v11065_v31 }
 0xb50   :  { %18361 = vrot.lane.b32.xlu0 %v35722_v36, %s27607_s30  ;;  %v35727_v36 = vld [vmem:[#allocation8_spill] sm:$0xff] }
 0xb51   :  { %11407 = vadd.xlane.f32.xlu1 %v11406_v3  ;;  %v11067_v3 = vmul.f32 1.442695, %v10832_v34  ;;  %v10833_v33 = vsub.f32 %v35727_v36, %v31251_v23  ;;  %v10834_v34 = vsub.f32 %v35730_v7, %v31278_v42  ;;  %v11418_v23 = vsel %vm614_vm2, %v31822_v62, 0.0 }
 0xb53   :  { %27278 = vpow2.f32 %v11067_v3  ;;  %v11069_v31 = vmul.f32 1.442695, %v10833_v33  ;;  %v35732_v3 = vld [vmem:[#allocation208_spill] sm:$0xff] }
 0xb54   :  { %18437 = vrot.lane.b32.xlu0 %v35724_v45, %s27607_s30  ;;  %v10835_v33 = vsub.f32 %v35732_v3, %v31301_v58 }
 0xb55   :  { %11410 = vadd.xlane.f32.xlu1 %v11409_v0  ;;  %27280 = vpow2.f32 %v11069_v31  ;;  %v10836_v31 = vsub.f32 %v35557_v57, %v31328_v48  ;;  %v35736_v48 = vld [vmem:[#allocation134_spill] sm:$0xff] }
 0xb56   :  { %v11073_v58 = vmul.f32 1.442695, %v10835_v33 }
 0xb58   :  { %18513 = vrot.lane.b32.xlu0 %v35726_v38, %s27607_s30  ;;  %v31834_v38 = vpop.eup %27270 }
 0xb59   :  { %11413 = vadd.xlane.f32.xlu1 %v11412_v55  ;;  %v35731_v55 = vld [vmem:[#allocation117_spill] sm:$0xff]  ;;  %v11421_v42 = vsel %vm614_vm2, %v31834_v38, 0.0 }
 0xb5c   :  { %18589 = vrot.lane.b32.xlu0 %v35728_v17, %s27607_s30  ;;  %v11071_v17 = vmul.f32 1.442695, %v10834_v34 }
 0xb5d   :  { %v31824_v1 = vpop.xlane.xlu1 %10717  ;;  %11416 = vadd.xlane.f32.xlu1 %v11415_v15  ;;  %v31826_v0 = vpop.f32.mrf.mxu0 }
 0xb5e   :  { %35729 = vst [vmem:[#allocation236_spill] sm:$0xff] %v31826_v0  ;;  %v27273_v15 = vpop.eup %27272  ;;  %27282 = vpow2.f32 %v11071_v17 }
 0xb5f   :  { %v26401_v45 = vpop.f32.mrf.mxu0  ;;  %v31844_v7 = vpop.eup %27274  ;;  %27284 = vpow2.f32 %v11073_v58 }
 0xb60   :  { %18665 = vrot.lane.b32.xlu0 %v35731_v55, %s27607_s30  ;;  %v35733_v45 = vld [vmem:[#allocation128_spill] sm:$0xff]  ;;  %v31847_v55 = vmul.f32 %v27273_v15, %v31234_v44  ;;  %v11424_v34 = vsel %vm614_vm2, %v31844_v7, 0.0  ;;  %v31860_v44 = vpop.eup %27276  ;;  %v35735_v15 = vld [vmem:[#allocation211_spill] sm:$0xff]  ;;  %27286 = vrcp.f32 %v31386_v27  ;;  %v10839_v27 = vsub.f32 %v35570_v51, %v31401_v11  ;;  %v35739_v11 = vld [vmem:[#allocation21_spill] sm:$0xff] }
 0xb61   :  { %v31836_v36 = vpop.xlane.xlu1 %11353  ;;  %11419 = vadd.xlane.f32.xlu1 %v11418_v23  ;;  %v35734_v23 = vld [vmem:[#allocation126_spill] sm:$0xff]  ;;  %v10837_v17 = vsub.f32 %v35735_v15, %v31351_v50  ;;  %v11427_v57 = vsel %vm614_vm2, %v31860_v44, 0.0  ;;  %v31868_v3 = vpop.eup %27278  ;;  %v35737_v50 = vld [vmem:[#allocation133_spill] sm:$0xff] }
 0xb62   :  { %v31877_v58 = vpop.eup %27280 }
 0xb63   :  { %v11077_v33 = vmul.f32 1.442695, %v10837_v17 }
 0xb64   :  { %18741 = vrot.lane.b32.xlu0 %v35733_v45, %s27607_s30  ;;  %v11430_v45 = vsel %vm614_vm2, %v31868_v3, 0.0 }
 0xb65   :  { %v16918_v0 = vpop.permute.xlu1 %16917  ;;  %11422 = vadd.xlane.f32.xlu1 %v11421_v42  ;;  %v10838_v42 = vsub.f32 %v35566_v28, %v31378_v32  ;;  %v35738_v28 = vld [vmem:[#allocation27_spill] sm:$0xff] }
 0xb66   :  { %26433 = vmatpush3.msra.mxu1 %v16918_v0  ;;  %v11075_v0 = vmul.f32 1.442695, %v10836_v31 }
 0xb67   :  { %26435 = vmatmul.mubr.msk.f32.vlgmr.msra.gmra.mxu1 %vm614_vm2, %v31847_v55  ;;  %26442 = vmatprep.subr.mxu1 %v35021_v52  ;;  %v11079_v31 = vmul.f32 1.442695, %v10838_v42 }
 0xb68   :  { %18817 = vrot.lane.b32.xlu0 %v35734_v23, %s27607_s30  ;;  %26444 = vmatprep.mubr.msk.f32.mxu1 %vm27602_vm1, %v35021_v52  ;;  %27288 = vpow2.f32 %v11075_v0  ;;  %v10840_v0 = vsub.f32 %v35575_v59, %v31428_v2 }
 0xb69   :  { %11425 = vadd.xlane.f32.xlu1 %v11424_v34  ;;  %27290 = vrcp.f32 %v31405_v43  ;;  %v11433_v34 = vsel %vm614_vm2, %v31877_v58, 0.0  ;;  %v11081_v43 = vmul.f32 1.442695, %v10839_v27 }
 0xb6a   :  { %27292 = vpow2.f32 %v11077_v33  ;;  %v35741_v33 = vld [vmem:[#allocation34_spill] sm:$0xff] }
 0xb6b   :  { %v31886_v32 = vpop.eup %27282  ;;  %27294 = vrcp.f32 %v31436_v54 }
 0xb6c   :  { %18893 = vrot.lane.b32.xlu0 %v35736_v48, %s27607_s30  ;;  %27296 = vpow2.f32 %v11079_v31  ;;  %v11436_v51 = vsel %vm614_vm2, %v31886_v32, 0.0  ;;  %v31897_v15 = vpop.eup %27284  ;;  %v10841_v48 = vsub.f32 %v35581_v9, %v31451_v39  ;;  %v35742_v39 = vld [vmem:[#allocation218_spill] sm:$0xff] }
 0xb6d   :  { %11428 = vadd.xlane.f32.xlu1 %v11427_v57  ;;  %27298 = vrcp.f32 %v31455_v35  ;;  %v27287_v54 = vpop.eup %27286  ;;  %v11083_v57 = vmul.f32 1.442695, %v10840_v0  ;;  %v11439_v2 = vsel %vm614_vm2, %v31897_v15, 0.0  ;;  %v10842_v27 = vsub.f32 %v35742_v39, %v31478_v53 }
 0xb6e   :  { %27300 = vpow2.f32 %v11081_v43  ;;  %v11085_v9 = vmul.f32 1.442695, %v10841_v48  ;;  %v35746_v48 = vld [vmem:[#allocation42_spill] sm:$0xff] }
 0xb6f   :  { %27302 = vrcp.f32 %v31486_v20 }
 0xb70   :  { %18969 = vrot.lane.b32.xlu0 %v35737_v50, %s27607_s30  ;;  %27304 = vpow2.f32 %v11083_v57 }
 0xb71   :  { %11431 = vadd.xlane.f32.xlu1 %v11430_v45  ;;  %v31913_v45 = vmul.f32 %v27287_v54, %v31261_v25  ;;  %v35744_v25 = vld [vmem:[#allocation209_spill] sm:$0xff]  ;;  %27306 = vrcp.f32 %v31505_v8 }
 0xb72   :  { %27308 = vpow2.f32 %v11085_v9  ;;  %v35747_v8 = vld [vmem:[#allocation101_spill] sm:$0xff] }
 0xb73   :  { %27310 = vrcp.f32 %v31536_v24  ;;  %v35750_v24 = vld [vmem:[#allocation215_spill] sm:$0xff] }
 0xb74   :  { %19045 = vrot.lane.b32.xlu0 %v35738_v28, %s27607_s30  ;;  %v35743_v28 = vld [vmem:[#allocation28_spill] sm:$0xff] }
 0xb75   :  { %11434 = vadd.xlane.f32.xlu1 %v11433_v34  ;;  %v31910_v42 = vpop.eup %27288 }
 0xb76   :  { %v27291_v31 = vpop.eup %27290  ;;  %v11442_v34 = vsel %vm614_vm2, %v31910_v42, 0.0 }
 0xb77   :  { %v31889_v23 = vpop.xlane.xlu0 %10720  ;;  %v31922_v43 = vpop.eup %27292  ;;  %v31930_v53 = vmul.f32 %v27291_v31, %v35744_v25  ;;  %v35748_v31 = vld [vmem:[#allocation222_spill] sm:$0xff] }
 0xb78   :  { %19121 = vrot.lane.b32.xlu0 %v35739_v11, %s27607_s30  ;;  %v27295_v0 = vpop.eup %27294  ;;  %v35745_v11 = vld [vmem:[#allocation221_spill] sm:$0xff]  ;;  %v11445_v57 = vsel %vm614_vm2, %v31922_v43, 0.0  ;;  %v10844_v9 = vsub.f32 %v35748_v31, %v31528_v61 }
 0xb79   :  { %11437 = vadd.xlane.f32.xlu1 %v11436_v51  ;;  %v11087_v51 = vmul.f32 1.442695, %v10842_v27  ;;  %v10843_v54 = vsub.f32 %v35745_v11, %v31501_v63  ;;  %v31947_v63 = vmul.f32 %v27295_v0, %v35747_v8  ;;  %v35749_v27 = vld [vmem:[#allocation41_spill] sm:$0xff]  ;;  %v35751_v0 = vld [vmem:[#allocation224_spill] sm:$0xff] }
 0xb7a   :  { %v35756_v31 = vld [vmem:[#allocation225_spill] sm:$0xff] }
 0xb7b   :  { %v31900_v17 = vpop.xlane.xlu0 %11356  ;;  %27312 = vpow2.f32 %v11087_v51  ;;  %v10845_v51 = vsub.f32 %v35751_v0, %v31551_v56 }
 0xb7c   :  { %v31904_v59 = vpop.f32.mrf.mxu1  ;;  %19197 = vrot.lane.b32.xlu0 %v35741_v33, %s27607_s30  ;;  %27314 = vrcp.f32 %v31555_v10  ;;  %v35753_v10 = vld [vmem:[#allocation167_spill] sm:$0xff] }
 0xb7d   :  { %35740 = vst [vmem:[#allocation46_spill] sm:$0xff] %v31904_v59  ;;  %11440 = vadd.xlane.f32.xlu1 %v11439_v2  ;;  %v31939_v2 = vpop.eup %27296 }
 0xb7e   :  { %v26406_v35 = vpop.f32.mrf.mxu1  ;;  %v11448_v39 = vsel %vm614_vm2, %v31939_v2, 0.0 }
 0xb7f   :  { %v16994_v50 = vpop.permute.xlu0 %16993  ;;  %v27299_v35 = vpop.eup %27298 }
 0xb80   :  { %19273 = vrot.lane.b32.xlu0 %v35743_v28, %s27607_s30  ;;  %26438 = vmatpush3.msra.mxu0 %v16994_v50  ;;  %v11089_v50 = vmul.f32 1.442695, %v10843_v54  ;;  %v31964_v61 = vmul.f32 %v27299_v35, %v35750_v24  ;;  %v35752_v54 = vld [vmem:[#allocation50_spill] sm:$0xff]  ;;  %v11093_v35 = vmul.f32 1.442695, %v10845_v51 }
 0xb81   :  { %11443 = vadd.xlane.f32.xlu1 %v11442_v34  ;;  %26440 = vmatmul.mubr.msk.f32.vlgmr.msra.gmra.mxu0 %vm614_vm2, %v31913_v45  ;;  %v31956_v34 = vpop.eup %27300 }
 0xb82   :  { %26447 = vmatprep.subr.mxu0 %v35021_v52  ;;  %26449 = vmatprep.mubr.msk.f32.mxu0 %vm27602_vm1, %v35021_v52  ;;  %v27303_v25 = vpop.eup %27302  ;;  %27316 = vpow2.f32 %v11089_v50  ;;  %v11451_v11 = vsel %vm614_vm2, %v31956_v34, 0.0  ;;  %v35755_v50 = vld [vmem:[#allocation30_spill] sm:$0xff] }
 0xb83   :  { %v17070_v20 = vpop.permute.xlu0 %17069  ;;  %v31981_v56 = vmul.f32 %v27303_v25, %v35753_v10 }
 0xb84   :  { %19349 = vrot.lane.b32.xlu0 %v35746_v48, %s27607_s30  ;;  %26443 = vmatpush3.msra.mxu1 %v17070_v20  ;;  %v11091_v20 = vmul.f32 1.442695, %v10844_v9  ;;  %v35754_v48 = vld [vmem:[#allocation26_spill] sm:$0xff]  ;;  %v10846_v9 = vsub.f32 %v35756_v31, %v35755_v50 }
 0xb85   :  { %11446 = vadd.xlane.f32.xlu1 %v11445_v57  ;;  %26445 = vmatmul.mubr.msk.f32.vlgmr.msra.gmra.mxu1 %vm614_vm2, %v31930_v53  ;;  %v31973_v57 = vpop.eup %27304  ;;  %27318 = vrcp.f32 %v35754_v48  ;;  %v35760_v48 = vld [vmem:[#allocation58_spill] sm:$0xff] }
 0xb86   :  { %26452 = vmatprep.subr.mxu1 %v35021_v52  ;;  %26454 = vmatprep.mubr.msk.f32.mxu1 %vm27602_vm1, %v35021_v52  ;;  %27320 = vpow2.f32 %v11091_v20  ;;  %v11095_v51 = vmul.f32 1.442695, %v10846_v9 }
 0xb87   :  { %v17146_v33 = vpop.permute.xlu0 %17145  ;;  %27322 = vrcp.f32 %v31613_v22 }
 0xb88   :  { %19425 = vrot.lane.b32.xlu0 %v35749_v27, %s27607_s30  ;;  %26448 = vmatpush3.msra.mxu0 %v17146_v33  ;;  %v27307_v33 = vpop.eup %27306  ;;  %v35757_v27 = vld [vmem:[#allocation45_spill] sm:$0xff]  ;;  %27324 = vpow2.f32 %v11093_v35 }
 0xb89   :  { %11449 = vadd.xlane.f32.xlu1 %v11448_v39  ;;  %26450 = vmatmul.mubr.msk.f32.vlgmr.msra.gmra.mxu0 %vm614_vm2, %v31947_v63  ;;  %v11454_v39 = vsel %vm614_vm2, %v31973_v57, 0.0  ;;  %v31990_v24 = vpop.eup %27308  ;;  %27326 = vrcp.f32 %v31690_v14 }
 0xb8a   :  { %26457 = vmatprep.subr.mxu0 %v35021_v52  ;;  %26459 = vmatprep.mubr.msk.f32.mxu0 %vm27602_vm1, %v35021_v52  ;;  %v27311_v0 = vpop.eup %27310  ;;  %v11457_v10 = vsel %vm614_vm2, %v31990_v24, 0.0  ;;  %27328 = vpow2.f32 %v11095_v51 }
 0xb8b   :  { %v17222_v28 = vpop.permute.xlu0 %17221  ;;  %27330 = vrcp.f32 %v31755_v30 }
 0xb8c   :  { %19501 = vrot.lane.b32.xlu0 %v35752_v54, %s27607_s30  ;;  %26453 = vmatpush3.msra.mxu1 %v17222_v28  ;;  %v35758_v28 = vld [vmem:[#allocation120_spill] sm:$0xff] }
 0xb8d   :  { %11452 = vadd.xlane.f32.xlu1 %v11451_v11  ;;  %26455 = vmatmul.mubr.msk.f32.vlgmr.msra.gmra.mxu1 %vm614_vm2, %v31964_v61  ;;  %v31998_v25 = vmul.f32 %v27307_v33, %v35758_v28  ;;  %v35759_v11 = vld [vmem:[#allocation228_spill] sm:$0xff] }
 0xb8e   :  { %26462 = vmatprep.subr.mxu1 %v35021_v52  ;;  %26464 = vmatprep.mubr.msk.f32.mxu1 %vm27602_vm1, %v35021_v52  ;;  %v10847_v54 = vsub.f32 %v35759_v11, %v31607_v47  ;;  %v35762_v47 = vld [vmem:[#allocation124_spill] sm:$0xff] }
 0xb8f   :  { %v17298_v8 = vpop.permute.xlu0 %17297  ;;  %v32019_v35 = vmul.f32 %v27311_v0, %v35762_v47  ;;  %v35766_v47 = vld [vmem:[#allocation231_spill] sm:$0xff] }
 0xb90   :  { %19577 = vrot.lane.b32.xlu0 %v35757_v27, %s27607_s30  ;;  %26458 = vmatpush3.msra.mxu0 %v17298_v8  ;;  %v32007_v8 = vpop.eup %27312  ;;  %v11097_v9 = vmul.f32 1.442695, %v10847_v54 }
 0xb91   :  { %11455 = vadd.xlane.f32.xlu1 %v11454_v39  ;;  %26460 = vmatmul.mubr.msk.f32.vlgmr.msra.gmra.mxu0 %vm614_vm2, %v31981_v56  ;;  %v27315_v31 = vpop.eup %27314  ;;  %v35763_v39 = vld [vmem:[#allocation10_spill] sm:$0xff]  ;;  %v11460_v28 = vsel %vm614_vm2, %v32007_v8, 0.0 }
 0xb92   :  { %26467 = vmatprep.subr.mxu0 %v35021_v52  ;;  %26469 = vmatprep.mubr.msk.f32.mxu0 %vm27602_vm1, %v35021_v52  ;;  %v10848_v27 = vsub.f32 %v35763_v39, %v31676_v18  ;;  %v35765_v18 = vld [vmem:[#allocation122_spill] sm:$0xff]  ;;  %27332 = vpow2.f32 %v11097_v9 }
 0xb93   :  { %v17374_v20 = vpop.permute.xlu0 %17373  ;;  %v32036_v0 = vmul.f32 %v27315_v31, %v35765_v18  ;;  %27334 = vrcp.f32 %v31836_v36  ;;  %v35770_v18 = vld [vmem:[#allocation232_spill] sm:$0xff] }
 0xb94   :  { %19653 = vrot.lane.b32.xlu0 %v35760_v48, %s27607_s30  ;;  %26463 = vmatpush3.msra.mxu1 %v17374_v20  ;;  %v35764_v20 = vld [vmem:[#allocation57_spill] sm:$0xff]  ;;  %v11099_v48 = vmul.f32 1.442695, %v10848_v27 }
 0xb95   :  { %11458 = vadd.xlane.f32.xlu1 %v11457_v10  ;;  %26465 = vmatmul.mubr.msk.f32.vlgmr.msra.gmra.mxu1 %vm614_vm2, %v31998_v25  ;;  %v32028_v10 = vpop.eup %27316 }
 0xb96   :  { %v32011_v22 = vpop.xlane.xlu1 %10723  ;;  %v32013_v33 = vpop.f32.mrf.mxu0  ;;  %26472 = vmatprep.subr.mxu1 %v35021_v52  ;;  %26474 = vmatprep.mubr.msk.f32.mxu1 %vm27602_vm1, %v35021_v52  ;;  %v11463_v39 = vsel %vm614_vm2, %v32028_v10, 0.0  ;;  %27336 = vpow2.f32 %v11099_v48 }
 0xb97   :  { %35761 = vst [vmem:[#allocation185_spill] sm:$0xff] %v32013_v33  ;;  %v17450_v50 = vpop.permute.xlu0 %17449  ;;  %v27319_v54 = vpop.eup %27318  ;;  %27338 = vrcp.f32 %v31900_v17 }
 0xb98   :  { %19729 = vrot.lane.b32.xlu0 %v35764_v20, %s27607_s30  ;;  %v26411_v11 = vpop.f32.mrf.mxu0  ;;  %26468 = vmatpush3.msra.mxu0 %v17450_v50  ;;  %v10849_v50 = vsub.f32 %v35766_v47, %v31745_v46  ;;  %v32045_v20 = vpop.eup %27320  ;;  %v35769_v46 = vld [vmem:[#allocation216_spill] sm:$0xff] }
 0xb99   :  { %11461 = vadd.xlane.f32.xlu1 %v11460_v28  ;;  %26470 = vmatmul.mubr.msk.f32.vlgmr.msra.gmra.mxu0 %vm614_vm2, %v32019_v35  ;;  %v35767_v28 = vld [vmem:[#allocation66_spill] sm:$0xff]  ;;  %35768 = vst [vmem:[#allocation44_spill] sm:$0xff] %v32045_v20  ;;  %v32053_v31 = vmul.f32 %v27319_v54, %v35769_v46  ;;  %v27323_v27 = vpop.eup %27322  ;;  %v11466_v47 = vsel %vm614_vm2, %v32045_v20, 0.0 }
 0xb9a   :  { %v11360_v14 = vpop.xlane.xlu1 %11359  ;;  %26477 = vmatprep.subr.mxu0 %v35021_v52  ;;  %26479 = vmatprep.mubr.msk.f32.mxu0 %vm27602_vm1, %v35021_v52  ;;  %v11101_v11 = vmul.f32 1.442695, %v10849_v50 }
 0xb9b   :  { %v17526_v51 = vpop.permute.xlu0 %17525 }
 0xb9c   :  { %19805 = vrot.lane.b32.xlu0 %v35767_v28, %s27607_s30  ;;  %26473 = vmatpush3.msra.mxu1 %v17526_v51  ;;  %v10850_v51 = vsub.f32 %v35770_v18, %v31824_v1  ;;  %v32062_v28 = vpop.eup %27324  ;;  %v35773_v1 = vld [vmem:[#allocation7_spill] sm:$0xff]  ;;  %27340 = vpow2.f32 %v11101_v11 }
 0xb9d   :  { %11464 = vadd.xlane.f32.xlu1 %v11463_v39  ;;  %26475 = vmatmul.mubr.msk.f32.vlgmr.msra.gmra.mxu1 %vm614_vm2, %v32036_v0  ;;  %v35771_v39 = vld [vmem:[#allocation61_spill] sm:$0xff]  ;;  %35772 = vst [vmem:[#allocation33_spill] sm:$0xff] %v32062_v28  ;;  %v32070_v54 = vmul.f32 %v27323_v27, %v35773_v1  ;;  %v27327_v50 = vpop.eup %27326  ;;  %27342 = vrcp.f32 %v11360_v14 }
 0xb9e   :  { %v11363_v30 = vpop.xlane.xlu1 %11362  ;;  %26482 = vmatprep.subr.mxu1 %v35021_v52  ;;  %26484 = vmatprep.mubr.msk.f32.mxu1 %vm27602_vm1, %v35021_v52  ;;  %v11103_v46 = vmul.f32 1.442695, %v10850_v51  ;;  %v32079_v33 = vpop.eup %27328 }
 0xb9f   :  { %v17602_v9 = vpop.permute.xlu0 %17601  ;;  %35776 = vst [vmem:[#allocation187_spill] sm:$0xff] %v32079_v33  ;;  %v27331_v51 = vpop.eup %27330 }
 0xba0   :  { %19881 = vrot.lane.b32.xlu0 %v35771_v39, %s27607_s30  ;;  %26478 = vmatpush3.msra.mxu0 %v17602_v9  ;;  %v35774_v9 = vld [vmem:[#allocation235_spill] sm:$0xff]  ;;  %v35775_v39 = vld [vmem:[#allocation74_spill] sm:$0xff]  ;;  %27344 = vpow2.f32 %v11103_v46 }
 0xba1   :  { %11467 = vadd.xlane.f32.xlu1 %v11466_v47  ;;  %26480 = vmatmul.mubr.msk.f32.vlgmr.msra.gmra.mxu0 %vm614_vm2, %v32053_v31  ;;  %v10851_v18 = vsub.f32 %v35774_v9, %v31889_v23  ;;  %v11469_v47 = vsel %vm614_vm2, %v32062_v28, 0.0  ;;  %v35777_v23 = vld [vmem:[#allocation47_spill] sm:$0xff]  ;;  %v11472_v9 = vsel %vm614_vm2, %v32079_v33, 0.0  ;;  %27346 = vrcp.f32 %v11363_v30 }
 0xba2   :  { %v11366_v36 = vpop.xlane.xlu1 %11365  ;;  %26487 = vmatprep.subr.mxu0 %v35021_v52  ;;  %26489 = vmatprep.mubr.msk.f32.mxu0 %vm27602_vm1, %v35021_v52  ;;  %v32087_v27 = vmul.f32 %v27327_v50, %v35777_v23  ;;  %v35783_v30 = vld [vmem:[#allocation55_spill] sm:$0xff] }
 0xba3   :  { %v17678_v48 = vpop.permute.xlu0 %17677  ;;  %v11105_v1 = vmul.f32 1.442695, %v10851_v18  ;;  %v35815_v33 = vld [vmem:[#allocation63_spill] sm:$0xff] }
 0xba4   :  { %19957 = vrot.lane.b32.xlu0 %v35775_v39, %s27607_s30  ;;  %26483 = vmatpush3.msra.mxu1 %v17678_v48  ;;  %v10852_v48 = vsub.f32 %v35667_v49, %v32011_v22  ;;  %v32095_v39 = vpop.eup %27332  ;;  %v35780_v49 = vld [vmem:[#allocation137_spill] sm:$0xff] }
 0xba5   :  { %11470 = vadd.xlane.f32.xlu1 %v11469_v47  ;;  %26485 = vmatmul.mubr.msk.f32.vlgmr.msra.gmra.mxu1 %vm614_vm2, %v32070_v54  ;;  %v35778_v47 = vld [vmem:[#allocation73_spill] sm:$0xff]  ;;  %35779 = vst [vmem:[#allocation54_spill] sm:$0xff] %v32095_v39  ;;  %v32103_v22 = vmul.f32 %v27331_v51, %v35780_v49  ;;  %v27335_v46 = vpop.eup %27334  ;;  %27348 = vpow2.f32 %v11105_v1  ;;  %v11475_v23 = vsel %vm614_vm2, %v32095_v39, 0.0 }
 0xba6   :  { %v11369_v17 = vpop.xlane.xlu1 %11368  ;;  %26492 = vmatprep.subr.mxu1 %v35021_v52  ;;  %26494 = vmatprep.mubr.msk.f32.mxu1 %vm27602_vm1, %v35021_v52  ;;  %v11107_v18 = vmul.f32 1.442695, %v10852_v48  ;;  %v32117_v1 = vmul.f32 %v27335_v46, %v35783_v30  ;;  %27350 = vrcp.f32 %v11366_v36  ;;  %v35786_v36 = vld [vmem:[#allocation176_spill] sm:$0xff] }
 0xba7   :  { %v17754_v11 = vpop.permute.xlu0 %17753 }
 0xba8   :  { %20033 = vrot.lane.b32.xlu0 %v35778_v47, %s27607_s30  ;;  %26488 = vmatpush3.msra.mxu0 %v17754_v11  ;;  %v35781_v11 = vld [vmem:[#allocation82_spill] sm:$0xff]  ;;  %27352 = vpow2.f32 %v11107_v18 }
 0xba9   :  { %11473 = vadd.xlane.f32.xlu1 %v11472_v9  ;;  %26490 = vmatmul.mubr.msk.f32.vlgmr.msra.gmra.mxu0 %vm614_vm2, %v32087_v27  ;;  %v32109_v9 = vpop.eup %27336  ;;  %27354 = vrcp.f32 %v11369_v17 }
 0xbaa   :  { %v11372_v14 = vpop.xlane.xlu1 %11371  ;;  %26497 = vmatprep.subr.mxu0 %v35021_v52  ;;  %26499 = vmatprep.mubr.msk.f32.mxu0 %vm27602_vm1, %v35021_v52  ;;  %35782 = vst [vmem:[#allocation6_spill] sm:$0xff] %v32109_v9  ;;  %v27339_v47 = vpop.eup %27338  ;;  %v11478_v49 = vsel %vm614_vm2, %v32109_v9, 0.0 }
 0xbab   :  { %v17830_v50 = vpop.permute.xlu0 %17829  ;;  %v32131_v46 = vmul.f32 %v27339_v47, %v35786_v36  ;;  %27356 = vrcp.f32 %v11372_v14 }
 0xbac   :  { %20109 = vrot.lane.b32.xlu0 %v35781_v11, %s27607_s30  ;;  %26493 = vmatpush3.msra.mxu1 %v17830_v50  ;;  %v35784_v50 = vld [vmem:[#allocation81_spill] sm:$0xff] }
 0xbad   :  { %11476 = vadd.xlane.f32.xlu1 %v11475_v23  ;;  %26495 = vmatmul.mubr.msk.f32.vlgmr.msra.gmra.mxu1 %vm614_vm2, %v32103_v22  ;;  %v32123_v23 = vpop.eup %27340 }
 0xbae   :  { %v11375_v51 = vpop.xlane.xlu1 %11374  ;;  %26502 = vmatprep.subr.mxu1 %v35021_v52  ;;  %26504 = vmatprep.mubr.msk.f32.mxu1 %vm27602_vm1, %v35021_v52  ;;  %35785 = vst [vmem:[#allocation186_spill] sm:$0xff] %v32123_v23  ;;  %v27343_v30 = vpop.eup %27342 }
 0xbaf   :  { %v17906_v48 = vpop.permute.xlu0 %17905  ;;  %v32147_v17 = vmul.f32 %v27343_v30, %v31623_v21  ;;  %27358 = vrcp.f32 %v11375_v51 }
 0xbb0   :  { %20185 = vrot.lane.b32.xlu0 %v35784_v50, %s27607_s30  ;;  %26498 = vmatpush3.msra.mxu0 %v17906_v48  ;;  %v35787_v48 = vld [vmem:[#allocation88_spill] sm:$0xff]  ;;  %v32137_v50 = vpop.eup %27344 }
 0xbb1   :  { %11479 = vadd.xlane.f32.xlu1 %v11478_v49  ;;  %26500 = vmatmul.mubr.msk.f32.vlgmr.msra.gmra.mxu0 %vm614_vm2, %v32117_v1  ;;  %v11481_v49 = vsel %vm614_vm2, %v32123_v23, 0.0  ;;  %35788 = vst [vmem:[#allocation53_spill] sm:$0xff] %v32137_v50  ;;  %v11484_v23 = vsel %vm614_vm2, %v32137_v50, 0.0  ;;  %v35812_v50 = vld [vmem:[#allocation182_spill] sm:$0xff] }
 0xbb2   :  { %v11378_v11 = vpop.xlane.xlu1 %11377  ;;  %26507 = vmatprep.subr.mxu0 %v35021_v52  ;;  %26509 = vmatprep.mubr.msk.f32.mxu0 %vm27602_vm1, %v35021_v52 }
 0xbb3   :  { %v17982_v18 = vpop.permute.xlu0 %17981  ;;  %27360 = vrcp.f32 %v11378_v11 }
 0xbb4   :  { %20261 = vrot.lane.b32.xlu0 %v35787_v48, %s27607_s30  ;;  %26503 = vmatpush3.msra.mxu1 %v17982_v18  ;;  %v27347_v48 = vpop.eup %27346 }
 0xbb5   :  { %v32139_v59 = vpop.f32.mrf.mxu1  ;;  %11482 = vadd.xlane.f32.xlu1 %v11481_v49  ;;  %26505 = vmatmul.mubr.msk.f32.vlgmr.msra.gmra.mxu1 %vm614_vm2, %v32131_v46  ;;  %v35789_v49 = vld [vmem:[#allocation87_spill] sm:$0xff]  ;;  %v32153_v9 = vpop.eup %27348  ;;  %v32161_v21 = vmul.f32 %v27347_v48, %v31639_v26 }
 0xbb6   :  { %v11381_v47 = vpop.xlane.xlu1 %11380  ;;  %26512 = vmatprep.subr.mxu1 %v35021_v52  ;;  %26514 = vmatprep.mubr.msk.f32.mxu1 %vm27602_vm1, %v35021_v52  ;;  %35790 = vst [vmem:[#allocation35_spill] sm:$0xff] %v32153_v9  ;;  %v27351_v30 = vpop.eup %27350 }
 0xbb7   :  { %v26416_v36 = vpop.f32.mrf.mxu1  ;;  %v18058_v18 = vpop.permute.xlu0 %18057  ;;  %v32175_v26 = vmul.f32 %v27351_v30, %v31647_v4  ;;  %27362 = vrcp.f32 %v11381_v47 }
 0xbb8   :  { %20337 = vrot.lane.b32.xlu0 %v35789_v49, %s27607_s30  ;;  %26508 = vmatpush3.msra.mxu0 %v18058_v18  ;;  %v35791_v36 = vld [vmem:[#allocation94_spill] sm:$0xff]  ;;  %v32167_v18 = vpop.eup %27352 }
 0xbb9   :  { %11485 = vadd.xlane.f32.xlu1 %v11484_v23  ;;  %26510 = vmatmul.mubr.msk.f32.vlgmr.msra.gmra.mxu0 %vm614_vm2, %v32147_v17  ;;  %v11487_v23 = vsel %vm614_vm2, %v32153_v9, 0.0  ;;  %35792 = vst [vmem:[#allocation189_spill] sm:$0xff] %v32167_v18  ;;  %v27355_v48 = vpop.eup %27354 }
 0xbba   :  { %v11384_v39 = vpop.xlane.xlu1 %11383  ;;  %26517 = vmatprep.subr.mxu0 %v35021_v52  ;;  %26519 = vmatprep.mubr.msk.f32.mxu0 %vm27602_vm1, %v35021_v52  ;;  %v32187_v4 = vmul.f32 %v27355_v48, %v31655_v40  ;;  %v27357_v30 = vpop.eup %27356  ;;  %v35795_v48 = vld [vmem:[#allocation106_spill] sm:$0xff] }
 0xbbb   :  { %v18134_v14 = vpop.permute.xlu0 %18133  ;;  %27364 = vrcp.f32 %v11384_v39 }
 0xbbc   :  { %20413 = vrot.lane.b32.xlu0 %v35791_v36, %s27607_s30  ;;  %26513 = vmatpush3.msra.mxu1 %v18134_v14  ;;  %v35793_v14 = vld [vmem:[#allocation100_spill] sm:$0xff]  ;;  %v11490_v36 = vsel %vm614_vm2, %v32167_v18, 0.0  ;;  %v27359_v47 = vpop.eup %27358 }
 0xbbd   :  { %11488 = vadd.xlane.f32.xlu1 %v11487_v23  ;;  %26515 = vmatmul.mubr.msk.f32.vlgmr.msra.gmra.mxu1 %vm614_vm2, %v32161_v21 }
 0xbbe   :  { %v11387_v49 = vpop.xlane.xlu1 %11386  ;;  %26522 = vmatprep.subr.mxu1 %v35021_v52  ;;  %26524 = vmatprep.mubr.msk.f32.mxu1 %vm27602_vm1, %v35021_v52 }
 0xbbf   :  { %v18210_v51 = vpop.permute.xlu0 %18209  ;;  %27366 = vrcp.f32 %v11387_v49 }
 0xbc0   :  { %20565 = vrot.lane.b32.xlu0 %v35793_v14, %s27607_s30  ;;  %26518 = vmatpush3.msra.mxu0 %v18210_v51  ;;  %v35794_v14 = vld [vmem:[#allocation99_spill] sm:$0xff]  ;;  %v27361_v39 = vpop.eup %27360 }
 0xbc1   :  { %11491 = vadd.xlane.f32.xlu1 %v11490_v36  ;;  %26520 = vmatmul.mubr.msk.f32.vlgmr.msra.gmra.mxu0 %vm614_vm2, %v32175_v26  ;;  %v32197_v36 = vmul.f32 %v27357_v30, %v31664_v5  ;;  %v35798_v30 = vld [vmem:[#allocation105_spill] sm:$0xff] }
 0xbc2   :  { %v11390_v23 = vpop.xlane.xlu1 %11389  ;;  %26527 = vmatprep.subr.mxu0 %v35021_v52  ;;  %26529 = vmatprep.mubr.msk.f32.mxu0 %vm27602_vm1, %v35021_v52 }
 0xbc3   :  { %v18286_v11 = vpop.permute.xlu0 %18285  ;;  %27368 = vrcp.f32 %v11390_v23 }
 0xbc4   :  { %20641 = vrot.lane.b32.xlu0 %v35794_v14, %s27607_s30  ;;  %26523 = vmatpush3.msra.mxu1 %v18286_v11  ;;  %v35796_v14 = vld [vmem:[#allocation72_spill] sm:$0xff]  ;;  %v27363_v9 = vpop.eup %27362 }
 0xbc5   :  { %26525 = vmatmul.mubr.msk.f32.vlgmr.msra.gmra.mxu1 %vm614_vm2, %v32187_v4  ;;  %26532 = vmatprep.subr.mxu1 %v35021_v52  ;;  %v32207_v18 = vmul.f32 %v27359_v47, %v35796_v14 }
 0xbc6   :  { %v11393_v51 = vpop.xlane.xlu1 %11392  ;;  %26534 = vmatprep.mubr.msk.f32.mxu1 %vm27602_vm1, %v35021_v52 }
 0xbc7   :  { %v18362_v40 = vpop.permute.xlu0 %18361  ;;  %35797 = vst [vmem:[#allocation62_spill] sm:$0xff] %v32207_v18 }
 0xbc8   :  { %20717 = vrot.lane.b32.xlu0 %v35795_v48, %s27607_s30  ;;  %26528 = vmatpush3.msra.mxu0 %v18362_v40  ;;  %v35799_v48 = vld [vmem:[#allocation180_spill] sm:$0xff] }
 0xbc9   :  { %26530 = vmatmul.mubr.msk.f32.vlgmr.msra.gmra.mxu0 %vm614_vm2, %v32197_v36  ;;  %26537 = vmatprep.subr.mxu0 %v35021_v52  ;;  %v32217_v47 = vmul.f32 %v27361_v39, %v35799_v48  ;;  %v35802_v39 = vld [vmem:[#allocation93_spill] sm:$0xff] }
 0xbca   :  { %v11396_v11 = vpop.xlane.xlu1 %11395  ;;  %26539 = vmatprep.mubr.msk.f32.mxu0 %vm27602_vm1, %v35021_v52 }
 0xbcb   :  { %v18438_v5 = vpop.permute.xlu0 %18437  ;;  %35800 = vst [vmem:[#allocation49_spill] sm:$0xff] %v32217_v47 }
 0xbcc   :  { %20793 = vrot.lane.b32.xlu0 %v35798_v30, %s27607_s30  ;;  %26533 = vmatpush3.msra.mxu1 %v18438_v5  ;;  %v35801_v5 = vld [vmem:[#allocation114_spill] sm:$0xff] }
 0xbcd   :  { %26535 = vmatmul.mubr.msk.f32.vlgmr.msra.gmra.mxu1 %vm614_vm2, %v32207_v18  ;;  %26542 = vmatprep.subr.mxu1 %v35021_v52 }
 0xbce   :  { %v11399_v40 = vpop.xlane.xlu1 %11398  ;;  %26544 = vmatprep.mubr.msk.f32.mxu1 %vm27602_vm1, %v35021_v52 }
 0xbcf   :  { %27370 = vrcp.f32 %v11399_v40  ;;  %v32219_v49 = vpop.f32.mrf.mxu0  ;;  %v18514_v14 = vpop.permute.xlu0 %18513  ;;  %v32231_v40 = vmul.f32 %v27363_v9, %v31686_v19  ;;  %v35806_v19 = vld [vmem:[#allocation181_spill] sm:$0xff] }
 0xbd0   :  { %20869 = vrot.lane.b32.xlu0 %v35801_v5, %s27607_s30  ;;  %26538 = vmatpush3.msra.mxu0 %v18514_v14  ;;  %27372 = vrcp.f32 %v11393_v51  ;;  %v27365_v14 = vpop.eup %27364  ;;  %v35804_v5 = vld [vmem:[#allocation121_spill] sm:$0xff] }
 0xbd1   :  { %v26421_v30 = vpop.f32.mrf.mxu0  ;;  %26540 = vmatmul.mubr.msk.f32.vlgmr.msra.gmra.mxu0 %vm614_vm2, %v32217_v47  ;;  %26547 = vmatprep.subr.mxu0 %v35021_v52  ;;  %35803 = vst [vmem:[#allocation188_spill] sm:$0xff] %v32231_v40  ;;  %v32243_v9 = vmul.f32 %v27365_v14, %v35806_v19 }
 0xbd2   :  { %v11402_v23 = vpop.xlane.xlu1 %11401  ;;  %20489 = vrot.lane.b32.xlu1 %v35802_v39, %s27607_s30  ;;  %26549 = vmatprep.mubr.msk.f32.mxu0 %vm27602_vm1, %v35021_v52  ;;  %v35805_v30 = vld [vmem:[#allocation112_spill] sm:$0xff]  ;;  %v27367_v39 = vpop.eup %27366 }
 0xbd3   :  { %27374 = vrcp.f32 %v11402_v23  ;;  %v18590_v48 = vpop.permute.xlu0 %18589  ;;  %35807 = vst [vmem:[#allocation60_spill] sm:$0xff] %v32243_v9  ;;  %v27369_v14 = vpop.eup %27368 }
 0xbd4   :  { %21021 = vrot.lane.b32.xlu0 %v35804_v5, %s27607_s30  ;;  %26543 = vmatpush3.msra.mxu1 %v18590_v48  ;;  %27376 = vrcp.f32 %v11396_v11  ;;  %v35808_v48 = vld [vmem:[#allocation130_spill] sm:$0xff]  ;;  %v35809_v5 = vld [vmem:[#allocation119_spill] sm:$0xff] }
 0xbd5   :  { %26545 = vmatmul.mubr.msk.f32.vlgmr.msra.gmra.mxu1 %vm614_vm2, %v32231_v40  ;;  %26552 = vmatprep.subr.mxu1 %v35021_v52  ;;  %v32257_v40 = vmul.f32 %v27367_v39, %v35812_v50  ;;  %v35816_v50 = vld [vmem:[#allocation129_spill] sm:$0xff] }
 0xbd6   :  { %v11405_v51 = vpop.xlane.xlu1 %11404  ;;  %20945 = vrot.lane.b32.xlu1 %v35805_v30, %s27607_s30  ;;  %26554 = vmatprep.mubr.msk.f32.mxu1 %vm27602_vm1, %v35021_v52  ;;  %v35811_v30 = vld [vmem:[#allocation150_spill] sm:$0xff] }
 0xbd7   :  { %27378 = vrcp.f32 %v11405_v51  ;;  %v18666_v23 = vpop.permute.xlu0 %18665  ;;  %v35810_v51 = vld [vmem:[#allocation9_spill] sm:$0xff]  ;;  %35813 = vst [vmem:[#allocation192_spill] sm:$0xff] %v32257_v40 }
 0xbd8   :  { %21173 = vrot.lane.b32.xlu0 %v35808_v48, %s27607_s30  ;;  %26548 = vmatpush3.msra.mxu0 %v18666_v23  ;;  %v21477_v19 = vadd.f32 %v35811_v30, %v35810_v51 }
 0xbd9   :  { %26550 = vmatmul.mubr.msk.f32.vlgmr.msra.gmra.mxu0 %vm614_vm2, %v32243_v9  ;;  %26557 = vmatprep.subr.mxu0 %v35021_v52  ;;  %v35814_v9 = vld [vmem:[#allocation143_spill] sm:$0xff] }
 0xbda   :  { %v11408_v11 = vpop.xlane.xlu1 %11407  ;;  %21097 = vrot.lane.b32.xlu1 %v35809_v5, %s27607_s30  ;;  %26559 = vmatprep.mubr.msk.f32.mxu0 %vm27602_vm1, %v35021_v52  ;;  %v21509_v47 = vadd.f32 %v21477_v19, %v35815_v33  ;;  %v35819_v33 = vld [vmem:[#allocation234_spill] sm:$0xff] }
 0xbdb   :  { %27380 = vrcp.f32 %v11408_v11  ;;  %v18742_v23 = vpop.permute.xlu0 %18741  ;;  %v35818_v11 = vld [vmem:[#allocation29_spill] sm:$0xff]  ;;  %v32275_v19 = vmul.f32 %v27369_v14, %v35819_v33  ;;  %v35822_v14 = vld [vmem:[#allocation142_spill] sm:$0xff] }
 0xbdc   :  { %v27371_v48 = vpop.eup %27370  ;;  %21325 = vrot.lane.b32.xlu0 %v35814_v9, %s27607_s30  ;;  %26553 = vmatpush3.msra.mxu1 %v18742_v23  ;;  %v35817_v9 = vld [vmem:[#allocation243_spill] sm:$0xff] }
 0xbdd   :  { %v32263_v5 = vmul.f32 %v27371_v48, %v31753_v60  ;;  %26555 = vmatmul.mubr.msk.f32.vlgmr.msra.gmra.mxu1 %vm614_vm2, %v32257_v40  ;;  %26562 = vmatprep.subr.mxu1 %v35021_v52  ;;  %v27373_v39 = vpop.eup %27372  ;;  %v21478_v30 = vadd.f32 %v35818_v11, %v35817_v9  ;;  %v35820_v40 = vld [vmem:[#allocation240_spill] sm:$0xff] }
 0xbde   :  { %v11411_v51 = vpop.xlane.xlu1 %11410  ;;  %21249 = vrot.lane.b32.xlu1 %v35816_v50, %s27607_s30  ;;  %26564 = vmatprep.mubr.msk.f32.mxu1 %vm27602_vm1, %v35021_v52  ;;  %v35821_v50 = vld [vmem:[#allocation38_spill] sm:$0xff]  ;;  %v35824_v9 = vld [vmem:[#allocation140_spill] sm:$0xff] }
 0xbdf   :  { %v21541_v60 = vadd.f32 %v21509_v47, %v32263_v5  ;;  %27382 = vrcp.f32 %v11411_v51  ;;  %v18818_v23 = vpop.permute.xlu0 %18817  ;;  %v21510_v28 = vadd.f32 %v21478_v30, %v35821_v50  ;;  %v35823_v51 = vld [vmem:[#allocation244_spill] sm:$0xff]  ;;  %v35825_v30 = vld [vmem:[#allocation183_spill] sm:$0xff] }
 0xbe0   :  { %v27375_v48 = vpop.eup %27374  ;;  %21637 = vrot.lane.b32.xlu0 %v35820_v40, %s27608_s8  ;;  %26558 = vmatpush3.msra.mxu0 %v18818_v23  ;;  %v21479_v11 = vadd.f32 %v35824_v9, %v35823_v51  ;;  %v32294_v33 = vmul.f32 %v27373_v39, %v35825_v30  ;;  %v35830_v9 = vld [vmem:[#allocation37_spill] sm:$0xff] }
 0xbe1   :  { %v21573_v18 = vmul.f32 0.25, %v21541_v60  ;;  %v32282_v20 = vmul.f32 %v27375_v48, %v31765_v6  ;;  %26560 = vmatmul.mubr.msk.f32.vlgmr.msra.gmra.mxu0 %vm614_vm2, %v32275_v19  ;;  %26567 = vmatprep.subr.mxu0 %v35021_v52  ;;  %v27377_v40 = vpop.eup %27376  ;;  %v35826_v48 = vld [vmem:[#allocation147_spill] sm:$0xff] }
 0xbe2   :  { %v11414_v47 = vpop.xlane.xlu1 %11413  ;;  %21401 = vrot.lane.b32.xlu1 %v35822_v14, %s27607_s30  ;;  %26569 = vmatprep.mubr.msk.f32.mxu0 %vm27602_vm1, %v35021_v52  ;;  %v21511_v50 = vadd.f32 %v21479_v11, %v35826_v48  ;;  %v32315_v11 = vmul.f32 %v27377_v40, %v35830_v9 }
 0xbe3   :  { %24184 = vst.msk [vmem:[%s34545_s7] sm:$0xff] %vm614_vm2, %v21573_v18  ;;  %v21542_v6 = vadd.f32 %v21510_v28, %v32282_v20  ;;  %27384 = vrcp.f32 %v11414_v47  ;;  %v18894_v60 = vpop.permute.xlu0 %18893  ;;  %v35827_v28 = vld [vmem:[#allocation155_spill] sm:$0xff]  ;;  %v35828_v47 = vld [vmem:[#allocation245_spill] sm:$0xff] }
 0xbe4   :  { %v27379_v23 = vpop.eup %27378  ;;  %21765 = vrot.lane.b32.xlu0 %v32139_v59, %s27609_s11  ;;  %26563 = vmatpush3.msra.mxu1 %v18894_v60  ;;  %v35829_v59 = vld [vmem:[#allocation151_spill] sm:$0xff] }
 0xbe5   :  { %v21574_v14 = vmul.f32 0.25, %v21542_v6  ;;  %v11690_v39 = vmul.f32 %v27379_v23, %v31778_v12  ;;  %26565 = vmatmul.mubr.msk.f32.vlgmr.msra.gmra.mxu1 %vm614_vm2, %v32294_v33  ;;  %26572 = vmatprep.subr.mxu1 %v35021_v52  ;;  %v21480_v51 = vadd.f32 %v35829_v59, %v35828_v47 }
 0xbe6   :  { %v11417_v18 = vpop.xlane.xlu1 %11416  ;;  %21639 = vrot.lane.b32.xlu1 %v35827_v28, %s27608_s8  ;;  %26574 = vmatprep.mubr.msk.f32.mxu1 %vm27602_vm1, %v35021_v52 }
 0xbe7   :  { %24185 = vst.msk [vmem:[%s34545_s7 + $0x8] sm:$0xff] %vm614_vm2, %v21574_v14  ;;  %v21543_v12 = vadd.f32 %v21511_v50, %v11690_v39  ;;  %27386 = vrcp.f32 %v11417_v18  ;;  %v18970_v30 = vpop.permute.xlu0 %18969  ;;  %v21512_v60 = vadd.f32 %v21480_v51, %v31768_v37  ;;  %v35831_v50 = vld [vmem:[#allocation11_spill] sm:$0xff]  ;;  %v35832_v14 = vld [vmem:[#allocation141_spill] sm:$0xff] }
 0xbe8   :  { %v27381_v6 = vpop.eup %27380  ;;  %26568 = vmatpush3.msra.mxu0 %v18970_v30  ;;  %v21481_v18 = vadd.f32 %v35832_v14, %v35831_v50  ;;  %v35834_v30 = vld [vmem:[#allocation241_spill] sm:$0xff] }
 0xbe9   :  { %v21575_v23 = vmul.f32 0.25, %v21543_v12  ;;  %v11692_v48 = vmul.f32 %v27381_v6, %v31789_v13  ;;  %26570 = vmatmul.mubr.msk.f32.vlgmr.msra.gmra.mxu0 %vm614_vm2, %v32315_v11  ;;  %26577 = vmatprep.subr.mxu0 %v35021_v52  ;;  %v35833_v12 = vld [vmem:[#allocation247_spill] sm:$0xff] }
 0xbea   :  { %v11420_v40 = vpop.xlane.xlu1 %11419  ;;  %21767 = vrot.lane.b32.xlu1 %v32219_v49, %s27609_s11  ;;  %26579 = vmatprep.mubr.msk.f32.mxu0 %vm27602_vm1, %v35021_v52  ;;  %v21513_v47 = vadd.f32 %v21481_v18, %v31847_v55  ;;  %v21482_v6 = vadd.f32 %v35834_v30, %v35833_v12  ;;  %v35835_v18 = vld [vmem:[#allocation14_spill] sm:$0xff]  ;;  %v35837_v12 = vld [vmem:[#allocation13_spill] sm:$0xff]  ;;  %v35838_v30 = vld [vmem:[#allocation152_spill] sm:$0xff] }
 0xbeb   :  { %24186 = vst.msk [vmem:[%s34545_s7 + $0x10] sm:$0xff] %vm614_vm2, %v21575_v23  ;;  %v21544_v37 = vadd.f32 %v21512_v60, %v11692_v48  ;;  %27388 = vrcp.f32 %v11420_v40  ;;  %v19046_v13 = vpop.permute.xlu0 %19045 }
 0xbec   :  { %v27383_v28 = vpop.eup %27382  ;;  %26573 = vmatpush3.msra.mxu1 %v19046_v13  ;;  %v21514_v23 = vadd.f32 %v21482_v6, %v31913_v45  ;;  %v21484_v6 = vadd.f32 %v35838_v30, %v35837_v12 }
 0xbed   :  { %v21576_v59 = vmul.f32 0.25, %v21544_v37  ;;  %v11694_v49 = vmul.f32 %v27383_v28, %v31797_v16  ;;  %26575 = vmatmul.mubr.msk.f32.vlgmr.msra.gmra.mxu1 %vm614_vm2, %v32263_v5  ;;  %26582 = vmatprep.subr.mxu1 %v35021_v52  ;;  %v35836_v37 = vld [vmem:[#allocation52_spill] sm:$0xff] }
 0xbee   :  { %v11423_v51 = vpop.xlane.xlu1 %11422  ;;  %v32341_v9 = vpop.f32.mrf.mxu1  ;;  %26584 = vmatprep.mubr.msk.f32.mxu1 %vm27602_vm1, %v35021_v52  ;;  %v21483_v13 = vadd.f32 %v35836_v37, %v35835_v18 }
 0xbef   :  { %24187 = vst.msk [vmem:[%s34545_s7 + $0x18] sm:$0xff] %vm614_vm2, %v21576_v59  ;;  %v21545_v16 = vadd.f32 %v21513_v47, %v11694_v49  ;;  %27390 = vrcp.f32 %v11423_v51  ;;  %v19122_v55 = vpop.permute.xlu0 %19121 }
 0xbf0   :  { %v27385_v5 = vpop.eup %27384  ;;  %v26426_v60 = vpop.f32.mrf.mxu1  ;;  %26578 = vmatpush3.msra.mxu0 %v19122_v55 }
 0xbf1   :  { %v21577_v40 = vmul.f32 0.25, %v21545_v16  ;;  %v11696_v50 = vmul.f32 %v27385_v5, %v31805_v41  ;;  %26580 = vmatmul.mubr.msk.f32.vlgmr.msra.gmra.mxu0 %vm614_vm2, %v32282_v20  ;;  %26587 = vmatprep.subr.mxu0 %v35021_v52  ;;  %v21515_v20 = vadd.f32 %v21483_v13, %v31930_v53 }
 0xbf2   :  { %v11426_v14 = vpop.xlane.xlu1 %11425  ;;  %26589 = vmatprep.mubr.msk.f32.mxu0 %vm27602_vm1, %v35021_v52 }
 0xbf3   :  { %24188 = vst.msk [vmem:[%s34545_s7 + $0x20] sm:$0xff] %vm614_vm2, %v21577_v40  ;;  %v21546_v45 = vadd.f32 %v21514_v23, %v11696_v50  ;;  %27392 = vrcp.f32 %v11426_v14  ;;  %v19198_v41 = vpop.permute.xlu0 %19197  ;;  %v35839_v23 = vld [vmem:[#allocation16_spill] sm:$0xff]  ;;  %v35840_v40 = vld [vmem:[#allocation65_spill] sm:$0xff] }
 0xbf4   :  { %v27387_v28 = vpop.eup %27386  ;;  %26583 = vmatpush3.msra.mxu1 %v19198_v41  ;;  %v21485_v14 = vadd.f32 %v35840_v40, %v35839_v23  ;;  %v35841_v41 = vld [vmem:[#allocation15_spill] sm:$0xff]  ;;  %v35845_v23 = vld [vmem:[#allocation17_spill] sm:$0xff] }
 0xbf5   :  { %v21578_v47 = vmul.f32 0.25, %v21546_v45  ;;  %v11698_v59 = vmul.f32 %v27387_v28, %v31814_v29  ;;  %26585 = vmatmul.mubr.msk.f32.vlgmr.msra.gmra.mxu1 %vm614_vm2, %v11690_v39  ;;  %26592 = vmatprep.subr.mxu1 %v35021_v52  ;;  %v21516_v39 = vadd.f32 %v21484_v6, %v31947_v63  ;;  %v35842_v28 = vld [vmem:[#allocation157_spill] sm:$0xff]  ;;  %v35843_v6 = vld [vmem:[#allocation18_spill] sm:$0xff]  ;;  %v35846_v40 = vld [vmem:[#allocation159_spill] sm:$0xff] }
 0xbf6   :  { %v11429_v51 = vpop.xlane.xlu1 %11428  ;;  %26594 = vmatprep.mubr.msk.f32.mxu1 %vm27602_vm1, %v35021_v52 }
 0xbf7   :  { %24189 = vst.msk [vmem:[%s34545_s7 + $0x28] sm:$0xff] %vm614_vm2, %v21578_v47  ;;  %v21547_v53 = vadd.f32 %v21515_v20, %v11698_v59  ;;  %27394 = vrcp.f32 %v11429_v51  ;;  %v19274_v16 = vpop.permute.xlu0 %19273  ;;  %v21486_v20 = vadd.f32 %v35842_v28, %v35841_v41  ;;  %v35847_v41 = vld [vmem:[#allocation253_spill] sm:$0xff]  ;;  %v35848_v28 = vld [vmem:[#allocation158_spill] sm:$0xff] }
 0xbf8   :  { %v27389_v29 = vpop.eup %27388  ;;  %26588 = vmatpush3.msra.mxu0 %v19274_v16 }
 0xbf9   :  { %v21579_v55 = vmul.f32 0.25, %v21547_v53  ;;  %v11700_v5 = vmul.f32 %v27389_v29, %v31822_v62  ;;  %26590 = vmatmul.mubr.msk.f32.vlgmr.msra.gmra.mxu0 %vm614_vm2, %v11692_v48  ;;  %26597 = vmatprep.subr.mxu0 %v35021_v52  ;;  %v21517_v48 = vadd.f32 %v21485_v14, %v31964_v61  ;;  %v35844_v53 = vld [vmem:[#allocation156_spill] sm:$0xff]  ;;  %v21488_v14 = vadd.f32 %v35846_v40, %v35845_v23 }
 0xbfa   :  { %v11432_v60 = vpop.xlane.xlu1 %11431  ;;  %26599 = vmatprep.mubr.msk.f32.mxu0 %vm27602_vm1, %v35021_v52  ;;  %v21487_v16 = vadd.f32 %v35844_v53, %v35843_v6 }
 0xbfb   :  { %24190 = vst.msk [vmem:[%s34545_s7 + $0x30] sm:$0xff] %vm614_vm2, %v21579_v55  ;;  %v21548_v63 = vadd.f32 %v21516_v39, %v11700_v5  ;;  %27396 = vrcp.f32 %v11432_v60  ;;  %v19350_v18 = vpop.permute.xlu0 %19349 }
 0xbfc   :  { %v27391_v62 = vpop.eup %27390  ;;  %26593 = vmatpush3.msra.mxu1 %v19350_v18 }
 0xbfd   :  { %v21580_v37 = vmul.f32 0.25, %v21548_v63  ;;  %v11702_v13 = vmul.f32 %v27391_v62, %v31834_v38  ;;  %26595 = vmatmul.mubr.msk.f32.vlgmr.msra.gmra.mxu1 %vm614_vm2, %v11694_v49  ;;  %26602 = vmatprep.subr.mxu1 %v35021_v52  ;;  %v21518_v49 = vadd.f32 %v21486_v20, %v31981_v56  ;;  %v21489_v20 = vadd.f32 %v35848_v28, %v35847_v41  ;;  %v35855_v41 = vld [vmem:[#allocation195_spill] sm:$0xff] }
 0xbfe   :  { %v11435_v45 = vpop.xlane.xlu1 %11434  ;;  %26604 = vmatprep.mubr.msk.f32.mxu1 %vm27602_vm1, %v35021_v52  ;;  %v35856_v28 = vld [vmem:[#allocation163_spill] sm:$0xff] }
 0xbff   :  { %24191 = vst.msk [vmem:[%s34545_s7 + $0x38] sm:$0xff] %vm614_vm2, %v21580_v37  ;;  %v21549_v61 = vadd.f32 %v21517_v48, %v11702_v13  ;;  %27398 = vrcp.f32 %v11435_v45  ;;  %v19426_v47 = vpop.permute.xlu0 %19425 }
 0xc00   :  { %v27393_v38 = vpop.eup %27392  ;;  %26598 = vmatpush3.msra.mxu0 %v19426_v47 }
 0xc01   :  { %v21581_v51 = vmul.f32 0.25, %v21549_v61  ;;  %v11704_v12 = vmul.f32 %v27393_v38, %v31844_v7  ;;  %26600 = vmatmul.mubr.msk.f32.vlgmr.msra.gmra.mxu0 %vm614_vm2, %v11696_v50  ;;  %26607 = vmatprep.subr.mxu0 %v35021_v52  ;;  %v21519_v50 = vadd.f32 %v21487_v16, %v31998_v25 }
 0xc02   :  { %v11438_v30 = vpop.xlane.xlu1 %11437  ;;  %26609 = vmatprep.mubr.msk.f32.mxu0 %vm27602_vm1, %v35021_v52 }
 0xc03   :  { %24192 = vst.msk [vmem:[%s34545_s7 + $0x40] sm:$0xff] %vm614_vm2, %v21581_v51  ;;  %v21550_v56 = vadd.f32 %v21518_v49, %v11704_v12  ;;  %27400 = vrcp.f32 %v11438_v30  ;;  %v19502_v29 = vpop.permute.xlu0 %19501  ;;  %v35849_v51 = vld [vmem:[#allocation23_spill] sm:$0xff]  ;;  %v35850_v30 = vld [vmem:[#allocation248_spill] sm:$0xff] }
 0xc04   :  { %v27395_v7 = vpop.eup %27394  ;;  %26603 = vmatpush3.msra.mxu1 %v19502_v29  ;;  %v21490_v6 = vadd.f32 %v35850_v30, %v35849_v51 }
 0xc05   :  { %v21582_v39 = vmul.f32 0.25, %v21550_v56  ;;  %v11706_v55 = vmul.f32 %v27395_v7, %v31860_v44  ;;  %26605 = vmatmul.mubr.msk.f32.vlgmr.msra.gmra.mxu1 %vm614_vm2, %v11698_v59  ;;  %26612 = vmatprep.subr.mxu1 %v35021_v52  ;;  %v21520_v59 = vadd.f32 %v21488_v14, %v32019_v35  ;;  %v35851_v7 = vld [vmem:[#allocation32_spill] sm:$0xff] }
 0xc06   :  { %v11441_v60 = vpop.xlane.xlu1 %11440  ;;  %26614 = vmatprep.mubr.msk.f32.mxu1 %vm27602_vm1, %v35021_v52 }
 0xc07   :  { %24193 = vst.msk [vmem:[%s34545_s7 + $0x48] sm:$0xff] %vm614_vm2, %v21582_v39  ;;  %v21551_v25 = vadd.f32 %v21519_v50, %v11706_v55  ;;  %27402 = vrcp.f32 %v11441_v60  ;;  %v19578_v63 = vpop.permute.xlu0 %19577  ;;  %v35852_v50 = vld [vmem:[#allocation84_spill] sm:$0xff] }
 0xc08   :  { %v27397_v44 = vpop.eup %27396  ;;  %v32424_v18 = vpop.f32.mrf.mxu0  ;;  %26608 = vmatpush3.msra.mxu0 %v19578_v63  ;;  %v21491_v39 = vadd.f32 %v35852_v50, %v35851_v7  ;;  %v35854_v63 = vld [vmem:[#allocation160_spill] sm:$0xff] }
 0xc09   :  { %v21583_v62 = vmul.f32 0.25, %v21551_v25  ;;  %v11708_v48 = vmul.f32 %v27397_v44, %v31868_v3  ;;  %26610 = vmatmul.mubr.msk.f32.vlgmr.msra.gmra.mxu0 %vm614_vm2, %v11700_v5  ;;  %26617 = vmatprep.subr.mxu0 %v35021_v52  ;;  %v21521_v5 = vadd.f32 %v21489_v20, %v32036_v0  ;;  %v35853_v25 = vld [vmem:[#allocation213_spill] sm:$0xff]  ;;  %v21493_v20 = vadd.f32 %v35856_v28, %v35855_v41  ;;  %v35865_v28 = vld [vmem:[#allocation220_spill] sm:$0xff] }
 0xc0a   :  { %v11444_v37 = vpop.xlane.xlu1 %11443  ;;  %v26431_v45 = vpop.f32.mrf.mxu0  ;;  %26619 = vmatprep.mubr.msk.f32.mxu0 %vm27602_vm1, %v35021_v52  ;;  %v21492_v44 = vadd.f32 %v35854_v63, %v35853_v25 }
 0xc0b   :  { %24194 = vst.msk [vmem:[%s34545_s7 + $0x50] sm:$0xff] %vm614_vm2, %v21583_v62  ;;  %v21552_v35 = vadd.f32 %v21520_v59, %v11708_v48  ;;  %27404 = vrcp.f32 %v11444_v37  ;;  %v19654_v3 = vpop.permute.xlu0 %19653 }
 0xc0c   :  { %v27399_v61 = vpop.eup %27398  ;;  %26613 = vmatpush3.msra.mxu1 %v19654_v3 }
 0xc0d   :  { %v21584_v47 = vmul.f32 0.25, %v21552_v35  ;;  %v11710_v38 = vmul.f32 %v27399_v61, %v31877_v58  ;;  %26615 = vmatmul.mubr.msk.f32.vlgmr.msra.gmra.mxu1 %vm614_vm2, %v11702_v13  ;;  %26622 = vmatprep.subr.mxu1 %v35021_v52  ;;  %v21522_v13 = vadd.f32 %v21490_v6, %v32053_v31 }
 0xc0e   :  { %v11447_v49 = vpop.xlane.xlu1 %11446  ;;  %26624 = vmatprep.mubr.msk.f32.mxu1 %vm27602_vm1, %v35021_v52 }
 0xc0f   :  { %24195 = vst.msk [vmem:[%s34545_s7 + $0x58] sm:$0xff] %vm614_vm2, %v21584_v47  ;;  %v21553_v0 = vadd.f32 %v21521_v5, %v11710_v38  ;;  %27406 = vrcp.f32 %v11447_v49  ;;  %v19730_v53 = vpop.permute.xlu0 %19729  ;;  %v35857_v47 = vld [vmem:[#allocation204_spill] sm:$0xff]  ;;  %v35858_v49 = vld [vmem:[#allocation162_spill] sm:$0xff] }
 0xc10   :  { %v27401_v58 = vpop.eup %27400  ;;  %26618 = vmatpush3.msra.mxu0 %v19730_v53  ;;  %v21494_v51 = vadd.f32 %v35858_v49, %v35857_v47  ;;  %v35868_v47 = vld [vmem:[#allocation107_spill] sm:$0xff] }
 0xc11   :  { %v21585_v16 = vmul.f32 0.25, %v21553_v0  ;;  %v11712_v56 = vmul.f32 %v27401_v58, %v31886_v32  ;;  %26620 = vmatmul.mubr.msk.f32.vlgmr.msra.gmra.mxu0 %vm614_vm2, %v11704_v12  ;;  %26627 = vmatprep.subr.mxu0 %v35021_v52  ;;  %v21523_v12 = vadd.f32 %v21491_v39, %v32070_v54  ;;  %v35859_v58 = vld [vmem:[#allocation179_spill] sm:$0xff] }
 0xc12   :  { %v11450_v29 = vpop.xlane.xlu1 %11449  ;;  %26629 = vmatprep.mubr.msk.f32.mxu0 %vm27602_vm1, %v35021_v52 }
 0xc13   :  { %24196 = vst.msk [vmem:[%s34545_s7 + $0x60] sm:$0xff] %vm614_vm2, %v21585_v16  ;;  %v21554_v31 = vadd.f32 %v21522_v13, %v11712_v56  ;;  %27408 = vrcp.f32 %v11450_v29  ;;  %v19806_v60 = vpop.permute.xlu0 %19805  ;;  %v35860_v13 = vld [vmem:[#allocation164_spill] sm:$0xff] }
 0xc14   :  { %v27403_v32 = vpop.eup %27402  ;;  %26623 = vmatpush3.msra.mxu1 %v19806_v60  ;;  %v21495_v16 = vadd.f32 %v35860_v13, %v35859_v58  ;;  %v35862_v60 = vld [vmem:[#allocation165_spill] sm:$0xff] }
 0xc15   :  { %v21586_v23 = vmul.f32 0.25, %v21554_v31  ;;  %v11714_v40 = vmul.f32 %v27403_v32, %v31897_v15  ;;  %26625 = vmatmul.mubr.msk.f32.vlgmr.msra.gmra.mxu1 %vm614_vm2, %v11706_v55  ;;  %26632 = vmatprep.subr.mxu1 %v35021_v52  ;;  %v21524_v55 = vadd.f32 %v21492_v44, %v32087_v27  ;;  %v35861_v31 = vld [vmem:[#allocation48_spill] sm:$0xff] }
 0xc16   :  { %v11453_v14 = vpop.xlane.xlu1 %11452  ;;  %26634 = vmatprep.mubr.msk.f32.mxu1 %vm27602_vm1, %v35021_v52  ;;  %v21496_v32 = vadd.f32 %v35862_v60, %v35861_v31  ;;  %v35874_v60 = vld [vmem:[#allocation62_spill] sm:$0xff] }
 0xc17   :  { %24197 = vst.msk [vmem:[%s34545_s7 + $0x68] sm:$0xff] %vm614_vm2, %v21586_v23  ;;  %v21555_v54 = vadd.f32 %v21523_v12, %v11714_v40  ;;  %27410 = vrcp.f32 %v11453_v14  ;;  %v19882_v59 = vpop.permute.xlu0 %19881 }
 0xc18   :  { %v27405_v15 = vpop.eup %27404  ;;  %26628 = vmatpush3.msra.mxu0 %v19882_v59  ;;  %v35864_v59 = vld [vmem:[#allocation166_spill] sm:$0xff] }
 0xc19   :  { %v21587_v62 = vmul.f32 0.25, %v21555_v54  ;;  %v11716_v37 = vmul.f32 %v27405_v15, %v31910_v42  ;;  %26630 = vmatmul.mubr.msk.f32.vlgmr.msra.gmra.mxu0 %vm614_vm2, %v11708_v48  ;;  %26637 = vmatprep.subr.mxu0 %v35021_v52  ;;  %v21525_v48 = vadd.f32 %v21493_v20, %v32103_v22  ;;  %v35863_v54 = vld [vmem:[#allocation127_spill] sm:$0xff]  ;;  %v35866_v20 = vld [vmem:[#allocation212_spill] sm:$0xff] }
 0xc1a   :  { %v11456_v45 = vpop.xlane.xlu1 %11455  ;;  %26639 = vmatprep.mubr.msk.f32.mxu0 %vm27602_vm1, %v35021_v52  ;;  %v21497_v15 = vadd.f32 %v35864_v59, %v35863_v54 }
 0xc1b   :  { %24198 = vst.msk [vmem:[%s34545_s7 + $0x70] sm:$0xff] %vm614_vm2, %v21587_v62  ;;  %v21556_v27 = vadd.f32 %v21524_v55, %v11716_v37  ;;  %27412 = vrcp.f32 %v11456_v45  ;;  %v19958_v35 = vpop.permute.xlu0 %19957 }
 0xc1c   :  { %v27407_v42 = vpop.eup %27406  ;;  %26633 = vmatpush3.msra.mxu1 %v19958_v35  ;;  %v21529_v62 = vadd.f32 %v21497_v15, %v32161_v21 }
 0xc1d   :  { %v21588_v3 = vmul.f32 0.25, %v21556_v27  ;;  %v11718_v61 = vmul.f32 %v27407_v42, %v31922_v43  ;;  %26635 = vmatmul.mubr.msk.f32.vlgmr.msra.gmra.mxu1 %vm614_vm2, %v11710_v38  ;;  %26642 = vmatprep.subr.mxu1 %v35021_v52  ;;  %v21526_v38 = vadd.f32 %v21494_v51, %v32117_v1  ;;  %v21498_v27 = vadd.f32 %v35866_v20, %v35865_v28  ;;  %v35880_v28 = vld [vmem:[#allocation145_spill] sm:$0xff]  ;;  %v35881_v20 = vld [vmem:[#allocation170_spill] sm:$0xff] }
 0xc1e   :  { %v11459_v5 = vpop.xlane.xlu1 %11458  ;;  %26644 = vmatprep.mubr.msk.f32.mxu1 %vm27602_vm1, %v35021_v52 }
 0xc1f   :  { %24199 = vst.msk [vmem:[%s34545_s7 + $0x78] sm:$0xff] %vm614_vm2, %v21588_v3  ;;  %v21557_v22 = vadd.f32 %v21525_v48, %v11718_v61  ;;  %27414 = vrcp.f32 %v11459_v5  ;;  %v20034_v30 = vpop.permute.xlu0 %20033  ;;  %v21530_v42 = vadd.f32 %v21498_v27, %v32175_v26  ;;  %v35867_v5 = vld [vmem:[#allocation136_spill] sm:$0xff]  ;;  %v21503_v27 = vadd.f32 %v35881_v20, %v35880_v28  ;;  %v35894_v28 = vld [vmem:[#allocation53_spill] sm:$0xff] }
 0xc20   :  { %v27409_v43 = vpop.eup %27408  ;;  %26638 = vmatpush3.msra.mxu0 %v20034_v30  ;;  %v21499_v49 = vadd.f32 %v35868_v47, %v35867_v5  ;;  %v35883_v47 = vld [vmem:[#allocation54_spill] sm:$0xff] }
 0xc21   :  { %v21589_v6 = vmul.f32 0.25, %v21557_v22  ;;  %v11720_v0 = vmul.f32 %v27409_v43, %v31939_v2  ;;  %26640 = vmatmul.mubr.msk.f32.vlgmr.msra.gmra.mxu0 %vm614_vm2, %v11712_v56  ;;  %26647 = vmatprep.subr.mxu0 %v35021_v52  ;;  %v21527_v56 = vadd.f32 %v21495_v16, %v32131_v46 }
 0xc22   :  { %v11462_v53 = vpop.xlane.xlu1 %11461  ;;  %26649 = vmatprep.mubr.msk.f32.mxu0 %vm27602_vm1, %v35021_v52  ;;  %v21531_v22 = vadd.f32 %v21499_v49, %v32187_v4 }
 0xc23   :  { %24200 = vst.msk [vmem:[%s34545_s7 + $0x80] sm:$0xff] %vm614_vm2, %v21589_v6  ;;  %v21558_v1 = vadd.f32 %v21526_v38, %v11720_v0  ;;  %27416 = vrcp.f32 %v11462_v53  ;;  %v20110_v29 = vpop.permute.xlu0 %20109  ;;  %v35869_v6 = vld [vmem:[#allocation144_spill] sm:$0xff] }
 0xc24   :  { %v27411_v2 = vpop.eup %27410  ;;  %26643 = vmatpush3.msra.mxu1 %v20110_v29 }
 0xc25   :  { %v21590_v7 = vmul.f32 0.25, %v21558_v1  ;;  %v11722_v50 = vmul.f32 %v27411_v2, %v31956_v34  ;;  %26645 = vmatmul.mubr.msk.f32.vlgmr.msra.gmra.mxu1 %vm614_vm2, %v11714_v40  ;;  %26652 = vmatprep.subr.mxu1 %v35021_v52  ;;  %v21528_v40 = vadd.f32 %v21496_v32, %v32147_v17  ;;  %v35871_v1 = vld [vmem:[#allocation44_spill] sm:$0xff] }
 0xc26   :  { %v11465_v39 = vpop.xlane.xlu1 %11464  ;;  %26654 = vmatprep.mubr.msk.f32.mxu1 %vm27602_vm1, %v35021_v52 }
 0xc27   :  { %24201 = vst.msk [vmem:[%s34545_s7 + $0x88] sm:$0xff] %vm614_vm2, %v21590_v7  ;;  %v21559_v46 = vadd.f32 %v21527_v56, %v11722_v50  ;;  %27418 = vrcp.f32 %v11465_v39  ;;  %v32522_v12 = vpop.f32.mrf.mxu1  ;;  %v20186_v34 = vpop.permute.xlu0 %20185  ;;  %v35872_v56 = vld [vmem:[#allocation5_spill] sm:$0xff]  ;;  %v35873_v7 = vld [vmem:[#allocation168_spill] sm:$0xff] }
 0xc28   :  { %v27413_v23 = vpop.eup %27412  ;;  %26648 = vmatpush3.msra.mxu0 %v20186_v34  ;;  %v35875_v34 = vld [vmem:[#allocation33_spill] sm:$0xff] }
 0xc29   :  { %v21591_v14 = vmul.f32 0.25, %v21559_v46  ;;  %v32526_v25 = vmul.f32 %v27413_v23, %v31973_v57  ;;  %v26436_v63 = vpop.f32.mrf.mxu1  ;;  %26650 = vmatmul.mubr.msk.f32.vlgmr.msra.gmra.mxu0 %vm614_vm2, %v11716_v37  ;;  %26657 = vmatprep.subr.mxu0 %v35021_v52 }
 0xc2a   :  { %v11468_v44 = vpop.xlane.xlu1 %11467  ;;  %26659 = vmatprep.mubr.msk.f32.mxu0 %vm27602_vm1, %v35021_v52  ;;  %v35877_v63 = vld [vmem:[#allocation169_spill] sm:$0xff] }
 0xc2b   :  { %24202 = vst.msk [vmem:[%s34545_s7 + $0x90] sm:$0xff] %vm614_vm2, %v21591_v14  ;;  %v21560_v57 = vadd.f32 %v21528_v40, %v32526_v25  ;;  %27420 = vrcp.f32 %v11468_v44  ;;  %v20262_v17 = vpop.permute.xlu0 %20261  ;;  %v35876_v14 = vld [vmem:[#allocation146_spill] sm:$0xff] }
 0xc2c   :  { %v27415_v55 = vpop.eup %27414  ;;  %26653 = vmatpush3.msra.mxu1 %v20262_v17  ;;  %v21502_v44 = vadd.f32 %v35877_v63, %v35876_v14 }
 0xc2d   :  { %v21592_v37 = vmul.f32 0.25, %v21560_v57  ;;  %v11726_v45 = vmul.f32 %v27415_v55, %v31990_v24  ;;  %26655 = vmatmul.mubr.msk.f32.vlgmr.msra.gmra.mxu1 %vm614_vm2, %v11718_v61  ;;  %26662 = vmatprep.subr.mxu1 %v35021_v52  ;;  %v35878_v57 = vld [vmem:[#allocation49_spill] sm:$0xff] }
 0xc2e   :  { %v11471_v41 = vpop.xlane.xlu1 %11470  ;;  %26664 = vmatprep.mubr.msk.f32.mxu1 %vm27602_vm1, %v35021_v52  ;;  %v21534_v17 = vadd.f32 %v21502_v44, %v35878_v57  ;;  %v35892_v44 = vld [vmem:[#allocation79_spill] sm:$0xff] }
 0xc2f   :  { %24203 = vst.msk [vmem:[%s34545_s7 + $0x98] sm:$0xff] %vm614_vm2, %v21592_v37  ;;  %v21561_v21 = vadd.f32 %v21529_v62, %v11726_v45  ;;  %27422 = vrcp.f32 %v11471_v41  ;;  %v20338_v35 = vpop.permute.xlu0 %20337  ;;  %v35879_v62 = vld [vmem:[#allocation187_spill] sm:$0xff] }
 0xc30   :  { %v27417_v24 = vpop.eup %27416  ;;  %26658 = vmatpush3.msra.mxu0 %v20338_v35 }
 0xc31   :  { %v21593_v48 = vmul.f32 0.25, %v21561_v21  ;;  %v32553_v3 = vmul.f32 %v27417_v24, %v32007_v8  ;;  %26660 = vmatmul.mubr.msk.f32.vlgmr.msra.gmra.mxu0 %vm614_vm2, %v11720_v0  ;;  %26667 = vmatprep.subr.mxu0 %v35021_v52  ;;  %v35870_v0 = vld [vmem:[#allocation116_spill] sm:$0xff] }
 0xc32   :  { %v11474_v61 = vpop.xlane.xlu1 %11473  ;;  %26669 = vmatprep.mubr.msk.f32.mxu0 %vm27602_vm1, %v35021_v52  ;;  %v21500_v53 = vadd.f32 %v35870_v0, %v35869_v6 }
 0xc33   :  { %24204 = vst.msk [vmem:[%s34545_s7 + $0xa0] sm:$0xff] %vm614_vm2, %v21593_v48  ;;  %v21562_v26 = vadd.f32 %v21530_v42, %v32553_v3  ;;  %27424 = vrcp.f32 %v11474_v61  ;;  %v20414_v8 = vpop.permute.xlu0 %20413  ;;  %v35882_v48 = vld [vmem:[#allocation188_spill] sm:$0xff] }
 0xc34   :  { %v27419_v51 = vpop.eup %27418  ;;  %26663 = vmatpush3.msra.mxu1 %v20414_v8  ;;  %v21532_v13 = vadd.f32 %v21500_v53, %v32197_v36  ;;  %v21535_v61 = vadd.f32 %v21503_v27, %v35882_v48  ;;  %v35886_v53 = vld [vmem:[#allocation60_spill] sm:$0xff] }
 0xc35   :  { %v21594_v30 = vmul.f32 0.25, %v21562_v26  ;;  %v11730_v43 = vmul.f32 %v27419_v51, %v32028_v10  ;;  %26665 = vmatmul.mubr.msk.f32.vlgmr.msra.gmra.mxu1 %vm614_vm2, %v11722_v50  ;;  %26672 = vmatprep.subr.mxu1 %v35021_v52  ;;  %v21501_v50 = vadd.f32 %v35873_v7, %v35872_v56  ;;  %v35884_v51 = vld [vmem:[#allocation230_spill] sm:$0xff]  ;;  %v35889_v56 = vld [vmem:[#allocation172_spill] sm:$0xff] }
 0xc36   :  { %v11477_v38 = vpop.xlane.xlu1 %11476  ;;  %26674 = vmatprep.mubr.msk.f32.mxu1 %vm27602_vm1, %v35021_v52 }
 0xc37   :  { %24205 = vst.msk [vmem:[%s34545_s7 + $0xa8] sm:$0xff] %vm614_vm2, %v21594_v30  ;;  %v21563_v4 = vadd.f32 %v21531_v22, %v11730_v43  ;;  %27426 = vrcp.f32 %v11477_v38  ;;  %v20566_v58 = vpop.permute.xlu0 %20565  ;;  %v21533_v32 = vadd.f32 %v21501_v50, %v35874_v60  ;;  %v35885_v22 = vld [vmem:[#allocation171_spill] sm:$0xff] }
 0xc38   :  { %v27421_v10 = vpop.eup %27420  ;;  %26673 = vmatpush3.msra.mxu1 %v20566_v58  ;;  %v21504_v30 = vadd.f32 %v35885_v22, %v35884_v51  ;;  %v35898_v22 = vld [vmem:[#allocation19_spill] sm:$0xff] }
 0xc39   :  { %v21595_v16 = vmul.f32 0.25, %v21563_v4  ;;  %v32580_v29 = vmul.f32 %v27421_v10, %v35871_v1  ;;  %26675 = vmatmul.mubr.msk.f32.vlgmr.msra.gmra.mxu1 %vm614_vm2, %v11726_v45  ;;  %26682 = vmatprep.subr.mxu1 %v35021_v52  ;;  %v35887_v10 = vld [vmem:[#allocation6_spill] sm:$0xff] }
 0xc3a   :  { %v11480_v2 = vpop.xlane.xlu1 %11479  ;;  %26684 = vmatprep.mubr.msk.f32.mxu1 %vm27602_vm1, %v35021_v52  ;;  %v21536_v4 = vadd.f32 %v21504_v30, %v35886_v53  ;;  %v35900_v53 = vld [vmem:[#allocation189_spill] sm:$0xff] }
 0xc3b   :  { %24206 = vst.msk [vmem:[%s34545_s7 + $0xb0] sm:$0xff] %vm614_vm2, %v21595_v16  ;;  %v21564_v36 = vadd.f32 %v21532_v13, %v32580_v29  ;;  %27428 = vrcp.f32 %v11480_v2  ;;  %v32593_v39 = vpop.permute.xlu0 %20641  ;;  %v35888_v2 = vld [vmem:[#allocation233_spill] sm:$0xff] }
 0xc3c   :  { %v27423_v31 = vpop.eup %27422  ;;  %v21505_v7 = vadd.f32 %v35889_v56, %v35888_v2 }
 0xc3d   :  { %v21596_v46 = vmul.f32 0.25, %v21564_v36  ;;  %v11734_v23 = vmul.f32 %v27423_v31, %v35875_v34 }
 0xc3e   :  { %v11483_v40 = vpop.xlane.xlu1 %11482 }
 0xc3f   :  { %24207 = vst.msk [vmem:[%s34545_s7 + $0xb8] sm:$0xff] %vm614_vm2, %v21596_v46  ;;  %v21565_v54 = vadd.f32 %v21533_v32, %v11734_v23  ;;  %27430 = vrcp.f32 %v11483_v40  ;;  %v20718_v59 = vpop.permute.xlu0 %20717  ;;  %v35890_v32 = vld [vmem:[#allocation192_spill] sm:$0xff] }
 0xc40   :  { %v27425_v15 = vpop.eup %27424  ;;  %26683 = vmatpush3.msra.mxu1 %v20718_v59  ;;  %v21537_v46 = vadd.f32 %v21505_v7, %v35890_v32 }
 0xc41   :  { %v21597_v55 = vmul.f32 0.25, %v21565_v54  ;;  %v32605_v37 = vmul.f32 %v27425_v15, %v35879_v62  ;;  %v32607_v45 = vpop.f32.mrf.mxu0  ;;  %26685 = vmatmul.mubr.msk.f32.vlgmr.msra.gmra.mxu1 %vm614_vm2, %v11730_v43  ;;  %26692 = vmatprep.subr.mxu1 %v35021_v52  ;;  %v35893_v54 = vld [vmem:[#allocation173_spill] sm:$0xff] }
 0xc42   :  { %v11486_v41 = vpop.xlane.xlu1 %11485  ;;  %26694 = vmatprep.mubr.msk.f32.mxu1 %vm27602_vm1, %v35021_v52  ;;  %v21506_v59 = vadd.f32 %v35893_v54, %v35892_v44 }
 0xc43   :  { %24208 = vst.msk [vmem:[%s34545_s7 + $0xc0] sm:$0xff] %vm614_vm2, %v21597_v55  ;;  %v21566_v21 = vadd.f32 %v21534_v17, %v32605_v37  ;;  %27432 = vrcp.f32 %v11486_v41  ;;  %v26441_v35 = vpop.f32.mrf.mxu0  ;;  %v32620_v24 = vpop.permute.xlu0 %20793 }
 0xc44   :  { %v27427_v42 = vpop.eup %27426  ;;  %v21538_v62 = vadd.f32 %v21506_v59, %v32275_v19  ;;  %v35895_v35 = vld [vmem:[#allocation22_spill] sm:$0xff] }
 0xc45   :  { %v21598_v5 = vmul.f32 0.25, %v21566_v21  ;;  %v11738_v49 = vmul.f32 %v27427_v42, %v35883_v47  ;;  %v32624_v26 = vpop.f32.mrf.mxu1 }
 0xc46   :  { %v11489_v8 = vpop.xlane.xlu1 %11488 }
 0xc47   :  { %24209 = vst.msk [vmem:[%s34545_s7 + $0xc8] sm:$0xff] %vm614_vm2, %v21598_v5  ;;  %v21567_v43 = vadd.f32 %v21535_v61, %v11738_v49  ;;  %27434 = vrcp.f32 %v11489_v8  ;;  %v26446_v38 = vpop.f32.mrf.mxu1  ;;  %v20870_v6 = vpop.permute.xlu0 %20869 }
 0xc48   :  { %v27429_v0 = vpop.eup %27428  ;;  %26693 = vmatpush3.msra.mxu1 %v20870_v6 }
 0xc49   :  { %v21599_v58 = vmul.f32 0.25, %v21567_v43  ;;  %v32634_v13 = vmul.f32 %v27429_v0, %v35887_v10  ;;  %v32636_v16 = vpop.f32.mrf.mxu0  ;;  %26695 = vmatmul.mubr.msk.f32.vlgmr.msra.gmra.mxu1 %vm614_vm2, %v11734_v23  ;;  %26702 = vmatprep.subr.mxu1 %v35021_v52  ;;  %v35891_v23 = vld [vmem:[#allocation186_spill] sm:$0xff] }
 0xc4a   :  { %v11492_v1 = vpop.xlane.xlu1 %11491  ;;  %26704 = vmatprep.mubr.msk.f32.mxu1 %vm27602_vm1, %v35021_v52 }
 0xc4b   :  { %24210 = vst.msk [vmem:[%s34545_s7 + $0xd0] sm:$0xff] %vm614_vm2, %v21599_v58  ;;  %v21568_v50 = vadd.f32 %v21536_v4, %v32634_v13  ;;  %27436 = vrcp.f32 %v11492_v1  ;;  %v26451_v36 = vpop.f32.mrf.mxu0  ;;  %v21022_v31 = vpop.permute.xlu0 %21021 }
 0xc4c   :  { %v27431_v60 = vpop.eup %27430  ;;  %26703 = vmatpush3.msra.mxu1 %v21022_v31 }
 0xc4d   :  { %v21600_v34 = vmul.f32 0.25, %v21568_v50  ;;  %v11742_v40 = vmul.f32 %v27431_v60, %v35891_v23  ;;  %v32651_v14 = vpop.f32.mrf.mxu1  ;;  %26705 = vmatmul.mubr.msk.f32.vlgmr.msra.gmra.mxu1 %vm614_vm2, %v11738_v49  ;;  %26712 = vmatprep.subr.mxu1 %v35021_v52  ;;  %v35897_v49 = vld [vmem:[#allocation35_spill] sm:$0xff] }
 0xc4e   :  { %v20490_v63 = vpop.permute.xlu1 %20489  ;;  %26714 = vmatprep.mubr.msk.f32.mxu1 %vm27602_vm1, %v35021_v52 }
 0xc4f   :  { %24211 = vst.msk [vmem:[%s34545_s7 + $0xd8] sm:$0xff] %vm614_vm2, %v21600_v34  ;;  %v21569_v15 = vadd.f32 %v21537_v46, %v11742_v40  ;;  %26668 = vmatpush3.msra.mxu0 %v20490_v63  ;;  %v26456_v57 = vpop.f32.mrf.mxu1  ;;  %v21174_v17 = vpop.permute.xlu0 %21173 }
 0xc50   :  { %v27433_v55 = vpop.eup %27432  ;;  %26670 = vmatmul.mubr.msk.f32.vlgmr.msra.gmra.mxu0 %vm614_vm2, %v32526_v25  ;;  %26677 = vmatprep.subr.mxu0 %v35021_v52  ;;  %v35896_v25 = vld [vmem:[#allocation174_spill] sm:$0xff] }
 0xc51   :  { %v21601_v41 = vmul.f32 0.25, %v21569_v15  ;;  %v11744_v20 = vmul.f32 %v27433_v55, %v35894_v28  ;;  %26678 = vmatpush3.msra.mxu0 %v32593_v39  ;;  %26713 = vmatpush3.msra.mxu1 %v21174_v17  ;;  %v32669_v27 = vpop.f32.mrf.mxu0  ;;  %v21507_v42 = vadd.f32 %v35896_v25, %v35895_v35 }
 0xc52   :  { %v20946_v21 = vpop.permute.xlu1 %20945  ;;  %26715 = vmatmul.mubr.msk.f32.vlgmr.msra.gmra.mxu1 %vm614_vm2, %v11742_v40  ;;  %26679 = vmatprep.mubr.msk.f32.mxu0 %vm27602_vm1, %v35021_v52 }
 0xc53   :  { %24212 = vst.msk [vmem:[%s34545_s7 + $0xe0] sm:$0xff] %vm614_vm2, %v21601_v41  ;;  %v21570_v19 = vadd.f32 %v21538_v62, %v11744_v20  ;;  %26687 = vmatprep.subr.mxu0 %v35021_v52  ;;  %v26461_v39 = vpop.f32.mrf.mxu0  ;;  %26722 = vmatprep.subr.mxu1 %v35021_v52  ;;  %v21326_v48 = vpop.permute.xlu0 %21325  ;;  %v21539_v5 = vadd.f32 %v21507_v42, %v32294_v33 }
 0xc54   :  { %v27435_v61 = vpop.eup %27434  ;;  %26680 = vmatmul.mubr.msk.f32.vlgmr.msra.gmra.mxu0 %vm614_vm2, %v32553_v3  ;;  %26723 = vmatpush3.msra.mxu1 %v21326_v48  ;;  %v35899_v3 = vld [vmem:[#allocation175_spill] sm:$0xff] }
 0xc55   :  { %v21602_v47 = vmul.f32 0.25, %v21570_v19  ;;  %v11746_v8 = vmul.f32 %v27435_v61, %v35897_v49  ;;  %26688 = vmatpush3.msra.mxu0 %v32620_v24  ;;  %v32687_v51 = vpop.f32.mrf.mxu1  ;;  %26724 = vmatprep.mubr.msk.f32.mxu1 %vm27602_vm1, %v35021_v52  ;;  %v21508_v30 = vadd.f32 %v35899_v3, %v35898_v22 }
 0xc56   :  { %26689 = vmatprep.mubr.msk.f32.mxu0 %vm27602_vm1, %v35021_v52  ;;  %26697 = vmatprep.subr.mxu0 %v35021_v52  ;;  %v21098_v38 = vpop.permute.xlu1 %21097 }
 0xc57   :  { %24213 = vst.msk [vmem:[%s34545_s7 + $0xe8] sm:$0xff] %vm614_vm2, %v21602_v47  ;;  %v21571_v33 = vadd.f32 %v21539_v5, %v11746_v8  ;;  %26725 = vmatmul.mubr.msk.f32.vlgmr.msra.gmra.mxu1 %vm614_vm2, %v11746_v8  ;;  %v26466_v24 = vpop.f32.mrf.mxu1  ;;  %v21540_v6 = vadd.f32 %v21508_v30, %v32315_v11  ;;  %v22090_v5 = vld [vmem:[%s34546_s2 + $0x18] sm:$0xff]  ;;  %v22089_v47 = vld [vmem:[%s34546_s2 + $0x10] sm:$0xff]  ;;  %v22088_v8 = vld [vmem:[%s34546_s2 + $0x8] sm:$0xff] }
 0xc58   :  { %v27437_v43 = vpop.eup %27436  ;;  %26690 = vmatmul.mubr.msk.f32.vlgmr.msra.gmra.mxu0 %vm614_vm2, %v32580_v29  ;;  %26908 = vmatprep.subr.mxu1 %v22090_v5  ;;  %v22087_v30 = vld [vmem:[%s34546_s2] sm:$0xff] }
 0xc59   :  { %v21603_v0 = vmul.f32 0.25, %v21571_v33  ;;  %v11748_v4 = vmul.f32 %v27437_v43, %v35900_v53  ;;  %26698 = vmatpush3.msra.mxu0 %v20946_v21  ;;  %v32705_v58 = vpop.f32.mrf.mxu0  ;;  %26699 = vmatprep.mubr.msk.f32.mxu0 %vm27602_vm1, %v35021_v52  ;;  %v35901_v53 = vld [vmem:[#allocation59_spill] sm:$0xff] }
 0xc5a   :  { %26707 = vmatprep.subr.mxu0 %v35021_v52  ;;  %v21250_v2 = vpop.permute.xlu1 %21249  ;;  %26912 = vmatpush3.msra.mxu1 %v22090_v5 }
 0xc5b   :  { %24214 = vst.msk [vmem:[%s34545_s7 + $0xf0] sm:$0xff] %vm614_vm2, %v21603_v0  ;;  %v21572_v10 = vadd.f32 %v21540_v6, %v11748_v4  ;;  %v26471_v29 = vpop.f32.mrf.mxu0  ;;  %26909 = vmatprep.subr.mxu1 %v22089_v47 }
 0xc5c   :  { %26700 = vmatmul.mubr.msk.f32.vlgmr.msra.gmra.mxu0 %vm614_vm2, %v32605_v37  ;;  %26913 = vmatpush3.msra.mxu1 %v22089_v47  ;;  %v35902_v29 = vld [vmem:[#allocation242_spill] sm:$0xff] }
 0xc5d   :  { %v21604_v11 = vmul.f32 0.25, %v21572_v10  ;;  %26708 = vmatpush3.msra.mxu0 %v21098_v38  ;;  %v32716_v1 = vpop.f32.mrf.mxu1  ;;  %26709 = vmatprep.mubr.msk.f32.mxu0 %vm27602_vm1, %v35021_v52 }
 0xc5e   :  { %26717 = vmatprep.subr.mxu0 %v35021_v52  ;;  %v21402_v50 = vpop.permute.xlu1 %21401  ;;  %26910 = vmatprep.subr.mxu1 %v22088_v8 }
 0xc5f   :  { %24215 = vst.msk [vmem:[%s34545_s7 + $0xf8] sm:$0xff] %vm614_vm2, %v21604_v11  ;;  %v26476_v56 = vpop.f32.mrf.mxu1  ;;  %26914 = vmatpush3.msra.mxu1 %v22088_v8 }
 0xc60   :  { %26710 = vmatmul.mubr.msk.f32.vlgmr.msra.gmra.mxu0 %vm614_vm2, %v32634_v13  ;;  %26911 = vmatprep.subr.mxu1 %v22087_v30 }
 0xc61   :  { %26718 = vmatpush3.msra.mxu0 %v21250_v2  ;;  %v32727_v37 = vpop.f32.mrf.mxu0  ;;  %26719 = vmatprep.mubr.msk.f32.mxu0 %vm27602_vm1, %v35021_v52 }
 0xc62   :  { %26727 = vmatprep.subr.mxu0 %v35021_v52  ;;  %26915 = vmatpush3.msra.mxu1 %v22087_v30 }
 0xc63   :  { %v26481_v7 = vpop.f32.mrf.mxu0 }
 0xc64   :  { %26720 = vmatmul.mubr.msk.f32.vlgmr.msra.gmra.mxu0 %vm614_vm2, %v11744_v20 }
 0xc65   :  { %26728 = vmatpush3.msra.mxu0 %v21402_v50  ;;  %v32733_v36 = vpop.f32.mrf.mxu1  ;;  %26729 = vmatprep.mubr.msk.f32.mxu0 %vm27602_vm1, %v35021_v52  ;;  %v35903_v50 = vld [vmem:[#allocation246_spill] sm:$0xff] }
 0xc66   :  { %26732 = vmatprep.subr.mxu0 %v22090_v5 }
 0xc67   :  { %v26486_v31 = vpop.f32.mrf.mxu1 }
 0xc68   :  { %26730 = vmatmul.mubr.msk.f32.vlgmr.msra.gmra.mxu0 %vm614_vm2, %v11748_v4 }
 0xc69   :  { %v32738_v13 = vpop.f32.mrf.mxu0  ;;  %26733 = vmatpush3.msra.mxu0 %v22090_v5 }
 0xc6a   :  { %26734 = vmatprep.subr.mxu0 %v22089_v47 }
 0xc6b   :  { %v26491_v60 = vpop.f32.mrf.mxu0  ;;  %26735 = vmatpush3.msra.mxu0 %v22089_v47 }
 0xc6c   :  { %26736 = vmatprep.subr.mxu0 %v22088_v8 }
 0xc6d   :  { %v32740_v32 = vpop.f32.mrf.mxu1  ;;  %26737 = vmatpush3.msra.mxu0 %v22088_v8  ;;  %v35909_v8 = vld [vmem:[#allocation90_spill] sm:$0xff] }
 0xc6e   :  { %26738 = vmatprep.subr.mxu0 %v22087_v30 }
 0xc6f   :  { %v26496_v46 = vpop.f32.mrf.mxu1  ;;  %26739 = vmatpush3.msra.mxu0 %v22087_v30 }
 0xc71   :  { %v32742_v34 = vpop.f32.mrf.mxu0 }
 0xc73   :  { %v26501_v23 = vpop.f32.mrf.mxu0 }
 0xc75   :  { %v32744_v40 = vpop.f32.mrf.mxu1 }
 0xc77   :  { %v26506_v63 = vpop.f32.mrf.mxu1 }
 0xc79   :  { %v32746_v44 = vpop.f32.mrf.mxu0 }
 0xc7b   :  { %v26511_v54 = vpop.f32.mrf.mxu0 }
 0xc7c   :  { %v35905_v54 = vld [vmem:[#allocation75_spill] sm:$0xff] }
 0xc7d   :  { %v32748_v59 = vpop.f32.mrf.mxu1 }
 0xc7f   :  { %v26516_v52 = vpop.f32.mrf.mxu1 }
 0xc81   :  { %v32750_v15 = vpop.f32.mrf.mxu0 }
 0xc83   :  { %v26521_v57 = vpop.f32.mrf.mxu0 }
 0xc85   :  { %v32752_v17 = vpop.f32.mrf.mxu1 }
 0xc87   :  { %v26526_v55 = vpop.f32.mrf.mxu1 }
 0xc89   :  { %v32754_v62 = vpop.f32.mrf.mxu0 }
 0xc8b   :  { %v26531_v41 = vpop.f32.mrf.mxu0 }
 0xc8d   :  { %v32756_v28 = vpop.f32.mrf.mxu1 }
 0xc8f   :  { %v26536_v20 = vpop.f32.mrf.mxu1 }
 0xc91   :  { %v32758_v21 = vpop.f32.mrf.mxu0 }
 0xc93   :  { %v26541_v35 = vpop.f32.mrf.mxu0 }
 0xc94   :  { %v35907_v35 = vld [vmem:[#allocation249_spill] sm:$0xff] }
 0xc95   :  { %v32760_v25 = vpop.f32.mrf.mxu1 }
 0xc97   :  { %v26546_v42 = vpop.f32.mrf.mxu1 }
 0xc99   :  { %v32762_v19 = vpop.f32.mrf.mxu0 }
 0xc9b   :  { %v26551_v39 = vpop.f32.mrf.mxu0 }
 0xc9d   :  { %v32764_v48 = vpop.f32.mrf.mxu1 }
 0xc9f   :  { %v26556_v61 = vpop.f32.mrf.mxu1 }
 0xca1   :  { %v32772_v49 = vpop.f32.mrf.mxu0 }
 0xca3   :  { %v26561_v22 = vpop.f32.mrf.mxu0 }
 0xca5   :  { %v32777_v3 = vpop.f32.mrf.mxu1 }
 0xca7   :  { %v26566_v33 = vpop.f32.mrf.mxu1 }
 0xca9   :  { %v32782_v24 = vpop.f32.mrf.mxu0 }
 0xcab   :  { %v26571_v43 = vpop.f32.mrf.mxu0 }
 0xcad   :  { %v19117_v38 = vpop.f32.mrf.mxu1 }
 0xcae   :  { %21893 = vrot.lane.b32.xlu0 %v19117_v38, %s27610_s15 }
 0xcaf   :  { %v26576_v6 = vpop.f32.mrf.mxu1 }
 0xcb0   :  { %v35911_v6 = vld [vmem:[#allocation96_spill] sm:$0xff] }
 0xcb1   :  { %v19193_v0 = vpop.f32.mrf.mxu0 }
 0xcb2   :  { %21641 = vrot.lane.b32.xlu0 %v35901_v53, %s27608_s8  ;;  %21895 = vrot.lane.b32.xlu1 %v19193_v0, %s27610_s15 }
 0xcb3   :  { %v26581_v4 = vpop.f32.mrf.mxu0 }
 0xcb5   :  { %v19269_v10 = vpop.f32.mrf.mxu1 }
 0xcb6   :  { %21769 = vrot.lane.b32.xlu0 %v32341_v9, %s27609_s11  ;;  %21643 = vrot.lane.b32.xlu1 %v35902_v29, %s27608_s8  ;;  %v35904_v9 = vld [vmem:[#allocation12_spill] sm:$0xff] }
 0xcb7   :  { %v26586_v11 = vpop.f32.mrf.mxu1 }
 0xcb8   :  { %v35913_v11 = vld [vmem:[#allocation102_spill] sm:$0xff] }
 0xcb9   :  { %v19345_v2 = vpop.f32.mrf.mxu0 }
 0xcba   :  { %21771 = vrot.lane.b32.xlu1 %v32424_v18, %s27609_s11  ;;  %21897 = vrot.lane.b32.xlu0 %v19269_v10, %s27610_s15 }
 0xcbb   :  { %v26591_v56 = vpop.f32.mrf.mxu0 }
 0xcbd   :  { %v19421_v7 = vpop.f32.mrf.mxu1 }
 0xcbe   :  { %21645 = vrot.lane.b32.xlu0 %v35903_v50, %s27608_s8  ;;  %21899 = vrot.lane.b32.xlu1 %v19345_v2, %s27610_s15 }
 0xcbf   :  { %v26596_v31 = vpop.f32.mrf.mxu1 }
 0xcc1   :  { %v19497_v60 = vpop.f32.mrf.mxu0 }
 0xcc2   :  { %21773 = vrot.lane.b32.xlu0 %v32522_v12, %s27609_s11  ;;  %21647 = vrot.lane.b32.xlu1 %v35904_v9, %s27608_s8  ;;  %v35906_v12 = vld [vmem:[#allocation161_spill] sm:$0xff] }
 0xcc3   :  { %v26601_v46 = vpop.f32.mrf.mxu0 }
 0xcc5   :  { %v19573_v23 = vpop.f32.mrf.mxu1 }
 0xcc6   :  { %21775 = vrot.lane.b32.xlu1 %v32607_v45, %s27609_s11  ;;  %21901 = vrot.lane.b32.xlu0 %v19421_v7, %s27610_s15  ;;  %v35915_v7 = vld [vmem:[#allocation214_spill] sm:$0xff] }
 0xcc7   :  { %v26606_v18 = vpop.f32.mrf.mxu1 }
 0xcc8   :  { %v35917_v18 = vld [vmem:[#allocation115_spill] sm:$0xff] }
 0xcc9   :  { %v19649_v63 = vpop.f32.mrf.mxu0 }
 0xcca   :  { %21649 = vrot.lane.b32.xlu0 %v35905_v54, %s27608_s8  ;;  %21903 = vrot.lane.b32.xlu1 %v19497_v60, %s27610_s15  ;;  %v21638_v54 = vpop.permute.xlu0 %21637 }
 0xccb   :  { %v26611_v52 = vpop.f32.mrf.mxu0 }
 0xccd   :  { %v19725_v57 = vpop.f32.mrf.mxu1 }
 0xcce   :  { %21777 = vrot.lane.b32.xlu0 %v32624_v26, %s27609_s11  ;;  %21651 = vrot.lane.b32.xlu1 %v35906_v12, %s27608_s8  ;;  %v35908_v26 = vld [vmem:[#allocation83_spill] sm:$0xff] }
 0xccf   :  { %v26616_v55 = vpop.f32.mrf.mxu1 }
 0xcd0   :  { %v21640_v55 = vpop.permute.xlu1 %21639 }
 0xcd1   :  { %v19801_v41 = vpop.f32.mrf.mxu0 }
 0xcd2   :  { %21779 = vrot.lane.b32.xlu1 %v32636_v16, %s27609_s11  ;;  %21905 = vrot.lane.b32.xlu0 %v19573_v23, %s27610_s15 }
 0xcd3   :  { %v26621_v45 = vpop.f32.mrf.mxu0 }
 0xcd5   :  { %v19877_v20 = vpop.f32.mrf.mxu1 }
 0xcd6   :  { %21653 = vrot.lane.b32.xlu0 %v35907_v35, %s27608_s8  ;;  %21907 = vrot.lane.b32.xlu1 %v19649_v63, %s27610_s15 }
 0xcd7   :  { %v26626_v42 = vpop.f32.mrf.mxu1 }
 0xcd9   :  { %v19953_v39 = vpop.f32.mrf.mxu0 }
 0xcda   :  { %21781 = vrot.lane.b32.xlu0 %v32651_v14, %s27609_s11  ;;  %21655 = vrot.lane.b32.xlu1 %v35908_v26, %s27608_s8  ;;  %v35910_v14 = vld [vmem:[#allocation89_spill] sm:$0xff] }
 0xcdb   :  { %v26631_v61 = vpop.f32.mrf.mxu0 }
 0xcdc   :  { %v21768_v61 = vpop.permute.xlu1 %21767 }
 0xcdd   :  { %v20029_v5 = vpop.f32.mrf.mxu1 }
 0xcde   :  { %21783 = vrot.lane.b32.xlu1 %v32669_v27, %s27609_s11  ;;  %21909 = vrot.lane.b32.xlu0 %v19725_v57, %s27610_s15 }
 0xcdf   :  { %v26636_v16 = vpop.f32.mrf.mxu1 }
 0xce1   :  { %v20105_v47 = vpop.f32.mrf.mxu0 }
 0xce2   :  { %21657 = vrot.lane.b32.xlu0 %v35909_v8, %s27608_s8  ;;  %21911 = vrot.lane.b32.xlu1 %v19801_v41, %s27610_s15 }
 0xce3   :  { %v26641_v22 = vpop.f32.mrf.mxu0 }
 0xce4   :  { %v35921_v22 = vld [vmem:[#allocation132_spill] sm:$0xff] }
 0xce5   :  { %v20181_v30 = vpop.f32.mrf.mxu1 }
 0xce6   :  { %21785 = vrot.lane.b32.xlu0 %v32687_v51, %s27609_s11  ;;  %21659 = vrot.lane.b32.xlu1 %v35910_v14, %s27608_s8  ;;  %v35912_v51 = vld [vmem:[#allocation95_spill] sm:$0xff] }
 0xce7   :  { %v26646_v33 = vpop.f32.mrf.mxu1 }
 0xce9   :  { %v20257_v43 = vpop.f32.mrf.mxu0 }
 0xcea   :  { %21787 = vrot.lane.b32.xlu1 %v32705_v58, %s27609_s11  ;;  %21913 = vrot.lane.b32.xlu0 %v19877_v20, %s27610_s15  ;;  %v21766_v20 = vpop.permute.xlu0 %21765 }
 0xceb   :  { %v26651_v27 = vpop.f32.mrf.mxu0 }
 0xced   :  { %v20333_v38 = vpop.f32.mrf.mxu1 }
 0xcee   :  { %21661 = vrot.lane.b32.xlu0 %v35911_v6, %s27608_s8  ;;  %21915 = vrot.lane.b32.xlu1 %v19953_v39, %s27610_s15  ;;  %v35920_v39 = vld [vmem:[#allocation4_spill] sm:$0xff] }
 0xcef   :  { %v26656_v0 = vpop.f32.mrf.mxu1  ;;  %v21989_v26 = vsel %vm614_vm2, %v35920_v39, %v21638_v54 }
 0xcf1   :  { %v20409_v53 = vpop.f32.mrf.mxu0 }
 0xcf2   :  { %21789 = vrot.lane.b32.xlu0 %v32716_v1, %s27609_s11  ;;  %21663 = vrot.lane.b32.xlu1 %v35912_v51, %s27608_s8  ;;  %v35914_v1 = vld [vmem:[#allocation108_spill] sm:$0xff] }
 0xcf3   :  { %v26661_v4 = vpop.f32.mrf.mxu0 }
 0xcf5   :  { %v20485_v10 = vpop.f32.mrf.mxu1 }
 0xcf6   :  { %21791 = vrot.lane.b32.xlu1 %v32727_v37, %s27609_s11  ;;  %21917 = vrot.lane.b32.xlu0 %v20029_v5, %s27610_s15  ;;  %v22022_v5 = vsel %vm22021_vm3, %v21989_v26, %v21766_v20  ;;  %v35931_v26 = vld [vmem:[#allocation177_spill] sm:$0xff] }
 0xcf7   :  { %v26666_v58 = vpop.f32.mrf.mxu1 }
 0xcf8   :  { %v35924_v58 = vld [vmem:[#allocation3_spill] sm:$0xff] }
 0xcf9   :  { %v20637_v29 = vpop.f32.mrf.mxu1 }
 0xcfa   :  { %21665 = vrot.lane.b32.xlu0 %v35913_v11, %s27608_s8  ;;  %21919 = vrot.lane.b32.xlu1 %v20105_v47, %s27610_s15 }
 0xcfb   :  { %v26676_v2 = vpop.f32.mrf.mxu1 }
 0xcfe   :  { %21793 = vrot.lane.b32.xlu0 %v32733_v36, %s27609_s11  ;;  %21667 = vrot.lane.b32.xlu1 %v35914_v1, %s27608_s8  ;;  %v35916_v36 = vld [vmem:[#allocation217_spill] sm:$0xff] }
 0xd01   :  { %v32852_v56 = vpop.f32.mrf.mxu1 }
 0xd02   :  { %21795 = vrot.lane.b32.xlu1 %v32738_v13, %s27609_s11  ;;  %21921 = vrot.lane.b32.xlu0 %v20181_v30, %s27610_s15  ;;  %v35922_v30 = vld [vmem:[#allocation250_spill] sm:$0xff] }
 0xd03   :  { %v26686_v37 = vpop.f32.mrf.mxu1  ;;  %v21990_v14 = vsel %vm614_vm2, %v35922_v30, %v21640_v55 }
 0xd04   :  { %v22023_v33 = vsel %vm22021_vm3, %v21990_v14, %v21768_v61  ;;  %v35925_v37 = vld [vmem:[#allocation25_spill] sm:$0xff]  ;;  %v35932_v61 = vld [vmem:[#allocation110_spill] sm:$0xff] }
 0xd06   :  { %21669 = vrot.lane.b32.xlu0 %v35915_v7, %s27608_s8  ;;  %21923 = vrot.lane.b32.xlu1 %v20257_v43, %s27610_s15  ;;  %v35926_v7 = vld [vmem:[#allocation251_spill] sm:$0xff] }
 0xd09   :  { %v32860_v50 = vpop.f32.mrf.mxu1 }
 0xd0a   :  { %21797 = vrot.lane.b32.xlu0 %v32740_v32, %s27609_s11  ;;  %21671 = vrot.lane.b32.xlu1 %v35916_v36, %s27608_s8 }
 0xd0b   :  { %v26696_v31 = vpop.f32.mrf.mxu1 }
 0xd0d   :  { %v32866_v60 = vpop.f32.mrf.mxu1 }
 0xd0e   :  { %21799 = vrot.lane.b32.xlu1 %v32742_v34, %s27609_s11  ;;  %21925 = vrot.lane.b32.xlu0 %v20333_v38, %s27610_s15  ;;  %v35918_v34 = vld [vmem:[#allocation125_spill] sm:$0xff] }
 0xd0f   :  { %v26706_v13 = vpop.f32.mrf.mxu1 }
 0xd10   :  { %v20561_v9 = vpop.f32.mrf.mxu0 }
 0xd12   :  { %v26671_v46 = vpop.f32.mrf.mxu0  ;;  %v32871_v23 = vpop.f32.mrf.mxu1  ;;  %21673 = vrot.lane.b32.xlu0 %v35917_v18, %s27608_s8  ;;  %21927 = vrot.lane.b32.xlu1 %v20409_v53, %s27610_s15 }
 0xd14   :  { %v20713_v32 = vpop.f32.mrf.mxu0  ;;  %v26716_v63 = vpop.f32.mrf.mxu1 }
 0xd15   :  { %v35928_v63 = vld [vmem:[#allocation252_spill] sm:$0xff] }
 0xd16   :  { %v26681_v52 = vpop.f32.mrf.mxu0  ;;  %21801 = vrot.lane.b32.xlu0 %v32744_v40, %s27609_s11  ;;  %21675 = vrot.lane.b32.xlu1 %v35918_v34, %s27608_s8  ;;  %v35919_v40 = vld [vmem:[#allocation123_spill] sm:$0xff] }
 0xd17   :  { %v32880_v57 = vpop.f32.mrf.mxu1 }
 0xd18   :  { %v20865_v12 = vpop.f32.mrf.mxu0 }
 0xd19   :  { %v26726_v41 = vpop.f32.mrf.mxu1 }
 0xd1a   :  { %v26691_v45 = vpop.f32.mrf.mxu0  ;;  %21803 = vrot.lane.b32.xlu1 %v32746_v44, %s27609_s11  ;;  %21929 = vrot.lane.b32.xlu0 %v20485_v10, %s27610_s15  ;;  %v35923_v10 = vld [vmem:[#allocation131_spill] sm:$0xff]  ;;  %v35930_v41 = vld [vmem:[#allocation24_spill] sm:$0xff] }
 0xd1c   :  { %v32885_v35 = vpop.f32.mrf.mxu0 }
 0xd1e   :  { %v26701_v42 = vpop.f32.mrf.mxu0  ;;  %21931 = vrot.lane.b32.xlu1 %v20561_v9, %s27610_s15  ;;  %21677 = vrot.lane.b32.xlu0 %v35919_v40, %s27608_s8 }
 0xd20   :  { %v32893_v44 = vpop.f32.mrf.mxu0  ;;  %v21894_v16 = vpop.permute.xlu0 %21893 }
 0xd21   :  { %v22055_v47 = vsel %vm22054_vm4, %v22022_v5, %v21894_v16 }
 0xd22   :  { %v26711_v8 = vpop.f32.mrf.mxu0  ;;  %21679 = vrot.lane.b32.xlu1 %v35921_v22, %s27608_s8  ;;  %21805 = vrot.lane.b32.xlu0 %v32748_v59, %s27609_s11  ;;  %v35934_v22 = vld [vmem:[#allocation113_spill] sm:$0xff] }
 0xd23   :  { %26740 = vmatprep.mubr.msk.f32.mxu0 %vm66_vm0, %v22055_v47 }
 0xd24   :  { %v32904_v43 = vpop.f32.mrf.mxu0  ;;  %v21896_v27 = vpop.permute.xlu1 %21895 }
 0xd25   :  { %v22056_v38 = vsel %vm22054_vm4, %v22023_v33, %v21896_v27  ;;  %v21642_v6 = vpop.permute.xlu0 %21641 }
 0xd26   :  { %v26721_v0 = vpop.f32.mrf.mxu0  ;;  %21807 = vrot.lane.b32.xlu1 %v32750_v15, %s27609_s11  ;;  %21933 = vrot.lane.b32.xlu0 %v20637_v29, %s27610_s15  ;;  %v21991_v11 = vsel %vm614_vm2, %v35924_v58, %v21642_v6  ;;  %v35935_v6 = vld [vmem:[#allocation184_spill] sm:$0xff]  ;;  %v35938_v58 = vld [vmem:[#allocation31_spill] sm:$0xff] }
 0xd27   :  { %26741 = vmatmul.mubr.msk.f32.vlgmr.msra.gmra.mxu0 %vm66_vm0, %v22056_v38  ;;  %v35936_v0 = vld [vmem:[#allocation190_spill] sm:$0xff] }
 0xd28   :  { %v32911_v59 = vpop.f32.mrf.mxu0  ;;  %v21644_v53 = vpop.permute.xlu1 %21643 }
 0xd29   :  { %v21770_v51 = vpop.permute.xlu0 %21769  ;;  %v21992_v36 = vsel %vm614_vm2, %v35926_v7, %v21644_v53  ;;  %v35940_v7 = vld [vmem:[#allocation40_spill] sm:$0xff] }
 0xd2a   :  { %v26731_v4 = vpop.f32.mrf.mxu0  ;;  %21681 = vrot.lane.b32.xlu0 %v35923_v10, %s27608_s8  ;;  %21935 = vrot.lane.b32.xlu1 %v20713_v32, %s27610_s15  ;;  %v22024_v15 = vsel %vm22021_vm3, %v21991_v11, %v21770_v51  ;;  %v35927_v32 = vld [vmem:[#allocation20_spill] sm:$0xff] }
 0xd2c   :  { %v21772_v2 = vpop.permute.xlu1 %21771 }
 0xd2d   :  { %v21898_v1 = vpop.permute.xlu0 %21897  ;;  %v22025_v31 = vsel %vm22021_vm3, %v21992_v36, %v21772_v2 }
 0xd2e   :  { %v22057_v29 = vsel %vm22054_vm4, %v22024_v15, %v21898_v1  ;;  %21809 = vrot.lane.b32.xlu0 %v32752_v17, %s27609_s11  ;;  %21683 = vrot.lane.b32.xlu1 %v35925_v37, %s27608_s8  ;;  %v35939_v37 = vld [vmem:[#allocation46_spill] sm:$0xff] }
 0xd2f   :  { %26743 = vmatprep.mubr.msk.f32.mxu0 %vm66_vm0, %v22057_v29 }
 0xd30   :  { %v21900_v13 = vpop.permute.xlu1 %21899 }
 0xd31   :  { %v22058_v9 = vsel %vm22054_vm4, %v22025_v31, %v21900_v13  ;;  %v21646_v46 = vpop.permute.xlu0 %21645 }
 0xd32   :  { %21811 = vrot.lane.b32.xlu1 %v32754_v62, %s27609_s11  ;;  %21937 = vrot.lane.b32.xlu0 %v32852_v56, %s27610_s15  ;;  %v21993_v54 = vsel %vm614_vm2, %v35928_v63, %v21646_v46  ;;  %v35929_v56 = vld [vmem:[#allocation64_spill] sm:$0xff]  ;;  %v35942_v46 = vld [vmem:[#allocation39_spill] sm:$0xff] }
 0xd33   :  { %26744 = vmatmul.mubr.msk.f32.gmra.mxu0 %vm66_vm0, %v22058_v9 }
 0xd34   :  { %v21648_v17 = vpop.permute.xlu1 %21647 }
 0xd35   :  { %v21774_v18 = vpop.permute.xlu0 %21773  ;;  %v21994_v45 = vsel %vm614_vm2, %v35930_v41, %v21648_v17 }
 0xd36   :  { %21685 = vrot.lane.b32.xlu0 %v35927_v32, %s27608_s8  ;;  %21939 = vrot.lane.b32.xlu1 %v20865_v12, %s27610_s15  ;;  %v22026_v34 = vsel %vm22021_vm3, %v21993_v54, %v21774_v18 }
 0xd38   :  { %v21776_v52 = vpop.permute.xlu1 %21775 }
 0xd39   :  { %v21902_v55 = vpop.permute.xlu0 %21901  ;;  %v22027_v12 = vsel %vm22021_vm3, %v21994_v45, %v21776_v52  ;;  %v35943_v52 = vld [vmem:[#allocation135_spill] sm:$0xff] }
 0xd3a   :  { %v22059_v62 = vsel %vm22054_vm4, %v22026_v34, %v21902_v55  ;;  %21813 = vrot.lane.b32.xlu0 %v32756_v28, %s27609_s11  ;;  %21687 = vrot.lane.b32.xlu1 %v35929_v56, %s27608_s8 }
 0xd3b   :  { %26746 = vmatprep.mubr.msk.f32.mxu0 %vm66_vm0, %v22059_v62 }
 0xd3c   :  { %v21904_v20 = vpop.permute.xlu1 %21903 }
 0xd3d   :  { %v22060_v42 = vsel %vm22054_vm4, %v22027_v12, %v21904_v20  ;;  %v21650_v40 = vpop.permute.xlu0 %21649 }
 0xd3e   :  { %21815 = vrot.lane.b32.xlu1 %v32758_v21, %s27609_s11  ;;  %21941 = vrot.lane.b32.xlu0 %v32860_v50, %s27610_s15  ;;  %v21995_v5 = vsel %vm614_vm2, %v35932_v61, %v21650_v40  ;;  %v35933_v50 = vld [vmem:[#allocation178_spill] sm:$0xff] }
 0xd3f   :  { %26747 = vmatmul.mubr.msk.f32.gmra.mxu0 %vm66_vm0, %v22060_v42 }
 0xd40   :  { %v21652_v28 = vpop.permute.xlu1 %21651 }
 0xd41   :  { %v21778_v39 = vpop.permute.xlu0 %21777 }
 0xd42   :  { %21943 = vrot.lane.b32.xlu1 %v32885_v35, %s27610_s15  ;;  %21689 = vrot.lane.b32.xlu0 %v35931_v26, %s27608_s8  ;;  %v22028_v47 = vsel %vm22021_vm3, %v21995_v5, %v21778_v39  ;;  %v21996_v35 = vsel %vm614_vm2, %v35934_v22, %v21652_v28  ;;  %v35945_v28 = vld [vmem:[#allocation210_spill] sm:$0xff] }
 0xd44   :  { %v21780_v16 = vpop.permute.xlu1 %21779 }
 0xd45   :  { %v21906_v21 = vpop.permute.xlu0 %21905  ;;  %v22029_v30 = vsel %vm22021_vm3, %v21996_v35, %v21780_v16 }
 0xd46   :  { %v22061_v8 = vsel %vm22054_vm4, %v22028_v47, %v21906_v21  ;;  %21691 = vrot.lane.b32.xlu1 %v35933_v50, %s27608_s8  ;;  %21817 = vrot.lane.b32.xlu0 %v32760_v25, %s27609_s11  ;;  %v35946_v47 = vld [vmem:[#allocation56_spill] sm:$0xff] }
 0xd47   :  { %26749 = vmatprep.mubr.msk.f32.mxu0 %vm66_vm0, %v22061_v8 }
 0xd48   :  { %v21908_v14 = vpop.permute.xlu1 %21907 }
 0xd49   :  { %v22062_v33 = vsel %vm22054_vm4, %v22029_v30, %v21908_v14  ;;  %v21654_v27 = vpop.permute.xlu0 %21653 }
 0xd4a   :  { %21819 = vrot.lane.b32.xlu1 %v32762_v19, %s27609_s11  ;;  %21945 = vrot.lane.b32.xlu0 %v32866_v60, %s27610_s15  ;;  %v21997_v53 = vsel %vm614_vm2, %v35936_v0, %v21654_v27  ;;  %v35937_v60 = vld [vmem:[#allocation236_spill] sm:$0xff] }
 0xd4b   :  { %26750 = vmatmul.mubr.msk.f32.gmra.mxu0 %vm66_vm0, %v22062_v33  ;;  %v35947_v33 = vld [vmem:[#allocation223_spill] sm:$0xff] }
 0xd4c   :  { %v21656_v25 = vpop.permute.xlu1 %21655 }
 0xd4d   :  { %v21782_v38 = vpop.permute.xlu0 %21781 }
 0xd4e   :  { %21947 = vrot.lane.b32.xlu1 %v32893_v44, %s27610_s15  ;;  %21693 = vrot.lane.b32.xlu0 %v35935_v6, %s27608_s8  ;;  %v22030_v4 = vsel %vm22021_vm3, %v21997_v53, %v21782_v38  ;;  %v21998_v44 = vsel %vm614_vm2, %v35938_v58, %v21656_v25  ;;  %v35948_v53 = vld [vmem:[#allocation226_spill] sm:$0xff] }
 0xd50   :  { %v21784_v51 = vpop.permute.xlu1 %21783 }
 0xd51   :  { %v21910_v19 = vpop.permute.xlu0 %21909  ;;  %v22031_v11 = vsel %vm22021_vm3, %v21998_v44, %v21784_v51 }
 0xd52   :  { %v22063_v10 = vsel %vm22054_vm4, %v22030_v4, %v21910_v19  ;;  %21695 = vrot.lane.b32.xlu1 %v35937_v60, %s27608_s8  ;;  %21821 = vrot.lane.b32.xlu0 %v32764_v48, %s27609_s11 }
 0xd53   :  { %26752 = vmatprep.mubr.msk.f32.mxu0 %vm66_vm0, %v22063_v10 }
 0xd54   :  { %v21912_v2 = vpop.permute.xlu1 %21911 }
 0xd55   :  { %v22064_v15 = vsel %vm22054_vm4, %v22031_v11, %v21912_v2  ;;  %v21658_v1 = vpop.permute.xlu0 %21657  ;;  %v35949_v11 = vld [vmem:[#allocation227_spill] sm:$0xff] }
 0xd56   :  { %21823 = vrot.lane.b32.xlu1 %v32772_v49, %s27609_s11  ;;  %21949 = vrot.lane.b32.xlu0 %v32871_v23, %s27610_s15  ;;  %v21999_v36 = vsel %vm614_vm2, %v35940_v7, %v21658_v1  ;;  %v35941_v23 = vld [vmem:[#allocation185_spill] sm:$0xff] }
 0xd57   :  { %26753 = vmatmul.mubr.msk.f32.gmra.mxu0 %vm66_vm0, %v22064_v15 }
 0xd58   :  { %v21660_v48 = vpop.permute.xlu1 %21659 }
 0xd59   :  { %v21786_v29 = vpop.permute.xlu0 %21785 }
 0xd5a   :  { %21951 = vrot.lane.b32.xlu1 %v32904_v43, %s27610_s15  ;;  %21697 = vrot.lane.b32.xlu0 %v35939_v37, %s27608_s8  ;;  %v22032_v13 = vsel %vm22021_vm3, %v21999_v36, %v21786_v29  ;;  %v22000_v43 = vsel %vm614_vm2, %v35942_v46, %v21660_v48  ;;  %v35950_v37 = vld [vmem:[#allocation229_spill] sm:$0xff]  ;;  %v35951_v46 = vld [vmem:[#allocation71_spill] sm:$0xff] }
 0xd5c   :  { %v21788_v31 = vpop.permute.xlu1 %21787 }
 0xd5d   :  { %v21914_v49 = vpop.permute.xlu0 %21913  ;;  %v22033_v17 = vsel %vm22021_vm3, %v22000_v43, %v21788_v31 }
 0xd5e   :  { %v22065_v9 = vsel %vm22054_vm4, %v22032_v13, %v21914_v49  ;;  %21699 = vrot.lane.b32.xlu1 %v35941_v23, %s27608_s8  ;;  %21825 = vrot.lane.b32.xlu0 %v32777_v3, %s27609_s11 }
 0xd5f   :  { %26755 = vmatprep.mubr.msk.f32.mxu0 %vm66_vm0, %v22065_v9 }
 0xd60   :  { %v21916_v18 = vpop.permute.xlu1 %21915 }
 0xd61   :  { %v22066_v32 = vsel %vm22054_vm4, %v22033_v17, %v21916_v18  ;;  %v21662_v63 = vpop.permute.xlu0 %21661 }
 0xd62   :  { %21827 = vrot.lane.b32.xlu1 %v32782_v24, %s27609_s11  ;;  %21953 = vrot.lane.b32.xlu0 %v32880_v57, %s27610_s15  ;;  %v22001_v34 = vsel %vm614_vm2, %v35943_v52, %v21662_v63  ;;  %v35944_v24 = vld [vmem:[#allocation219_spill] sm:$0xff] }
 0xd63   :  { %26756 = vmatmul.mubr.msk.f32.gmra.mxu0 %vm66_vm0, %v22066_v32 }
 0xd64   :  { %v21664_v3 = vpop.permute.xlu1 %21663 }
 0xd65   :  { %v21790_v54 = vpop.permute.xlu0 %21789  ;;  %v22002_v45 = vsel %vm614_vm2, %v35944_v24, %v21664_v3  ;;  %v35952_v3 = vld [vmem:[#allocation80_spill] sm:$0xff]  ;;  %v35953_v24 = vld [vmem:[#allocation138_spill] sm:$0xff] }
 0xd66   :  { %21955 = vrot.lane.b32.xlu1 %v32911_v59, %s27610_s15  ;;  %v22034_v62 = vsel %vm22021_vm3, %v22001_v34, %v21790_v54 }
 0xd68   :  { %v21792_v55 = vpop.permute.xlu1 %21791 }
 0xd69   :  { %v21918_v56 = vpop.permute.xlu0 %21917  ;;  %v22035_v57 = vsel %vm22021_vm3, %v22002_v45, %v21792_v55 }
 0xd6a   :  { %v22067_v41 = vsel %vm22054_vm4, %v22034_v62, %v21918_v56 }
 0xd6b   :  { %26758 = vmatprep.mubr.msk.f32.mxu0 %vm66_vm0, %v22067_v41 }
 0xd6c   :  { %v21920_v12 = vpop.permute.xlu1 %21919 }
 0xd6d   :  { %v22068_v20 = vsel %vm22054_vm4, %v22035_v57, %v21920_v12  ;;  %v21666_v59 = vpop.permute.xlu0 %21665 }
 0xd6e   :  { %26759 = vmatmul.mubr.msk.f32.gmra.mxu0 %vm66_vm0, %v22068_v20  ;;  %v22003_v39 = vsel %vm614_vm2, %v35945_v28, %v21666_v59 }
 0xd70   :  { %v21668_v42 = vpop.permute.xlu1 %21667 }
 0xd71   :  { %v21794_v40 = vpop.permute.xlu0 %21793  ;;  %v22004_v21 = vsel %vm614_vm2, %v35946_v47, %v21668_v42  ;;  %v35954_v42 = vld [vmem:[#allocation149_spill] sm:$0xff]  ;;  %v35955_v47 = vld [vmem:[#allocation148_spill] sm:$0xff] }
 0xd72   :  { %v22036_v61 = vsel %vm22021_vm3, %v22003_v39, %v21794_v40 }
 0xd74   :  { %v21796_v26 = vpop.permute.xlu1 %21795 }
 0xd75   :  { %v21922_v5 = vpop.permute.xlu0 %21921  ;;  %v22037_v8 = vsel %vm22021_vm3, %v22004_v21, %v21796_v26 }
 0xd76   :  { %v22069_v16 = vsel %vm22054_vm4, %v22036_v61, %v21922_v5 }
 0xd77   :  { %26761 = vmatprep.mubr.msk.f32.mxu1 %vm66_vm0, %v22069_v16 }
 0xd78   :  { %v21924_v50 = vpop.permute.xlu1 %21923 }
 0xd79   :  { %v22070_v22 = vsel %vm22054_vm4, %v22037_v8, %v21924_v50  ;;  %v21670_v35 = vpop.permute.xlu0 %21669 }
 0xd7a   :  { %26762 = vmatmul.mubr.msk.f32.vlgmr.msra.gmra.mxu1 %vm66_vm0, %v22070_v22  ;;  %v22005_v27 = vsel %vm614_vm2, %v35947_v33, %v21670_v35 }
 0xd7c   :  { %v21672_v30 = vpop.permute.xlu1 %21671 }
 0xd7d   :  { %v21798_v14 = vpop.permute.xlu0 %21797  ;;  %v22006_v51 = vsel %vm614_vm2, %v35948_v53, %v21672_v30  ;;  %v35956_v30 = vld [vmem:[#allocation237_spill] sm:$0xff]  ;;  %v35957_v53 = vld [vmem:[#allocation139_spill] sm:$0xff] }
 0xd7e   :  { %v22038_v38 = vsel %vm22021_vm3, %v22005_v27, %v21798_v14 }
 0xd80   :  { %v21800_v25 = vpop.permute.xlu1 %21799 }
 0xd81   :  { %v21926_v6 = vpop.permute.xlu0 %21925  ;;  %v22039_v4 = vsel %vm22021_vm3, %v22006_v51, %v21800_v25 }
 0xd82   :  { %v22071_v0 = vsel %vm22054_vm4, %v22038_v38, %v21926_v6 }
 0xd83   :  { %26764 = vmatprep.mubr.msk.f32.mxu1 %vm66_vm0, %v22071_v0 }
 0xd84   :  { %v21928_v19 = vpop.permute.xlu1 %21927 }
 0xd85   :  { %v22072_v10 = vsel %vm22054_vm4, %v22039_v4, %v21928_v19  ;;  %v21674_v60 = vpop.permute.xlu0 %21673 }
 0xd86   :  { %26765 = vmatmul.mubr.msk.f32.gmra.mxu1 %vm66_vm0, %v22072_v10  ;;  %v22007_v2 = vsel %vm614_vm2, %v35949_v11, %v21674_v60 }
 0xd88   :  { %v21676_v58 = vpop.permute.xlu1 %21675 }
 0xd89   :  { %v21802_v44 = vpop.permute.xlu0 %21801  ;;  %v22008_v7 = vsel %vm614_vm2, %v35950_v37, %v21676_v58  ;;  %v35958_v58 = vld [vmem:[#allocation36_spill] sm:$0xff]  ;;  %v35959_v37 = vld [vmem:[#allocation238_spill] sm:$0xff] }
 0xd8a   :  { %v22040_v1 = vsel %vm22021_vm3, %v22007_v2, %v21802_v44 }
 0xd8c   :  { %v21804_v15 = vpop.permute.xlu1 %21803 }
 0xd8d   :  { %v21930_v48 = vpop.permute.xlu0 %21929  ;;  %v22041_v36 = vsel %vm22021_vm3, %v22008_v7, %v21804_v15 }
 0xd8e   :  { %v22073_v29 = vsel %vm22054_vm4, %v22040_v1, %v21930_v48 }
 0xd8f   :  { %26767 = vmatprep.mubr.msk.f32.mxu1 %vm66_vm0, %v22073_v29 }
 0xd90   :  { %v21932_v31 = vpop.permute.xlu1 %21931 }
 0xd91   :  { %v22074_v13 = vsel %vm22054_vm4, %v22041_v36, %v21932_v31  ;;  %v21678_v49 = vpop.permute.xlu0 %21677 }
 0xd92   :  { %26768 = vmatmul.mubr.msk.f32.gmra.mxu1 %vm66_vm0, %v22074_v13  ;;  %v22009_v43 = vsel %vm614_vm2, %v35951_v46, %v21678_v49 }
 0xd94   :  { %v21680_v9 = vpop.permute.xlu1 %21679 }
 0xd95   :  { %v21806_v23 = vpop.permute.xlu0 %21805  ;;  %v22010_v54 = vsel %vm614_vm2, %v35952_v3, %v21680_v9  ;;  %v35960_v9 = vld [vmem:[#allocation239_spill] sm:$0xff] }
 0xd96   :  { %v22042_v18 = vsel %vm22021_vm3, %v22009_v43, %v21806_v23  ;;  %v35961_v3 = vld [vmem:[#allocation43_spill] sm:$0xff] }
 0xd98   :  { %v21808_v17 = vpop.permute.xlu1 %21807 }
 0xd99   :  { %v21934_v32 = vpop.permute.xlu0 %21933  ;;  %v22043_v52 = vsel %vm22021_vm3, %v22010_v54, %v21808_v17 }
 0xd9a   :  { %v22075_v63 = vsel %vm22054_vm4, %v22042_v18, %v21934_v32 }
 0xd9b   :  { %26770 = vmatprep.mubr.msk.f32.mxu1 %vm66_vm0, %v22075_v63 }
 0xd9c   :  { %v21936_v34 = vpop.permute.xlu1 %21935 }
 0xd9d   :  { %v22076_v55 = vsel %vm22054_vm4, %v22043_v52, %v21936_v34  ;;  %v21682_v62 = vpop.permute.xlu0 %21681 }
 0xd9e   :  { %26771 = vmatmul.mubr.msk.f32.gmra.mxu1 %vm66_vm0, %v22076_v55  ;;  %v22011_v45 = vsel %vm614_vm2, %v35953_v24, %v21682_v62 }
 0xda0   :  { %v21684_v56 = vpop.permute.xlu1 %21683 }
 0xda1   :  { %v21810_v41 = vpop.permute.xlu0 %21809  ;;  %v22012_v40 = vsel %vm614_vm2, %v35954_v42, %v21684_v56  ;;  %v35962_v56 = vld [vmem:[#allocation153_spill] sm:$0xff] }
 0xda2   :  { %v22044_v12 = vsel %vm22021_vm3, %v22011_v45, %v21810_v41 }
 0xda4   :  { %v21812_v57 = vpop.permute.xlu1 %21811 }
 0xda5   :  { %v21938_v20 = vpop.permute.xlu0 %21937  ;;  %v22045_v28 = vsel %vm22021_vm3, %v22012_v40, %v21812_v57 }
 0xda6   :  { %v22077_v59 = vsel %vm22054_vm4, %v22044_v12, %v21938_v20  ;;  %v35963_v12 = vld [vmem:[#allocation2_spill] sm:$0xff] }
 0xda7   :  { %26773 = vmatprep.mubr.msk.f32.mxu1 %vm66_vm0, %v22077_v59  ;;  %v22093_v20 = vsub.s32 1, %v35963_v12  ;;  %v33127_v59 = vld [vmem:[%s34544_s5] sm:$0xff] }
 0xda8   :  { %v21940_v39 = vpop.permute.xlu1 %21939 }
 0xda9   :  { %v22078_v26 = vsel %vm22054_vm4, %v22045_v28, %v21940_v39  ;;  %v21686_v61 = vpop.permute.xlu0 %21685  ;;  %v33130_v42 = vrot.slane %v33127_v59, %v22093_v20 }
 0xdaa   :  { %26774 = vmatmul.mubr.msk.f32.gmra.mxu1 %vm66_vm0, %v22078_v26  ;;  %v22013_v21 = vsel %vm614_vm2, %v35955_v47, %v21686_v61  ;;  %v27567_v26 = vld [vmem:[%s34543_s0 + $0x8] sm:$0xff] }
 0xdac   :  { %v21688_v5 = vpop.permute.xlu1 %21687 }
 0xdad   :  { %v21814_v16 = vpop.permute.xlu0 %21813  ;;  %v22014_v14 = vsel %vm614_vm2, %v35956_v30, %v21688_v5 }
 0xdae   :  { %v22046_v50 = vsel %vm22021_vm3, %v22013_v21, %v21814_v16  ;;  %v27568_v16 = vld [vmem:[%s34543_s0] sm:$0xff] }
 0xdb0   :  { %v21816_v8 = vpop.permute.xlu1 %21815 }
 0xdb1   :  { %v21942_v22 = vpop.permute.xlu0 %21941  ;;  %v22047_v33 = vsel %vm22021_vm3, %v22014_v14, %v21816_v8  ;;  %v27569_v14 = vld [vmem:[%s34543_s0 + $0x10] sm:$0xff] }
 0xdb2   :  { %v22079_v35 = vsel %vm22054_vm4, %v22046_v50, %v21942_v22 }
 0xdb3   :  { %26776 = vmatprep.mubr.msk.f32.mxu1 %vm66_vm0, %v22079_v35 }
 0xdb4   :  { %v21944_v27 = vpop.permute.xlu1 %21943 }
 0xdb5   :  { %v22080_v25 = vsel %vm22054_vm4, %v22047_v33, %v21944_v27  ;;  %v21690_v38 = vpop.permute.xlu0 %21689  ;;  %v27570_v27 = vld [vmem:[%s34543_s0 + $0x18] sm:$0xff] }
 0xdb6   :  { %26777 = vmatmul.mubr.msk.f32.gmra.mxu1 %vm66_vm0, %v22080_v25  ;;  %v22015_v51 = vsel %vm614_vm2, %v35957_v53, %v21690_v38 }
 0xdb8   :  { %v21692_v6 = vpop.permute.xlu1 %21691 }
 0xdb9   :  { %v21818_v0 = vpop.permute.xlu0 %21817  ;;  %v22016_v44 = vsel %vm614_vm2, %v35958_v58, %v21692_v6 }
 0xdba   :  { %v22048_v19 = vsel %vm22021_vm3, %v22015_v51, %v21818_v0 }
 0xdbc   :  { %v21820_v4 = vpop.permute.xlu1 %21819 }
 0xdbd   :  { %v21946_v10 = vpop.permute.xlu0 %21945  ;;  %v22049_v11 = vsel %vm22021_vm3, %v22016_v44, %v21820_v4  ;;  %v27571_v4 = vld [vmem:[%s34543_s0 + $0x28] sm:$0xff] }
 0xdbe   :  { %v22081_v60 = vsel %vm22054_vm4, %v22048_v19, %v21946_v10 }
 0xdbf   :  { %26779 = vmatprep.mubr.msk.f32.mxu1 %vm66_vm0, %v22081_v60  ;;  %v27572_v60 = vld [vmem:[%s34543_s0 + $0x20] sm:$0xff] }
 0xdc0   :  { %v21948_v2 = vpop.permute.xlu1 %21947 }
 0xdc1   :  { %v22082_v15 = vsel %vm22054_vm4, %v22049_v11, %v21948_v2  ;;  %v21694_v1 = vpop.permute.xlu0 %21693 }
 0xdc2   :  { %26780 = vmatmul.mubr.msk.f32.gmra.mxu1 %vm66_vm0, %v22082_v15  ;;  %v22017_v7 = vsel %vm614_vm2, %v35959_v37, %v21694_v1 }
 0xdc4   :  { %v21696_v48 = vpop.permute.xlu1 %21695 }
 0xdc5   :  { %v21822_v29 = vpop.permute.xlu0 %21821  ;;  %v22018_v23 = vsel %vm614_vm2, %v35960_v9, %v21696_v48  ;;  %v27573_v48 = vld [vmem:[%s34543_s0 + $0x38] sm:$0xff] }
 0xdc6   :  { %v22050_v31 = vsel %vm22021_vm3, %v22017_v7, %v21822_v29  ;;  %v27574_v7 = vld [vmem:[%s34543_s0 + $0x30] sm:$0xff] }
 0xdc8   :  { %v21824_v36 = vpop.permute.xlu1 %21823 }
 0xdc9   :  { %v21950_v13 = vpop.permute.xlu0 %21949  ;;  %v22051_v46 = vsel %vm22021_vm3, %v22018_v23, %v21824_v36 }
 0xdca   :  { %v22083_v49 = vsel %vm22054_vm4, %v22050_v31, %v21950_v13 }
 0xdcb   :  { %26782 = vmatprep.mubr.msk.f32.mxu1 %vm66_vm0, %v22083_v49 }
 0xdcc   :  { %v21952_v43 = vpop.permute.xlu1 %21951 }
 0xdcd   :  { %v22084_v17 = vsel %vm22054_vm4, %v22051_v46, %v21952_v43  ;;  %v21698_v18 = vpop.permute.xlu0 %21697  ;;  %v27575_v46 = vld [vmem:[%s34543_s0 + $0x48] sm:$0xff] }
 0xdce   :  { %26783 = vmatmul.mubr.msk.f32.gmra.mxu1 %vm66_vm0, %v22084_v17  ;;  %v22019_v54 = vsel %vm614_vm2, %v35961_v3, %v21698_v18  ;;  %v27576_v18 = vld [vmem:[%s34543_s0 + $0x40] sm:$0xff] }
 0xdd0   :  { %v21700_v32 = vpop.permute.xlu1 %21699 }
 0xdd1   :  { %v21826_v63 = vpop.permute.xlu0 %21825  ;;  %v22020_v41 = vsel %vm614_vm2, %v35962_v56, %v21700_v32 }
 0xdd2   :  { %v22052_v34 = vsel %vm22021_vm3, %v22019_v54, %v21826_v63 }
 0xdd4   :  { %v21828_v52 = vpop.permute.xlu1 %21827 }
 0xdd5   :  { %v21954_v55 = vpop.permute.xlu0 %21953  ;;  %v22053_v24 = vsel %vm22021_vm3, %v22020_v41, %v21828_v52  ;;  %v27578_v41 = vld [vmem:[%s34543_s0 + $0x50] sm:$0xff] }
 0xdd6   :  { %v22085_v62 = vsel %vm22054_vm4, %v22052_v34, %v21954_v55  ;;  %v27577_v55 = vld [vmem:[%s34543_s0 + $0x58] sm:$0xff] }
 0xdd7   :  { %26785 = vmatprep.mubr.msk.f32.mxu1 %vm66_vm0, %v22085_v62 }
 0xdd8   :  { %v21956_v45 = vpop.permute.xlu1 %21955 }
 0xdd9   :  { %v22086_v57 = vsel %vm22054_vm4, %v22053_v24, %v21956_v45 }
 0xdda   :  { %26786 = vmatmul.mubr.msk.f32.gmra.mxu1 %vm66_vm0, %v22086_v57 }
 0xde7   :  { %v26742_v40 = vpop.f32.mrf.mxu0 }
 0xde8   :  { %v22263_v28 = vadd.f32 %v26742_v40, %v33130_v42 }
 0xde9   :  { %v22257_v39 = vpop.f32.mrf.mxu0 }
 0xdea   :  { %v33136_v61 = vadd.f32 %v27567_v26, %v22263_v28  ;;  %v22258_v5 = vadd.f32 %v22257_v39, %v33130_v42  ;;  %v27579_v39 = vld [vmem:[%s34543_s0 + $0x68] sm:$0xff] }
 0xdec   :  { %v33142_v47 = vadd.f32 %v27568_v16, %v22258_v5  ;;  %v22451_v21 = vsel %vm66_vm0, %v33136_v61, 0.0  ;;  %v27580_v16 = vld [vmem:[%s34543_s0 + $0x60] sm:$0xff] }
 0xded   :  { %22452 = vadd.xlane.f32.xlu1 %v22451_v21 }
 0xdee   :  { %v22448_v8 = vsel %vm66_vm0, %v33142_v47, 0.0 }
 0xdef   :  { %22449 = vadd.xlane.f32.xlu0 %v22448_v8 }
 0xdf3   :  { %v26745_v50 = vpop.f32.mrf.mxu0 }
 0xdf4   :  { %v22273_v35 = vadd.f32 %v26745_v50, %v33130_v42 }
 0xdf5   :  { %v22267_v22 = vpop.f32.mrf.mxu0 }
 0xdf6   :  { %v22268_v30 = vadd.f32 %v22267_v22, %v33130_v42  ;;  %v33158_v25 = vadd.f32 %v27570_v27, %v22273_v35 }
 0xdf8   :  { %v33153_v33 = vadd.f32 %v27569_v14, %v22268_v30  ;;  %v22457_v6 = vsel %vm66_vm0, %v33158_v25, 0.0  ;;  %v27581_v14 = vld [vmem:[%s34543_s0 + $0x78] sm:$0xff] }
 0xdfa   :  { %v22454_v38 = vsel %vm66_vm0, %v33153_v33, 0.0 }
 0xdfb   :  { %22455 = vadd.xlane.f32.xlu0 %v22454_v38 }
 0xdff   :  { %22458 = vadd.xlane.f32.xlu0 %v22457_v6  ;;  %v26748_v0 = vpop.f32.mrf.mxu0  ;;  %v27582_v6 = vld [vmem:[%s34543_s0 + $0x70] sm:$0xff] }
 0xe00   :  { %v22283_v53 = vadd.f32 %v26748_v0, %v33130_v42 }
 0xe01   :  { %v22277_v51 = vpop.f32.mrf.mxu0 }
 0xe02   :  { %v33168_v19 = vadd.f32 %v27571_v4, %v22283_v53  ;;  %v22278_v10 = vadd.f32 %v22277_v51, %v33130_v42 }
 0xe04   :  { %v33174_v58 = vadd.f32 %v27572_v60, %v22278_v10  ;;  %v22463_v44 = vsel %vm66_vm0, %v33168_v19, 0.0 }
 0xe05   :  { %22464 = vadd.xlane.f32.xlu0 %v22463_v44  ;;  %v27583_v44 = vld [vmem:[%s34543_s0 + $0x88] sm:$0xff] }
 0xe06   :  { %v22460_v11 = vsel %vm66_vm0, %v33174_v58, 0.0 }
 0xe07   :  { %22461 = vadd.xlane.f32.xlu1 %v22460_v11 }
 0xe0b   :  { %v26751_v2 = vpop.f32.mrf.mxu0 }
 0xe0c   :  { %v22293_v15 = vadd.f32 %v26751_v2, %v33130_v42 }
 0xe0d   :  { %v22287_v1 = vpop.f32.mrf.mxu0 }
 0xe0e   :  { %v33184_v29 = vadd.f32 %v27573_v48, %v22293_v15  ;;  %v22288_v37 = vadd.f32 %v22287_v1, %v33130_v42  ;;  %v27584_v15 = vld [vmem:[%s34543_s0 + $0x80] sm:$0xff] }
 0xe10   :  { %v33190_v36 = vadd.f32 %v27574_v7, %v22288_v37  ;;  %v22469_v31 = vsel %vm66_vm0, %v33184_v29, 0.0 }
 0xe11   :  { %22470 = vadd.xlane.f32.xlu0 %v22469_v31 }
 0xe12   :  { %v22466_v13 = vsel %vm66_vm0, %v33190_v36, 0.0 }
 0xe13   :  { %22467 = vadd.xlane.f32.xlu1 %v22466_v13 }
 0xe17   :  { %v26754_v49 = vpop.f32.mrf.mxu0 }
 0xe18   :  { %v22303_v9 = vadd.f32 %v26754_v49, %v33130_v42  ;;  %v27585_v49 = vld [vmem:[%s34543_s0 + $0x98] sm:$0xff] }
 0xe19   :  { %v22297_v23 = vpop.f32.mrf.mxu0 }
 0xe1a   :  { %v33200_v43 = vadd.f32 %v27575_v46, %v22303_v9  ;;  %v22298_v17 = vadd.f32 %v22297_v23, %v33130_v42  ;;  %v27586_v46 = vld [vmem:[%s34543_s0 + $0x90] sm:$0xff] }
 0xe1c   :  { %v33206_v32 = vadd.f32 %v27576_v18, %v22298_v17  ;;  %v22475_v63 = vsel %vm66_vm0, %v33200_v43, 0.0 }
 0xe1d   :  { %22476 = vadd.xlane.f32.xlu0 %v22475_v63 }
 0xe1e   :  { %v22472_v3 = vsel %vm66_vm0, %v33206_v32, 0.0 }
 0xe1f   :  { %22473 = vadd.xlane.f32.xlu1 %v22472_v3 }
 0xe23   :  { %v26757_v54 = vpop.f32.mrf.mxu0 }
 0xe24   :  { %v22313_v52 = vadd.f32 %v26757_v54, %v33130_v42 }
 0xe25   :  { %v22307_v34 = vpop.f32.mrf.mxu0 }
 0xe26   :  { %v33216_v62 = vadd.f32 %v27577_v55, %v22313_v52  ;;  %v22308_v56 = vadd.f32 %v22307_v34, %v33130_v42  ;;  %v27587_v34 = vld [vmem:[%s34543_s0 + $0xa8] sm:$0xff] }
 0xe28   :  { %v33222_v24 = vadd.f32 %v27578_v41, %v22308_v56  ;;  %v22481_v45 = vsel %vm66_vm0, %v33216_v62, 0.0  ;;  %v27588_v41 = vld [vmem:[%s34543_s0 + $0xa0] sm:$0xff] }
 0xe29   :  { %22482 = vadd.xlane.f32.xlu0 %v22481_v45 }
 0xe2a   :  { %v22478_v57 = vsel %vm66_vm0, %v33222_v24, 0.0 }
 0xe2b   :  { %22479 = vadd.xlane.f32.xlu1 %v22478_v57 }
 0xe2e   :  { %v26760_v20 = vpop.f32.mrf.mxu0 }
 0xe2f   :  { %v22323_v40 = vadd.f32 %v26760_v20, %v33130_v42 }
 0xe30   :  { %v22317_v28 = vpop.f32.mrf.mxu0 }
 0xe31   :  { %v33232_v26 = vadd.f32 %v27579_v39, %v22323_v40  ;;  %v22318_v5 = vadd.f32 %v22317_v28, %v33130_v42 }
 0xe33   :  { %v33238_v21 = vadd.f32 %v27580_v16, %v22318_v5  ;;  %v22487_v8 = vsel %vm66_vm0, %v33232_v26, 0.0  ;;  %v27589_v5 = vld [vmem:[%s34543_s0 + $0xb8] sm:$0xff] }
 0xe34   :  { %22488 = vadd.xlane.f32.xlu0 %v22487_v8 }
 0xe35   :  { %v22484_v50 = vsel %vm66_vm0, %v33238_v21, 0.0 }
 0xe36   :  { %22485 = vadd.xlane.f32.xlu1 %v22484_v50  ;;  %v27590_v50 = vld [vmem:[%s34543_s0 + $0xb0] sm:$0xff] }
 0xe3a   :  { %v26763_v22 = vpop.f32.mrf.mxu1 }
 0xe3b   :  { %v22333_v35 = vadd.f32 %v26763_v22, %v33130_v42 }
 0xe3c   :  { %v22327_v30 = vpop.f32.mrf.mxu1 }
 0xe3d   :  { %v33248_v27 = vadd.f32 %v27581_v14, %v22333_v35  ;;  %v22328_v38 = vadd.f32 %v22327_v30, %v33130_v42 }
 0xe3f   :  { %v33254_v0 = vadd.f32 %v27582_v6, %v22328_v38  ;;  %v22493_v53 = vsel %vm66_vm0, %v33248_v27, 0.0 }
 0xe40   :  { %22494 = vadd.xlane.f32.xlu0 %v22493_v53  ;;  %v27591_v53 = vld [vmem:[%s34543_s0 + $0xc8] sm:$0xff] }
 0xe41   :  { %v22490_v51 = vsel %vm66_vm0, %v33254_v0, 0.0 }
 0xe42   :  { %22491 = vadd.xlane.f32.xlu1 %v22490_v51 }
 0xe46   :  { %v26766_v4 = vpop.f32.mrf.mxu1 }
 0xe47   :  { %v22343_v10 = vadd.f32 %v26766_v4, %v33130_v42 }
 0xe48   :  { %v22337_v60 = vpop.f32.mrf.mxu1 }
 0xe49   :  { %v33264_v11 = vadd.f32 %v27583_v44, %v22343_v10  ;;  %v22338_v2 = vadd.f32 %v22337_v60, %v33130_v42  ;;  %v27592_v10 = vld [vmem:[%s34543_s0 + $0xc0] sm:$0xff] }
 0xe4b   :  { %v33270_v1 = vadd.f32 %v27584_v15, %v22338_v2  ;;  %v22499_v48 = vsel %vm66_vm0, %v33264_v11, 0.0 }
 0xe4c   :  { %22500 = vadd.xlane.f32.xlu0 %v22499_v48 }
 0xe4d   :  { %v22496_v37 = vsel %vm66_vm0, %v33270_v1, 0.0 }
 0xe4e   :  { %22497 = vadd.xlane.f32.xlu1 %v22496_v37 }
 0xe52   :  { %v26769_v7 = vpop.f32.mrf.mxu1 }
 0xe53   :  { %v22353_v31 = vadd.f32 %v26769_v7, %v33130_v42  ;;  %v27593_v7 = vld [vmem:[%s34543_s0 + $0xd8] sm:$0xff] }
 0xe54   :  { %v22347_v13 = vpop.f32.mrf.mxu1 }
 0xe55   :  { %v33280_v9 = vadd.f32 %v27585_v49, %v22353_v31  ;;  %v22348_v23 = vadd.f32 %v22347_v13, %v33130_v42  ;;  %v27594_v49 = vld [vmem:[%s34543_s0 + $0xd0] sm:$0xff] }
 0xe57   :  { %v33286_v17 = vadd.f32 %v27586_v46, %v22348_v23  ;;  %v22505_v18 = vsel %vm66_vm0, %v33280_v9, 0.0 }
 0xe58   :  { %22506 = vadd.xlane.f32.xlu0 %v22505_v18 }
 0xe59   :  { %v22502_v63 = vsel %vm66_vm0, %v33286_v17, 0.0 }
 0xe5a   :  { %22503 = vadd.xlane.f32.xlu1 %v22502_v63 }
 0xe5e   :  { %v26772_v3 = vpop.f32.mrf.mxu1 }
 0xe5f   :  { %v22363_v54 = vadd.f32 %v26772_v3, %v33130_v42 }
 0xe60   :  { %v22357_v52 = vpop.f32.mrf.mxu1 }
 0xe61   :  { %v33296_v55 = vadd.f32 %v27587_v34, %v22363_v54  ;;  %v22358_v56 = vadd.f32 %v22357_v52, %v33130_v42  ;;  %v27595_v34 = vld [vmem:[%s34543_s0 + $0xe8] sm:$0xff] }
 0xe63   :  { %v33302_v45 = vadd.f32 %v27588_v41, %v22358_v56  ;;  %v22511_v57 = vsel %vm66_vm0, %v33296_v55, 0.0 }
 0xe64   :  { %22512 = vadd.xlane.f32.xlu0 %v22511_v57 }
 0xe65   :  { %v22508_v20 = vsel %vm66_vm0, %v33302_v45, 0.0 }
 0xe66   :  { %22509 = vadd.xlane.f32.xlu1 %v22508_v20 }
 0xe6a   :  { %v26775_v40 = vpop.f32.mrf.mxu1 }
 0xe6b   :  { %v22373_v28 = vadd.f32 %v26775_v40, %v33130_v42  ;;  %v27596_v40 = vld [vmem:[%s34543_s0 + $0xe0] sm:$0xff] }
 0xe6c   :  { %v22367_v39 = vpop.f32.mrf.mxu1 }
 0xe6d   :  { %v33312_v16 = vadd.f32 %v27589_v5, %v22373_v28  ;;  %v22368_v8 = vadd.f32 %v22367_v39, %v33130_v42 }
 0xe6f   :  { %v33318_v22 = vadd.f32 %v27590_v50, %v22368_v8  ;;  %v22517_v35 = vsel %vm66_vm0, %v33312_v16, 0.0 }
 0xe70   :  { %22518 = vadd.xlane.f32.xlu0 %v22517_v35 }
 0xe71   :  { %v22514_v30 = vsel %vm66_vm0, %v33318_v22, 0.0 }
 0xe72   :  { %22515 = vadd.xlane.f32.xlu1 %v22514_v30 }
 0xe76   :  { %v26778_v14 = vpop.f32.mrf.mxu1  ;;  %v22453_v20 = vpop.xlane.xlu1 %22452 }
 0xe77   :  { %v22383_v38 = vadd.f32 %v26778_v14, %v33130_v42  ;;  %v22546_v8 = vmul.f32 0.03125, %v22453_v20 }
 0xe78   :  { %v22377_v6 = vpop.f32.mrf.mxu1  ;;  %v22450_v63 = vpop.xlane.xlu0 %22449 }
 0xe79   :  { %v33328_v51 = vadd.f32 %v27591_v53, %v22383_v38  ;;  %v22378_v4 = vadd.f32 %v22377_v6, %v33130_v42  ;;  %v22545_v35 = vmul.f32 0.03125, %v22450_v63  ;;  %v33373_v30 = vsub.f32 %v33136_v61, %v22546_v8 }
 0xe7b   :  { %v33334_v60 = vadd.f32 %v27592_v10, %v22378_v4  ;;  %v22523_v44 = vsel %vm66_vm0, %v33328_v51, 0.0  ;;  %v33377_v10 = vsub.f32 %v33142_v47, %v22545_v35  ;;  %v27598_v47 = vld [vmem:[%s34543_s0 + $0xf0] sm:$0xff] }
 0xe7c   :  { %22524 = vadd.xlane.f32.xlu0 %v22523_v44 }
 0xe7d   :  { %v22520_v2 = vsel %vm66_vm0, %v33334_v60, 0.0 }
 0xe7e   :  { %22521 = vadd.xlane.f32.xlu1 %v22520_v2  ;;  %v27597_v2 = vld [vmem:[%s34543_s0 + $0xf8] sm:$0xff] }
 0xe82   :  { %v26781_v15 = vpop.f32.mrf.mxu1 }
 0xe83   :  { %v22393_v48 = vadd.f32 %v26781_v15, %v33130_v42 }
 0xe84   :  { %v22387_v37 = vpop.f32.mrf.mxu1  ;;  %v22456_v57 = vpop.xlane.xlu0 %22455 }
 0xe85   :  { %v33344_v31 = vadd.f32 %v27593_v7, %v22393_v48  ;;  %v22388_v13 = vadd.f32 %v22387_v37, %v33130_v42  ;;  %v22547_v44 = vmul.f32 0.03125, %v22456_v57  ;;  %v22610_v37 = vmul.f32 %v33373_v30, %v33373_v30 }
 0xe87   :  { %v33350_v23 = vadd.f32 %v27594_v49, %v22388_v13  ;;  %v22529_v46 = vsel %vm66_vm0, %v33344_v31, 0.0 }
 0xe88   :  { %22530 = vadd.xlane.f32.xlu0 %v22529_v46  ;;  %v22459_v50 = vpop.xlane.xlu0 %22458 }
 0xe89   :  { %v22526_v18 = vsel %vm66_vm0, %v33350_v23, 0.0  ;;  %v22548_v38 = vmul.f32 0.03125, %v22459_v50 }
 0xe8a   :  { %22527 = vadd.xlane.f32.xlu1 %v22526_v18 }
 0xe8b   :  { %v33388_v7 = vsub.f32 %v33158_v25, %v22548_v38 }
 0xe8d   :  { %v22612_v57 = vmul.f32 %v33388_v7, %v33388_v7 }
 0xe8e   :  { %v26784_v3 = vpop.f32.mrf.mxu1  ;;  %v22465_v53 = vpop.xlane.xlu0 %22464 }
 0xe8f   :  { %v22403_v54 = vadd.f32 %v26784_v3, %v33130_v42  ;;  %v22550_v13 = vmul.f32 0.03125, %v22465_v53  ;;  %v22609_v3 = vmul.f32 %v33377_v10, %v33377_v10  ;;  %v22650_v50 = vsel %vm66_vm0, %v22612_v57, 0.0 }
 0xe90   :  { %v22397_v52 = vpop.f32.mrf.mxu1  ;;  %v22462_v61 = vpop.xlane.xlu1 %22461 }
 0xe91   :  { %v33360_v56 = vadd.f32 %v27595_v34, %v22403_v54  ;;  %v22398_v41 = vadd.f32 %v22397_v52, %v33130_v42  ;;  %v22549_v63 = vmul.f32 0.03125, %v22462_v61  ;;  %v33405_v52 = vsub.f32 %v33168_v19, %v22550_v13 }
 0xe93   :  { %v33366_v28 = vadd.f32 %v27596_v40, %v22398_v41  ;;  %v22535_v39 = vsel %vm66_vm0, %v33360_v56, 0.0  ;;  %v22644_v41 = vsel %vm66_vm0, %v22610_v37, 0.0  ;;  %v22641_v40 = vsel %vm66_vm0, %v22609_v3, 0.0 }
 0xe94   :  { %22536 = vadd.xlane.f32.xlu0 %v22535_v39  ;;  %v22614_v35 = vmul.f32 %v33405_v52, %v33405_v52 }
 0xe95   :  { %v22532_v5 = vsel %vm66_vm0, %v33366_v28, 0.0 }
 0xe96   :  { %22533 = vadd.xlane.f32.xlu1 %v22532_v5 }
 0xe9a   :  { %v26787_v14 = vpop.f32.mrf.mxu1  ;;  %v22471_v18 = vpop.xlane.xlu0 %22470 }
 0xe9b   :  { %v22413_v6 = vadd.f32 %v26787_v14, %v33130_v42  ;;  %v22552_v34 = vmul.f32 0.03125, %v22471_v18 }
 0xe9c   :  { %v22407_v4 = vpop.f32.mrf.mxu1  ;;  %v22468_v54 = vpop.xlane.xlu1 %22467 }
 0xe9d   :  { %v33382_v15 = vadd.f32 %v27597_v2, %v22413_v6  ;;  %v22408_v48 = vadd.f32 %v22407_v4, %v33130_v42  ;;  %v33398_v42 = vsub.f32 %v33153_v33, %v22547_v44  ;;  %v33411_v33 = vsub.f32 %v33174_v58, %v22549_v63 }
 0xe9e   :  { %v22551_v20 = vmul.f32 0.03125, %v22468_v54  ;;  %v33417_v19 = vsub.f32 %v33184_v29, %v22552_v34  ;;  %v22656_v4 = vsel %vm66_vm0, %v22614_v35, 0.0 }
 0xe9f   :  { %v33393_v49 = vadd.f32 %v27598_v47, %v22408_v48  ;;  %v22541_v46 = vsel %vm66_vm0, %v33382_v15, 0.0  ;;  %v22611_v39 = vmul.f32 %v33398_v42, %v33398_v42  ;;  %v22613_v53 = vmul.f32 %v33411_v33, %v33411_v33 }
 0xea0   :  { %22542 = vadd.xlane.f32.xlu0 %v22541_v46  ;;  %v33423_v58 = vsub.f32 %v33190_v36, %v22551_v20  ;;  %v22616_v44 = vmul.f32 %v33417_v19, %v33417_v19 }
 0xea1   :  { %v22538_v25 = vsel %vm66_vm0, %v33393_v49, 0.0  ;;  %v22647_v6 = vsel %vm66_vm0, %v22611_v39, 0.0  ;;  %v22653_v36 = vsel %vm66_vm0, %v22613_v53, 0.0  ;;  %v22938_v53 = vld [vmem:[%s34547_s3 + $0x8] sm:$0xff] }
 0xea2   :  { %22539 = vadd.xlane.f32.xlu1 %v22538_v25  ;;  %v22615_v48 = vmul.f32 %v33423_v58, %v33423_v58  ;;  %v22662_v61 = vsel %vm66_vm0, %v22616_v44, 0.0 }
 0xea4   :  { %22645 = vadd.xlane.f32.xlu0 %v22644_v41  ;;  %v22659_v37 = vsel %vm66_vm0, %v22615_v48, 0.0 }
 0xea6   :  { %v22477_v5 = vpop.xlane.xlu0 %22476  ;;  %22642 = vadd.xlane.f32.xlu1 %v22641_v40 }
 0xea7   :  { %v22554_v8 = vmul.f32 0.03125, %v22477_v5 }
 0xea8   :  { %v22474_v14 = vpop.xlane.xlu1 %22473  ;;  %22651 = vadd.xlane.f32.xlu0 %v22650_v50 }
 0xea9   :  { %v22553_v38 = vmul.f32 0.03125, %v22474_v14  ;;  %v33429_v29 = vsub.f32 %v33200_v43, %v22554_v8 }
 0xeaa   :  { %22648 = vadd.xlane.f32.xlu1 %v22647_v6 }
 0xeab   :  { %v33435_v2 = vsub.f32 %v33206_v32, %v22553_v38  ;;  %v22618_v43 = vmul.f32 %v33429_v29, %v33429_v29  ;;  %v22940_v38 = vld [vmem:[%s34547_s3 + $0x18] sm:$0xff] }
 0xeac   :  { %22657 = vadd.xlane.f32.xlu0 %v22656_v4  ;;  %26788 = vmatprep.subr.mxu0 %v22940_v38 }
 0xead   :  { %v22617_v13 = vmul.f32 %v33435_v2, %v33435_v2  ;;  %v22668_v46 = vsel %vm66_vm0, %v22618_v43, 0.0  ;;  %26789 = vmatpush3.msra.mxu0 %v22940_v38 }
 0xeae   :  { %22654 = vadd.xlane.f32.xlu1 %v22653_v36  ;;  %v22937_v36 = vld [vmem:[%s34547_s3] sm:$0xff] }
 0xeaf   :  { %v22665_v3 = vsel %vm66_vm0, %v22617_v13, 0.0 }
 0xeb0   :  { %22663 = vadd.xlane.f32.xlu0 %v22662_v61 }
 0xeb2   :  { %v22483_v47 = vpop.xlane.xlu0 %22482  ;;  %22660 = vadd.xlane.f32.xlu1 %v22659_v37 }
 0xeb3   :  { %v22556_v32 = vmul.f32 0.03125, %v22483_v47 }
 0xeb4   :  { %v22480_v18 = vpop.xlane.xlu1 %22479  ;;  %22669 = vadd.xlane.f32.xlu0 %v22668_v46 }
 0xeb5   :  { %v33448_v63 = vsub.f32 %v33216_v62, %v22556_v32  ;;  %v22555_v25 = vmul.f32 0.03125, %v22480_v18 }
 0xeb6   :  { %22666 = vadd.xlane.f32.xlu1 %v22665_v3 }
 0xeb7   :  { %v33452_v54 = vsub.f32 %v33222_v24, %v22555_v25  ;;  %v22620_v34 = vmul.f32 %v33448_v63, %v33448_v63 }
 0xeb9   :  { %v22674_v41 = vsel %vm66_vm0, %v22620_v34, 0.0  ;;  %v22619_v57 = vmul.f32 %v33452_v54, %v33452_v54 }
 0xeba   :  { %22675 = vadd.xlane.f32.xlu0 %v22674_v41 }
 0xebb   :  { %v22671_v20 = vsel %vm66_vm0, %v22619_v57, 0.0 }
 0xebc   :  { %22672 = vadd.xlane.f32.xlu1 %v22671_v20 }
 0xebd   :  { %v22489_v62 = vpop.xlane.xlu0 %22488 }
 0xebe   :  { %v22558_v40 = vmul.f32 0.03125, %v22489_v62 }
 0xebf   :  { %v22486_v39 = vpop.xlane.xlu1 %22485 }
 0xec0   :  { %v33461_v5 = vsub.f32 %v33232_v26, %v22558_v40  ;;  %v22557_v24 = vmul.f32 0.03125, %v22486_v39 }
 0xec2   :  { %v33464_v8 = vsub.f32 %v33238_v21, %v22557_v24  ;;  %v22622_v50 = vmul.f32 %v33461_v5, %v33461_v5  ;;  %v22939_v21 = vld [vmem:[%s34547_s3 + $0x10] sm:$0xff] }
 0xec3   :  { %26790 = vmatprep.subr.mxu0 %v22939_v21 }
 0xec4   :  { %v22680_v35 = vsel %vm66_vm0, %v22622_v50, 0.0  ;;  %v22621_v14 = vmul.f32 %v33464_v8, %v33464_v8  ;;  %26791 = vmatpush3.msra.mxu0 %v22939_v21 }
 0xec5   :  { %22681 = vadd.xlane.f32.xlu0 %v22680_v35  ;;  %26792 = vmatprep.subr.mxu0 %v22938_v53 }
 0xec6   :  { %v22677_v26 = vsel %vm66_vm0, %v22621_v14, 0.0  ;;  %26793 = vmatpush3.msra.mxu0 %v22938_v53 }
 0xec7   :  { %22678 = vadd.xlane.f32.xlu1 %v22677_v26  ;;  %26794 = vmatprep.subr.mxu0 %v22937_v36 }
 0xec8   :  { %26795 = vmatpush3.msra.mxu0 %v22937_v36 }
 0xec9   :  { %v22495_v6 = vpop.xlane.xlu0 %22494 }
 0xeca   :  { %v22560_v4 = vmul.f32 0.03125, %v22495_v6 }
 0xecb   :  { %v22492_v44 = vpop.xlane.xlu1 %22491 }
 0xecc   :  { %v33485_v48 = vsub.f32 %v33248_v27, %v22560_v4  ;;  %v22559_v61 = vmul.f32 0.03125, %v22492_v44 }
 0xece   :  { %v33488_v43 = vsub.f32 %v33254_v0, %v22559_v61  ;;  %v22624_v37 = vmul.f32 %v33485_v48, %v33485_v48 }
 0xed0   :  { %v22686_v13 = vsel %vm66_vm0, %v22624_v37, 0.0  ;;  %v22623_v47 = vmul.f32 %v33488_v43, %v33488_v43 }
 0xed1   :  { %22687 = vadd.xlane.f32.xlu0 %v22686_v13 }
 0xed2   :  { %v22683_v32 = vsel %vm66_vm0, %v22623_v47, 0.0 }
 0xed3   :  { %22684 = vadd.xlane.f32.xlu1 %v22683_v32 }
 0xed5   :  { %v22501_v27 = vpop.xlane.xlu0 %22500 }
 0xed6   :  { %v22562_v46 = vmul.f32 0.03125, %v22501_v27 }
 0xed7   :  { %v22498_v18 = vpop.xlane.xlu1 %22497 }
 0xed8   :  { %v33497_v25 = vsub.f32 %v33264_v11, %v22562_v46  ;;  %v22561_v0 = vmul.f32 0.03125, %v22498_v18 }
 0xeda   :  { %v33500_v3 = vsub.f32 %v33270_v1, %v22561_v0  ;;  %v22626_v34 = vmul.f32 %v33497_v25, %v33497_v25 }
 0xedc   :  { %v22692_v41 = vsel %vm66_vm0, %v22626_v34, 0.0  ;;  %v22625_v57 = vmul.f32 %v33500_v3, %v33500_v3 }
 0xedd   :  { %22693 = vadd.xlane.f32.xlu0 %v22692_v41 }
 0xede   :  { %v22689_v20 = vsel %vm66_vm0, %v22625_v57, 0.0 }
 0xedf   :  { %22690 = vadd.xlane.f32.xlu1 %v22689_v20 }
 0xee1   :  { %v22507_v62 = vpop.xlane.xlu0 %22506 }
 0xee2   :  { %v22564_v40 = vmul.f32 0.03125, %v22507_v62 }
 0xee3   :  { %v22504_v11 = vpop.xlane.xlu1 %22503 }
 0xee4   :  { %v33509_v39 = vsub.f32 %v33280_v9, %v22564_v40  ;;  %v22563_v1 = vmul.f32 0.03125, %v22504_v11 }
 0xee6   :  { %v33512_v24 = vsub.f32 %v33286_v17, %v22563_v1  ;;  %v22628_v50 = vmul.f32 %v33509_v39, %v33509_v39 }
 0xee8   :  { %v22698_v35 = vsel %vm66_vm0, %v22628_v50, 0.0  ;;  %v22627_v14 = vmul.f32 %v33512_v24, %v33512_v24 }
 0xee9   :  { %22699 = vadd.xlane.f32.xlu0 %v22698_v35 }
 0xeea   :  { %v22695_v38 = vsel %vm66_vm0, %v22627_v14, 0.0 }
 0xeeb   :  { %22696 = vadd.xlane.f32.xlu1 %v22695_v38 }
 0xeed   :  { %v22513_v26 = vpop.xlane.xlu0 %22512 }
 0xeee   :  { %v22566_v21 = vmul.f32 0.03125, %v22513_v26 }
 0xeef   :  { %v22510_v9 = vpop.xlane.xlu1 %22509 }
 0xef0   :  { %v33521_v6 = vsub.f32 %v33296_v55, %v22566_v21  ;;  %v22565_v17 = vmul.f32 0.03125, %v22510_v9 }
 0xef2   :  { %v33524_v53 = vsub.f32 %v33302_v45, %v22565_v17  ;;  %v22630_v4 = vmul.f32 %v33521_v6, %v33521_v6 }
 0xef4   :  { %v22704_v44 = vsel %vm66_vm0, %v22630_v4, 0.0  ;;  %v22629_v36 = vmul.f32 %v33524_v53, %v33524_v53 }
 0xef5   :  { %22705 = vadd.xlane.f32.xlu0 %v22704_v44 }
 0xef6   :  { %v22701_v61 = vsel %vm66_vm0, %v22629_v36, 0.0 }
 0xef7   :  { %22702 = vadd.xlane.f32.xlu1 %v22701_v61 }
 0xef9   :  { %v22519_v37 = vpop.xlane.xlu0 %22518 }
 0xefa   :  { %v22568_v13 = vmul.f32 0.03125, %v22519_v37 }
 0xefb   :  { %v22516_v55 = vpop.xlane.xlu1 %22515 }
 0xefc   :  { %v33533_v47 = vsub.f32 %v33312_v16, %v22568_v13  ;;  %v22567_v45 = vmul.f32 0.03125, %v22516_v55 }
 0xefe   :  { %v33536_v32 = vsub.f32 %v33318_v22, %v22567_v45  ;;  %v22632_v27 = vmul.f32 %v33533_v47, %v33533_v47 }
 0xf00   :  { %v22710_v46 = vsel %vm66_vm0, %v22632_v27, 0.0  ;;  %v22631_v18 = vmul.f32 %v33536_v32, %v33536_v32 }
 0xf01   :  { %22711 = vadd.xlane.f32.xlu0 %v22710_v46 }
 0xf02   :  { %v22707_v0 = vsel %vm66_vm0, %v22631_v18, 0.0 }
 0xf03   :  { %22708 = vadd.xlane.f32.xlu1 %v22707_v0 }
 0xf05   :  { %v22525_v34 = vpop.xlane.xlu0 %22524 }
 0xf06   :  { %v22570_v41 = vmul.f32 0.03125, %v22525_v34 }
 0xf07   :  { %v22522_v16 = vpop.xlane.xlu1 %22521 }
 0xf08   :  { %v33545_v57 = vsub.f32 %v33328_v51, %v22570_v41  ;;  %v22569_v22 = vmul.f32 0.03125, %v22522_v16 }
 0xf0a   :  { %v33548_v20 = vsub.f32 %v33334_v60, %v22569_v22  ;;  %v22634_v62 = vmul.f32 %v33545_v57, %v33545_v57 }
 0xf0c   :  { %v22716_v40 = vsel %vm66_vm0, %v22634_v62, 0.0  ;;  %v22633_v11 = vmul.f32 %v33548_v20, %v33548_v20 }
 0xf0d   :  { %22717 = vadd.xlane.f32.xlu0 %v22716_v40 }
 0xf0e   :  { %v22713_v1 = vsel %vm66_vm0, %v22633_v11, 0.0 }
 0xf0f   :  { %22714 = vadd.xlane.f32.xlu1 %v22713_v1 }
 0xf11   :  { %v22531_v50 = vpop.xlane.xlu0 %22530 }
 0xf12   :  { %v22572_v35 = vmul.f32 0.03125, %v22531_v50 }
 0xf13   :  { %v22528_v51 = vpop.xlane.xlu1 %22527 }
 0xf14   :  { %v33557_v14 = vsub.f32 %v33344_v31, %v22572_v35  ;;  %v22571_v60 = vmul.f32 0.03125, %v22528_v51 }
 0xf16   :  { %v33560_v38 = vsub.f32 %v33350_v23, %v22571_v60  ;;  %v22636_v26 = vmul.f32 %v33557_v14, %v33557_v14 }
 0xf18   :  { %v22722_v21 = vsel %vm66_vm0, %v22636_v26, 0.0  ;;  %v22635_v9 = vmul.f32 %v33560_v38, %v33560_v38 }
 0xf19   :  { %22723 = vadd.xlane.f32.xlu0 %v22722_v21 }
 0xf1a   :  { %v22719_v17 = vsel %vm66_vm0, %v22635_v9, 0.0 }
 0xf1b   :  { %22720 = vadd.xlane.f32.xlu1 %v22719_v17 }
 0xf1d   :  { %v22537_v4 = vpop.xlane.xlu0 %22536 }
 0xf1e   :  { %v22574_v44 = vmul.f32 0.03125, %v22537_v4 }
 0xf1f   :  { %v22534_v31 = vpop.xlane.xlu1 %22533 }
 0xf20   :  { %v33569_v36 = vsub.f32 %v33360_v56, %v22574_v44  ;;  %v22573_v23 = vmul.f32 0.03125, %v22534_v31 }
 0xf22   :  { %v33572_v61 = vsub.f32 %v33366_v28, %v22573_v23  ;;  %v22638_v37 = vmul.f32 %v33569_v36, %v33569_v36 }
 0xf24   :  { %v22728_v13 = vsel %vm66_vm0, %v22638_v37, 0.0  ;;  %v22637_v55 = vmul.f32 %v33572_v61, %v33572_v61 }
 0xf25   :  { %22729 = vadd.xlane.f32.xlu0 %v22728_v13 }
 0xf26   :  { %v22725_v45 = vsel %vm66_vm0, %v22637_v55, 0.0  ;;  %v22867_v55 = vsub.s32 4, %v35963_v12 }
 0xf27   :  { %22726 = vadd.xlane.f32.xlu1 %v22725_v45 }
 0xf29   :  { %v22543_v27 = vpop.xlane.xlu0 %22542 }
 0xf2a   :  { %v22576_v46 = vmul.f32 0.03125, %v22543_v27 }
 0xf2b   :  { %v22540_v56 = vpop.xlane.xlu1 %22539 }
 0xf2c   :  { %v33581_v18 = vsub.f32 %v33382_v15, %v22576_v46  ;;  %v22575_v28 = vmul.f32 0.03125, %v22540_v56 }
 0xf2d   :  { %v22646_v0 = vpop.xlane.xlu0 %22645 }
 0xf2e   :  { %v33584_v34 = vsub.f32 %v33393_v49, %v22575_v28  ;;  %v22738_v41 = vmul.f32 0.03125, %v22646_v0  ;;  %v22640_v16 = vmul.f32 %v33581_v18, %v33581_v18 }
 0xf2f   :  { %v22643_v22 = vpop.xlane.xlu1 %22642 }
 0xf30   :  { %v22770_v62 = vadd.f32 1e-05, %v22738_v41  ;;  %v22737_v40 = vmul.f32 0.03125, %v22643_v22  ;;  %v22734_v11 = vsel %vm66_vm0, %v22640_v16, 0.0  ;;  %v22639_v1 = vmul.f32 %v33584_v34, %v33584_v34 }
 0xf31   :  { %22735 = vadd.xlane.f32.xlu0 %v22734_v11  ;;  %v22652_v15 = vpop.xlane.xlu0 %22651  ;;  %v33594_v16 = vrot.slane %v33127_v59, %v22867_v55  ;;  %v22903_v22 = vsub.s32 5, %v35963_v12 }
 0xf32   :  { %27438 = vrsqrt.f32 %v22770_v62  ;;  %v22769_v50 = vadd.f32 1e-05, %v22737_v40  ;;  %v22740_v35 = vmul.f32 0.03125, %v22652_v15  ;;  %v22731_v49 = vsel %vm66_vm0, %v22639_v1, 0.0 }
 0xf33   :  { %22732 = vadd.xlane.f32.xlu1 %v22731_v49  ;;  %v22649_v51 = vpop.xlane.xlu1 %22648 }
 0xf34   :  { %27440 = vrsqrt.f32 %v22769_v50  ;;  %v22772_v60 = vadd.f32 1e-05, %v22740_v35  ;;  %v22739_v26 = vmul.f32 0.03125, %v22649_v51  ;;  %v33600_v51 = vrot.slane %v33127_v59, %v22903_v22 }
 0xf35   :  { %v22658_v21 = vpop.xlane.xlu0 %22657 }
 0xf36   :  { %27442 = vrsqrt.f32 %v22772_v60  ;;  %v22771_v9 = vadd.f32 1e-05, %v22739_v26  ;;  %v22742_v17 = vmul.f32 0.03125, %v22658_v21 }
 0xf37   :  { %v22655_v4 = vpop.xlane.xlu1 %22654 }
 0xf38   :  { %27444 = vrsqrt.f32 %v22771_v9  ;;  %v22774_v44 = vadd.f32 1e-05, %v22742_v17  ;;  %v22741_v31 = vmul.f32 0.03125, %v22655_v4 }
 0xf39   :  { %v22664_v23 = vpop.xlane.xlu0 %22663 }
 0xf3a   :  { %27446 = vrsqrt.f32 %v22774_v44  ;;  %v22773_v37 = vadd.f32 1e-05, %v22741_v31  ;;  %v22744_v13 = vmul.f32 0.03125, %v22664_v23 }
 0xf3b   :  { %v22661_v45 = vpop.xlane.xlu1 %22660 }
 0xf3c   :  { %27448 = vrsqrt.f32 %v22773_v37  ;;  %v22776_v27 = vadd.f32 1e-05, %v22744_v13  ;;  %v22743_v46 = vmul.f32 0.03125, %v22661_v45 }
 0xf3d   :  { %v22670_v56 = vpop.xlane.xlu0 %22669 }
 0xf3e   :  { %27450 = vrsqrt.f32 %v22776_v27  ;;  %v22775_v28 = vadd.f32 1e-05, %v22743_v46  ;;  %v22746_v0 = vmul.f32 0.03125, %v22670_v56 }
 0xf3f   :  { %v27439_v41 = vpop.eup %27438  ;;  %v22667_v62 = vpop.xlane.xlu1 %22666 }
 0xf40   :  { %v22834_v40 = vmul.f32 %v27439_v41, %v33373_v30  ;;  %27452 = vrsqrt.f32 %v22775_v28  ;;  %v22778_v11 = vadd.f32 1e-05, %v22746_v0  ;;  %v22745_v1 = vmul.f32 0.03125, %v22667_v62 }
 0xf41   :  { %v27441_v15 = vpop.eup %27440 }
 0xf42   :  { %27454 = vrsqrt.f32 %v22778_v11  ;;  %v22777_v50 = vadd.f32 1e-05, %v22745_v1  ;;  %v22833_v35 = vmul.f32 %v27441_v15, %v33377_v10  ;;  %v22870_v60 = vmul.f32 %v33594_v16, %v22834_v40 }
 0xf43   :  { %v27443_v49 = vpop.eup %27442  ;;  %v22676_v26 = vpop.xlane.xlu0 %22675 }
 0xf44   :  { %v22836_v21 = vmul.f32 %v27443_v49, %v33388_v7  ;;  %27456 = vrsqrt.f32 %v22777_v50  ;;  %v22748_v9 = vmul.f32 0.03125, %v22676_v26  ;;  %v22869_v4 = vmul.f32 %v33594_v16, %v22833_v35 }
 0xf45   :  { %v27445_v30 = vpop.eup %27444  ;;  %v22673_v17 = vpop.xlane.xlu1 %22672  ;;  %v33607_v37 = vadd.f32 %v33600_v51, %v22870_v60 }
 0xf46   :  { %v22780_v44 = vadd.f32 1e-05, %v22748_v9  ;;  %v22747_v31 = vmul.f32 0.03125, %v22673_v17  ;;  %v22835_v23 = vmul.f32 %v27445_v30, %v33398_v42  ;;  %v33610_v59 = vadd.f32 %v33600_v51, %v22869_v4 }
 0xf47   :  { %v27447_v10 = vpop.eup %27446  ;;  %v22872_v13 = vmul.f32 %v33594_v16, %v22836_v21 }
 0xf48   :  { %v22838_v7 = vmul.f32 %v27447_v10, %v33405_v52  ;;  %27458 = vrsqrt.f32 %v22780_v44  ;;  %v22779_v55 = vadd.f32 1e-05, %v22747_v31  ;;  %v22871_v45 = vmul.f32 %v33594_v16, %v22835_v23  ;;  %26796 = vmatprep.mubr.msk.f32.mxu0 %vm66_vm0, %v33610_v59  ;;  %v23305_v10 = vld [vmem:[%s34548_s4 + $0x38] sm:$0xff] }
 0xf49   :  { %v27449_v27 = vpop.eup %27448  ;;  %26797 = vmatmul.mubr.msk.f32.vlgmr.msra.gmra.mxu0 %vm66_vm0, %v33607_v37  ;;  %v33627_v28 = vadd.f32 %v33600_v51, %v22872_v13  ;;  %v23304_v13 = vld [vmem:[%s34548_s4 + $0x30] sm:$0xff]  ;;  %26844 = vmatprep.subr.mxu1 %v23305_v10 }
 0xf4a   :  { %27460 = vrsqrt.f32 %v22779_v55  ;;  %v33620_v42 = vadd.f32 %v33600_v51, %v22871_v45  ;;  %v22837_v46 = vmul.f32 %v27449_v27, %v33411_v33  ;;  %v22874_v41 = vmul.f32 %v33594_v16, %v22838_v7  ;;  %26845 = vmatpush3.msra.mxu1 %v23305_v10  ;;  %v23303_v45 = vld [vmem:[%s34548_s4 + $0x28] sm:$0xff] }
 0xf4b   :  { %v27451_v56 = vpop.eup %27450  ;;  %26846 = vmatprep.subr.mxu1 %v23304_v13 }
 0xf4c   :  { %v22840_v52 = vmul.f32 %v27451_v56, %v33417_v19  ;;  %26799 = vmatprep.mubr.msk.f32.mxu0 %vm66_vm0, %v33620_v42  ;;  %v22873_v0 = vmul.f32 %v33594_v16, %v22837_v46  ;;  %v33641_v50 = vadd.f32 %v33600_v51, %v22874_v41  ;;  %26847 = vmatpush3.msra.mxu1 %v23304_v13 }
 0xf4d   :  { %v27453_v22 = vpop.eup %27452  ;;  %26800 = vmatmul.mubr.msk.f32.gmra.mxu0 %vm66_vm0, %v33627_v28  ;;  %26848 = vmatprep.subr.mxu1 %v23303_v45 }
 0xf4e   :  { %v22682_v62 = vpop.xlane.xlu0 %22681  ;;  %v33634_v33 = vadd.f32 %v33600_v51, %v22873_v0  ;;  %v22839_v19 = vmul.f32 %v27453_v22, %v33423_v58  ;;  %v22876_v49 = vmul.f32 %v33594_v16, %v22840_v52  ;;  %26849 = vmatpush3.msra.mxu1 %v23303_v45 }
 0xf4f   :  { %v27455_v40 = vpop.eup %27454  ;;  %v22750_v11 = vmul.f32 0.03125, %v22682_v62 }
 0xf50   :  { %v22842_v1 = vmul.f32 %v27455_v40, %v33429_v29  ;;  %v22679_v15 = vpop.xlane.xlu1 %22678  ;;  %26802 = vmatprep.mubr.msk.f32.mxu0 %vm66_vm0, %v33634_v33  ;;  %v22875_v35 = vmul.f32 %v33594_v16, %v22839_v19  ;;  %v33654_v30 = vadd.f32 %v33600_v51, %v22876_v49 }
 0xf51   :  { %v27457_v60 = vpop.eup %27456  ;;  %v22782_v26 = vadd.f32 1e-05, %v22750_v11  ;;  %v22749_v21 = vmul.f32 0.03125, %v22679_v15  ;;  %26803 = vmatmul.mubr.msk.f32.gmra.mxu0 %vm66_vm0, %v33641_v50 }
 0xf52   :  { %v33648_v58 = vadd.f32 %v33600_v51, %v22875_v35  ;;  %v22841_v29 = vmul.f32 %v27457_v60, %v33435_v2  ;;  %v22878_v4 = vmul.f32 %v33594_v16, %v22842_v1 }
 0xf53   :  { %27462 = vrsqrt.f32 %v22782_v26  ;;  %v22781_v9 = vadd.f32 1e-05, %v22749_v21 }
 0xf54   :  { %26805 = vmatprep.mubr.msk.f32.mxu0 %vm66_vm0, %v33648_v58  ;;  %v22877_v17 = vmul.f32 %v33594_v16, %v22841_v29 }
 0xf55   :  { %v27459_v44 = vpop.eup %27458  ;;  %27464 = vrsqrt.f32 %v22781_v9  ;;  %26806 = vmatmul.mubr.msk.f32.gmra.mxu0 %vm66_vm0, %v33654_v30 }
 0xf56   :  { %v22844_v31 = vmul.f32 %v27459_v44, %v33448_v63  ;;  %v33662_v2 = vadd.f32 %v33600_v51, %v22877_v17  ;;  %v33673_v63 = vadd.f32 %v33600_v51, %v22878_v4 }
 0xf57   :  { %v27461_v23 = vpop.eup %27460 }
 0xf58   :  { %26808 = vmatprep.mubr.msk.f32.mxu0 %vm66_vm0, %v33662_v2  ;;  %v22843_v7 = vmul.f32 %v27461_v23, %v33452_v54  ;;  %v22880_v55 = vmul.f32 %v33594_v16, %v22844_v31  ;;  %v23302_v54 = vld [vmem:[%s34548_s4 + $0x20] sm:$0xff] }
 0xf59   :  { %26809 = vmatmul.mubr.msk.f32.gmra.mxu0 %vm66_vm0, %v33673_v63  ;;  %26850 = vmatprep.subr.mxu1 %v23302_v54 }
 0xf5a   :  { %v22688_v27 = vpop.xlane.xlu0 %22687  ;;  %v22879_v46 = vmul.f32 %v33594_v16, %v22843_v7  ;;  %v33690_v62 = vadd.f32 %v33600_v51, %v22880_v55  ;;  %26851 = vmatpush3.msra.mxu1 %v23302_v54 }
 0xf5b   :  { %v22752_v56 = vmul.f32 0.03125, %v22688_v27 }
 0xf5c   :  { %v22685_v52 = vpop.xlane.xlu1 %22684  ;;  %v33687_v0 = vadd.f32 %v33600_v51, %v22879_v46 }
 0xf5d   :  { %v22784_v41 = vadd.f32 1e-05, %v22752_v56  ;;  %v22751_v22 = vmul.f32 0.03125, %v22685_v52 }
 0xf5e   :  { %26811 = vmatprep.mubr.msk.f32.mxu0 %vm66_vm0, %v33687_v0 }
 0xf5f   :  { %27466 = vrsqrt.f32 %v22784_v41  ;;  %v22783_v19 = vadd.f32 1e-05, %v22751_v22  ;;  %26812 = vmatmul.mubr.msk.f32.gmra.mxu0 %vm66_vm0, %v33690_v62 }
 0xf60   :  { %v27463_v40 = vpop.eup %27462 }
 0xf61   :  { %v22846_v11 = vmul.f32 %v27463_v40, %v33461_v5  ;;  %27468 = vrsqrt.f32 %v22783_v19 }
 0xf62   :  { %v27465_v1 = vpop.eup %27464 }
 0xf63   :  { %v22845_v15 = vmul.f32 %v27465_v1, %v33464_v8  ;;  %v22882_v35 = vmul.f32 %v33594_v16, %v22846_v11 }
 0xf65   :  { %v22881_v49 = vmul.f32 %v33594_v16, %v22845_v15  ;;  %v33704_v9 = vadd.f32 %v33600_v51, %v22882_v35 }
 0xf66   :  { %v22694_v60 = vpop.xlane.xlu0 %22693 }
 0xf67   :  { %v22754_v26 = vmul.f32 0.03125, %v22694_v60  ;;  %v33701_v21 = vadd.f32 %v33600_v51, %v22881_v49 }
 0xf68   :  { %v22691_v29 = vpop.xlane.xlu1 %22690 }
 0xf69   :  { %v22786_v17 = vadd.f32 1e-05, %v22754_v26  ;;  %v22753_v4 = vmul.f32 0.03125, %v22691_v29  ;;  %26814 = vmatprep.mubr.msk.f32.mxu0 %vm66_vm0, %v33701_v21 }
 0xf6a   :  { %26815 = vmatmul.mubr.msk.f32.gmra.mxu0 %vm66_vm0, %v33704_v9 }
 0xf6b   :  { %27470 = vrsqrt.f32 %v22786_v17  ;;  %v22785_v5 = vadd.f32 1e-05, %v22753_v4 }
 0xf6c   :  { %v27467_v8 = vpop.eup %27466 }
 0xf6d   :  { %v22848_v44 = vmul.f32 %v27467_v8, %v33485_v48  ;;  %27472 = vrsqrt.f32 %v22785_v5 }
 0xf6e   :  { %v27469_v31 = vpop.eup %27468 }
 0xf6f   :  { %v22847_v23 = vmul.f32 %v27469_v31, %v33488_v43  ;;  %v22884_v10 = vmul.f32 %v33594_v16, %v22848_v44 }
 0xf71   :  { %v22883_v13 = vmul.f32 %v33594_v16, %v22847_v23  ;;  %v33718_v46 = vadd.f32 %v33600_v51, %v22884_v10 }
 0xf72   :  { %v22700_v7 = vpop.xlane.xlu0 %22699 }
 0xf73   :  { %v22756_v55 = vmul.f32 0.03125, %v22700_v7  ;;  %v33715_v45 = vadd.f32 %v33600_v51, %v22883_v13 }
 0xf74   :  { %v22697_v27 = vpop.xlane.xlu1 %22696 }
 0xf75   :  { %v22788_v56 = vadd.f32 1e-05, %v22756_v55  ;;  %v22755_v54 = vmul.f32 0.03125, %v22697_v27  ;;  %26817 = vmatprep.mubr.msk.f32.mxu0 %vm66_vm0, %v33715_v45  ;;  %v23300_v27 = vld [vmem:[%s34548_s4 + $0x10] sm:$0xff] }
 0xf76   :  { %26818 = vmatmul.mubr.msk.f32.gmra.mxu0 %vm66_vm0, %v33718_v46 }
 0xf77   :  { %27474 = vrsqrt.f32 %v22788_v56  ;;  %v22787_v48 = vadd.f32 1e-05, %v22755_v54 }
 0xf78   :  { %v27471_v43 = vpop.eup %27470 }
 0xf79   :  { %v22850_v52 = vmul.f32 %v27471_v43, %v33497_v25  ;;  %27476 = vrsqrt.f32 %v22787_v48  ;;  %v23299_v48 = vld [vmem:[%s34548_s4 + $0x8] sm:$0xff] }
 0xf7a   :  { %v27473_v41 = vpop.eup %27472 }
 0xf7b   :  { %v22849_v22 = vmul.f32 %v27473_v41, %v33500_v3  ;;  %v22886_v19 = vmul.f32 %v33594_v16, %v22850_v52  ;;  %v23298_v41 = vld [vmem:[%s34548_s4] sm:$0xff] }
 0xf7d   :  { %v22885_v40 = vmul.f32 %v33594_v16, %v22849_v22  ;;  %v33732_v49 = vadd.f32 %v33600_v51, %v22886_v19 }
 0xf7e   :  { %v22706_v11 = vpop.xlane.xlu0 %22705 }
 0xf7f   :  { %v22758_v1 = vmul.f32 0.03125, %v22706_v11  ;;  %v33729_v15 = vadd.f32 %v33600_v51, %v22885_v40 }
 0xf80   :  { %v22703_v35 = vpop.xlane.xlu1 %22702 }
 0xf81   :  { %v22790_v60 = vadd.f32 1e-05, %v22758_v1  ;;  %v22757_v26 = vmul.f32 0.03125, %v22703_v35  ;;  %26820 = vmatprep.mubr.msk.f32.mxu0 %vm66_vm0, %v33729_v15 }
 0xf82   :  { %26821 = vmatmul.mubr.msk.f32.gmra.mxu0 %vm66_vm0, %v33732_v49 }
 0xf83   :  { %27478 = vrsqrt.f32 %v22790_v60  ;;  %v22789_v25 = vadd.f32 1e-05, %v22757_v26 }
 0xf84   :  { %v27475_v3 = vpop.eup %27474 }
 0xf85   :  { %v22852_v29 = vmul.f32 %v27475_v3, %v33509_v39  ;;  %27480 = vrsqrt.f32 %v22789_v25  ;;  %v23301_v39 = vld [vmem:[%s34548_s4 + $0x18] sm:$0xff] }
 0xf86   :  { %v27477_v17 = vpop.eup %27476  ;;  %26852 = vmatprep.subr.mxu1 %v23301_v39 }
 0xf87   :  { %v22851_v4 = vmul.f32 %v27477_v17, %v33512_v24  ;;  %v22888_v5 = vmul.f32 %v33594_v16, %v22852_v29  ;;  %26853 = vmatpush3.msra.mxu1 %v23301_v39 }
 0xf88   :  { %26854 = vmatprep.subr.mxu1 %v23300_v27 }
 0xf89   :  { %v22887_v8 = vmul.f32 %v33594_v16, %v22851_v4  ;;  %v33746_v13 = vadd.f32 %v33600_v51, %v22888_v5  ;;  %26855 = vmatpush3.msra.mxu1 %v23300_v27 }
 0xf8a   :  { %v22712_v44 = vpop.xlane.xlu0 %22711  ;;  %26856 = vmatprep.subr.mxu1 %v23299_v48 }
 0xf8b   :  { %v22760_v31 = vmul.f32 0.03125, %v22712_v44  ;;  %v33743_v23 = vadd.f32 %v33600_v51, %v22887_v8  ;;  %26857 = vmatpush3.msra.mxu1 %v23299_v48 }
 0xf8c   :  { %v22709_v10 = vpop.xlane.xlu1 %22708  ;;  %26858 = vmatprep.subr.mxu1 %v23298_v41 }
 0xf8d   :  { %v22792_v7 = vadd.f32 1e-05, %v22760_v31  ;;  %v22759_v55 = vmul.f32 0.03125, %v22709_v10  ;;  %26823 = vmatprep.mubr.msk.f32.mxu0 %vm66_vm0, %v33743_v23  ;;  %26859 = vmatpush3.msra.mxu1 %v23298_v41 }
 0xf8e   :  { %26824 = vmatmul.mubr.msk.f32.gmra.mxu0 %vm66_vm0, %v33746_v13 }
 0xf8f   :  { %27482 = vrsqrt.f32 %v22792_v7  ;;  %v22791_v24 = vadd.f32 1e-05, %v22759_v55 }
 0xf90   :  { %v27479_v56 = vpop.eup %27478 }
 0xf91   :  { %v22854_v54 = vmul.f32 %v27479_v56, %v33521_v6  ;;  %27484 = vrsqrt.f32 %v22791_v24 }
 0xf92   :  { %v27481_v43 = vpop.eup %27480 }
 0xf93   :  { %v22853_v52 = vmul.f32 %v27481_v43, %v33524_v53  ;;  %v22890_v22 = vmul.f32 %v33594_v16, %v22854_v54 }
 0xf95   :  { %v22889_v6 = vmul.f32 %v33594_v16, %v22853_v52  ;;  %v33772_v35 = vadd.f32 %v33600_v51, %v22890_v22 }
 0xf96   :  { %v22718_v19 = vpop.xlane.xlu0 %22717 }
 0xf97   :  { %v22762_v40 = vmul.f32 0.03125, %v22718_v19  ;;  %v33769_v11 = vadd.f32 %v33600_v51, %v22889_v6 }
 0xf98   :  { %v22715_v1 = vpop.xlane.xlu1 %22714 }
 0xf99   :  { %v22794_v53 = vadd.f32 1e-05, %v22762_v40  ;;  %v22761_v60 = vmul.f32 0.03125, %v22715_v1  ;;  %26826 = vmatprep.mubr.msk.f32.mxu0 %vm66_vm0, %v33769_v11 }
 0xf9a   :  { %26827 = vmatmul.mubr.msk.f32.gmra.mxu0 %vm66_vm0, %v33772_v35 }
 0xf9b   :  { %27486 = vrsqrt.f32 %v22794_v53  ;;  %v22793_v26 = vadd.f32 1e-05, %v22761_v60 }
 0xf9c   :  { %v27483_v25 = vpop.eup %27482 }
 0xf9d   :  { %v22856_v3 = vmul.f32 %v27483_v25, %v33533_v47  ;;  %27488 = vrsqrt.f32 %v22793_v26 }
 0xf9e   :  { %v27485_v29 = vpop.eup %27484 }
 0xf9f   :  { %v22855_v17 = vmul.f32 %v27485_v29, %v33536_v32  ;;  %v22892_v4 = vmul.f32 %v33594_v16, %v22856_v3 }
 0xfa1   :  { %v22891_v5 = vmul.f32 %v33594_v16, %v22855_v17  ;;  %v33786_v7 = vadd.f32 %v33600_v51, %v22892_v4 }
 0xfa2   :  { %v22724_v8 = vpop.xlane.xlu0 %22723 }
 0xfa3   :  { %v22764_v44 = vmul.f32 0.03125, %v22724_v8  ;;  %v33783_v31 = vadd.f32 %v33600_v51, %v22891_v5 }
 0xfa4   :  { %v22721_v10 = vpop.xlane.xlu1 %22720 }
 0xfa5   :  { %v22796_v55 = vadd.f32 1e-05, %v22764_v44  ;;  %v22763_v39 = vmul.f32 0.03125, %v22721_v10  ;;  %26829 = vmatprep.mubr.msk.f32.mxu0 %vm66_vm0, %v33783_v31 }
 0xfa6   :  { %26830 = vmatmul.mubr.msk.f32.gmra.mxu0 %vm66_vm0, %v33786_v7 }
 0xfa7   :  { %27490 = vrsqrt.f32 %v22796_v55  ;;  %v22795_v47 = vadd.f32 1e-05, %v22763_v39 }
 0xfa8   :  { %v27487_v32 = vpop.eup %27486 }
 0xfa9   :  { %v22858_v24 = vmul.f32 %v27487_v32, %v33545_v57  ;;  %27492 = vrsqrt.f32 %v22795_v47 }
 0xfaa   :  { %v27489_v27 = vpop.eup %27488 }
 0xfab   :  { %v22857_v56 = vmul.f32 %v27489_v27, %v33548_v20  ;;  %v22894_v54 = vmul.f32 %v33594_v16, %v22858_v24 }
 0xfad   :  { %v22893_v48 = vmul.f32 %v33594_v16, %v22857_v56  ;;  %v33800_v6 = vadd.f32 %v33600_v51, %v22894_v54 }
 0xfae   :  { %v22730_v43 = vpop.xlane.xlu0 %22729 }
 0xfaf   :  { %v22766_v52 = vmul.f32 0.03125, %v22730_v43  ;;  %v33797_v41 = vadd.f32 %v33600_v51, %v22893_v48 }
 0xfb0   :  { %v22727_v22 = vpop.xlane.xlu1 %22726 }
 0xfb1   :  { %v22798_v19 = vadd.f32 1e-05, %v22766_v52  ;;  %v22765_v40 = vmul.f32 0.03125, %v22727_v22  ;;  %26832 = vmatprep.mubr.msk.f32.mxu0 %vm66_vm0, %v33797_v41 }
 0xfb2   :  { %26833 = vmatmul.mubr.msk.f32.gmra.mxu0 %vm66_vm0, %v33800_v6 }
 0xfb3   :  { %27494 = vrsqrt.f32 %v22798_v19  ;;  %v22797_v57 = vadd.f32 1e-05, %v22765_v40 }
 0xfb4   :  { %v27491_v20 = vpop.eup %27490 }
 0xfb5   :  { %v22860_v1 = vmul.f32 %v27491_v20, %v33557_v14  ;;  %27496 = vrsqrt.f32 %v22797_v57 }
 0xfb6   :  { %v27493_v53 = vpop.eup %27492 }
 0xfb7   :  { %v22859_v60 = vmul.f32 %v27493_v53, %v33560_v38  ;;  %v22896_v26 = vmul.f32 %v33594_v16, %v22860_v1 }
 0xfb9   :  { %v22895_v25 = vmul.f32 %v33594_v16, %v22859_v60  ;;  %v33814_v5 = vadd.f32 %v33600_v51, %v22896_v26 }
 0xfba   :  { %v22736_v3 = vpop.xlane.xlu0 %22735 }
 0xfbb   :  { %v22768_v29 = vmul.f32 0.03125, %v22736_v3  ;;  %v33811_v17 = vadd.f32 %v33600_v51, %v22895_v25 }
 0xfbc   :  { %v22733_v4 = vpop.xlane.xlu1 %22732 }
 0xfbd   :  { %v22800_v8 = vadd.f32 1e-05, %v22768_v29  ;;  %v22767_v44 = vmul.f32 0.03125, %v22733_v4  ;;  %26835 = vmatprep.mubr.msk.f32.mxu0 %vm66_vm0, %v33811_v17 }
 0xfbe   :  { %26836 = vmatmul.mubr.msk.f32.gmra.mxu0 %vm66_vm0, %v33814_v5 }
 0xfbf   :  { %27498 = vrsqrt.f32 %v22800_v8  ;;  %v22799_v14 = vadd.f32 1e-05, %v22767_v44 }
 0xfc0   :  { %v27495_v38 = vpop.eup %27494 }
 0xfc1   :  { %v22862_v10 = vmul.f32 %v27495_v38, %v33569_v36  ;;  %27500 = vrsqrt.f32 %v22799_v14 }
 0xfc2   :  { %v27497_v55 = vpop.eup %27496 }
 0xfc3   :  { %v22861_v39 = vmul.f32 %v27497_v55, %v33572_v61  ;;  %v22898_v47 = vmul.f32 %v33594_v16, %v22862_v10 }
 0xfc5   :  { %v22897_v32 = vmul.f32 %v33594_v16, %v22861_v39  ;;  %v33828_v27 = vadd.f32 %v33600_v51, %v22898_v47 }
 0xfc7   :  { %v33825_v24 = vadd.f32 %v33600_v51, %v22897_v32 }
 0xfc9   :  { %26838 = vmatprep.mubr.msk.f32.mxu0 %vm66_vm0, %v33825_v24 }
 0xfca   :  { %26839 = vmatmul.mubr.msk.f32.gmra.mxu0 %vm66_vm0, %v33828_v27 }
 0xfcc   :  { %v27499_v36 = vpop.eup %27498 }
 0xfcd   :  { %v22864_v56 = vmul.f32 %v27499_v36, %v33581_v18  ;;  %v22943_v18 = vsub.s32 2, %v35963_v12 }
 0xfce   :  { %v27501_v61 = vpop.eup %27500 }
 0xfcf   :  { %v22863_v54 = vmul.f32 %v27501_v61, %v33584_v34  ;;  %v22900_v48 = vmul.f32 %v33594_v16, %v22864_v56  ;;  %v33852_v34 = vld [vmem:[%s34544_s5] sm:$0xff] }
 0xfd1   :  { %v22899_v43 = vmul.f32 %v33594_v16, %v22863_v54  ;;  %v33842_v22 = vadd.f32 %v33600_v51, %v22900_v48  ;;  %v33855_v16 = vrot.slane %v33852_v34, %v22943_v18 }
 0xfd3   :  { %v33839_v52 = vadd.f32 %v33600_v51, %v22899_v43 }
 0xfd5   :  { %26841 = vmatprep.mubr.msk.f32.mxu0 %vm66_vm0, %v33839_v52 }
 0xfd6   :  { %26842 = vmatmul.mubr.msk.f32.gmra.mxu0 %vm66_vm0, %v33842_v22 }
0x1009   :  { %v26798_v19 = vpop.f32.mrf.mxu0 }
0x100a   :  { %v23113_v51 = vadd.f32 %v26798_v19, %v33855_v16 }
0x100b   :  { %v23107_v40 = vpop.f32.mrf.mxu0 }
0x100c   :  { %v23108_v57 = vadd.f32 %v23107_v40, %v33855_v16  ;;  %v23267_v53 = vmax.f32 %v23113_v51, 0.0 }
0x100d   :  { %v26801_v20 = vpop.f32.mrf.mxu0 }
0x100e   :  { %v23266_v1 = vmax.f32 %v23108_v57, 0.0  ;;  %v23123_v60 = vadd.f32 %v26801_v20, %v33855_v16 }
0x100f   :  { %v23117_v26 = vpop.f32.mrf.mxu0 }
0x1010   :  { %v23118_v25 = vadd.f32 %v23117_v26, %v33855_v16  ;;  %26860 = vmatprep.mubr.msk.f32.mxu1 %vm23310_vm5, %v23266_v1  ;;  %v23269_v4 = vmax.f32 %v23123_v60, 0.0 }
0x1011   :  { %v26804_v3 = vpop.f32.mrf.mxu0  ;;  %26861 = vmatmul.mubr.msk.f32.vlgmr.msra.gmra.mxu1 %vm23310_vm5, %v23267_v53 }
0x1012   :  { %v23268_v29 = vmax.f32 %v23118_v25, 0.0  ;;  %v23133_v8 = vadd.f32 %v26804_v3, %v33855_v16 }
0x1013   :  { %v23127_v44 = vpop.f32.mrf.mxu0 }
0x1014   :  { %v23128_v14 = vadd.f32 %v23127_v44, %v33855_v16  ;;  %26863 = vmatprep.mubr.msk.f32.mxu1 %vm23310_vm5, %v23268_v29  ;;  %v23271_v55 = vmax.f32 %v23133_v8, 0.0 }
0x1015   :  { %v26807_v38 = vpop.f32.mrf.mxu0  ;;  %26864 = vmatmul.mubr.msk.f32.gmra.mxu1 %vm23310_vm5, %v23269_v4 }
0x1016   :  { %v23270_v10 = vmax.f32 %v23128_v14, 0.0  ;;  %v23143_v39 = vadd.f32 %v26807_v38, %v33855_v16 }
0x1017   :  { %v23137_v47 = vpop.f32.mrf.mxu0 }
0x1018   :  { %v23138_v32 = vadd.f32 %v23137_v47, %v33855_v16  ;;  %26866 = vmatprep.mubr.msk.f32.mxu1 %vm23310_vm5, %v23270_v10  ;;  %v23273_v61 = vmax.f32 %v23143_v39, 0.0 }
0x1019   :  { %v26810_v36 = vpop.f32.mrf.mxu0  ;;  %26867 = vmatmul.mubr.msk.f32.gmra.mxu1 %vm23310_vm5, %v23271_v55 }
0x101a   :  { %v23272_v56 = vmax.f32 %v23138_v32, 0.0  ;;  %v23153_v54 = vadd.f32 %v26810_v36, %v33855_v16 }
0x101b   :  { %v23147_v48 = vpop.f32.mrf.mxu0 }
0x101c   :  { %v23148_v43 = vadd.f32 %v23147_v48, %v33855_v16  ;;  %26869 = vmatprep.mubr.msk.f32.mxu1 %vm23310_vm5, %v23272_v56  ;;  %v23275_v51 = vmax.f32 %v23153_v54, 0.0 }
0x101d   :  { %26870 = vmatmul.mubr.msk.f32.gmra.mxu1 %vm23310_vm5, %v23273_v61 }
0x101e   :  { %v23274_v18 = vmax.f32 %v23148_v43, 0.0 }
0x101f   :  { %v26813_v19 = vpop.f32.mrf.mxu0 }
0x1020   :  { %v23163_v40 = vadd.f32 %v26813_v19, %v33855_v16  ;;  %26872 = vmatprep.mubr.msk.f32.mxu1 %vm23310_vm5, %v23274_v18 }
0x1021   :  { %v23157_v57 = vpop.f32.mrf.mxu0  ;;  %26873 = vmatmul.mubr.msk.f32.gmra.mxu1 %vm23310_vm5, %v23275_v51 }
0x1022   :  { %v23158_v20 = vadd.f32 %v23157_v57, %v33855_v16  ;;  %v23277_v53 = vmax.f32 %v23163_v40, 0.0 }
0x1024   :  { %v23276_v1 = vmax.f32 %v23158_v20, 0.0 }
0x1026   :  { %26875 = vmatprep.mubr.msk.f32.mxu1 %vm23310_vm5, %v23276_v1 }
0x1027   :  { %26876 = vmatmul.mubr.msk.f32.gmra.mxu1 %vm23310_vm5, %v23277_v53 }
0x102a   :  { %v26816_v60 = vpop.f32.mrf.mxu0 }
0x102b   :  { %v23173_v26 = vadd.f32 %v26816_v60, %v33855_v16 }
0x102c   :  { %v23167_v25 = vpop.f32.mrf.mxu0 }
0x102d   :  { %v23168_v3 = vadd.f32 %v23167_v25, %v33855_v16  ;;  %v23279_v4 = vmax.f32 %v23173_v26, 0.0 }
0x102f   :  { %v23278_v29 = vmax.f32 %v23168_v3, 0.0 }
0x1031   :  { %26878 = vmatprep.mubr.msk.f32.mxu1 %vm23310_vm5, %v23278_v29 }
0x1032   :  { %26879 = vmatmul.mubr.msk.f32.gmra.mxu1 %vm23310_vm5, %v23279_v4 }
0x1036   :  { %v26819_v8 = vpop.f32.mrf.mxu0 }
0x1037   :  { %v23183_v44 = vadd.f32 %v26819_v8, %v33855_v16 }
0x1038   :  { %v23177_v14 = vpop.f32.mrf.mxu0 }
0x1039   :  { %v23178_v38 = vadd.f32 %v23177_v14, %v33855_v16  ;;  %v23281_v55 = vmax.f32 %v23183_v44, 0.0 }
0x103b   :  { %v23280_v10 = vmax.f32 %v23178_v38, 0.0 }
0x103d   :  { %26881 = vmatprep.mubr.msk.f32.mxu1 %vm23310_vm5, %v23280_v10 }
0x103e   :  { %26882 = vmatmul.mubr.msk.f32.gmra.mxu1 %vm23310_vm5, %v23281_v55 }
0x1042   :  { %v26822_v39 = vpop.f32.mrf.mxu0 }
0x1043   :  { %v23193_v47 = vadd.f32 %v26822_v39, %v33855_v16 }
0x1044   :  { %v23187_v32 = vpop.f32.mrf.mxu0 }
0x1045   :  { %v23188_v36 = vadd.f32 %v23187_v32, %v33855_v16  ;;  %v23283_v61 = vmax.f32 %v23193_v47, 0.0 }
0x1047   :  { %v23282_v56 = vmax.f32 %v23188_v36, 0.0 }
0x1049   :  { %26884 = vmatprep.mubr.msk.f32.mxu1 %vm23310_vm5, %v23282_v56 }
0x104a   :  { %26885 = vmatmul.mubr.msk.f32.gmra.mxu1 %vm23310_vm5, %v23283_v61 }
0x104e   :  { %v26825_v54 = vpop.f32.mrf.mxu0 }
0x104f   :  { %v23203_v48 = vadd.f32 %v26825_v54, %v33855_v16 }
0x1050   :  { %v23197_v43 = vpop.f32.mrf.mxu0 }
0x1051   :  { %v23198_v18 = vadd.f32 %v23197_v43, %v33855_v16  ;;  %v23285_v51 = vmax.f32 %v23203_v48, 0.0 }
0x1053   :  { %v23284_v19 = vmax.f32 %v23198_v18, 0.0 }
0x1055   :  { %26887 = vmatprep.mubr.msk.f32.mxu1 %vm23310_vm5, %v23284_v19 }
0x1056   :  { %26888 = vmatmul.mubr.msk.f32.gmra.mxu1 %vm23310_vm5, %v23285_v51 }
0x105a   :  { %v26828_v40 = vpop.f32.mrf.mxu0 }
0x105b   :  { %v23213_v57 = vadd.f32 %v26828_v40, %v33855_v16 }
0x105c   :  { %v23207_v20 = vpop.f32.mrf.mxu0 }
0x105d   :  { %v23208_v1 = vadd.f32 %v23207_v20, %v33855_v16  ;;  %v23287_v60 = vmax.f32 %v23213_v57, 0.0 }
0x105f   :  { %v23286_v53 = vmax.f32 %v23208_v1, 0.0 }
0x1061   :  { %26890 = vmatprep.mubr.msk.f32.mxu1 %vm23310_vm5, %v23286_v53 }
0x1062   :  { %26891 = vmatmul.mubr.msk.f32.gmra.mxu1 %vm23310_vm5, %v23287_v60 }
0x1066   :  { %v26831_v26 = vpop.f32.mrf.mxu0 }
0x1067   :  { %v23223_v25 = vadd.f32 %v26831_v26, %v33855_v16 }
0x1068   :  { %v23217_v3 = vpop.f32.mrf.mxu0 }
0x1069   :  { %v23218_v29 = vadd.f32 %v23217_v3, %v33855_v16  ;;  %v23289_v8 = vmax.f32 %v23223_v25, 0.0  ;;  %v23308_v25 = vsub.s32 3, %v35963_v12 }
0x106b   :  { %v23288_v4 = vmax.f32 %v23218_v29, 0.0  ;;  %v33923_v3 = vrot.slane %v33852_v34, %v23308_v25 }
0x106d   :  { %26893 = vmatprep.mubr.msk.f32.mxu1 %vm23310_vm5, %v23288_v4 }
0x106e   :  { %26894 = vmatmul.mubr.msk.f32.gmra.mxu1 %vm23310_vm5, %v23289_v8 }
0x1072   :  { %v26834_v44 = vpop.f32.mrf.mxu0 }
0x1073   :  { %v23233_v14 = vadd.f32 %v26834_v44, %v33855_v16 }
0x1074   :  { %v23227_v38 = vpop.f32.mrf.mxu0 }
0x1075   :  { %v23228_v10 = vadd.f32 %v23227_v38, %v33855_v16  ;;  %v23291_v39 = vmax.f32 %v23233_v14, 0.0 }
0x1077   :  { %v23290_v55 = vmax.f32 %v23228_v10, 0.0 }
0x1079   :  { %26896 = vmatprep.mubr.msk.f32.mxu1 %vm23310_vm5, %v23290_v55 }
0x107a   :  { %26897 = vmatmul.mubr.msk.f32.gmra.mxu1 %vm23310_vm5, %v23291_v39 }
0x107e   :  { %v26837_v47 = vpop.f32.mrf.mxu0 }
0x107f   :  { %v23243_v32 = vadd.f32 %v26837_v47, %v33855_v16 }
0x1080   :  { %v23237_v36 = vpop.f32.mrf.mxu0 }
0x1081   :  { %v23238_v56 = vadd.f32 %v23237_v36, %v33855_v16  ;;  %v23293_v54 = vmax.f32 %v23243_v32, 0.0 }
0x1083   :  { %v23292_v61 = vmax.f32 %v23238_v56, 0.0 }
0x1085   :  { %26899 = vmatprep.mubr.msk.f32.mxu1 %vm23310_vm5, %v23292_v61 }
0x1086   :  { %26900 = vmatmul.mubr.msk.f32.gmra.mxu1 %vm23310_vm5, %v23293_v54 }
0x108a   :  { %v26840_v48 = vpop.f32.mrf.mxu0 }
0x108b   :  { %v23253_v43 = vadd.f32 %v26840_v48, %v33855_v16 }
0x108c   :  { %v23247_v18 = vpop.f32.mrf.mxu0 }
0x108d   :  { %v23248_v19 = vadd.f32 %v23247_v18, %v33855_v16  ;;  %v23295_v40 = vmax.f32 %v23253_v43, 0.0 }
0x108f   :  { %v23294_v51 = vmax.f32 %v23248_v19, 0.0 }
0x1091   :  { %26902 = vmatprep.mubr.msk.f32.mxu1 %vm23310_vm5, %v23294_v51 }
0x1092   :  { %26903 = vmatmul.mubr.msk.f32.gmra.mxu1 %vm23310_vm5, %v23295_v40 }
0x1096   :  { %v26843_v57 = vpop.f32.mrf.mxu0 }
0x1097   :  { %v23263_v20 = vadd.f32 %v26843_v57, %v33855_v16 }
0x1098   :  { %v23257_v1 = vpop.f32.mrf.mxu0 }
0x1099   :  { %v23258_v53 = vadd.f32 %v23257_v1, %v33855_v16  ;;  %v23297_v26 = vmax.f32 %v23263_v20, 0.0 }
0x109b   :  { %v23296_v60 = vmax.f32 %v23258_v53, 0.0 }
0x109d   :  { %26905 = vmatprep.mubr.msk.f32.mxu1 %vm23310_vm5, %v23296_v60 }
0x109e   :  { %26906 = vmatmul.mubr.msk.f32.gmra.mxu1 %vm23310_vm5, %v23297_v26 }
0x10d1   :  { %v26862_v29 = vpop.f32.mrf.mxu1 }
0x10d2   :  { %v23479_v4 = vadd.f32 %v26862_v29, %v33923_v3 }
0x10d3   :  { %v23473_v8 = vpop.f32.mrf.mxu1 }
0x10d4   :  { %v33927_v44 = vadd.f32 %v23479_v4, %v33607_v37  ;;  %v23474_v16 = vadd.f32 %v23473_v8, %v33923_v3 }
0x10d5   :  { %v26865_v14 = vpop.f32.mrf.mxu1 }
0x10d6   :  { %v33931_v38 = vadd.f32 %v23474_v16, %v33610_v59  ;;  %v23489_v10 = vadd.f32 %v26865_v14, %v33923_v3  ;;  %v23667_v55 = vsel %vm66_vm0, %v33927_v44, 0.0 }
0x10d7   :  { %23668 = vadd.xlane.f32.xlu0 %v23667_v55  ;;  %v23483_v34 = vpop.f32.mrf.mxu1 }
0x10d8   :  { %v33937_v39 = vadd.f32 %v23489_v10, %v33627_v28  ;;  %v23484_v47 = vadd.f32 %v23483_v34, %v33923_v3  ;;  %v23664_v37 = vsel %vm66_vm0, %v33931_v38, 0.0 }
0x10d9   :  { %23665 = vadd.xlane.f32.xlu1 %v23664_v37  ;;  %v26868_v32 = vpop.f32.mrf.mxu1 }
0x10da   :  { %v33943_v59 = vadd.f32 %v23484_v47, %v33620_v42  ;;  %v23499_v36 = vadd.f32 %v26868_v32, %v33923_v3  ;;  %v23673_v56 = vsel %vm66_vm0, %v33937_v39, 0.0 }
0x10db   :  { %23674 = vadd.xlane.f32.xlu0 %v23673_v56  ;;  %v23493_v61 = vpop.f32.mrf.mxu1 }
0x10dc   :  { %v33949_v28 = vadd.f32 %v23499_v36, %v33641_v50  ;;  %v23494_v54 = vadd.f32 %v23493_v61, %v33923_v3  ;;  %v23670_v48 = vsel %vm66_vm0, %v33943_v59, 0.0 }
0x10dd   :  { %23671 = vadd.xlane.f32.xlu1 %v23670_v48  ;;  %v26871_v43 = vpop.f32.mrf.mxu1 }
0x10de   :  { %v33955_v42 = vadd.f32 %v23494_v54, %v33634_v33  ;;  %v23509_v18 = vadd.f32 %v26871_v43, %v33923_v3  ;;  %v23679_v19 = vsel %vm66_vm0, %v33949_v28, 0.0 }
0x10df   :  { %23680 = vadd.xlane.f32.xlu0 %v23679_v19  ;;  %v23503_v51 = vpop.f32.mrf.mxu1 }
0x10e0   :  { %v33961_v50 = vadd.f32 %v23509_v18, %v33654_v30  ;;  %v23504_v40 = vadd.f32 %v23503_v51, %v33923_v3  ;;  %v23676_v57 = vsel %vm66_vm0, %v33955_v42, 0.0 }
0x10e1   :  { %23677 = vadd.xlane.f32.xlu1 %v23676_v57  ;;  %v26874_v20 = vpop.f32.mrf.mxu1 }
0x10e2   :  { %v33967_v33 = vadd.f32 %v23504_v40, %v33648_v58  ;;  %v23519_v1 = vadd.f32 %v26874_v20, %v33923_v3  ;;  %v23685_v53 = vsel %vm66_vm0, %v33961_v50, 0.0 }
0x10e3   :  { %23686 = vadd.xlane.f32.xlu0 %v23685_v53  ;;  %v23513_v60 = vpop.f32.mrf.mxu1 }
0x10e4   :  { %v33973_v30 = vadd.f32 %v23519_v1, %v33673_v63  ;;  %v23514_v26 = vadd.f32 %v23513_v60, %v33923_v3  ;;  %v23682_v25 = vsel %vm66_vm0, %v33967_v33, 0.0 }
0x10e5   :  { %23683 = vadd.xlane.f32.xlu1 %v23682_v25 }
0x10e6   :  { %v33979_v29 = vadd.f32 %v23514_v26, %v33662_v2  ;;  %v23691_v4 = vsel %vm66_vm0, %v33973_v30, 0.0 }
0x10e7   :  { %v26877_v58 = vpop.f32.mrf.mxu1  ;;  %23692 = vadd.xlane.f32.xlu0 %v23691_v4 }
0x10e8   :  { %v23529_v8 = vadd.f32 %v26877_v58, %v33923_v3  ;;  %v23688_v63 = vsel %vm66_vm0, %v33979_v29, 0.0 }
0x10e9   :  { %v23523_v16 = vpop.f32.mrf.mxu1  ;;  %23689 = vadd.xlane.f32.xlu1 %v23688_v63 }
0x10ea   :  { %v33987_v14 = vadd.f32 %v23529_v8, %v33690_v62  ;;  %v23524_v10 = vadd.f32 %v23523_v16, %v33923_v3 }
0x10ec   :  { %v33991_v2 = vadd.f32 %v23524_v10, %v33687_v0  ;;  %v23697_v55 = vsel %vm66_vm0, %v33987_v14, 0.0 }
0x10ed   :  { %23698 = vadd.xlane.f32.xlu0 %v23697_v55 }
0x10ee   :  { %v23694_v34 = vsel %vm66_vm0, %v33991_v2, 0.0 }
0x10ef   :  { %23695 = vadd.xlane.f32.xlu1 %v23694_v34 }
0x10f2   :  { %v26880_v47 = vpop.f32.mrf.mxu1 }
0x10f3   :  { %v23539_v37 = vadd.f32 %v26880_v47, %v33923_v3 }
0x10f4   :  { %v23533_v32 = vpop.f32.mrf.mxu1 }
0x10f5   :  { %v33999_v62 = vadd.f32 %v23539_v37, %v33704_v9  ;;  %v23534_v36 = vadd.f32 %v23533_v32, %v33923_v3 }
0x10f7   :  { %v34003_v0 = vadd.f32 %v23534_v36, %v33701_v21  ;;  %v23703_v56 = vsel %vm66_vm0, %v33999_v62, 0.0 }
0x10f8   :  { %23704 = vadd.xlane.f32.xlu0 %v23703_v56 }
0x10f9   :  { %v23700_v61 = vsel %vm66_vm0, %v34003_v0, 0.0 }
0x10fa   :  { %23701 = vadd.xlane.f32.xlu1 %v23700_v61 }
0x10fe   :  { %v26883_v54 = vpop.f32.mrf.mxu1 }
0x10ff   :  { %v23549_v48 = vadd.f32 %v26883_v54, %v33923_v3 }
0x1100   :  { %v23543_v43 = vpop.f32.mrf.mxu1 }
0x1101   :  { %v34011_v9 = vadd.f32 %v23549_v48, %v33718_v46  ;;  %v23544_v18 = vadd.f32 %v23543_v43, %v33923_v3 }
0x1103   :  { %v34015_v21 = vadd.f32 %v23544_v18, %v33715_v45  ;;  %v23709_v19 = vsel %vm66_vm0, %v34011_v9, 0.0 }
0x1104   :  { %23710 = vadd.xlane.f32.xlu0 %v23709_v19 }
0x1105   :  { %v23706_v51 = vsel %vm66_vm0, %v34015_v21, 0.0 }
0x1106   :  { %23707 = vadd.xlane.f32.xlu1 %v23706_v51 }
0x110a   :  { %v26886_v40 = vpop.f32.mrf.mxu1 }
0x110b   :  { %v23559_v57 = vadd.f32 %v26886_v40, %v33923_v3 }
0x110c   :  { %v23553_v20 = vpop.f32.mrf.mxu1 }
0x110d   :  { %v34023_v46 = vadd.f32 %v23559_v57, %v33732_v49  ;;  %v23554_v1 = vadd.f32 %v23553_v20, %v33923_v3 }
0x110f   :  { %v34027_v45 = vadd.f32 %v23554_v1, %v33729_v15  ;;  %v23715_v53 = vsel %vm66_vm0, %v34023_v46, 0.0 }
0x1110   :  { %23716 = vadd.xlane.f32.xlu0 %v23715_v53 }
0x1111   :  { %v23712_v60 = vsel %vm66_vm0, %v34027_v45, 0.0 }
0x1112   :  { %23713 = vadd.xlane.f32.xlu1 %v23712_v60 }
0x1116   :  { %v26889_v26 = vpop.f32.mrf.mxu1 }
0x1117   :  { %v23569_v25 = vadd.f32 %v26889_v26, %v33923_v3 }
0x1118   :  { %v23563_v58 = vpop.f32.mrf.mxu1 }
0x1119   :  { %v34035_v49 = vadd.f32 %v23569_v25, %v33746_v13  ;;  %v23564_v4 = vadd.f32 %v23563_v58, %v33923_v3 }
0x111b   :  { %v34039_v15 = vadd.f32 %v23564_v4, %v33743_v23  ;;  %v23721_v8 = vsel %vm66_vm0, %v34035_v49, 0.0 }
0x111c   :  { %23722 = vadd.xlane.f32.xlu0 %v23721_v8 }
0x111d   :  { %v23718_v16 = vsel %vm66_vm0, %v34039_v15, 0.0 }
0x111e   :  { %23719 = vadd.xlane.f32.xlu1 %v23718_v16 }
0x1122   :  { %v26892_v63 = vpop.f32.mrf.mxu1 }
0x1123   :  { %v23579_v10 = vadd.f32 %v26892_v63, %v33923_v3 }
0x1124   :  { %v23573_v55 = vpop.f32.mrf.mxu1 }
0x1125   :  { %v34047_v13 = vadd.f32 %v23579_v10, %v33772_v35  ;;  %v23574_v34 = vadd.f32 %v23573_v55, %v33923_v3 }
0x1127   :  { %v34051_v23 = vadd.f32 %v23574_v34, %v33769_v11  ;;  %v23727_v47 = vsel %vm66_vm0, %v34047_v13, 0.0 }
0x1128   :  { %23728 = vadd.xlane.f32.xlu0 %v23727_v47 }
0x1129   :  { %v23724_v37 = vsel %vm66_vm0, %v34051_v23, 0.0 }
0x112a   :  { %23725 = vadd.xlane.f32.xlu1 %v23724_v37 }
0x112e   :  { %v26895_v32 = vpop.f32.mrf.mxu1 }
0x112f   :  { %v23589_v36 = vadd.f32 %v26895_v32, %v33923_v3 }
0x1130   :  { %v23583_v56 = vpop.f32.mrf.mxu1 }
0x1131   :  { %v34059_v35 = vadd.f32 %v23589_v36, %v33786_v7  ;;  %v23584_v61 = vadd.f32 %v23583_v56, %v33923_v3 }
0x1133   :  { %v34063_v11 = vadd.f32 %v23584_v61, %v33783_v31  ;;  %v23733_v54 = vsel %vm66_vm0, %v34059_v35, 0.0 }
0x1134   :  { %23734 = vadd.xlane.f32.xlu0 %v23733_v54 }
0x1135   :  { %v23730_v48 = vsel %vm66_vm0, %v34063_v11, 0.0 }
0x1136   :  { %23731 = vadd.xlane.f32.xlu1 %v23730_v48 }
0x113a   :  { %v26898_v43 = vpop.f32.mrf.mxu1 }
0x113b   :  { %v23599_v18 = vadd.f32 %v26898_v43, %v33923_v3 }
0x113c   :  { %v23593_v19 = vpop.f32.mrf.mxu1 }
0x113d   :  { %v34071_v7 = vadd.f32 %v23599_v18, %v33800_v6  ;;  %v23594_v51 = vadd.f32 %v23593_v19, %v33923_v3 }
0x113f   :  { %v34075_v31 = vadd.f32 %v23594_v51, %v33797_v41  ;;  %v23739_v40 = vsel %vm66_vm0, %v34071_v7, 0.0 }
0x1140   :  { %23740 = vadd.xlane.f32.xlu0 %v23739_v40 }
0x1141   :  { %v23736_v57 = vsel %vm66_vm0, %v34075_v31, 0.0 }
0x1142   :  { %23737 = vadd.xlane.f32.xlu1 %v23736_v57 }
0x1146   :  { %v26901_v20 = vpop.f32.mrf.mxu1 }
0x1147   :  { %v23609_v1 = vadd.f32 %v26901_v20, %v33923_v3 }
0x1148   :  { %v23603_v53 = vpop.f32.mrf.mxu1 }
0x1149   :  { %v34083_v6 = vadd.f32 %v23609_v1, %v33814_v5  ;;  %v23604_v60 = vadd.f32 %v23603_v53, %v33923_v3 }
0x114b   :  { %v34087_v41 = vadd.f32 %v23604_v60, %v33811_v17  ;;  %v23745_v26 = vsel %vm66_vm0, %v34083_v6, 0.0 }
0x114c   :  { %23746 = vadd.xlane.f32.xlu0 %v23745_v26 }
0x114d   :  { %v23742_v25 = vsel %vm66_vm0, %v34087_v41, 0.0 }
0x114e   :  { %23743 = vadd.xlane.f32.xlu1 %v23742_v25 }
0x1152   :  { %v26904_v58 = vpop.f32.mrf.mxu1 }
0x1153   :  { %v23619_v4 = vadd.f32 %v26904_v58, %v33923_v3 }
0x1154   :  { %v23613_v8 = vpop.f32.mrf.mxu1 }
0x1155   :  { %v34095_v5 = vadd.f32 %v23619_v4, %v33828_v27  ;;  %v23614_v16 = vadd.f32 %v23613_v8, %v33923_v3 }
0x1157   :  { %v34099_v17 = vadd.f32 %v23614_v16, %v33825_v24  ;;  %v23751_v63 = vsel %vm66_vm0, %v34095_v5, 0.0 }
0x1158   :  { %23752 = vadd.xlane.f32.xlu0 %v23751_v63 }
0x1159   :  { %v23748_v10 = vsel %vm66_vm0, %v34099_v17, 0.0 }
0x115a   :  { %23749 = vadd.xlane.f32.xlu1 %v23748_v10 }
0x115e   :  { %v26907_v55 = vpop.f32.mrf.mxu1 }
0x115f   :  { %v23629_v34 = vadd.f32 %v26907_v55, %v33923_v3 }
0x1160   :  { %v23623_v47 = vpop.f32.mrf.mxu1  ;;  %v23669_v32 = vpop.xlane.xlu0 %23668 }
0x1161   :  { %v34107_v27 = vadd.f32 %v23629_v34, %v33842_v22  ;;  %v23624_v37 = vadd.f32 %v23623_v47, %v33923_v3  ;;  %v23761_v24 = vmul.f32 0.03125, %v23669_v32 }
0x1162   :  { %v23666_v56 = vpop.xlane.xlu1 %23665 }
0x1163   :  { %v34111_v36 = vadd.f32 %v23624_v37, %v33839_v52  ;;  %v23757_v61 = vsel %vm66_vm0, %v34107_v27, 0.0  ;;  %v34116_v54 = vsub.f32 %v33927_v44, %v23761_v24  ;;  %v23760_v48 = vmul.f32 0.03125, %v23666_v56 }
0x1164   :  { %23758 = vadd.xlane.f32.xlu0 %v23757_v61  ;;  %v23675_v43 = vpop.xlane.xlu0 %23674 }
0x1165   :  { %v23754_v22 = vsel %vm66_vm0, %v34111_v36, 0.0  ;;  %v34121_v3 = vsub.f32 %v33931_v38, %v23760_v48  ;;  %v23763_v18 = vmul.f32 0.03125, %v23675_v43  ;;  %v23825_v52 = vmul.f32 %v34116_v54, %v34116_v54 }
0x1166   :  { %23755 = vadd.xlane.f32.xlu1 %v23754_v22  ;;  %v23672_v19 = vpop.xlane.xlu1 %23671 }
0x1167   :  { %v34126_v51 = vsub.f32 %v33937_v39, %v23763_v18  ;;  %v23762_v44 = vmul.f32 0.03125, %v23672_v19  ;;  %v23859_v40 = vsel %vm66_vm0, %v23825_v52, 0.0  ;;  %v23824_v57 = vmul.f32 %v34121_v3, %v34121_v3 }
0x1168   :  { %23860 = vadd.xlane.f32.xlu0 %v23859_v40  ;;  %v23681_v20 = vpop.xlane.xlu0 %23680 }
0x1169   :  { %v34132_v38 = vsub.f32 %v33943_v59, %v23762_v44  ;;  %v23765_v1 = vmul.f32 0.03125, %v23681_v20  ;;  %v23856_v53 = vsel %vm66_vm0, %v23824_v57, 0.0  ;;  %v23827_v60 = vmul.f32 %v34126_v51, %v34126_v51 }
0x116a   :  { %v23678_v26 = vpop.xlane.xlu1 %23677  ;;  %23857 = vadd.xlane.f32.xlu1 %v23856_v53 }
0x116b   :  { %v34138_v39 = vsub.f32 %v33949_v28, %v23765_v1  ;;  %v23764_v25 = vmul.f32 0.03125, %v23678_v26  ;;  %v23865_v58 = vsel %vm66_vm0, %v23827_v60, 0.0  ;;  %v23826_v4 = vmul.f32 %v34132_v38, %v34132_v38 }
0x116c   :  { %23866 = vadd.xlane.f32.xlu0 %v23865_v58  ;;  %v23687_v59 = vpop.xlane.xlu0 %23686 }
0x116d   :  { %v34144_v8 = vsub.f32 %v33955_v42, %v23764_v25  ;;  %v23767_v16 = vmul.f32 0.03125, %v23687_v59  ;;  %v23862_v63 = vsel %vm66_vm0, %v23826_v4, 0.0  ;;  %v23829_v10 = vmul.f32 %v34138_v39, %v34138_v39 }
0x116e   :  { %v23684_v55 = vpop.xlane.xlu1 %23683  ;;  %23863 = vadd.xlane.f32.xlu1 %v23862_v63 }
0x116f   :  { %v34150_v28 = vsub.f32 %v33961_v50, %v23767_v16  ;;  %v23766_v34 = vmul.f32 0.03125, %v23684_v55  ;;  %v23871_v47 = vsel %vm66_vm0, %v23829_v10, 0.0  ;;  %v23828_v37 = vmul.f32 %v34144_v8, %v34144_v8 }
0x1170   :  { %23872 = vadd.xlane.f32.xlu0 %v23871_v47  ;;  %v23693_v42 = vpop.xlane.xlu0 %23692 }
0x1171   :  { %v34156_v32 = vsub.f32 %v33967_v33, %v23766_v34  ;;  %v23769_v24 = vmul.f32 0.03125, %v23693_v42  ;;  %v23868_v56 = vsel %vm66_vm0, %v23828_v37, 0.0  ;;  %v23831_v61 = vmul.f32 %v34150_v28, %v34150_v28 }
0x1172   :  { %v23690_v48 = vpop.xlane.xlu1 %23689  ;;  %23869 = vadd.xlane.f32.xlu1 %v23868_v56 }
0x1173   :  { %v34162_v50 = vsub.f32 %v33973_v30, %v23769_v24  ;;  %v23768_v43 = vmul.f32 0.03125, %v23690_v48  ;;  %v23877_v22 = vsel %vm66_vm0, %v23831_v61, 0.0  ;;  %v23830_v18 = vmul.f32 %v34156_v32, %v34156_v32 }
0x1174   :  { %23878 = vadd.xlane.f32.xlu0 %v23877_v22 }
0x1175   :  { %v34168_v33 = vsub.f32 %v33979_v29, %v23768_v43  ;;  %v23874_v19 = vsel %vm66_vm0, %v23830_v18, 0.0  ;;  %v23833_v44 = vmul.f32 %v34162_v50, %v34162_v50 }
0x1176   :  { %v23699_v52 = vpop.xlane.xlu0 %23698  ;;  %23875 = vadd.xlane.f32.xlu1 %v23874_v19 }
0x1177   :  { %v23771_v40 = vmul.f32 0.03125, %v23699_v52  ;;  %v23883_v57 = vsel %vm66_vm0, %v23833_v44, 0.0  ;;  %v23832_v20 = vmul.f32 %v34168_v33, %v34168_v33 }
0x1178   :  { %v23696_v30 = vpop.xlane.xlu1 %23695  ;;  %23884 = vadd.xlane.f32.xlu0 %v23883_v57 }
0x1179   :  { %v34177_v1 = vsub.f32 %v33987_v14, %v23771_v40  ;;  %v23770_v53 = vmul.f32 0.03125, %v23696_v30  ;;  %v23880_v29 = vsel %vm66_vm0, %v23832_v20, 0.0 }
0x117a   :  { %23881 = vadd.xlane.f32.xlu1 %v23880_v29 }
0x117b   :  { %v34181_v60 = vsub.f32 %v33991_v2, %v23770_v53  ;;  %v23835_v26 = vmul.f32 %v34177_v1, %v34177_v1 }
0x117d   :  { %v23889_v25 = vsel %vm66_vm0, %v23835_v26, 0.0  ;;  %v23834_v58 = vmul.f32 %v34181_v60, %v34181_v60 }
0x117e   :  { %23890 = vadd.xlane.f32.xlu0 %v23889_v25 }
0x117f   :  { %v23886_v14 = vsel %vm66_vm0, %v23834_v58, 0.0 }
0x1180   :  { %23887 = vadd.xlane.f32.xlu1 %v23886_v14 }
0x1181   :  { %v23705_v4 = vpop.xlane.xlu0 %23704 }
0x1182   :  { %v23773_v59 = vmul.f32 0.03125, %v23705_v4 }
0x1183   :  { %v23702_v16 = vpop.xlane.xlu1 %23701 }
0x1184   :  { %v34190_v63 = vsub.f32 %v33999_v62, %v23773_v59  ;;  %v23772_v2 = vmul.f32 0.03125, %v23702_v16 }
0x1186   :  { %v34193_v10 = vsub.f32 %v34003_v0, %v23772_v2  ;;  %v23837_v55 = vmul.f32 %v34190_v63, %v34190_v63 }
0x1188   :  { %v23895_v34 = vsel %vm66_vm0, %v23837_v55, 0.0  ;;  %v23836_v47 = vmul.f32 %v34193_v10, %v34193_v10 }
0x1189   :  { %23896 = vadd.xlane.f32.xlu0 %v23895_v34 }
0x118a   :  { %v23892_v37 = vsel %vm66_vm0, %v23836_v47, 0.0 }
0x118b   :  { %23893 = vadd.xlane.f32.xlu1 %v23892_v37 }
0x118d   :  { %v23711_v42 = vpop.xlane.xlu0 %23710 }
0x118e   :  { %v23775_v24 = vmul.f32 0.03125, %v23711_v42 }
0x118f   :  { %v23708_v62 = vpop.xlane.xlu1 %23707 }
0x1190   :  { %v34202_v56 = vsub.f32 %v34011_v9, %v23775_v24  ;;  %v23774_v0 = vmul.f32 0.03125, %v23708_v62 }
0x1192   :  { %v34205_v61 = vsub.f32 %v34015_v21, %v23774_v0  ;;  %v23839_v48 = vmul.f32 %v34202_v56, %v34202_v56 }
0x1194   :  { %v23901_v43 = vsel %vm66_vm0, %v23839_v48, 0.0  ;;  %v23838_v22 = vmul.f32 %v34205_v61, %v34205_v61 }
0x1195   :  { %23902 = vadd.xlane.f32.xlu0 %v23901_v43 }
0x1196   :  { %v23898_v18 = vsel %vm66_vm0, %v23838_v22, 0.0 }
0x1197   :  { %23899 = vadd.xlane.f32.xlu1 %v23898_v18 }
0x1199   :  { %v23717_v52 = vpop.xlane.xlu0 %23716 }
0x119a   :  { %v23777_v19 = vmul.f32 0.03125, %v23717_v52 }
0x119b   :  { %v23714_v9 = vpop.xlane.xlu1 %23713 }
0x119c   :  { %v34214_v44 = vsub.f32 %v34023_v46, %v23777_v19  ;;  %v23776_v21 = vmul.f32 0.03125, %v23714_v9 }
0x119e   :  { %v34217_v40 = vsub.f32 %v34027_v45, %v23776_v21  ;;  %v23841_v30 = vmul.f32 %v34214_v44, %v34214_v44 }
0x11a0   :  { %v23907_v57 = vsel %vm66_vm0, %v23841_v30, 0.0  ;;  %v23840_v20 = vmul.f32 %v34217_v40, %v34217_v40 }
0x11a1   :  { %23908 = vadd.xlane.f32.xlu0 %v23907_v57 }
0x11a2   :  { %v23904_v53 = vsel %vm66_vm0, %v23840_v20, 0.0 }
0x11a3   :  { %23905 = vadd.xlane.f32.xlu1 %v23904_v53 }
0x11a5   :  { %v23723_v29 = vpop.xlane.xlu0 %23722 }
0x11a6   :  { %v23779_v26 = vmul.f32 0.03125, %v23723_v29 }
0x11a7   :  { %v23720_v46 = vpop.xlane.xlu1 %23719 }
0x11a8   :  { %v34226_v25 = vsub.f32 %v34035_v49, %v23779_v26  ;;  %v23778_v45 = vmul.f32 0.03125, %v23720_v46 }
0x11aa   :  { %v34229_v58 = vsub.f32 %v34039_v15, %v23778_v45  ;;  %v23843_v14 = vmul.f32 %v34226_v25, %v34226_v25 }
0x11ac   :  { %v23913_v4 = vsel %vm66_vm0, %v23843_v14, 0.0  ;;  %v23842_v59 = vmul.f32 %v34229_v58, %v34229_v58 }
0x11ad   :  { %23914 = vadd.xlane.f32.xlu0 %v23913_v4 }
0x11ae   :  { %v23910_v16 = vsel %vm66_vm0, %v23842_v59, 0.0 }
0x11af   :  { %23911 = vadd.xlane.f32.xlu1 %v23910_v16 }
0x11b1   :  { %v23729_v2 = vpop.xlane.xlu0 %23728 }
0x11b2   :  { %v23781_v55 = vmul.f32 0.03125, %v23729_v2 }
0x11b3   :  { %v23726_v49 = vpop.xlane.xlu1 %23725 }
0x11b4   :  { %v34238_v34 = vsub.f32 %v34047_v13, %v23781_v55  ;;  %v23780_v15 = vmul.f32 0.03125, %v23726_v49 }
0x11b6   :  { %v34241_v47 = vsub.f32 %v34051_v23, %v23780_v15  ;;  %v23845_v37 = vmul.f32 %v34238_v34, %v34238_v34 }
0x11b8   :  { %v23919_v42 = vsel %vm66_vm0, %v23845_v37, 0.0  ;;  %v23844_v24 = vmul.f32 %v34241_v47, %v34241_v47 }
0x11b9   :  { %23920 = vadd.xlane.f32.xlu0 %v23919_v42 }
0x11ba   :  { %v23916_v62 = vsel %vm66_vm0, %v23844_v24, 0.0 }
0x11bb   :  { %23917 = vadd.xlane.f32.xlu1 %v23916_v62 }
0x11bd   :  { %v23735_v0 = vpop.xlane.xlu0 %23734 }
0x11be   :  { %v23783_v48 = vmul.f32 0.03125, %v23735_v0 }
0x11bf   :  { %v23732_v13 = vpop.xlane.xlu1 %23731 }
0x11c0   :  { %v34250_v43 = vsub.f32 %v34059_v35, %v23783_v48  ;;  %v23782_v23 = vmul.f32 0.03125, %v23732_v13 }
0x11c2   :  { %v34253_v22 = vsub.f32 %v34063_v11, %v23782_v23  ;;  %v23847_v18 = vmul.f32 %v34250_v43, %v34250_v43 }
0x11c4   :  { %v23925_v52 = vsel %vm66_vm0, %v23847_v18, 0.0  ;;  %v23846_v19 = vmul.f32 %v34253_v22, %v34253_v22 }
0x11c5   :  { %23926 = vadd.xlane.f32.xlu0 %v23925_v52 }
0x11c6   :  { %v23922_v9 = vsel %vm66_vm0, %v23846_v19, 0.0 }
0x11c7   :  { %23923 = vadd.xlane.f32.xlu1 %v23922_v9 }
0x11c9   :  { %v23741_v21 = vpop.xlane.xlu0 %23740 }
0x11ca   :  { %v23785_v30 = vmul.f32 0.03125, %v23741_v21 }
0x11cb   :  { %v23738_v35 = vpop.xlane.xlu1 %23737 }
0x11cc   :  { %v34262_v57 = vsub.f32 %v34071_v7, %v23785_v30  ;;  %v23784_v11 = vmul.f32 0.03125, %v23738_v35 }
0x11ce   :  { %v34265_v20 = vsub.f32 %v34075_v31, %v23784_v11  ;;  %v23849_v53 = vmul.f32 %v34262_v57, %v34262_v57 }
0x11d0   :  { %v23931_v29 = vsel %vm66_vm0, %v23849_v53, 0.0  ;;  %v23848_v26 = vmul.f32 %v34265_v20, %v34265_v20 }
0x11d1   :  { %23932 = vadd.xlane.f32.xlu0 %v23931_v29 }
0x11d2   :  { %v23928_v46 = vsel %vm66_vm0, %v23848_v26, 0.0 }
0x11d3   :  { %23929 = vadd.xlane.f32.xlu1 %v23928_v46 }
0x11d5   :  { %v23747_v45 = vpop.xlane.xlu0 %23746 }
0x11d6   :  { %v23787_v14 = vmul.f32 0.03125, %v23747_v45 }
0x11d7   :  { %v23744_v7 = vpop.xlane.xlu1 %23743 }
0x11d8   :  { %v34274_v4 = vsub.f32 %v34083_v6, %v23787_v14  ;;  %v23786_v31 = vmul.f32 0.03125, %v23744_v7 }
0x11da   :  { %v34277_v59 = vsub.f32 %v34087_v41, %v23786_v31  ;;  %v23851_v16 = vmul.f32 %v34274_v4, %v34274_v4 }
0x11dc   :  { %v23937_v2 = vsel %vm66_vm0, %v23851_v16, 0.0  ;;  %v23850_v55 = vmul.f32 %v34277_v59, %v34277_v59 }
0x11dd   :  { %23938 = vadd.xlane.f32.xlu0 %v23937_v2 }
0x11de   :  { %v23934_v49 = vsel %vm66_vm0, %v23850_v55, 0.0 }
0x11df   :  { %23935 = vadd.xlane.f32.xlu1 %v23934_v49 }
0x11e1   :  { %v23753_v15 = vpop.xlane.xlu0 %23752 }
0x11e2   :  { %v23789_v37 = vmul.f32 0.03125, %v23753_v15 }
0x11e3   :  { %v23750_v6 = vpop.xlane.xlu1 %23749 }
0x11e4   :  { %v34286_v42 = vsub.f32 %v34095_v5, %v23789_v37  ;;  %v23788_v41 = vmul.f32 0.03125, %v23750_v6 }
0x11e6   :  { %v34289_v24 = vsub.f32 %v34099_v17, %v23788_v41  ;;  %v23853_v62 = vmul.f32 %v34286_v42, %v34286_v42  ;;  %v24082_v41 = vsub.s32 6, %v35963_v12 }
0x11e8   :  { %v23943_v0 = vsel %vm66_vm0, %v23853_v62, 0.0  ;;  %v23852_v48 = vmul.f32 %v34289_v24, %v34289_v24 }
0x11e9   :  { %23944 = vadd.xlane.f32.xlu0 %v23943_v0 }
0x11ea   :  { %v23940_v13 = vsel %vm66_vm0, %v23852_v48, 0.0  ;;  %v24118_v48 = vsub.s32 7, %v35963_v12 }
0x11eb   :  { %23941 = vadd.xlane.f32.xlu1 %v23940_v13 }
0x11ed   :  { %v23759_v23 = vpop.xlane.xlu0 %23758 }
0x11ee   :  { %v23791_v18 = vmul.f32 0.03125, %v23759_v23 }
0x11ef   :  { %v23756_v5 = vpop.xlane.xlu1 %23755 }
0x11f0   :  { %v34298_v52 = vsub.f32 %v34107_v27, %v23791_v18  ;;  %v23790_v17 = vmul.f32 0.03125, %v23756_v5 }
0x11f1   :  { %v23861_v9 = vpop.xlane.xlu0 %23860 }
0x11f2   :  { %v34301_v19 = vsub.f32 %v34111_v36, %v23790_v17  ;;  %v23855_v21 = vmul.f32 %v34298_v52, %v34298_v52  ;;  %v23953_v30 = vmul.f32 0.03125, %v23861_v9  ;;  %v27600_v17 = vld [vmem:[%s34544_s5] sm:$0xff] }
0x11f3   :  { %v23858_v35 = vpop.xlane.xlu1 %23857  ;;  %v34314_v9 = vrot.slane %v27600_v17, %v24082_v41 }
0x11f4   :  { %v23949_v11 = vsel %vm66_vm0, %v23855_v21, 0.0  ;;  %v23854_v53 = vmul.f32 %v34301_v19, %v34301_v19  ;;  %v23985_v29 = vadd.f32 1e-05, %v23953_v30  ;;  %v23952_v26 = vmul.f32 0.03125, %v23858_v35 }
0x11f5   :  { %23950 = vadd.xlane.f32.xlu0 %v23949_v11  ;;  %v23867_v27 = vpop.xlane.xlu0 %23866  ;;  %v34316_v11 = vrot.slane %v27600_v17, %v24118_v48 }
0x11f6   :  { %v23946_v46 = vsel %vm66_vm0, %v23854_v53, 0.0  ;;  %27502 = vrsqrt.f32 %v23985_v29  ;;  %v23984_v36 = vadd.f32 1e-05, %v23952_v26  ;;  %v23955_v45 = vmul.f32 0.03125, %v23867_v27 }
0x11f7   :  { %23947 = vadd.xlane.f32.xlu1 %v23946_v46  ;;  %v23864_v14 = vpop.xlane.xlu1 %23863 }
0x11f8   :  { %27504 = vrsqrt.f32 %v23984_v36  ;;  %v23987_v7 = vadd.f32 1e-05, %v23955_v45  ;;  %v23954_v31 = vmul.f32 0.03125, %v23864_v14 }
0x11f9   :  { %v23873_v16 = vpop.xlane.xlu0 %23872 }
0x11fa   :  { %27506 = vrsqrt.f32 %v23987_v7  ;;  %v23986_v2 = vadd.f32 1e-05, %v23954_v31  ;;  %v23957_v55 = vmul.f32 0.03125, %v23873_v16 }
0x11fb   :  { %v23870_v49 = vpop.xlane.xlu1 %23869 }
0x11fc   :  { %27508 = vrsqrt.f32 %v23986_v2  ;;  %v23989_v15 = vadd.f32 1e-05, %v23957_v55  ;;  %v23956_v37 = vmul.f32 0.03125, %v23870_v49 }
0x11fd   :  { %v23879_v6 = vpop.xlane.xlu0 %23878 }
0x11fe   :  { %27510 = vrsqrt.f32 %v23989_v15  ;;  %v23988_v62 = vadd.f32 1e-05, %v23956_v37  ;;  %v23959_v0 = vmul.f32 0.03125, %v23879_v6 }
0x11ff   :  { %v23876_v13 = vpop.xlane.xlu1 %23875 }
0x1200   :  { %27512 = vrsqrt.f32 %v23988_v62  ;;  %v23991_v23 = vadd.f32 1e-05, %v23959_v0  ;;  %v23958_v18 = vmul.f32 0.03125, %v23876_v13 }
0x1201   :  { %v23885_v5 = vpop.xlane.xlu0 %23884 }
0x1202   :  { %27514 = vrsqrt.f32 %v23991_v23  ;;  %v23990_v21 = vadd.f32 1e-05, %v23958_v18  ;;  %v23961_v30 = vmul.f32 0.03125, %v23885_v5 }
0x1203   :  { %v27503_v35 = vpop.eup %27502  ;;  %v23882_v53 = vpop.xlane.xlu1 %23881 }
0x1204   :  { %v24049_v12 = vmul.f32 %v27503_v35, %v34116_v54  ;;  %27516 = vrsqrt.f32 %v23990_v21  ;;  %v23993_v29 = vadd.f32 1e-05, %v23961_v30  ;;  %v23960_v26 = vmul.f32 0.03125, %v23882_v53 }
0x1205   :  { %v27505_v27 = vpop.eup %27504 }
0x1206   :  { %v24085_v46 = vmul.f32 %v34314_v9, %v24049_v12  ;;  %v24048_v36 = vmul.f32 %v27505_v27, %v34121_v3  ;;  %27518 = vrsqrt.f32 %v23993_v29  ;;  %v23992_v45 = vadd.f32 1e-05, %v23960_v26 }
0x1207   :  { %v23891_v14 = vpop.xlane.xlu0 %23890  ;;  %v27507_v7 = vpop.eup %27506 }
0x1208   :  { %v23963_v31 = vmul.f32 0.03125, %v23891_v14  ;;  %v24121_v16 = vadd.f32 %v34316_v11, %v24085_v46  ;;  %v24084_v2 = vmul.f32 %v34314_v9, %v24048_v36  ;;  %v24051_v55 = vmul.f32 %v27507_v7, %v34126_v51 }
0x1209   :  { %27520 = vrsqrt.f32 %v23992_v45  ;;  %v23888_v54 = vpop.xlane.xlu1 %23887  ;;  %v27509_v49 = vpop.eup %27508 }
0x120a   :  { %v23995_v15 = vadd.f32 1e-05, %v23963_v31  ;;  %v23962_v37 = vmul.f32 0.03125, %v23888_v54  ;;  %24153 = vst.msk [vmem:[%s34549_s6 + $0x8] sm:$0xff] %vm66_vm0, %v24121_v16  ;;  %v24120_v3 = vadd.f32 %v34316_v11, %v24084_v2  ;;  %v24087_v6 = vmul.f32 %v34314_v9, %v24051_v55 }
0x120b   :  { %v24050_v41 = vmul.f32 %v27509_v49, %v34132_v38  ;;  %v27511_v62 = vpop.eup %27510 }
0x120c   :  { %27522 = vrsqrt.f32 %v23995_v15  ;;  %v23994_v0 = vadd.f32 1e-05, %v23962_v37  ;;  %24152 = vst.msk [vmem:[%s34549_s6] sm:$0xff] %vm66_vm0, %v24120_v3  ;;  %v24123_v51 = vadd.f32 %v34316_v11, %v24087_v6  ;;  %v24053_v13 = vmul.f32 %v27511_v62, %v34138_v39 }
0x120d   :  { %v24086_v48 = vmul.f32 %v34314_v9, %v24050_v41  ;;  %v27513_v23 = vpop.eup %27512 }
0x120e   :  { %27524 = vrsqrt.f32 %v23994_v0  ;;  %24155 = vst.msk [vmem:[%s34549_s6 + $0x18] sm:$0xff] %vm66_vm0, %v24123_v51  ;;  %v24089_v18 = vmul.f32 %v34314_v9, %v24053_v13  ;;  %v24052_v5 = vmul.f32 %v27513_v23, %v34144_v8 }
0x120f   :  { %v24122_v38 = vadd.f32 %v34316_v11, %v24086_v48  ;;  %v27515_v17 = vpop.eup %27514 }
0x1210   :  { %v24125_v39 = vadd.f32 %v34316_v11, %v24089_v18  ;;  %v24088_v21 = vmul.f32 %v34314_v9, %v24052_v5  ;;  %v24055_v30 = vmul.f32 %v27515_v17, %v34150_v28 }
0x1211   :  { %24154 = vst.msk [vmem:[%s34549_s6 + $0x10] sm:$0xff] %vm66_vm0, %v24122_v38  ;;  %v27517_v35 = vpop.eup %27516 }
0x1212   :  { %v23897_v53 = vpop.xlane.xlu0 %23896  ;;  %24157 = vst.msk [vmem:[%s34549_s6 + $0x28] sm:$0xff] %vm66_vm0, %v24125_v39  ;;  %v24124_v8 = vadd.f32 %v34316_v11, %v24088_v21  ;;  %v24091_v12 = vmul.f32 %v34314_v9, %v24055_v30  ;;  %v24054_v29 = vmul.f32 %v27517_v35, %v34156_v32 }
0x1213   :  { %v23965_v26 = vmul.f32 0.03125, %v23897_v53  ;;  %v27519_v27 = vpop.eup %27518 }
0x1214   :  { %v23894_v46 = vpop.xlane.xlu1 %23893  ;;  %24156 = vst.msk [vmem:[%s34549_s6 + $0x20] sm:$0xff] %vm66_vm0, %v24124_v8  ;;  %v24127_v28 = vadd.f32 %v34316_v11, %v24091_v12  ;;  %v24090_v36 = vmul.f32 %v34314_v9, %v24054_v29  ;;  %v24057_v45 = vmul.f32 %v27519_v27, %v34162_v50 }
0x1215   :  { %v23997_v14 = vadd.f32 1e-05, %v23965_v26  ;;  %v23964_v31 = vmul.f32 0.03125, %v23894_v46 }
0x1216   :  { %v27521_v7 = vpop.eup %27520  ;;  %24159 = vst.msk [vmem:[%s34549_s6 + $0x38] sm:$0xff] %vm66_vm0, %v24127_v28  ;;  %v24126_v32 = vadd.f32 %v34316_v11, %v24090_v36  ;;  %v24093_v16 = vmul.f32 %v34314_v9, %v24057_v45 }
0x1217   :  { %v24056_v2 = vmul.f32 %v27521_v7, %v34168_v33  ;;  %27526 = vrsqrt.f32 %v23997_v14  ;;  %v23996_v55 = vadd.f32 1e-05, %v23964_v31 }
0x1218   :  { %24158 = vst.msk [vmem:[%s34549_s6 + $0x30] sm:$0xff] %vm66_vm0, %v24126_v32  ;;  %v24129_v50 = vadd.f32 %v34316_v11, %v24093_v16 }
0x1219   :  { %v27523_v54 = vpop.eup %27522  ;;  %v24092_v49 = vmul.f32 %v34314_v9, %v24056_v2  ;;  %27528 = vrsqrt.f32 %v23996_v55 }
0x121a   :  { %v24059_v15 = vmul.f32 %v27523_v54, %v34177_v1  ;;  %24161 = vst.msk [vmem:[%s34549_s6 + $0x48] sm:$0xff] %vm66_vm0, %v24129_v50 }
0x121b   :  { %v27525_v37 = vpop.eup %27524  ;;  %v24128_v33 = vadd.f32 %v34316_v11, %v24092_v49 }
0x121c   :  { %v24095_v3 = vmul.f32 %v34314_v9, %v24059_v15  ;;  %v24058_v6 = vmul.f32 %v27525_v37, %v34181_v60 }
0x121d   :  { %24160 = vst.msk [vmem:[%s34549_s6 + $0x40] sm:$0xff] %vm66_vm0, %v24128_v33 }
0x121e   :  { %v24131_v1 = vadd.f32 %v34316_v11, %v24095_v3  ;;  %v24094_v41 = vmul.f32 %v34314_v9, %v24058_v6  ;;  %v23903_v62 = vpop.xlane.xlu0 %23902 }
0x121f   :  { %v23967_v0 = vmul.f32 0.03125, %v23903_v62 }
0x1220   :  { %24163 = vst.msk [vmem:[%s34549_s6 + $0x58] sm:$0xff] %vm66_vm0, %v24131_v1  ;;  %v24130_v51 = vadd.f32 %v34316_v11, %v24094_v41  ;;  %v23900_v48 = vpop.xlane.xlu1 %23899 }
0x1221   :  { %v23999_v60 = vadd.f32 1e-05, %v23967_v0  ;;  %v23966_v13 = vmul.f32 0.03125, %v23900_v48 }
0x1222   :  { %24162 = vst.msk [vmem:[%s34549_s6 + $0x50] sm:$0xff] %vm66_vm0, %v24130_v51 }
0x1223   :  { %27530 = vrsqrt.f32 %v23999_v60  ;;  %v23998_v23 = vadd.f32 1e-05, %v23966_v13 }
0x1224   :  { %v27527_v38 = vpop.eup %27526 }
0x1225   :  { %v24061_v18 = vmul.f32 %v27527_v38, %v34190_v63  ;;  %27532 = vrsqrt.f32 %v23998_v23 }
0x1226   :  { %v27529_v5 = vpop.eup %27528 }
0x1227   :  { %v24097_v17 = vmul.f32 %v34314_v9, %v24061_v18  ;;  %v24060_v39 = vmul.f32 %v27529_v5, %v34193_v10 }
0x1229   :  { %v24133_v21 = vadd.f32 %v34316_v11, %v24097_v17  ;;  %v24096_v30 = vmul.f32 %v34314_v9, %v24060_v39 }
0x122a   :  { %v23909_v35 = vpop.xlane.xlu0 %23908 }
0x122b   :  { %24165 = vst.msk [vmem:[%s34549_s6 + $0x68] sm:$0xff] %vm66_vm0, %v24133_v21  ;;  %v23969_v53 = vmul.f32 0.03125, %v23909_v35  ;;  %v24132_v8 = vadd.f32 %v34316_v11, %v24096_v30 }
0x122c   :  { %v23906_v63 = vpop.xlane.xlu1 %23905 }
0x122d   :  { %v24001_v12 = vadd.f32 1e-05, %v23969_v53  ;;  %v23968_v29 = vmul.f32 0.03125, %v23906_v63  ;;  %24164 = vst.msk [vmem:[%s34549_s6 + $0x60] sm:$0xff] %vm66_vm0, %v24132_v8 }
0x122f   :  { %27534 = vrsqrt.f32 %v24001_v12  ;;  %v24000_v10 = vadd.f32 1e-05, %v23968_v29 }
0x1230   :  { %v27531_v26 = vpop.eup %27530 }
0x1231   :  { %v24063_v27 = vmul.f32 %v27531_v26, %v34202_v56  ;;  %27536 = vrsqrt.f32 %v24000_v10 }
0x1232   :  { %v27533_v46 = vpop.eup %27532 }
0x1233   :  { %v24099_v28 = vmul.f32 %v34314_v9, %v24063_v27  ;;  %v24062_v36 = vmul.f32 %v27533_v46, %v34205_v61 }
0x1235   :  { %v24135_v45 = vadd.f32 %v34316_v11, %v24099_v28  ;;  %v24098_v14 = vmul.f32 %v34314_v9, %v24062_v36 }
0x1236   :  { %v23915_v7 = vpop.xlane.xlu0 %23914 }
0x1237   :  { %24167 = vst.msk [vmem:[%s34549_s6 + $0x78] sm:$0xff] %vm66_vm0, %v24135_v45  ;;  %v24134_v31 = vadd.f32 %v34316_v11, %v24098_v14  ;;  %v23971_v32 = vmul.f32 0.03125, %v23915_v7 }
0x1238   :  { %v23912_v56 = vpop.xlane.xlu1 %23911 }
0x1239   :  { %24166 = vst.msk [vmem:[%s34549_s6 + $0x70] sm:$0xff] %vm66_vm0, %v24134_v31  ;;  %v24003_v61 = vadd.f32 1e-05, %v23971_v32  ;;  %v23970_v16 = vmul.f32 0.03125, %v23912_v56 }
0x123b   :  { %27538 = vrsqrt.f32 %v24003_v61  ;;  %v24002_v2 = vadd.f32 1e-05, %v23970_v16 }
0x123c   :  { %v27535_v55 = vpop.eup %27534 }
0x123d   :  { %v24065_v54 = vmul.f32 %v27535_v55, %v34214_v44  ;;  %27540 = vrsqrt.f32 %v24002_v2 }
0x123e   :  { %v27537_v50 = vpop.eup %27536 }
0x123f   :  { %v24101_v49 = vmul.f32 %v34314_v9, %v24065_v54  ;;  %v24064_v15 = vmul.f32 %v27537_v50, %v34217_v40 }
0x1241   :  { %v24137_v37 = vadd.f32 %v34316_v11, %v24101_v49  ;;  %v24100_v33 = vmul.f32 %v34314_v9, %v24064_v15 }
0x1242   :  { %v23921_v3 = vpop.xlane.xlu0 %23920 }
0x1243   :  { %24169 = vst.msk [vmem:[%s34549_s6 + $0x88] sm:$0xff] %vm66_vm0, %v24137_v37  ;;  %v24136_v6 = vadd.f32 %v34316_v11, %v24100_v33  ;;  %v23973_v1 = vmul.f32 0.03125, %v23921_v3 }
0x1244   :  { %v23918_v44 = vpop.xlane.xlu1 %23917 }
0x1245   :  { %24168 = vst.msk [vmem:[%s34549_s6 + $0x80] sm:$0xff] %vm66_vm0, %v24136_v6  ;;  %v24005_v40 = vadd.f32 1e-05, %v23973_v1  ;;  %v23972_v41 = vmul.f32 0.03125, %v23918_v44 }
0x1247   :  { %27542 = vrsqrt.f32 %v24005_v40  ;;  %v24004_v62 = vadd.f32 1e-05, %v23972_v41 }
0x1248   :  { %v27539_v0 = vpop.eup %27538 }
0x1249   :  { %v24067_v51 = vmul.f32 %v27539_v0, %v34226_v25  ;;  %27544 = vrsqrt.f32 %v24004_v62 }
0x124a   :  { %v27541_v48 = vpop.eup %27540 }
0x124b   :  { %v24103_v60 = vmul.f32 %v34314_v9, %v24067_v51  ;;  %v24066_v13 = vmul.f32 %v27541_v48, %v34229_v58 }
0x124d   :  { %v24139_v23 = vadd.f32 %v34316_v11, %v24103_v60  ;;  %v24102_v38 = vmul.f32 %v34314_v9, %v24066_v13 }
0x124e   :  { %v23927_v18 = vpop.xlane.xlu0 %23926 }
0x124f   :  { %24171 = vst.msk [vmem:[%s34549_s6 + $0x98] sm:$0xff] %vm66_vm0, %v24139_v23  ;;  %v24138_v5 = vadd.f32 %v34316_v11, %v24102_v38  ;;  %v23975_v17 = vmul.f32 0.03125, %v23927_v18 }
0x1250   :  { %v23924_v25 = vpop.xlane.xlu1 %23923 }
0x1251   :  { %24170 = vst.msk [vmem:[%s34549_s6 + $0x90] sm:$0xff] %vm66_vm0, %v24138_v5  ;;  %v24007_v58 = vadd.f32 1e-05, %v23975_v17  ;;  %v23974_v39 = vmul.f32 0.03125, %v23924_v25 }
0x1253   :  { %27546 = vrsqrt.f32 %v24007_v58  ;;  %v24006_v21 = vadd.f32 1e-05, %v23974_v39 }
0x1254   :  { %v27543_v30 = vpop.eup %27542 }
0x1255   :  { %v24069_v35 = vmul.f32 %v27543_v30, %v34238_v34  ;;  %27548 = vrsqrt.f32 %v24006_v21 }
0x1256   :  { %v27545_v53 = vpop.eup %27544 }
0x1257   :  { %v24105_v8 = vmul.f32 %v34314_v9, %v24069_v35  ;;  %v24068_v63 = vmul.f32 %v27545_v53, %v34241_v47 }
0x1259   :  { %v24141_v12 = vadd.f32 %v34316_v11, %v24105_v8  ;;  %v24104_v29 = vmul.f32 %v34314_v9, %v24068_v63 }
0x125a   :  { %v23933_v10 = vpop.xlane.xlu0 %23932 }
0x125b   :  { %24173 = vst.msk [vmem:[%s34549_s6 + $0xa8] sm:$0xff] %vm66_vm0, %v24141_v12  ;;  %v24140_v26 = vadd.f32 %v34316_v11, %v24104_v29  ;;  %v23977_v27 = vmul.f32 0.03125, %v23933_v10 }
0x125c   :  { %v23930_v34 = vpop.xlane.xlu1 %23929 }
0x125d   :  { %24172 = vst.msk [vmem:[%s34549_s6 + $0xa0] sm:$0xff] %vm66_vm0, %v24140_v26  ;;  %v24009_v47 = vadd.f32 1e-05, %v23977_v27  ;;  %v23976_v46 = vmul.f32 0.03125, %v23930_v34 }
0x125f   :  { %27550 = vrsqrt.f32 %v24009_v47  ;;  %v24008_v28 = vadd.f32 1e-05, %v23976_v46 }
0x1260   :  { %v27547_v36 = vpop.eup %27546 }
0x1261   :  { %v24071_v45 = vmul.f32 %v27547_v36, %v34250_v43  ;;  %27552 = vrsqrt.f32 %v24008_v28 }
0x1262   :  { %v27549_v14 = vpop.eup %27548 }
0x1263   :  { %v24107_v7 = vmul.f32 %v34314_v9, %v24071_v45  ;;  %v24070_v31 = vmul.f32 %v27549_v14, %v34253_v22 }
0x1265   :  { %v24143_v32 = vadd.f32 %v34316_v11, %v24107_v7  ;;  %v24106_v56 = vmul.f32 %v34314_v9, %v24070_v31 }
0x1266   :  { %v23939_v61 = vpop.xlane.xlu0 %23938 }
0x1267   :  { %24175 = vst.msk [vmem:[%s34549_s6 + $0xb8] sm:$0xff] %vm66_vm0, %v24143_v32  ;;  %v24142_v16 = vadd.f32 %v34316_v11, %v24106_v56  ;;  %v23979_v2 = vmul.f32 0.03125, %v23939_v61 }
0x1268   :  { %v23936_v43 = vpop.xlane.xlu1 %23935 }
0x1269   :  { %24174 = vst.msk [vmem:[%s34549_s6 + $0xb0] sm:$0xff] %vm66_vm0, %v24142_v16  ;;  %v24011_v22 = vadd.f32 1e-05, %v23979_v2  ;;  %v23978_v55 = vmul.f32 0.03125, %v23936_v43 }
0x126b   :  { %27554 = vrsqrt.f32 %v24011_v22  ;;  %v24010_v54 = vadd.f32 1e-05, %v23978_v55 }
0x126c   :  { %v27551_v50 = vpop.eup %27550 }
0x126d   :  { %v24073_v49 = vmul.f32 %v27551_v50, %v34262_v57  ;;  %27556 = vrsqrt.f32 %v24010_v54 }
0x126e   :  { %v27553_v15 = vpop.eup %27552 }
0x126f   :  { %v24109_v37 = vmul.f32 %v34314_v9, %v24073_v49  ;;  %v24072_v33 = vmul.f32 %v27553_v15, %v34265_v20 }
0x1271   :  { %v24145_v3 = vadd.f32 %v34316_v11, %v24109_v37  ;;  %v24108_v6 = vmul.f32 %v34314_v9, %v24072_v33 }
0x1272   :  { %v23945_v1 = vpop.xlane.xlu0 %23944 }
0x1273   :  { %24177 = vst.msk [vmem:[%s34549_s6 + $0xc8] sm:$0xff] %vm66_vm0, %v24145_v3  ;;  %v24144_v44 = vadd.f32 %v34316_v11, %v24108_v6  ;;  %v23981_v40 = vmul.f32 0.03125, %v23945_v1 }
0x1274   :  { %v23942_v57 = vpop.xlane.xlu1 %23941 }
0x1275   :  { %24176 = vst.msk [vmem:[%s34549_s6 + $0xc0] sm:$0xff] %vm66_vm0, %v24144_v44  ;;  %v24013_v20 = vadd.f32 1e-05, %v23981_v40  ;;  %v23980_v41 = vmul.f32 0.03125, %v23942_v57 }
0x1277   :  { %27558 = vrsqrt.f32 %v24013_v20  ;;  %v24012_v62 = vadd.f32 1e-05, %v23980_v41 }
0x1278   :  { %v27555_v0 = vpop.eup %27554 }
0x1279   :  { %v24075_v51 = vmul.f32 %v27555_v0, %v34274_v4  ;;  %27560 = vrsqrt.f32 %v24012_v62 }
0x127a   :  { %v27557_v48 = vpop.eup %27556 }
0x127b   :  { %v24111_v60 = vmul.f32 %v34314_v9, %v24075_v51  ;;  %v24074_v13 = vmul.f32 %v27557_v48, %v34277_v59 }
0x127d   :  { %v24147_v23 = vadd.f32 %v34316_v11, %v24111_v60  ;;  %v24110_v38 = vmul.f32 %v34314_v9, %v24074_v13 }
0x127e   :  { %v23951_v18 = vpop.xlane.xlu0 %23950 }
0x127f   :  { %24179 = vst.msk [vmem:[%s34549_s6 + $0xd8] sm:$0xff] %vm66_vm0, %v24147_v23  ;;  %v24146_v5 = vadd.f32 %v34316_v11, %v24110_v38  ;;  %v23983_v17 = vmul.f32 0.03125, %v23951_v18 }
0x1280   :  { %v23948_v4 = vpop.xlane.xlu1 %23947 }
0x1281   :  { %24178 = vst.msk [vmem:[%s34549_s6 + $0xd0] sm:$0xff] %vm66_vm0, %v24146_v5  ;;  %v24015_v59 = vadd.f32 1e-05, %v23983_v17  ;;  %v23982_v25 = vmul.f32 0.03125, %v23948_v4 }
0x1283   :  { %27562 = vrsqrt.f32 %v24015_v59  ;;  %v24014_v58 = vadd.f32 1e-05, %v23982_v25 }
0x1284   :  { %v27559_v39 = vpop.eup %27558 }
0x1285   :  { %v24077_v21 = vmul.f32 %v27559_v39, %v34286_v42  ;;  %27564 = vrsqrt.f32 %v24014_v58 }
0x1286   :  { %v27561_v30 = vpop.eup %27560 }
0x1287   :  { %v24113_v35 = vmul.f32 %v34314_v9, %v24077_v21  ;;  %v24076_v53 = vmul.f32 %v27561_v30, %v34289_v24 }
0x1289   :  { %v24149_v8 = vadd.f32 %v34316_v11, %v24113_v35  ;;  %v24112_v63 = vmul.f32 %v34314_v9, %v24076_v53 }
0x128b   :  { %24181 = vst.msk [vmem:[%s34549_s6 + $0xe8] sm:$0xff] %vm66_vm0, %v24149_v8  ;;  %v24148_v12 = vadd.f32 %v34316_v11, %v24112_v63 }
0x128d   :  { %24180 = vst.msk [vmem:[%s34549_s6 + $0xe0] sm:$0xff] %vm66_vm0, %v24148_v12 }
0x1290   :  { %v27563_v42 = vpop.eup %27562 }
0x1291   :  { %v24079_v29 = vmul.f32 %v27563_v42, %v34298_v52 }
0x1292   :  { %v27565_v24 = vpop.eup %27564 }
0x1293   :  { %v24115_v10 = vmul.f32 %v34314_v9, %v24079_v29  ;;  %v24078_v26 = vmul.f32 %v27565_v24, %v34301_v19 }
0x1295   :  { %v24151_v27 = vadd.f32 %v34316_v11, %v24115_v10  ;;  %v24114_v34 = vmul.f32 %v34314_v9, %v24078_v26 }
0x1297   :  { %24183 = vst.msk [vmem:[%s34549_s6 + $0xf8] sm:$0xff] %vm66_vm0, %v24151_v27  ;;  %v24150_v47 = vadd.f32 %v34316_v11, %v24114_v34 }
0x1299   :  { %24182 = vst.msk [vmem:[%s34549_s6 + $0xf0] sm:$0xff] %vm66_vm0, %v24150_v47 }

</bundles_post_ra>
